<compile_context>
chip_gen: v5e
topology: v5e:2x2
jax: 0.10.0
libtpu: 0.0.40
codegen_flags: <defaults>
</compile_context>

<pallas_src>
import functools

import jax
import jax.numpy as jnp
from jax import lax
from jax.experimental import pallas as pl
from jax.experimental.pallas import tpu as pltpu

EPS = 1e-5                          # nn.BatchNorm2d default eps
P_HI = lax.Precision.HIGHEST        # reference-path matmul precision


def _bn_train(x, gamma, beta):
    """Training-mode BatchNorm over the row axis (biased variance, like torch)."""
    mean = jnp.mean(x, axis=0, keepdims=True)
    var = jnp.mean((x - mean) ** 2, axis=0, keepdims=True)
    return (x - mean) * lax.rsqrt(var + EPS) * gamma + beta


# --------------------------------------------------------------------------------------
# The fused kernel
# --------------------------------------------------------------------------------------
def _bottle_block_kernel(x_ref, wp_ref, rp_ref, o_ref, sc_ref, *,
                         batch, n, heads, dim_head, dim, dim_out, attn_dim_in):
    inner = heads * dim_head
    width_in = dim_out + attn_dim_in          # merged [shortcut | conv1] width
    gbh = batch * heads                       # attention batch
    bn_row = dim + attn_dim_in + inner        # first BN row inside the weight pack

    # ---- merged 1x1 convs [shortcut | net conv1], merged BN, ReLU --------------------
    x = x_ref[...]                                                     # (M, dim) f32
    w_in = wp_ref[pl.ds(0, dim), pl.ds(0, width_in)]                   # (dim, 80)
    g_in = wp_ref[pl.ds(bn_row + 0, 1), pl.ds(0, width_in)]
    b_in = wp_ref[pl.ds(bn_row + 1, 1), pl.ds(0, width_in)]
    h0 = jnp.dot(x, w_in, preferred_element_type=jnp.float32)          # (M, 80)
    h0 = jnp.maximum(_bn_train(h0, g_in, b_in), 0.0)

    sc_ref[...] = h0[:, :dim_out]        # shortcut -> scratch (single aligned store)
    y = h0[:, dim_out:width_in]          # live value; no VMEM round-trip for y

    # ---- qkv projection (q columns pre-scaled by dim_head**-0.5 on the host) ---------
    w_qkv = wp_ref[pl.ds(dim, attn_dim_in), :]                         # (attn_in, 3*inner)
    qkv = jnp.dot(y, w_qkv, preferred_element_type=jnp.float32)        # (M, 3*inner)

    # ---- gather per-(head, batch) row slabs ONCE (batch order g = h*batch + b) -------
    def heads_slab(base):
        cols = [qkv[:, base + h * dim_head: base + (h + 1) * dim_head]
                for h in range(heads)]
        return jnp.concatenate(cols, axis=0)                           # (heads*M, dh)

    q2 = heads_slab(0)                     # scale already folded into the weights
    k2 = heads_slab(inner)
    v2 = heads_slab(2 * inner)
    q3 = q2.reshape(gbh, n, dim_head)
    k3 = k2.reshape(gbh, n, dim_head)
    v3 = v2.reshape(gbh, n, dim_head)

    # ---- content logits, batched over (batch, head) ----------------------------------
    sim = jnp.einsum('gid,gjd->gij', q3, k3,
                     preferred_element_type=jnp.float32)               # (G, n, n)

    # ---- relative-position logits: two stacked shared-RHS matmuls --------------------
    #   bias[i, j] = q[i] . (rel_w[c_j - c_i + W-1] + rel_h[r_j - r_i + H-1])
    #             == ((q @ A) * M_mask) @ P
    a_mat = rp_ref[pl.ds(0, dim_head), :]                              # (dh, K)
    m_mask = rp_ref[pl.ds(dim_head, n), :]                             # (n, K)
    p_t = rp_ref[pl.ds(dim_head + n, n), :]                            # (n, K) == P^T
    t = jnp.dot(q2, a_mat, preferred_element_type=jnp.float32)         # (G*n, K)
    t = (t.reshape(gbh, n, -1) * m_mask).reshape(gbh * n, -1)          # mask per query token
    bias = lax.dot_general(t, p_t, (((1,), (1,)), ((), ())),
                           preferred_element_type=jnp.float32)         # (G*n, n)
    sim = sim + bias.reshape(gbh, n, n)

    # ---- numerically-stable softmax (f32, exact divide) ------------------------------
    sim = sim - jnp.max(sim, axis=-1, keepdims=True)
    pexp = jnp.exp(sim)
    attn = pexp / jnp.sum(pexp, axis=-1, keepdims=True)

    out = jnp.einsum('gij,gjd->gid', attn, v3,
                     preferred_element_type=jnp.float32)               # (G, n, dh)

    # ---- assemble (M, inner) attention output as ONE value (no masked partial stores)
    o2 = jnp.concatenate(
        [jnp.concatenate([out[h * batch + b] for b in range(batch)], axis=0)
         for h in range(heads)], axis=1)                               # (M, inner)

    # ---- tail: BN -> ReLU -> 1x1 conv -> BN -> (+ shortcut) -> ReLU ------------------
    g2 = wp_ref[pl.ds(bn_row + 2, 1), pl.ds(0, inner)]
    b2 = wp_ref[pl.ds(bn_row + 3, 1), pl.ds(0, inner)]
    g3 = wp_ref[pl.ds(bn_row + 4, 1), pl.ds(0, dim_out)]
    b3 = wp_ref[pl.ds(bn_row + 5, 1), pl.ds(0, dim_out)]
    w2 = wp_ref[pl.ds(dim + attn_dim_in, inner), pl.ds(0, dim_out)]    # (inner, dim_out)

    z = jnp.maximum(_bn_train(o2, g2, b2), 0.0)
    z = jnp.dot(z, w2, preferred_element_type=jnp.float32)
    z = _bn_train(z, g3, b3)
    o_ref[...] = jnp.maximum(z + sc_ref[...], 0.0).astype(o_ref.dtype)


# --------------------------------------------------------------------------------------
# Host-side helpers
# --------------------------------------------------------------------------------------
def build_factored_rel_pos(rel_height, rel_width, H, W):
    """Factor the BoTNet rel-pos bias q . E[i,j,:] into  ((q @ A) * M) @ P.

    Index k runs over (ci', cj') pairs (W*W block) then (ri', rj') pairs (H*H block):
      A[:, k] = rel_width[cj' - ci' + W - 1]   (or rel_height in the H*H block)
      M[i, k] = 1 iff ci' == c_i(i)            (resp. ri' == r_i(i))
      P[k, j] = 1 iff cj' == c_j(j)            (resp. rj' == r_j(j))
    """
    r_tok = jnp.repeat(jnp.arange(H), W)     # spatial row of token i   (i = x*W + y)
    c_tok = jnp.tile(jnp.arange(W), H)       # spatial column of token i

    ci, cj = jnp.meshgrid(jnp.arange(W), jnp.arange(W), indexing='ij')   # (W, W)
    ri, rj = jnp.meshgrid(jnp.arange(H), jnp.arange(H), indexing='ij')   # (H, H)

    aw = rel_width[(cj - ci + W - 1).reshape(-1)]       # (W*W, d)
    ah = rel_height[(rj - ri + H - 1).reshape(-1)]      # (H*H, d)
    A = jnp.concatenate([aw, ah], axis=0).T             # (d, W*W + H*H)

    mw = (c_tok[:, None] == ci.reshape(-1)[None, :]).astype(jnp.float32)
    mh = (r_tok[:, None] == ri.reshape(-1)[None, :]).astype(jnp.float32)
    Mm = jnp.concatenate([mw, mh], axis=1)              # (n, W*W + H*H)

    pw = (cj.reshape(-1)[:, None] == c_tok[None, :]).astype(jnp.float32)
    ph = (rj.reshape(-1)[:, None] == r_tok[None, :]).astype(jnp.float32)
    P = jnp.concatenate([pw, ph], axis=0)               # (W*W + H*H, n)
    return A, Mm, P


def build_rel_pos_table(rel_height, rel_width, H, W):
    """Dense E-table (reference path): E[i,j,:] = rel_w[dc] + rel_h[dr]."""
    rr, cc = jnp.meshgrid(jnp.arange(H), jnp.arange(W), indexing='ij')
    r = rr.reshape(-1)
    c = cc.reshape(-1)
    dr = r[None, :] - r[:, None] + (H - 1)
    dc = c[None, :] - c[:, None] + (W - 1)
    return rel_width[dc] + rel_height[dr]


def init_params(key, *, dim, dim_out, attn_dim_in, heads, dim_head, H, W):
    inner = heads * dim_head
    ks = jax.random.split(key, 6)
    p = {}
    # conv weights stored as (Cin, Cout) (== torch weight[:, :, 0, 0].T), ~1/sqrt(fan_in)
    p['w_sc'] = jax.random.normal(ks[0], (dim, dim_out), jnp.float32) * dim ** -0.5
    p['g_sc'] = jnp.ones((dim_out,), jnp.float32)
    p['b_sc'] = jnp.zeros((dim_out,), jnp.float32)
    p['w1'] = jax.random.normal(ks[1], (dim, attn_dim_in), jnp.float32) * dim ** -0.5
    p['g1'] = jnp.ones((attn_dim_in,), jnp.float32)
    p['b1'] = jnp.zeros((attn_dim_in,), jnp.float32)
    # qkv column layout: [q heads | k heads | v heads], head-major inside each chunk
    p['w_qkv'] = jax.random.normal(ks[2], (attn_dim_in, inner * 3), jnp.float32) * attn_dim_in ** -0.5
    p['rel_h'] = jax.random.normal(ks[3], (2 * H - 1, dim_head), jnp.float32) * dim_head ** -0.5
    p['rel_w'] = jax.random.normal(ks[4], (2 * W - 1, dim_head), jnp.float32) * dim_head ** -0.5
    p['g2'] = jnp.ones((inner,), jnp.float32)
    p['b2'] = jnp.zeros((inner,), jnp.float32)
    p['w2'] = jax.random.normal(ks[5], (inner, dim_out), jnp.float32) * inner ** -0.5
    # NOTE: the reference __init__ zero-inits the last BN gamma; ones is used here so
    # the attention branch actually contributes (forward semantics are unchanged).
    p['g3'] = jnp.ones((dim_out,), jnp.float32)
    p['b3'] = jnp.zeros((dim_out,), jnp.float32)
    return p


def prepare_kernel_params(p, *, H, W, heads, dim_head):
    """Pack all weights/BN params into ONE array and the rel-pos tables into another."""
    inner = heads * dim_head
    dim = p['w_sc'].shape[0]
    dim_out = p['w_sc'].shape[1]
    attn_dim_in = p['w1'].shape[1]
    width_in = dim_out + attn_dim_in
    scale = dim_head ** -0.5            # 0.25 here: exact power of two, folding is lossless

    w_in = jnp.concatenate([p['w_sc'], p['w1']], axis=1)                 # (dim, width_in)
    w_qkv = p['w_qkv'].at[:, :inner].multiply(scale)                     # fold q scale

    bn_row = dim + attn_dim_in + inner
    rows = bn_row + 6
    rows_pad = -(-rows // 8) * 8
    wp = jnp.zeros((rows_pad, 3 * inner), jnp.float32)
    wp = wp.at[:dim, :width_in].set(w_in)
    wp = wp.at[dim:dim + attn_dim_in, :].set(w_qkv)
    wp = wp.at[dim + attn_dim_in:bn_row, :dim_out].set(p['w2'])
    wp = wp.at[bn_row + 0, :width_in].set(jnp.concatenate([p['g_sc'], p['g1']]))
    wp = wp.at[bn_row + 1, :width_in].set(jnp.concatenate([p['b_sc'], p['b1']]))
    wp = wp.at[bn_row + 2, :inner].set(p['g2'])
    wp = wp.at[bn_row + 3, :inner].set(p['b2'])
    wp = wp.at[bn_row + 4, :dim_out].set(p['g3'])
    wp = wp.at[bn_row + 5, :dim_out].set(p['b3'])

    A, Mm, P = build_factored_rel_pos(p['rel_h'], p['rel_w'], H, W)
    rp = jnp.concatenate([A, Mm, P.T], axis=0).astype(jnp.float32)       # (dh + 2n, K)
    return wp, rp


def bottle_block_forward(x, wp, rp, *, heads, dim_head, dim_out, attn_dim_in):
    """x: (B, dim, H, W) NCHW (PyTorch convention). Returns (B, dim_out, H, W)."""
    B, dim, H, W = x.shape
    n = H * W
    M = B * n
    inner = heads * dim_head
    K = rp.shape[1]

    xf = jnp.transpose(x, (0, 2, 3, 1)).reshape(M, dim)

    kernel = functools.partial(
        _bottle_block_kernel, batch=B, n=n, heads=heads, dim_head=dim_head,
        dim=dim, dim_out=dim_out, attn_dim_in=attn_dim_in)

    def full_spec(a):
        zeros = (0,) * a.ndim
        return pl.BlockSpec(a.shape, lambda i, _z=zeros: _z)

    flops = int(
        2 * M * dim * (dim_out + attn_dim_in)          # merged head convs
        + 2 * M * attn_dim_in * 3 * inner              # qkv projection
        + 2 * (B * heads) * n * n * dim_head * 2       # q k^T and attn v
        + 2 * (B * heads * n) * dim_head * K           # q @ A
        + 2 * (B * heads * n) * K * n                  # (.) @ P
        + 2 * M * inner * dim_out)                     # tail conv
    bytes_accessed = int((xf.size + wp.size + rp.size + M * dim_out) * 4)
    cost = pl.CostEstimate(flops=flops,
                           transcendentals=int(B * heads * n * n),
                           bytes_accessed=bytes_accessed)

    out2d = pl.pallas_call(
        kernel,
        out_shape=jax.ShapeDtypeStruct((M, dim_out), jnp.float32),
        grid=(1,),
        in_specs=[full_spec(xf), full_spec(wp), full_spec(rp)],
        out_specs=pl.BlockSpec((M, dim_out), lambda i: (0, 0)),
        scratch_shapes=[pltpu.VMEM((M, dim_out), jnp.float32)],   # shortcut columns
        compiler_params=pltpu.CompilerParams(dimension_semantics=("arbitrary",)),
        cost_estimate=cost,
    )(xf, wp, rp)

    return out2d.reshape(B, H, W, dim_out).transpose(0, 3, 1, 2)


# --------------------------------------------------------------------------------------
# Pure-jnp reference (f32, HIGHEST precision, dense E-table) for the sanity check
# --------------------------------------------------------------------------------------
def reference_forward(x, p, *, heads, dim_head):
    B, C, H, W = x.shape
    n = H * W
    inner = heads * dim_head
    xf = jnp.transpose(x, (0, 2, 3, 1)).reshape(B * n, C)

    sc = jnp.maximum(_bn_train(jnp.dot(xf, p['w_sc'], precision=P_HI), p['g_sc'], p['b_sc']), 0.0)
    y = jnp.maximum(_bn_train(jnp.dot(xf, p['w1'], precision=P_HI), p['g1'], p['b1']), 0.0)
    qkv = jnp.dot(y, p['w_qkv'], precision=P_HI)
    qkv = qkv.reshape(B, n, 3, heads, dim_head).transpose(2, 0, 3, 1, 4)
    q, k, v = qkv[0] * (dim_head ** -0.5), qkv[1], qkv[2]
    sim = jnp.einsum('bhid,bhjd->bhij', q, k, precision=P_HI)
    E = build_rel_pos_table(p['rel_h'], p['rel_w'], H, W)
    sim = sim + jnp.einsum('bhid,ijd->bhij', q, E, precision=P_HI)
    attn = jax.nn.softmax(sim, axis=-1)
    o = jnp.einsum('bhij,bhjd->bhid', attn, v, precision=P_HI)
    o2 = o.transpose(0, 2, 1, 3).reshape(B * n, inner)
    z = jnp.maximum(_bn_train(o2, p['g2'], p['b2']), 0.0)
    z = _bn_train(jnp.dot(z, p['w2'], precision=P_HI), p['g3'], p['b3'])
    out = jnp.maximum(z + sc, 0.0)
    return out.reshape(B, H, W, -1).transpose(0, 3, 1, 2)


if __name__ == "__main__":
    # BottleBlock(dim=32, fmap_size=8, dim_out=64, proj_factor=4, stride=1,
    #             heads=4, dim_head=16, rel_pos_emb=True)
    B, dim, H, W = 2, 32, 8, 8
    dim_out, proj_factor = 64, 4
    heads, dim_head = 4, 16
    attn_dim_in = dim_out // proj_factor              # 16
    assert heads * dim_head == dim_out                # required by the torch module's last BN

    key = jax.random.PRNGKey(0)
    kx, kparam = jax.random.split(key)
    x = jax.random.normal(kx, (B, dim, H, W), jnp.float32)
    params = init_params(kparam, dim=dim, dim_out=dim_out, attn_dim_in=attn_dim_in,
                         heads=heads, dim_head=dim_head, H=H, W=W)
    wp, rp = prepare_kernel_params(params, H=H, W=W, heads=heads, dim_head=dim_head)

    fwd = jax.jit(functools.partial(bottle_block_forward, heads=heads, dim_head=dim_head,
                                    dim_out=dim_out, attn_dim_in=attn_dim_in))
    out = jax.block_until_ready(fwd(x, wp, rp))

    ref = reference_forward(x, params, heads=heads, dim_head=dim_head)
    assert out.shape == (B, dim_out, H, W), out.shape
    max_err = float(jnp.max(jnp.abs(out - ref)))
    assert jnp.allclose(out, ref, atol=5e-2, rtol=5e-2), max_err

    print("KERNEL_OK")
</pallas_src>

<mosaic_0001>
module attributes {stable_mosaic.version = 11 : i64} {
  func.func @_bottle_block_kernel(%arg0: i32, %arg1: memref<128x32xf32, #tpu.memory_space<vmem>>, %arg2: memref<120x192xf32, #tpu.memory_space<vmem>>, %arg3: memref<144x128xf32, #tpu.memory_space<vmem>>, %arg4: memref<128x64xf32, #tpu.memory_space<vmem>>, %arg5: memref<128x64xf32, #tpu.memory_space<vmem>>) attributes {dimension_semantics = [#tpu.dimension_semantics<arbitrary>], iteration_bounds = array<i64: 1>, scalar_prefetch = 0 : i64, scratch_operands = 1 : i64, tpu.core_type = #tpu.core_type<tc>, window_params = [{pipeline_mode = #tpu.pipeline_mode<synchronous>, transform_indices = @transform_0, window_bounds = array<i64: 128, 32>}, {pipeline_mode = #tpu.pipeline_mode<synchronous>, transform_indices = @transform_1, window_bounds = array<i64: 120, 192>}, {pipeline_mode = #tpu.pipeline_mode<synchronous>, transform_indices = @transform_2, window_bounds = array<i64: 144, 128>}, {pipeline_mode = #tpu.pipeline_mode<synchronous>, transform_indices = @transform_3, window_bounds = array<i64: 128, 64>}]} {
    %c0 = arith.constant 0 : index
    %c0_0 = arith.constant 0 : index
    %0 = vector.load %arg1[%c0, %c0_0] : memref<128x32xf32, #tpu.memory_space<vmem>>, vector<128x32xf32>
    %c0_1 = arith.constant 0 : index
    %c0_2 = arith.constant 0 : index
    %1 = vector.load %arg2[%c0_1, %c0_2] : memref<120x192xf32, #tpu.memory_space<vmem>>, vector<32x80xf32>
    %c112 = arith.constant 112 : index
    %c0_3 = arith.constant 0 : index
    %2 = vector.load %arg2[%c112, %c0_3] : memref<120x192xf32, #tpu.memory_space<vmem>>, vector<1x80xf32>
    %c113 = arith.constant 113 : index
    %c0_4 = arith.constant 0 : index
    %3 = vector.load %arg2[%c113, %c0_4] : memref<120x192xf32, #tpu.memory_space<vmem>>, vector<1x80xf32>
    %cst = arith.constant dense<0.000000e+00> : vector<128x80xf32>
    %4 = tpu.matmul %0, %1, %cst {dimension_numbers = #tpu.dot_dimension_numbers<[1], [0], [0], [1], [0, 0, 1, 1], [], []>} : vector<128x32xf32>, vector<32x80xf32>, vector<128x80xf32> -> vector<128x80xf32>
    %cst_5 = arith.constant dense<0.000000e+00> : vector<80xf32>
    %5 = vector.multi_reduction <add>, %4, %cst_5 [0] : vector<128x80xf32> to vector<80xf32>
    %6 = vector.shape_cast %5 : vector<80xf32> to vector<1x80xf32>
    %cst_6 = arith.constant 1.280000e+02 : f32
    %7 = vector.broadcast %cst_6 : f32 to vector<1x80xf32>
    %8 = arith.divf %6, %7 : vector<1x80xf32>
    %9 = vector.broadcast %8 : vector<1x80xf32> to vector<128x80xf32>
    %10 = arith.subf %4, %9 : vector<128x80xf32>
    %11 = arith.mulf %10, %10 : vector<128x80xf32>
    %cst_7 = arith.constant dense<0.000000e+00> : vector<80xf32>
    %12 = vector.multi_reduction <add>, %11, %cst_7 [0] : vector<128x80xf32> to vector<80xf32>
    %13 = vector.shape_cast %12 : vector<80xf32> to vector<1x80xf32>
    %cst_8 = arith.constant 1.280000e+02 : f32
    %14 = vector.broadcast %cst_8 : f32 to vector<1x80xf32>
    %15 = arith.divf %13, %14 : vector<1x80xf32>
    %16 = vector.broadcast %8 : vector<1x80xf32> to vector<128x80xf32>
    %17 = arith.subf %4, %16 : vector<128x80xf32>
    %cst_9 = arith.constant 9.99999974E-6 : f32
    %18 = vector.broadcast %cst_9 : f32 to vector<1x80xf32>
    %19 = arith.addf %15, %18 : vector<1x80xf32>
    %20 = math.rsqrt %19 : vector<1x80xf32>
    %21 = vector.broadcast %20 : vector<1x80xf32> to vector<128x80xf32>
    %22 = arith.mulf %17, %21 : vector<128x80xf32>
    %23 = vector.broadcast %2 : vector<1x80xf32> to vector<128x80xf32>
    %24 = arith.mulf %22, %23 : vector<128x80xf32>
    %25 = vector.broadcast %3 : vector<1x80xf32> to vector<128x80xf32>
    %26 = arith.addf %24, %25 : vector<128x80xf32>
    %cst_10 = arith.constant 0.000000e+00 : f32
    %27 = vector.broadcast %cst_10 : f32 to vector<128x80xf32>
    %28 = arith.maximumf %26, %27 : vector<128x80xf32>
    %29 = vector.extract_strided_slice %28 {offsets = [0, 0], sizes = [128, 64], strides = [1, 1]} : vector<128x80xf32> to vector<128x64xf32>
    %c0_11 = arith.constant 0 : index
    %c0_12 = arith.constant 0 : index
    %30 = vector.load %arg5[%c0_11, %c0_12] : memref<128x64xf32, #tpu.memory_space<vmem>>, vector<128x64xf32>
    tpu.vector_store %arg5[%c0_11, %c0_12], %29 {strides = array<i32>} : memref<128x64xf32, #tpu.memory_space<vmem>>, vector<128x64xf32>,
    %31 = vector.extract_strided_slice %28 {offsets = [0, 64], sizes = [128, 16], strides = [1, 1]} : vector<128x80xf32> to vector<128x16xf32>
    %c32 = arith.constant 32 : index
    %c0_13 = arith.constant 0 : index
    %32 = vector.load %arg2[%c32, %c0_13] : memref<120x192xf32, #tpu.memory_space<vmem>>, vector<16x192xf32>
    %cst_14 = arith.constant dense<0.000000e+00> : vector<128x192xf32>
    %33 = tpu.matmul %31, %32, %cst_14 {dimension_numbers = #tpu.dot_dimension_numbers<[1], [0], [0], [1], [0, 0, 1, 1], [], []>} : vector<128x16xf32>, vector<16x192xf32>, vector<128x192xf32> -> vector<128x192xf32>
    %34 = vector.extract_strided_slice %33 {offsets = [0, 0], sizes = [128, 16], strides = [1, 1]} : vector<128x192xf32> to vector<128x16xf32>
    %35 = vector.extract_strided_slice %33 {offsets = [0, 16], sizes = [128, 16], strides = [1, 1]} : vector<128x192xf32> to vector<128x16xf32>
    %36 = vector.extract_strided_slice %33 {offsets = [0, 32], sizes = [128, 16], strides = [1, 1]} : vector<128x192xf32> to vector<128x16xf32>
    %37 = vector.extract_strided_slice %33 {offsets = [0, 48], sizes = [128, 16], strides = [1, 1]} : vector<128x192xf32> to vector<128x16xf32>
    %38 = tpu.concatenate %34, %35, %36, %37 in 0 : vector<128x16xf32>, vector<128x16xf32>, vector<128x16xf32>, vector<128x16xf32> -> vector<512x16xf32>
    %39 = vector.extract_strided_slice %33 {offsets = [0, 64], sizes = [128, 16], strides = [1, 1]} : vector<128x192xf32> to vector<128x16xf32>
    %40 = vector.extract_strided_slice %33 {offsets = [0, 80], sizes = [128, 16], strides = [1, 1]} : vector<128x192xf32> to vector<128x16xf32>
    %41 = vector.extract_strided_slice %33 {offsets = [0, 96], sizes = [128, 16], strides = [1, 1]} : vector<128x192xf32> to vector<128x16xf32>
    %42 = vector.extract_strided_slice %33 {offsets = [0, 112], sizes = [128, 16], strides = [1, 1]} : vector<128x192xf32> to vector<128x16xf32>
    %43 = tpu.concatenate %39, %40, %41, %42 in 0 : vector<128x16xf32>, vector<128x16xf32>, vector<128x16xf32>, vector<128x16xf32> -> vector<512x16xf32>
    %44 = vector.extract_strided_slice %33 {offsets = [0, 128], sizes = [128, 16], strides = [1, 1]} : vector<128x192xf32> to vector<128x16xf32>
    %45 = vector.extract_strided_slice %33 {offsets = [0, 144], sizes = [128, 16], strides = [1, 1]} : vector<128x192xf32> to vector<128x16xf32>
    %46 = vector.extract_strided_slice %33 {offsets = [0, 160], sizes = [128, 16], strides = [1, 1]} : vector<128x192xf32> to vector<128x16xf32>
    %47 = vector.extract_strided_slice %33 {offsets = [0, 176], sizes = [128, 16], strides = [1, 1]} : vector<128x192xf32> to vector<128x16xf32>
    %48 = tpu.concatenate %44, %45, %46, %47 in 0 : vector<128x16xf32>, vector<128x16xf32>, vector<128x16xf32>, vector<128x16xf32> -> vector<512x16xf32>
    %49 = vector.shape_cast %38 : vector<512x16xf32> to vector<8x64x16xf32>
    %50 = vector.shape_cast %43 : vector<512x16xf32> to vector<8x64x16xf32>
    %51 = vector.shape_cast %48 : vector<512x16xf32> to vector<8x64x16xf32>
    "tpu.trace_start"() <{level = 10 : i32, message = "gid,gjd->gij"}> : () -> ()
    %cst_15 = arith.constant dense<0.000000e+00> : vector<8x64x64xf32>
    %52 = tpu.matmul %49, %50, %cst_15 {dimension_numbers = #tpu.dot_dimension_numbers<[2], [2], [1], [1], [0, 0, 0, 1, 1, 1], [0], [0]>} : vector<8x64x16xf32>, vector<8x64x16xf32>, vector<8x64x64xf32> -> vector<8x64x64xf32>
    "tpu.trace_stop"() : () -> ()
    %c0_16 = arith.constant 0 : index
    %c0_17 = arith.constant 0 : index
    %53 = vector.load %arg3[%c0_16, %c0_17] : memref<144x128xf32, #tpu.memory_space<vmem>>, vector<16x128xf32>
    %c16 = arith.constant 16 : index
    %c0_18 = arith.constant 0 : index
    %54 = vector.load %arg3[%c16, %c0_18] : memref<144x128xf32, #tpu.memory_space<vmem>>, vector<64x128xf32>
    %c80 = arith.constant 80 : index
    %c0_19 = arith.constant 0 : index
    %55 = vector.load %arg3[%c80, %c0_19] : memref<144x128xf32, #tpu.memory_space<vmem>>, vector<64x128xf32>
    %cst_20 = arith.constant dense<0.000000e+00> : vector<512x128xf32>
    %56 = tpu.matmul %38, %53, %cst_20 {dimension_numbers = #tpu.dot_dimension_numbers<[1], [0], [0], [1], [0, 0, 1, 1], [], []>} : vector<512x16xf32>, vector<16x128xf32>, vector<512x128xf32> -> vector<512x128xf32>
    %57 = vector.shape_cast %56 : vector<512x128xf32> to vector<8x64x128xf32>
    %58 = vector.shape_cast %54 : vector<64x128xf32> to vector<1x64x128xf32>
    %59 = vector.broadcast %58 : vector<1x64x128xf32> to vector<8x64x128xf32>
    %60 = arith.mulf %57, %59 : vector<8x64x128xf32>
    %61 = vector.shape_cast %60 : vector<8x64x128xf32> to vector<512x128xf32>
    %cst_21 = arith.constant dense<0.000000e+00> : vector<512x64xf32>
    %62 = tpu.matmul %61, %55, %cst_21 {dimension_numbers = #tpu.dot_dimension_numbers<[1], [1], [0], [0], [0, 0, 1, 0], [], []>} : vector<512x128xf32>, vector<64x128xf32>, vector<512x64xf32> -> vector<512x64xf32>
    %63 = vector.shape_cast %62 : vector<512x64xf32> to vector<8x64x64xf32>
    %64 = arith.addf %52, %63 : vector<8x64x64xf32>
    %cst_22 = arith.constant dense<0xFF800000> : vector<8x64xf32>
    %65 = vector.multi_reduction <maximumf>, %64, %cst_22 [2] : vector<8x64x64xf32> to vector<8x64xf32>
    %66 = vector.shape_cast %65 : vector<8x64xf32> to vector<8x64x1xf32>
    %67 = vector.broadcast %66 : vector<8x64x1xf32> to vector<8x64x64xf32>
    %68 = arith.subf %64, %67 : vector<8x64x64xf32>
    %69 = math.exp %68 : vector<8x64x64xf32>
    %cst_23 = arith.constant dense<0.000000e+00> : vector<8x64xf32>
    %70 = vector.multi_reduction <add>, %69, %cst_23 [2] : vector<8x64x64xf32> to vector<8x64xf32>
    %71 = vector.shape_cast %70 : vector<8x64xf32> to vector<8x64x1xf32>
    %72 = vector.broadcast %71 : vector<8x64x1xf32> to vector<8x64x64xf32>
    %73 = arith.divf %69, %72 : vector<8x64x64xf32>
    "tpu.trace_start"() <{level = 10 : i32, message = "gij,gjd->gid"}> : () -> ()
    %cst_24 = arith.constant dense<0.000000e+00> : vector<8x64x16xf32>
    %74 = tpu.matmul %73, %51, %cst_24 {dimension_numbers = #tpu.dot_dimension_numbers<[2], [1], [1], [2], [0, 0, 0, 1, 1, 2], [0], [0]>} : vector<8x64x64xf32>, vector<8x64x16xf32>, vector<8x64x16xf32> -> vector<8x64x16xf32>
    "tpu.trace_stop"() : () -> ()
    %75 = vector.extract_strided_slice %74 {offsets = [0, 0, 0], sizes = [1, 64, 16], strides = [1, 1, 1]} : vector<8x64x16xf32> to vector<1x64x16xf32>
    %76 = vector.shape_cast %75 : vector<1x64x16xf32> to vector<64x16xf32>
    %77 = vector.extract_strided_slice %74 {offsets = [1, 0, 0], sizes = [1, 64, 16], strides = [1, 1, 1]} : vector<8x64x16xf32> to vector<1x64x16xf32>
    %78 = vector.shape_cast %77 : vector<1x64x16xf32> to vector<64x16xf32>
    %79 = tpu.concatenate %76, %78 in 0 : vector<64x16xf32>, vector<64x16xf32> -> vector<128x16xf32>
    %80 = vector.extract_strided_slice %74 {offsets = [2, 0, 0], sizes = [1, 64, 16], strides = [1, 1, 1]} : vector<8x64x16xf32> to vector<1x64x16xf32>
    %81 = vector.shape_cast %80 : vector<1x64x16xf32> to vector<64x16xf32>
    %82 = vector.extract_strided_slice %74 {offsets = [3, 0, 0], sizes = [1, 64, 16], strides = [1, 1, 1]} : vector<8x64x16xf32> to vector<1x64x16xf32>
    %83 = vector.shape_cast %82 : vector<1x64x16xf32> to vector<64x16xf32>
    %84 = tpu.concatenate %81, %83 in 0 : vector<64x16xf32>, vector<64x16xf32> -> vector<128x16xf32>
    %85 = vector.extract_strided_slice %74 {offsets = [4, 0, 0], sizes = [1, 64, 16], strides = [1, 1, 1]} : vector<8x64x16xf32> to vector<1x64x16xf32>
    %86 = vector.shape_cast %85 : vector<1x64x16xf32> to vector<64x16xf32>
    %87 = vector.extract_strided_slice %74 {offsets = [5, 0, 0], sizes = [1, 64, 16], strides = [1, 1, 1]} : vector<8x64x16xf32> to vector<1x64x16xf32>
    %88 = vector.shape_cast %87 : vector<1x64x16xf32> to vector<64x16xf32>
    %89 = tpu.concatenate %86, %88 in 0 : vector<64x16xf32>, vector<64x16xf32> -> vector<128x16xf32>
    %90 = vector.extract_strided_slice %74 {offsets = [6, 0, 0], sizes = [1, 64, 16], strides = [1, 1, 1]} : vector<8x64x16xf32> to vector<1x64x16xf32>
    %91 = vector.shape_cast %90 : vector<1x64x16xf32> to vector<64x16xf32>
    %92 = vector.extract_strided_slice %74 {offsets = [7, 0, 0], sizes = [1, 64, 16], strides = [1, 1, 1]} : vector<8x64x16xf32> to vector<1x64x16xf32>
    %93 = vector.shape_cast %92 : vector<1x64x16xf32> to vector<64x16xf32>
    %94 = tpu.concatenate %91, %93 in 0 : vector<64x16xf32>, vector<64x16xf32> -> vector<128x16xf32>
    %95 = tpu.concatenate %79, %84, %89, %94 in 1 : vector<128x16xf32>, vector<128x16xf32>, vector<128x16xf32>, vector<128x16xf32> -> vector<128x64xf32>
    %c114 = arith.constant 114 : index
    %c0_25 = arith.constant 0 : index
    %96 = vector.load %arg2[%c114, %c0_25] : memref<120x192xf32, #tpu.memory_space<vmem>>, vector<1x64xf32>
    %c115 = arith.constant 115 : index
    %c0_26 = arith.constant 0 : index
    %97 = vector.load %arg2[%c115, %c0_26] : memref<120x192xf32, #tpu.memory_space<vmem>>, vector<1x64xf32>
    %c116 = arith.constant 116 : index
    %c0_27 = arith.constant 0 : index
    %98 = vector.load %arg2[%c116, %c0_27] : memref<120x192xf32, #tpu.memory_space<vmem>>, vector<1x64xf32>
    %c117 = arith.constant 117 : index
    %c0_28 = arith.constant 0 : index
    %99 = vector.load %arg2[%c117, %c0_28] : memref<120x192xf32, #tpu.memory_space<vmem>>, vector<1x64xf32>
    %c48 = arith.constant 48 : index
    %c0_29 = arith.constant 0 : index
    %100 = vector.load %arg2[%c48, %c0_29] : memref<120x192xf32, #tpu.memory_space<vmem>>, vector<64x64xf32>
    %cst_30 = arith.constant dense<0.000000e+00> : vector<64xf32>
    %101 = vector.multi_reduction <add>, %95, %cst_30 [0] : vector<128x64xf32> to vector<64xf32>
    %102 = vector.shape_cast %101 : vector<64xf32> to vector<1x64xf32>
    %cst_31 = arith.constant 1.280000e+02 : f32
    %103 = vector.broadcast %cst_31 : f32 to vector<1x64xf32>
    %104 = arith.divf %102, %103 : vector<1x64xf32>
    %105 = vector.broadcast %104 : vector<1x64xf32> to vector<128x64xf32>
    %106 = arith.subf %95, %105 : vector<128x64xf32>
    %107 = arith.mulf %106, %106 : vector<128x64xf32>
    %cst_32 = arith.constant dense<0.000000e+00> : vector<64xf32>
    %108 = vector.multi_reduction <add>, %107, %cst_32 [0] : vector<128x64xf32> to vector<64xf32>
    %109 = vector.shape_cast %108 : vector<64xf32> to vector<1x64xf32>
    %cst_33 = arith.constant 1.280000e+02 : f32
    %110 = vector.broadcast %cst_33 : f32 to vector<1x64xf32>
    %111 = arith.divf %109, %110 : vector<1x64xf32>
    %112 = vector.broadcast %104 : vector<1x64xf32> to vector<128x64xf32>
    %113 = arith.subf %95, %112 : vector<128x64xf32>
    %cst_34 = arith.constant 9.99999974E-6 : f32
    %114 = vector.broadcast %cst_34 : f32 to vector<1x64xf32>
    %115 = arith.addf %111, %114 : vector<1x64xf32>
    %116 = math.rsqrt %115 : vector<1x64xf32>
    %117 = vector.broadcast %116 : vector<1x64xf32> to vector<128x64xf32>
    %118 = arith.mulf %113, %117 : vector<128x64xf32>
    %119 = vector.broadcast %96 : vector<1x64xf32> to vector<128x64xf32>
    %120 = arith.mulf %118, %119 : vector<128x64xf32>
    %121 = vector.broadcast %97 : vector<1x64xf32> to vector<128x64xf32>
    %122 = arith.addf %120, %121 : vector<128x64xf32>
    %cst_35 = arith.constant 0.000000e+00 : f32
    %123 = vector.broadcast %cst_35 : f32 to vector<128x64xf32>
    %124 = arith.maximumf %122, %123 : vector<128x64xf32>
    %cst_36 = arith.constant dense<0.000000e+00> : vector<128x64xf32>
    %125 = tpu.matmul %124, %100, %cst_36 {dimension_numbers = #tpu.dot_dimension_numbers<[1], [0], [0], [1], [0, 0, 1, 1], [], []>} : vector<128x64xf32>, vector<64x64xf32>, vector<128x64xf32> -> vector<128x64xf32>
    %cst_37 = arith.constant dense<0.000000e+00> : vector<64xf32>
    %126 = vector.multi_reduction <add>, %125, %cst_37 [0] : vector<128x64xf32> to vector<64xf32>
    %127 = vector.shape_cast %126 : vector<64xf32> to vector<1x64xf32>
    %cst_38 = arith.constant 1.280000e+02 : f32
    %128 = vector.broadcast %cst_38 : f32 to vector<1x64xf32>
    %129 = arith.divf %127, %128 : vector<1x64xf32>
    %130 = vector.broadcast %129 : vector<1x64xf32> to vector<128x64xf32>
    %131 = arith.subf %125, %130 : vector<128x64xf32>
    %132 = arith.mulf %131, %131 : vector<128x64xf32>
    %cst_39 = arith.constant dense<0.000000e+00> : vector<64xf32>
    %133 = vector.multi_reduction <add>, %132, %cst_39 [0] : vector<128x64xf32> to vector<64xf32>
    %134 = vector.shape_cast %133 : vector<64xf32> to vector<1x64xf32>
    %cst_40 = arith.constant 1.280000e+02 : f32
    %135 = vector.broadcast %cst_40 : f32 to vector<1x64xf32>
    %136 = arith.divf %134, %135 : vector<1x64xf32>
    %137 = vector.broadcast %129 : vector<1x64xf32> to vector<128x64xf32>
    %138 = arith.subf %125, %137 : vector<128x64xf32>
    %cst_41 = arith.constant 9.99999974E-6 : f32
    %139 = vector.broadcast %cst_41 : f32 to vector<1x64xf32>
    %140 = arith.addf %136, %139 : vector<1x64xf32>
    %141 = math.rsqrt %140 : vector<1x64xf32>
    %142 = vector.broadcast %141 : vector<1x64xf32> to vector<128x64xf32>
    %143 = arith.mulf %138, %142 : vector<128x64xf32>
    %144 = vector.broadcast %98 : vector<1x64xf32> to vector<128x64xf32>
    %145 = arith.mulf %143, %144 : vector<128x64xf32>
    %146 = vector.broadcast %99 : vector<1x64xf32> to vector<128x64xf32>
    %147 = arith.addf %145, %146 : vector<128x64xf32>
    %c0_42 = arith.constant 0 : index
    %c0_43 = arith.constant 0 : index
    %148 = vector.load %arg5[%c0_42, %c0_43] : memref<128x64xf32, #tpu.memory_space<vmem>>, vector<128x64xf32>
    %149 = arith.addf %147, %148 : vector<128x64xf32>
    %cst_44 = arith.constant 0.000000e+00 : f32
    %150 = vector.broadcast %cst_44 : f32 to vector<128x64xf32>
    %151 = arith.maximumf %149, %150 : vector<128x64xf32>
    %c0_45 = arith.constant 0 : index
    %c0_46 = arith.constant 0 : index
    %152 = vector.load %arg4[%c0_45, %c0_46] : memref<128x64xf32, #tpu.memory_space<vmem>>, vector<128x64xf32>
    tpu.vector_store %arg4[%c0_45, %c0_46], %151 {strides = array<i32>} : memref<128x64xf32, #tpu.memory_space<vmem>>, vector<128x64xf32>,
    return
  }
  func.func @transform_0(%arg0: i32) -> (i32, i32) {
    %c0_i32 = arith.constant 0 : i32
    %c0_i32_0 = arith.constant 0 : i32
    %c0_i32_1 = arith.constant 0 : i32
    return %c0_i32, %c0_i32_0 : i32, i32
  }
  func.func @transform_1(%arg0: i32) -> (i32, i32) {
    %c0_i32 = arith.constant 0 : i32
    %c0_i32_0 = arith.constant 0 : i32
    %c0_i32_1 = arith.constant 0 : i32
    return %c0_i32, %c0_i32_0 : i32, i32
  }
  func.func @transform_2(%arg0: i32) -> (i32, i32) {
    %c0_i32 = arith.constant 0 : i32
    %c0_i32_0 = arith.constant 0 : i32
    %c0_i32_1 = arith.constant 0 : i32
    return %c0_i32, %c0_i32_0 : i32, i32
  }
  func.func @transform_3(%arg0: i32) -> (i32, i32) {
    %c0_i32 = arith.constant 0 : i32
    %c0_i32_0 = arith.constant 0 : i32
    %c0_i32_1 = arith.constant 0 : i32
    return %c0_i32, %c0_i32_0 : i32, i32
  }
}

</mosaic_0001>

<bundles_post_ra>
// kernel: bottle_block_forward.1
= control target key start
LH: loop header
LB: loop body
LE: loop exit
PB: predicated region body
PF: predicated region fallthrough
CT: control target
= control target key end

     0   :  { %s9452_s0 = inlined_call_operand.vmem [shape: f32[128,32], index: 0, kind: input, shape index: {}]   ;;  %s9453_s1 = inlined_call_operand.vmem [shape: f32[120,192], index: 1, kind: input, shape index: {}]   ;;  %s9454_s2 = inlined_call_operand.vmem [shape: f32[144,128], index: 2, kind: input, shape index: {}]   ;;  %s9455_s3 = inlined_call_operand.hbm [shape: f32[128,64], index: 3, kind: output, shape index: {}]  }
   0x1   :  { %v34_v0 = vld [vmem:[%s9453_s1 + $0x30] sm:$0xff]  ;;  %v33_v1 = vld [vmem:[%s9453_s1 + $0x20] sm:$0xff] }
   0x2   :  { %98 = vmatpush.msra.mxu0 %v34_v0  ;;  %v32_v2 = vld [vmem:[%s9453_s1 + $0x10] sm:$0xff] }
   0x4   :  { %99 = vmatpush.msra.mxu0 %v33_v1 }
   0x5   :  { %8 = vsyncpa [#allocation4], 0  ;;  %v31_v3 = vld [vmem:[%s9453_s1] sm:$0xff]  ;;  %vm37_vm0 = vcmask 261120   ;;  %v16_v5 = vld [vmem:[%s9452_s0 + $0x8] sm:$0xff]  ;;  %vm151_vm1 = vcmask 654336  }
   0x6   :  { %100 = vmatpush.msra.mxu0 %v32_v2  ;;  %v15_v4 = vld [vmem:[%s9452_s0] sm:$0xff]  ;;  %v17_v6 = vld [vmem:[%s9452_s0 + $0x10] sm:$0xff]  ;;  %v18_v7 = vld [vmem:[%s9452_s0 + $0x18] sm:$0xff]  ;;  %v5661_v52 = vmov 128.0   ;;  %vm342_vm6 = vcmask 523264   ;;  %s5662_s28 = smov 64  }
   0x7   :  { %v19_v8 = vld [vmem:[%s9452_s0 + $0x20] sm:$0xff]  ;;  %v20_v9 = vld [vmem:[%s9452_s0 + $0x28] sm:$0xff]  ;;  %v21_v10 = vld [vmem:[%s9452_s0 + $0x30] sm:$0xff]  ;;  %5363 = vrcp.f32 %v5661_v52  ;;  %vm411_vm7 = vcmask 130048   ;;  %s5663_s14 = smov 112   ;;  %s5664_s15 = smov 96  }
   0x8   :  { %101 = vmatpush.msra.mxu0 %v31_v3  ;;  %v22_v11 = vld [vmem:[%s9452_s0 + $0x38] sm:$0xff]  ;;  %v23_v12 = vld [vmem:[%s9452_s0 + $0x40] sm:$0xff]  ;;  %v24_v13 = vld [vmem:[%s9452_s0 + $0x48] sm:$0xff]  ;;  %s5665_s5 = smov 80   ;;  %s5666_s11 = smov 32  }
   0x9   :  { %4912 = vmatmul.msk.f32.vlgmr.msra.gmra.mxu0 %vm37_vm0, %v15_v4  ;;  %v25_v14 = vld [vmem:[%s9452_s0 + $0x50] sm:$0xff]  ;;  %v26_v15 = vld [vmem:[%s9452_s0 + $0x58] sm:$0xff]  ;;  %v27_v16 = vld [vmem:[%s9452_s0 + $0x60] sm:$0xff]  ;;  %s5667_s12 = smov 16   ;;  %s5668_s19 = smov 48  }
   0xa   :  { %v28_v17 = vld [vmem:[%s9452_s0 + $0x68] sm:$0xff]  ;;  %v29_v18 = vld [vmem:[%s9452_s0 + $0x70] sm:$0xff]  ;;  %v30_v19 = vld [vmem:[%s9452_s0 + $0x78] sm:$0xff] }
   0xd   :  { %v5364_v59 = vpop.eup %5363 }
   0xe   :  { %v190_v0 = vmul.f32 128.0, %v5364_v59  ;;  %vm194_vm2 = vweird.f32 %v5364_v59 }
  0x11   :  { %4913 = vmatmul.msk.f32.gmra.mxu0 %vm37_vm0, %v16_v5  ;;  %v191_v5 = vsub.f32 1.0, %v190_v0 }
  0x19   :  { %4914 = vmatmul.msk.f32.gmra.mxu0 %vm37_vm0, %v17_v6 }
  0x21   :  { %4915 = vmatmul.msk.f32.gmra.mxu0 %vm37_vm0, %v18_v7 }
  0x29   :  { %4916 = vmatmul.msk.f32.gmra.mxu0 %vm37_vm0, %v19_v8  ;;  %v192_v8 = vmul.f32 %v5364_v59, %v191_v5 }
  0x31   :  { %4917 = vmatmul.msk.f32.gmra.mxu0 %vm37_vm0, %v20_v9 }
  0x39   :  { %4918 = vmatmul.msk.f32.gmra.mxu0 %vm37_vm0, %v21_v10 }
  0x41   :  { %4919 = vmatmul.msk.f32.gmra.mxu0 %vm37_vm0, %v22_v11  ;;  %v193_v11 = vadd.f32 %v5364_v59, %v192_v8 }
  0x49   :  { %4920 = vmatmul.msk.f32.gmra.mxu0 %vm37_vm0, %v23_v12 }
  0x51   :  { %4921 = vmatmul.msk.f32.gmra.mxu0 %vm37_vm0, %v24_v13 }
  0x59   :  { %4922 = vmatmul.msk.f32.gmra.mxu0 %vm37_vm0, %v25_v14  ;;  %v5832_v14 = vsel %vm194_vm2, %v5364_v59, %v193_v11 }
  0x5a   :  { %9583 = vst [vmem:[#allocation6_spill] sm:$0xff] %v5832_v14 }
  0x61   :  { %4923 = vmatmul.msk.f32.gmra.mxu0 %vm37_vm0, %v26_v15 }
  0x69   :  { %4924 = vmatmul.msk.f32.gmra.mxu0 %vm37_vm0, %v27_v16 }
  0x71   :  { %4925 = vmatmul.msk.f32.gmra.mxu0 %vm37_vm0, %v28_v17 }
  0x79   :  { %4926 = vmatmul.msk.f32.gmra.mxu0 %vm37_vm0, %v29_v18 }
  0x81   :  { %4927 = vmatmul.msk.f32.gmra.mxu0 %vm37_vm0, %v30_v19 }
  0x86   :  { %v5768_v20 = vpop.f32.mrf.mxu0 }
  0x87   :  { %v152_v33 = vsel %vm151_vm1, %v5768_v20, 0.0 }
  0x8e   :  { %v5770_v21 = vpop.f32.mrf.mxu0 }
  0x8f   :  { %v153_v32 = vsel %vm151_vm1, %v5770_v21, 0.0 }
  0x90   :  { %v154_v35 = vadd.f32 %v153_v32, %v152_v33 }
  0x96   :  { %v5772_v22 = vpop.f32.mrf.mxu0 }
  0x97   :  { %v155_v34 = vsel %vm151_vm1, %v5772_v22, 0.0 }
  0x98   :  { %v156_v37 = vadd.f32 %v155_v34, %v154_v35 }
  0x9e   :  { %v5774_v23 = vpop.f32.mrf.mxu0 }
  0x9f   :  { %v157_v36 = vsel %vm151_vm1, %v5774_v23, 0.0 }
  0xa0   :  { %v158_v40 = vadd.f32 %v157_v36, %v156_v37 }
  0xa6   :  { %v5776_v24 = vpop.f32.mrf.mxu0 }
  0xa7   :  { %v159_v39 = vsel %vm151_vm1, %v5776_v24, 0.0 }
  0xa8   :  { %v160_v42 = vadd.f32 %v159_v39, %v158_v40 }
  0xae   :  { %v5778_v25 = vpop.f32.mrf.mxu0 }
  0xaf   :  { %v161_v41 = vsel %vm151_vm1, %v5778_v25, 0.0 }
  0xb0   :  { %v162_v44 = vadd.f32 %v161_v41, %v160_v42 }
  0xb6   :  { %v5780_v26 = vpop.f32.mrf.mxu0 }
  0xb7   :  { %v163_v43 = vsel %vm151_vm1, %v5780_v26, 0.0 }
  0xb8   :  { %v164_v46 = vadd.f32 %v163_v43, %v162_v44 }
  0xbe   :  { %v5782_v27 = vpop.f32.mrf.mxu0 }
  0xbf   :  { %v165_v45 = vsel %vm151_vm1, %v5782_v27, 0.0 }
  0xc0   :  { %v166_v49 = vadd.f32 %v165_v45, %v164_v46 }
  0xc6   :  { %v5784_v28 = vpop.f32.mrf.mxu0 }
  0xc7   :  { %v167_v48 = vsel %vm151_vm1, %v5784_v28, 0.0 }
  0xc8   :  { %v168_v51 = vadd.f32 %v167_v48, %v166_v49 }
  0xce   :  { %v5786_v29 = vpop.f32.mrf.mxu0 }
  0xcf   :  { %v169_v50 = vsel %vm151_vm1, %v5786_v29, 0.0 }
  0xd0   :  { %v170_v54 = vadd.f32 %v169_v50, %v168_v51 }
  0xd6   :  { %v5788_v30 = vpop.f32.mrf.mxu0 }
  0xd7   :  { %v171_v53 = vsel %vm151_vm1, %v5788_v30, 0.0 }
  0xd8   :  { %v172_v56 = vadd.f32 %v171_v53, %v170_v54 }
  0xde   :  { %v5790_v31 = vpop.f32.mrf.mxu0 }
  0xdf   :  { %v173_v55 = vsel %vm151_vm1, %v5790_v31, 0.0 }
  0xe0   :  { %v174_v60 = vadd.f32 %v173_v55, %v172_v56 }
  0xe6   :  { %v5800_v38 = vpop.f32.mrf.mxu0 }
  0xe7   :  { %v175_v58 = vsel %vm151_vm1, %v5800_v38, 0.0 }
  0xe8   :  { %v176_v62 = vadd.f32 %v175_v58, %v174_v60 }
  0xee   :  { %v5810_v47 = vpop.f32.mrf.mxu0 }
  0xef   :  { %v177_v61 = vsel %vm151_vm1, %v5810_v47, 0.0 }
  0xf0   :  { %v178_v1 = vadd.f32 %v177_v61, %v176_v62 }
  0xf6   :  { %v5820_v57 = vpop.f32.mrf.mxu0 }
  0xf7   :  { %v179_v63 = vsel %vm151_vm1, %v5820_v57, 0.0 }
  0xf8   :  { %v180_v2 = vadd.f32 %v179_v63, %v178_v1 }
  0xfe   :  { %v5828_v3 = vpop.f32.mrf.mxu0 }
  0xff   :  { %v181_v4 = vsel %vm151_vm1, %v5828_v3, 0.0 }
 0x100   :  { %v182_v6 = vadd.f32 %v181_v4, %v180_v2 }
 0x102   :  { %v183_v7 = vrot.slane %v182_v6, 4 }
 0x104   :  { %v184_v9 = vadd.f32 %v183_v7, %v182_v6 }
 0x106   :  { %v185_v10 = vrot.slane %v184_v9, 2 }
 0x108   :  { %v186_v12 = vadd.f32 %v185_v10, %v184_v9 }
 0x10a   :  { %v187_v13 = vrot.slane %v186_v12, 1 }
 0x10c   :  { %v188_v15 = vadd.f32 %v187_v13, %v186_v12 }
 0x10e   :  { %v196_v16 = vmul.f32 %v5832_v14, %v188_v15 }
 0x110   :  { %v5836_v17 = vsub.f32 %v5768_v20, %v196_v16  ;;  %v5839_v18 = vsub.f32 %v5770_v21, %v196_v16  ;;  %v5842_v19 = vsub.f32 %v5772_v22, %v196_v16  ;;  %v5845_v32 = vsub.f32 %v5774_v23, %v196_v16 }
 0x111   :  { %v5852_v35 = vsub.f32 %v5776_v24, %v196_v16  ;;  %v5857_v21 = vsub.f32 %v5778_v25, %v196_v16  ;;  %v5864_v39 = vsub.f32 %v5780_v26, %v196_v16  ;;  %v5870_v25 = vsub.f32 %v5782_v27, %v196_v16 }
 0x112   :  { %v213_v33 = vmul.f32 %v5836_v17, %v5836_v17  ;;  %v214_v34 = vmul.f32 %v5839_v18, %v5839_v18  ;;  %v215_v20 = vmul.f32 %v5842_v19, %v5842_v19  ;;  %v216_v22 = vmul.f32 %v5845_v32, %v5845_v32 }
 0x113   :  { %v217_v24 = vmul.f32 %v5852_v35, %v5852_v35  ;;  %v218_v42 = vmul.f32 %v5857_v21, %v5857_v21  ;;  %v5876_v45 = vsub.f32 %v5784_v28, %v196_v16  ;;  %v219_v26 = vmul.f32 %v5864_v39, %v5864_v39 }
 0x114   :  { %v229_v23 = vsel %vm151_vm1, %v213_v33, 0.0  ;;  %v230_v36 = vsel %vm151_vm1, %v214_v34, 0.0  ;;  %v232_v40 = vsel %vm151_vm1, %v215_v20, 0.0  ;;  %v234_v43 = vsel %vm151_vm1, %v216_v22, 0.0 }
 0x115   :  { %v231_v37 = vadd.f32 %v230_v36, %v229_v23  ;;  %v236_v46 = vsel %vm151_vm1, %v217_v24, 0.0  ;;  %v5882_v49 = vsub.f32 %v5786_v29, %v196_v16  ;;  %v220_v27 = vmul.f32 %v5870_v25, %v5870_v25 }
 0x116   :  { %v238_v50 = vsel %vm151_vm1, %v218_v42, 0.0  ;;  %v5888_v52 = vsub.f32 %v5788_v30, %v196_v16  ;;  %v221_v28 = vmul.f32 %v5876_v45, %v5876_v45  ;;  %v240_v53 = vsel %vm151_vm1, %v219_v26, 0.0 }
 0x117   :  { %v233_v41 = vadd.f32 %v232_v40, %v231_v37  ;;  %v5894_v55 = vsub.f32 %v5790_v31, %v196_v16  ;;  %v222_v29 = vmul.f32 %v5882_v49, %v5882_v49  ;;  %v242_v56 = vsel %vm151_vm1, %v220_v27, 0.0 }
 0x118   :  { %v5900_v59 = vsub.f32 %v5800_v38, %v196_v16  ;;  %v223_v30 = vmul.f32 %v5888_v52, %v5888_v52  ;;  %v244_v60 = vsel %vm151_vm1, %v221_v28, 0.0  ;;  %v5906_v62 = vsub.f32 %v5810_v47, %v196_v16  ;;  %v5941_v28 = vld [vmem:[%s9453_s1 + $0xe1] ss:$0 sm:$0xff] }
 0x119   :  { %v235_v44 = vadd.f32 %v234_v43, %v233_v41  ;;  %v224_v31 = vmul.f32 %v5894_v55, %v5894_v55  ;;  %v246_v63 = vsel %vm151_vm1, %v222_v29, 0.0  ;;  %v5912_v1 = vsub.f32 %v5820_v57, %v196_v16 }
 0x11a   :  { %v225_v38 = vmul.f32 %v5900_v59, %v5900_v59  ;;  %v248_v2 = vsel %vm151_vm1, %v223_v30, 0.0  ;;  %v5918_v5 = vsub.f32 %v5828_v3, %v196_v16  ;;  %v226_v47 = vmul.f32 %v5906_v62, %v5906_v62 }
 0x11b   :  { %v237_v48 = vadd.f32 %v236_v46, %v235_v44  ;;  %v250_v6 = vsel %vm151_vm1, %v224_v31, 0.0  ;;  %v227_v8 = vmul.f32 %v5912_v1, %v5912_v1 }
 0x11c   :  { %v252_v57 = vsel %vm151_vm1, %v225_v38, 0.0  ;;  %v228_v10 = vmul.f32 %v5918_v5, %v5918_v5  ;;  %v254_v11 = vsel %vm151_vm1, %v226_v47, 0.0 }
 0x11d   :  { %v239_v51 = vadd.f32 %v238_v50, %v237_v48  ;;  %v256_v3 = vsel %vm151_vm1, %v227_v8, 0.0  ;;  %v35_v48 = vld [vmem:[%s9453_s1 + $0xe0] ss:$0 sm:$0xff] }
 0x11e   :  { %v258_v15 = vsel %vm151_vm1, %v228_v10, 0.0 }
 0x11f   :  { %v241_v54 = vadd.f32 %v240_v53, %v239_v51 }
 0x121   :  { %v243_v58 = vadd.f32 %v242_v56, %v241_v54 }
 0x123   :  { %v245_v61 = vadd.f32 %v244_v60, %v243_v58 }
 0x125   :  { %v247_v0 = vadd.f32 %v246_v63, %v245_v61 }
 0x127   :  { %v249_v4 = vadd.f32 %v248_v2, %v247_v0 }
 0x129   :  { %v251_v7 = vadd.f32 %v250_v6, %v249_v4 }
 0x12b   :  { %v253_v9 = vadd.f32 %v252_v57, %v251_v7 }
 0x12d   :  { %v255_v12 = vadd.f32 %v254_v11, %v253_v9 }
 0x12f   :  { %v257_v13 = vadd.f32 %v256_v3, %v255_v12 }
 0x131   :  { %v259_v16 = vadd.f32 %v258_v15, %v257_v13 }
 0x133   :  { %v260_v33 = vrot.slane %v259_v16, 4 }
 0x135   :  { %v261_v34 = vadd.f32 %v260_v33, %v259_v16 }
 0x137   :  { %v262_v20 = vrot.slane %v261_v34, 2 }
 0x139   :  { %v263_v22 = vadd.f32 %v262_v20, %v261_v34 }
 0x13b   :  { %v264_v23 = vrot.slane %v263_v22, 1 }
 0x13d   :  { %v265_v36 = vadd.f32 %v264_v23, %v263_v22 }
 0x13f   :  { %v266_v37 = vmul.f32 %v265_v36, %v5832_v14 }
 0x141   :  { %v267_v24 = vadd.f32 1e-05, %v266_v37 }
 0x143   :  { %5365 = vrsqrt.f32 %v267_v24  ;;  %vm274_vm4 = vweird.f32 %v267_v24 }
 0x149   :  { %v5366_v40 = vpop.eup %5365 }
 0x14a   :  { %v269_v41 = vmul.f32 %v5366_v40, %v267_v24  ;;  %vm275_vm3 = vweird.f32 %v5366_v40 }
 0x14b   :  { %vm276_vm5 = vmor %vm274_vm4, %vm275_vm3 }
 0x14c   :  { %v270_v42 = vmul.f32 %v5366_v40, %v269_v41 }
 0x14e   :  { %v271_v43 = vmul.f32 0.5, %v270_v42 }
 0x150   :  { %v272_v44 = vsub.f32 1.5, %v271_v43 }
 0x152   :  { %v273_v26 = vmul.f32 %v5366_v40, %v272_v44 }
 0x154   :  { %v277_v46 = vsel %vm276_vm5, %v5366_v40, %v273_v26 }
 0x155   :  { %v282_v27 = vmul.f32 %v277_v46, %v5852_v35  ;;  %v280_v50 = vmul.f32 %v277_v46, %v5842_v19  ;;  %v278_v51 = vmul.f32 %v277_v46, %v5836_v17  ;;  %v283_v53 = vmul.f32 %v277_v46, %v5857_v21 }
 0x156   :  { %v281_v54 = vmul.f32 %v277_v46, %v5845_v32  ;;  %v279_v29 = vmul.f32 %v277_v46, %v5839_v18  ;;  %v286_v56 = vmul.f32 %v277_v46, %v5876_v45  ;;  %v285_v19 = vmul.f32 %v277_v46, %v5870_v25 }
 0x157   :  { %v298_v58 = vmul.f32 %v282_v27, %v35_v48  ;;  %v296_v35 = vmul.f32 %v280_v50, %v35_v48  ;;  %v294_v30 = vmul.f32 %v278_v51, %v35_v48  ;;  %v299_v60 = vmul.f32 %v283_v53, %v35_v48  ;;  %v361_v51 = vld [vmem:[%s9453_s1 + $0x50] sm:$0xff]  ;;  %v359_v53 = vld [vmem:[%s9453_s1 + $0x40] sm:$0xff] }
 0x158   :  { %v297_v17 = vmul.f32 %v281_v54, %v35_v48  ;;  %v295_v61 = vmul.f32 %v279_v29, %v35_v48  ;;  %v302_v31 = vmul.f32 %v286_v56, %v35_v48  ;;  %v301_v32 = vmul.f32 %v285_v19, %v35_v48  ;;  %458 = vmatpush.msra.mxu1 %v361_v51  ;;  %v360_v54 = vld [vmem:[%s9453_s1 + $0x48] sm:$0xff] }
 0x159   :  { %v314_v63 = vadd.f32 %v298_v58, %v5941_v28  ;;  %v312_v0 = vadd.f32 %v296_v35, %v5941_v28  ;;  %v310_v21 = vadd.f32 %v294_v30, %v5941_v28  ;;  %v315_v18 = vadd.f32 %v299_v60, %v5941_v28 }
 0x15a   :  { %v313_v45 = vadd.f32 %v297_v17, %v5941_v28  ;;  %v311_v38 = vadd.f32 %v295_v61, %v5941_v28  ;;  %v5955_v2 = vadd.f32 %v302_v31, %v5941_v28  ;;  %v317_v6 = vadd.f32 %v301_v32, %v5941_v28  ;;  %459 = vmatpush.msra.mxu1 %v359_v53  ;;  %v846_v32 = vld [vmem:[%s9454_s2] sm:$0xff] }
 0x15b   :  { %v330_v25 = vmax.f32 %v314_v63, 0.0  ;;  %v328_v4 = vmax.f32 %v312_v0, 0.0  ;;  %v326_v47 = vmax.f32 %v310_v21, 0.0  ;;  %v293_v7 = vmul.f32 %v277_v46, %v5918_v5  ;;  %v847_v21 = vld [vmem:[%s9454_s2 + $0x8] sm:$0xff] }
 0x15c   :  { %v331_v8 = vmax.f32 %v315_v18, 0.0  ;;  %v329_v57 = vmax.f32 %v313_v45, 0.0  ;;  %v327_v9 = vmax.f32 %v311_v38, 0.0  ;;  %v334_v10 = vmax.f32 %v5955_v2, 0.0  ;;  %1006 = vmatpush.msra.mxu3 %v847_v21 }
 0x15d   :  { %387 = vrot.lane.b32.xlu2 %v330_v25, %s5662_s28  ;;  %347 = vst.msk [vmem:[#allocation2 + $0x20] sm:$0xff] %vm342_vm6, %v330_v25  ;;  %383 = vrot.lane.b32.xlu1 %v328_v4, %s5662_s28  ;;  %v284_v11 = vmul.f32 %v277_v46, %v5864_v39  ;;  %v289_v12 = vmul.f32 %v277_v46, %v5894_v55  ;;  %v333_v5 = vmax.f32 %v317_v6, 0.0 }
 0x15e   :  { %345 = vst.msk [vmem:[#allocation2 + $0x10] sm:$0xff] %vm342_vm6, %v328_v4  ;;  %379 = vrot.lane.b32.xlu0 %v326_v47, %s5662_s28  ;;  %v288_v3 = vmul.f32 %v277_v46, %v5888_v52  ;;  %v287_v13 = vmul.f32 %v277_v46, %v5882_v49  ;;  %v292_v15 = vmul.f32 %v277_v46, %v5912_v1 }
 0x15f   :  { %343 = vst.msk [vmem:[#allocation2] sm:$0xff] %vm342_vm6, %v326_v47  ;;  %v300_v16 = vmul.f32 %v284_v11, %v35_v48  ;;  %v305_v33 = vmul.f32 %v289_v12, %v35_v48  ;;  %v291_v34 = vmul.f32 %v277_v46, %v5906_v62  ;;  %v290_v39 = vmul.f32 %v277_v46, %v5900_v59 }
 0x160   :  { %348 = vst.msk [vmem:[#allocation2 + $0x28] sm:$0xff] %vm342_vm6, %v331_v8  ;;  %v304_v55 = vmul.f32 %v288_v3, %v35_v48  ;;  %v303_v20 = vmul.f32 %v287_v13, %v35_v48  ;;  %v308_v22 = vmul.f32 %v292_v15, %v35_v48  ;;  %v309_v23 = vmul.f32 %v293_v7, %v35_v48  ;;  %v863_v3 = vld [vmem:[%s9454_s2 + $0x88] sm:$0xff]  ;;  %v862_v15 = vld [vmem:[%s9454_s2 + $0x80] sm:$0xff] }
 0x161   :  { %346 = vst.msk [vmem:[#allocation2 + $0x18] sm:$0xff] %vm342_vm6, %v329_v57  ;;  %v316_v49 = vadd.f32 %v300_v16, %v5941_v28  ;;  %v321_v52 = vadd.f32 %v305_v33, %v5941_v28  ;;  %v307_v1 = vmul.f32 %v291_v34, %v35_v48  ;;  %v306_v36 = vmul.f32 %v290_v39, %v35_v48  ;;  %v861_v33 = vld [vmem:[%s9454_s2 + $0x78] sm:$0xff]  ;;  %v860_v39 = vld [vmem:[%s9454_s2 + $0x70] sm:$0xff] }
 0x162   :  { %344 = vst.msk [vmem:[#allocation2 + $0x8] sm:$0xff] %vm342_vm6, %v327_v9  ;;  %v320_v62 = vadd.f32 %v304_v55, %v5941_v28  ;;  %v319_v59 = vadd.f32 %v303_v20, %v5941_v28  ;;  %v324_v37 = vadd.f32 %v308_v22, %v5941_v28  ;;  %v325_v26 = vadd.f32 %v309_v23, %v5941_v28  ;;  %v859_v20 = vld [vmem:[%s9454_s2 + $0x68] sm:$0xff]  ;;  %v858_v22 = vld [vmem:[%s9454_s2 + $0x60] sm:$0xff] }
 0x163   :  { %351 = vst.msk [vmem:[#allocation2 + $0x40] sm:$0xff] %vm342_vm6, %v334_v10  ;;  %v332_v24 = vmax.f32 %v316_v49, 0.0  ;;  %v337_v40 = vmax.f32 %v321_v52, 0.0  ;;  %v323_v41 = vadd.f32 %v307_v1, %v5941_v28  ;;  %v322_v42 = vadd.f32 %v306_v36, %v5941_v28  ;;  %v362_v28 = vld [vmem:[%s9453_s1 + $0x58] sm:$0xff]  ;;  %1007 = vmatpush.msra.mxu3 %v846_v32  ;;  %1273 = vmatpush.xpose.msrb.mxu1 %v863_v3  ;;  %v856_v36 = vld [vmem:[%s9454_s2 + $0x50] sm:$0xff]  ;;  %v6328_v32 = vld [vmem:[%s9454_s2 + $0x28] sm:$0xff] }
 0x164   :  { %350 = vst.msk [vmem:[#allocation2 + $0x38] sm:$0xff] %vm342_vm6, %v333_v5  ;;  %v336_v43 = vmax.f32 %v320_v62, 0.0  ;;  %v335_v44 = vmax.f32 %v319_v59, 0.0  ;;  %v340_v46 = vmax.f32 %v324_v37, 0.0  ;;  %v341_v50 = vmax.f32 %v325_v26, 0.0  ;;  %523 = vmatpush.msra.mxu2 %v362_v28  ;;  %v857_v52 = vld [vmem:[%s9454_s2 + $0x58] sm:$0xff] }
 0x165   :  { %389 = vrot.lane.b32.xlu2 %v331_v8, %s5662_s28  ;;  %385 = vrot.lane.b32.xlu1 %v329_v57, %s5662_s28  ;;  %349 = vst.msk [vmem:[#allocation2 + $0x30] sm:$0xff] %vm342_vm6, %v332_v24  ;;  %v339_v48 = vmax.f32 %v323_v41, 0.0  ;;  %v338_v27 = vmax.f32 %v322_v42, 0.0 }
 0x166   :  { %381 = vrot.lane.b32.xlu0 %v327_v9, %s5662_s28  ;;  %354 = vst.msk [vmem:[#allocation2 + $0x58] sm:$0xff] %vm342_vm6, %v337_v40  ;;  %524 = vmatpush.msra.mxu2 %v360_v54 }
 0x167   :  { %353 = vst.msk [vmem:[#allocation2 + $0x50] sm:$0xff] %vm342_vm6, %v336_v43  ;;  %1274 = vmatpush.xpose.msrb.mxu1 %v862_v15  ;;  %v6348_v15 = vld [vmem:[%s9454_s2 + $0x30] sm:$0xff] }
 0x168   :  { %352 = vst.msk [vmem:[#allocation2 + $0x48] sm:$0xff] %vm342_vm6, %v335_v44 }
 0x169   :  { %357 = vst.msk [vmem:[#allocation2 + $0x70] sm:$0xff] %vm342_vm6, %v340_v46 }
 0x16a   :  { %356 = vst.msk [vmem:[#allocation2 + $0x68] sm:$0xff] %vm342_vm6, %v339_v48 }
 0x16b   :  { %355 = vst.msk [vmem:[#allocation2 + $0x60] sm:$0xff] %vm342_vm6, %v338_v27  ;;  %1275 = vmatpush.xpose.msrb.mxu1 %v861_v33 }
 0x16c   :  { %358 = vst.msk [vmem:[#allocation2 + $0x78] sm:$0xff] %vm342_vm6, %v341_v50 }
 0x16d   :  { %395 = vrot.lane.b32.xlu2 %v334_v10, %s5662_s28  ;;  %393 = vrot.lane.b32.xlu1 %v333_v5, %s5662_s28 }
 0x16e   :  { %391 = vrot.lane.b32.xlu0 %v332_v24, %s5662_s28 }
 0x16f   :  { %1276 = vmatpush.xpose.msrb.mxu1 %v860_v39 }
 0x173   :  { %1277 = vmatpush.xpose.msrb.mxu1 %v859_v20 }
 0x175   :  { %401 = vrot.lane.b32.xlu2 %v337_v40, %s5662_s28  ;;  %399 = vrot.lane.b32.xlu1 %v336_v43, %s5662_s28 }
 0x176   :  { %397 = vrot.lane.b32.xlu0 %v335_v44, %s5662_s28 }
 0x177   :  { %1278 = vmatpush.xpose.msrb.mxu1 %v858_v22 }
 0x17b   :  { %1279 = vmatpush.xpose.msrb.mxu1 %v857_v52 }
 0x17d   :  { %407 = vrot.lane.b32.xlu2 %v340_v46, %s5662_s28  ;;  %405 = vrot.lane.b32.xlu1 %v339_v48, %s5662_s28  ;;  %v6266_v48 = vld [vmem:[%s9454_s2 + $0x10] sm:$0xff] }
 0x17e   :  { %403 = vrot.lane.b32.xlu0 %v338_v27, %s5662_s28 }
 0x17f   :  { %1280 = vmatpush.xpose.msrb.mxu1 %v856_v36  ;;  %v6368_v36 = vld [vmem:[%s9454_s2 + $0x38] sm:$0xff] }
 0x186   :  { %409 = vrot.lane.b32.xlu0 %v341_v50, %s5662_s28 }
 0x1b7   :  { %v388_v30 = vpop.permute.xlu2 %387 }
 0x1bf   :  { %v390_v19 = vpop.permute.xlu2 %389 }
 0x1c7   :  { %v396_v61 = vpop.permute.xlu2 %395 }
 0x1cf   :  { %v384_v58 = vpop.permute.xlu1 %383  ;;  %v402_v0 = vpop.permute.xlu2 %401 }
 0x1d0   :  { %v380_v29 = vpop.permute.xlu0 %379 }
 0x1d1   :  { %4928 = vmatmul.msk.f32.vlgmr.msra.gmra.mxu1 %vm411_vm7, %v380_v29  ;;  %4944 = vmatmul.msk.f32.vlgmr.msra.gmra.mxu2 %vm411_vm7, %v380_v29  ;;  %v6288_v29 = vld [vmem:[%s9454_s2 + $0x18] sm:$0xff] }
 0x1d7   :  { %v386_v35 = vpop.permute.xlu1 %385  ;;  %v408_v38 = vpop.permute.xlu2 %407 }
 0x1d8   :  { %v382_v56 = vpop.permute.xlu0 %381 }
 0x1d9   :  { %4929 = vmatmul.msk.f32.gmra.mxu1 %vm411_vm7, %v382_v56  ;;  %4945 = vmatmul.msk.f32.gmra.mxu2 %vm411_vm7, %v382_v56 }
 0x1df   :  { %v394_v17 = vpop.permute.xlu1 %393 }
 0x1e0   :  { %v392_v60 = vpop.permute.xlu0 %391 }
 0x1e1   :  { %4930 = vmatmul.msk.f32.gmra.mxu1 %vm411_vm7, %v384_v58  ;;  %4946 = vmatmul.msk.f32.gmra.mxu2 %vm411_vm7, %v384_v58 }
 0x1e7   :  { %v400_v63 = vpop.permute.xlu1 %399 }
 0x1e8   :  { %v398_v31 = vpop.permute.xlu0 %397 }
 0x1e9   :  { %4931 = vmatmul.msk.f32.gmra.mxu1 %vm411_vm7, %v386_v35  ;;  %4947 = vmatmul.msk.f32.gmra.mxu2 %vm411_vm7, %v386_v35 }
 0x1ef   :  { %v406_v45 = vpop.permute.xlu1 %405 }
 0x1f0   :  { %v404_v18 = vpop.permute.xlu0 %403 }
 0x1f1   :  { %4932 = vmatmul.msk.f32.gmra.mxu1 %vm411_vm7, %v388_v30  ;;  %4948 = vmatmul.msk.f32.gmra.mxu2 %vm411_vm7, %v388_v30 }
 0x1f8   :  { %v410_v2 = vpop.permute.xlu0 %409 }
 0x1f9   :  { %4933 = vmatmul.msk.f32.gmra.mxu1 %vm411_vm7, %v390_v19  ;;  %4949 = vmatmul.msk.f32.gmra.mxu2 %vm411_vm7, %v390_v19 }
 0x201   :  { %4934 = vmatmul.msk.f32.gmra.mxu1 %vm411_vm7, %v392_v60  ;;  %4950 = vmatmul.msk.f32.gmra.mxu2 %vm411_vm7, %v392_v60  ;;  %v6308_v60 = vld [vmem:[%s9454_s2 + $0x20] sm:$0xff] }
 0x209   :  { %4935 = vmatmul.msk.f32.gmra.mxu1 %vm411_vm7, %v394_v17  ;;  %4951 = vmatmul.msk.f32.gmra.mxu2 %vm411_vm7, %v394_v17 }
 0x211   :  { %4936 = vmatmul.msk.f32.gmra.mxu1 %vm411_vm7, %v396_v61  ;;  %4952 = vmatmul.msk.f32.gmra.mxu2 %vm411_vm7, %v396_v61 }
 0x219   :  { %4937 = vmatmul.msk.f32.gmra.mxu1 %vm411_vm7, %v398_v31  ;;  %4953 = vmatmul.msk.f32.gmra.mxu2 %vm411_vm7, %v398_v31 }
 0x221   :  { %4938 = vmatmul.msk.f32.gmra.mxu1 %vm411_vm7, %v400_v63  ;;  %4954 = vmatmul.msk.f32.gmra.mxu2 %vm411_vm7, %v400_v63 }
 0x229   :  { %4939 = vmatmul.msk.f32.gmra.mxu1 %vm411_vm7, %v402_v0  ;;  %4955 = vmatmul.msk.f32.gmra.mxu2 %vm411_vm7, %v402_v0 }
 0x231   :  { %4940 = vmatmul.msk.f32.gmra.mxu1 %vm411_vm7, %v404_v18  ;;  %4956 = vmatmul.msk.f32.gmra.mxu2 %vm411_vm7, %v404_v18 }
 0x239   :  { %4941 = vmatmul.msk.f32.gmra.mxu1 %vm411_vm7, %v406_v45  ;;  %4957 = vmatmul.msk.f32.gmra.mxu2 %vm411_vm7, %v406_v45 }
 0x241   :  { %4942 = vmatmul.msk.f32.gmra.mxu1 %vm411_vm7, %v408_v38  ;;  %4958 = vmatmul.msk.f32.gmra.mxu2 %vm411_vm7, %v408_v38 }
 0x249   :  { %4943 = vmatmul.msk.f32.gmra.mxu1 %vm411_vm7, %v410_v2  ;;  %4959 = vmatmul.msk.f32.gmra.mxu2 %vm411_vm7, %v410_v2 }
 0x24e   :  { %v6057_v25 = vpop.f32.mrf.mxu1 }
 0x24f   :  { %590 = vrot.lane.b32.xlu1 %v6057_v25, %s5663_s14  ;;  %4960 = vmatmul.msk.f32.vlgmr.msra.gmra.mxu3 %vm411_vm7, %v6057_v25 }
 0x254   :  { %v6117_v9 = vpop.f32.mrf.mxu2 }
 0x255   :  { %9584 = vst [vmem:[#allocation7_spill] sm:$0xff] %v6117_v9 }
 0x256   :  { %v6063_v4 = vpop.f32.mrf.mxu1 }
 0x257   :  { %624 = vrot.lane.b32.xlu0 %v6063_v4, %s5664_s15  ;;  %592 = vrot.lane.b32.xlu2 %v6063_v4, %s5663_s14 }
 0x258   :  { %4961 = vmatmul.msk.f32.gmra.mxu3 %vm411_vm7, %v6063_v4 }
 0x25c   :  { %v6129_v11 = vpop.f32.mrf.mxu2 }
 0x25d   :  { %9585 = vst [vmem:[#allocation8_spill] sm:$0xff] %v6129_v11 }
 0x25e   :  { %v6071_v47 = vpop.f32.mrf.mxu1 }
 0x25f   :  { %622 = vrot.lane.b32.xlu2 %v6057_v25, %s5664_s15  ;;  %626 = vrot.lane.b32.xlu1 %v6071_v47, %s5664_s15 }
 0x260   :  { %594 = vrot.lane.b32.xlu0 %v6071_v47, %s5663_s14  ;;  %4962 = vmatmul.msk.f32.gmra.mxu3 %vm411_vm7, %v6071_v47 }
 0x264   :  { %v6148_v13 = vpop.f32.mrf.mxu2 }
 0x265   :  { %9586 = vst [vmem:[#allocation9_spill] sm:$0xff] %v6148_v13 }
 0x266   :  { %v6081_v6 = vpop.f32.mrf.mxu1 }
 0x267   :  { %628 = vrot.lane.b32.xlu2 %v6081_v6, %s5664_s15  ;;  %596 = vrot.lane.b32.xlu1 %v6081_v6, %s5663_s14 }
 0x268   :  { %4963 = vmatmul.msk.f32.gmra.mxu3 %vm411_vm7, %v6081_v6 }
 0x26c   :  { %v6168_v34 = vpop.f32.mrf.mxu2 }
 0x26d   :  { %9587 = vst [vmem:[#allocation10_spill] sm:$0xff] %v6168_v34 }
 0x26e   :  { %v6089_v7 = vpop.f32.mrf.mxu1 }
 0x26f   :  { %630 = vrot.lane.b32.xlu0 %v6089_v7, %s5664_s15  ;;  %598 = vrot.lane.b32.xlu2 %v6089_v7, %s5663_s14 }
 0x270   :  { %4964 = vmatmul.msk.f32.gmra.mxu3 %vm411_vm7, %v6089_v7 }
 0x274   :  { %v6189_v23 = vpop.f32.mrf.mxu2 }
 0x275   :  { %9588 = vst [vmem:[#allocation11_spill] sm:$0xff] %v6189_v23 }
 0x276   :  { %v6097_v8 = vpop.f32.mrf.mxu1 }
 0x277   :  { %1482 = vrot.lane.b32.xlu0 %v6089_v7, %s5662_s28  ;;  %1480 = vrot.lane.b32.xlu2 %v6081_v6, %s5662_s28 }
 0x278   :  { %632 = vrot.lane.b32.xlu1 %v6097_v8, %s5664_s15  ;;  %4965 = vmatmul.msk.f32.gmra.mxu3 %vm411_vm7, %v6097_v8 }
 0x27c   :  { %v6209_v62 = vpop.f32.mrf.mxu2 }
 0x27d   :  { %9590 = vst [vmem:[#allocation13_spill] sm:$0xff] %v6209_v62 }
 0x27e   :  { %v6107_v57 = vpop.f32.mrf.mxu1 }
 0x27f   :  { %600 = vrot.lane.b32.xlu0 %v6097_v8, %s5663_s14  ;;  %634 = vrot.lane.b32.xlu2 %v6107_v57, %s5664_s15 }
 0x280   :  { %602 = vrot.lane.b32.xlu1 %v6107_v57, %s5663_s14  ;;  %4966 = vmatmul.msk.f32.gmra.mxu3 %vm411_vm7, %v6107_v57 }
 0x284   :  { %v6229_v40 = vpop.f32.mrf.mxu2 }
 0x285   :  { %9593 = vst [vmem:[#allocation16_spill] sm:$0xff] %v6229_v40 }
 0x286   :  { %v6119_v10 = vpop.f32.mrf.mxu1 }
 0x287   :  { %1484 = vrot.lane.b32.xlu0 %v6097_v8, %s5662_s28  ;;  %604 = vrot.lane.b32.xlu2 %v6119_v10, %s5663_s14 }
 0x288   :  { %1486 = vrot.lane.b32.xlu1 %v6107_v57, %s5662_s28  ;;  %4967 = vmatmul.msk.f32.gmra.mxu3 %vm411_vm7, %v6119_v10 }
 0x28c   :  { %v6247_v43 = vpop.f32.mrf.mxu2 }
 0x28d   :  { %9596 = vst [vmem:[#allocation19_spill] sm:$0xff] %v6247_v43 }
 0x28e   :  { %v6131_v12 = vpop.f32.mrf.mxu1 }
 0x28f   :  { %636 = vrot.lane.b32.xlu0 %v6119_v10, %s5664_s15 }
 0x290   :  { %1488 = vrot.lane.b32.xlu1 %v6119_v10, %s5662_s28  ;;  %4968 = vmatmul.msk.f32.gmra.mxu3 %vm411_vm7, %v6131_v12 }
 0x294   :  { %v6269_v51 = vpop.f32.mrf.mxu2 }
 0x295   :  { %9600 = vst [vmem:[#allocation23_spill] sm:$0xff] %v6269_v51 }
 0x296   :  { %v6139_v5 = vpop.f32.mrf.mxu1 }
 0x297   :  { %606 = vrot.lane.b32.xlu0 %v6131_v12, %s5663_s14  ;;  %640 = vrot.lane.b32.xlu2 %v6139_v5, %s5664_s15 }
 0x298   :  { %638 = vrot.lane.b32.xlu1 %v6131_v12, %s5664_s15  ;;  %4969 = vmatmul.msk.f32.gmra.mxu3 %vm411_vm7, %v6139_v5 }
 0x29c   :  { %v6291_v35 = vpop.f32.mrf.mxu2 }
 0x29d   :  { %9602 = vst [vmem:[#allocation25_spill] sm:$0xff] %v6291_v35 }
 0x29e   :  { %v6157_v16 = vpop.f32.mrf.mxu1 }
 0x29f   :  { %610 = vrot.lane.b32.xlu2 %v6157_v16, %s5663_s14 }
 0x2a0   :  { %1547 = vrot.lane.b32.xlu1 %v6131_v12, %s5662_s28  ;;  %4970 = vmatmul.msk.f32.gmra.mxu3 %vm411_vm7, %v6157_v16 }
 0x2a4   :  { %v6317_v63 = vpop.f32.mrf.mxu2 }
 0x2a5   :  { %9605 = vst [vmem:[#allocation28_spill] sm:$0xff] %v6317_v63 }
 0x2a6   :  { %v6173_v55 = vpop.f32.mrf.mxu1 }
 0x2a7   :  { %1551 = vrot.lane.b32.xlu2 %v6157_v16, %s5662_s28  ;;  %612 = vrot.lane.b32.xlu0 %v6173_v55, %s5663_s14 }
 0x2a8   :  { %608 = vrot.lane.b32.xlu1 %v6139_v5, %s5663_s14  ;;  %4971 = vmatmul.msk.f32.gmra.mxu3 %vm411_vm7, %v6173_v55 }
 0x2ac   :  { %v6352_v39 = vpop.f32.mrf.mxu2 }
 0x2ad   :  { %9611 = vst [vmem:[#allocation34_spill] sm:$0xff] %v6352_v39 }
 0x2ae   :  { %v6191_v49 = vpop.f32.mrf.mxu1 }
 0x2af   :  { %644 = vrot.lane.b32.xlu2 %v6173_v55, %s5664_s15  ;;  %1555 = vrot.lane.b32.xlu0 %v6191_v49, %s5662_s28 }
 0x2b0   :  { %1549 = vrot.lane.b32.xlu1 %v6139_v5, %s5662_s28  ;;  %4972 = vmatmul.msk.f32.gmra.mxu3 %vm411_vm7, %v6191_v49 }
 0x2b1   :  { %v6204_v1 = vpop.permute.xlu2 %592 }
 0x2b2   :  { %9589 = vst [vmem:[#allocation12_spill] sm:$0xff] %v6204_v1 }
 0x2b6   :  { %v6211_v59 = vpop.f32.mrf.mxu1 }
 0x2b7   :  { %1553 = vrot.lane.b32.xlu2 %v6173_v55, %s5662_s28  ;;  %1476 = vrot.lane.b32.xlu0 %v6063_v4, %s5662_s28 }
 0x2b8   :  { %642 = vrot.lane.b32.xlu1 %v6157_v16, %s5664_s15  ;;  %4973 = vmatmul.msk.f32.gmra.mxu3 %vm411_vm7, %v6211_v59 }
 0x2b9   :  { %v6221_v37 = vpop.permute.xlu2 %622 }
 0x2ba   :  { %9591 = vst [vmem:[#allocation14_spill] sm:$0xff] %v6221_v37 }
 0x2be   :  { %v6223_v24 = vpop.f32.mrf.mxu1 }
 0x2bf   :  { %9592 = vst [vmem:[#allocation15_spill] sm:$0xff] %v6223_v24  ;;  %664 = vrot.lane.b32.xlu0 %v6097_v8, %s5665_s5  ;;  %616 = vrot.lane.b32.xlu2 %v6211_v59, %s5663_s14 }
 0x2c0   :  { %614 = vrot.lane.b32.xlu1 %v6191_v49, %s5663_s14  ;;  %4974 = vmatmul.msk.f32.gmra.mxu3 %vm411_vm7, %v6223_v24 }
 0x2c1   :  { %v6235_v41 = vpop.permute.xlu2 %628  ;;  %v6251_v26 = vpop.permute.xlu1 %590 }
 0x2c2   :  { %9594 = vst [vmem:[#allocation17_spill] sm:$0xff] %v6235_v41 }
 0x2c3   :  { %9598 = vst [vmem:[#allocation21_spill] sm:$0xff] %v6251_v26 }
 0x2c6   :  { %v6237_v42 = vpop.f32.mrf.mxu1 }
 0x2c7   :  { %9595 = vst [vmem:[#allocation18_spill] sm:$0xff] %v6237_v42  ;;  %668 = vrot.lane.b32.xlu0 %v6119_v10, %s5665_s5  ;;  %1478 = vrot.lane.b32.xlu2 %v6071_v47, %s5662_s28 }
 0x2c8   :  { %646 = vrot.lane.b32.xlu1 %v6191_v49, %s5664_s15  ;;  %4975 = vmatmul.msk.f32.gmra.mxu3 %vm411_vm7, %v6237_v42 }
 0x2c9   :  { %v6249_v44 = vpop.permute.xlu2 %598  ;;  %v6253_v46 = vpop.permute.xlu0 %624 }
 0x2ca   :  { %9597 = vst [vmem:[#allocation20_spill] sm:$0xff] %v6249_v44 }
 0x2cb   :  { %9599 = vst [vmem:[#allocation22_spill] sm:$0xff] %v6253_v46 }
 0x2cf   :  { %1557 = vrot.lane.b32.xlu0 %v6211_v59, %s5662_s28  ;;  %1474 = vrot.lane.b32.xlu2 %v6057_v25, %s5662_s28 }
 0x2d0   :  { %654 = vrot.lane.b32.xlu1 %v6057_v25, %s5665_s5  ;;  %4976 = vmatmul.msk.f32.gmra.mxu3 %vm411_vm7, %v6251_v26 }
 0x2d1   :  { %v6271_v28 = vpop.permute.xlu2 %1480  ;;  %v6277_v53 = vpop.permute.xlu1 %626 }
 0x2d2   :  { %v1009_v27 = vpop.f32.mrf.mxu3  ;;  %9601 = vst [vmem:[#allocation24_spill] sm:$0xff] %v6277_v53  ;;  %v6283_v54 = vpop.permute.xlu0 %594 }
 0x2d3   :  { %v1201_v50 = vmul.f32 %v1009_v27, %v6266_v48 }
 0x2d5   :  { %1281 = vmatmul.f32.vlgmr.msrb.gmra.mxu1 %v1201_v50 }
 0x2d7   :  { %648 = vrot.lane.b32.xlu0 %v6211_v59, %s5664_s15  ;;  %656 = vrot.lane.b32.xlu2 %v6063_v4, %s5665_s5 }
 0x2d8   :  { %658 = vrot.lane.b32.xlu1 %v6071_v47, %s5665_s5  ;;  %4977 = vmatmul.msk.f32.gmra.mxu3 %vm411_vm7, %v6204_v1 }
 0x2d9   :  { %v6293_v30 = vpop.permute.xlu2 %634  ;;  %v6310_v17 = vpop.permute.xlu1 %596 }
 0x2da   :  { %9603 = vst [vmem:[#allocation26_spill] sm:$0xff] %v6293_v30 }
 0x2db   :  { %v1012_v56 = vpop.f32.mrf.mxu3 }
 0x2dc   :  { %v1202_v58 = vmul.f32 %v1012_v56, %v6288_v29 }
 0x2de   :  { %1284 = vmatmul.f32.gmra.mxu1 %v1202_v58 }
 0x2df   :  { %660 = vrot.lane.b32.xlu2 %v6081_v6, %s5665_s5  ;;  %618 = vrot.lane.b32.xlu0 %v6223_v24, %s5663_s14 }
 0x2e0   :  { %662 = vrot.lane.b32.xlu1 %v6089_v7, %s5665_s5  ;;  %4978 = vmatmul.msk.f32.gmra.mxu3 %vm411_vm7, %v6283_v54 }
 0x2e1   :  { %v6303_v19 = vpop.permute.xlu0 %630  ;;  %v6323_v0 = vpop.permute.xlu2 %604 }
 0x2e2   :  { %9604 = vst [vmem:[#allocation27_spill] sm:$0xff] %v6303_v19 }
 0x2e3   :  { %v1015_v61 = vpop.f32.mrf.mxu3  ;;  %9606 = vst [vmem:[#allocation29_spill] sm:$0xff] %v6323_v0 }
 0x2e4   :  { %v1203_v31 = vmul.f32 %v1015_v61, %v6308_v60  ;;  %v6371_v61 = vpop.f32.mrf.mxu2 }
 0x2e5   :  { %9613 = vst [vmem:[#allocation36_spill] sm:$0xff] %v6371_v61 }
 0x2e6   :  { %1287 = vmatmul.f32.gmra.mxu1 %v1203_v31 }
 0x2e7   :  { %672 = vrot.lane.b32.xlu2 %v6139_v5, %s5665_s5  ;;  %682 = vrot.lane.b32.xlu0 %v6223_v24, %s5665_s5 }
 0x2e8   :  { %666 = vrot.lane.b32.xlu1 %v6107_v57, %s5665_s5  ;;  %4979 = vmatmul.msk.f32.gmra.mxu3 %vm411_vm7, %v6310_v17 }
 0x2e9   :  { %v1483_v21 = vpop.permute.xlu0 %1482 }
 0x2ea   :  { %v6330_v18 = vpop.permute.xlu1 %632 }
 0x2eb   :  { %9607 = vst [vmem:[#allocation30_spill] sm:$0xff] %v6330_v18  ;;  %v1018_v45 = vpop.f32.mrf.mxu3 }
 0x2ec   :  { %v1204_v38 = vmul.f32 %v1018_v45, %v6328_v32  ;;  %v6386_v45 = vld [vmem:[%s9454_s2 + $0x40] sm:$0xff] }
 0x2ee   :  { %1290 = vmatmul.f32.gmra.mxu1 %v1204_v38 }
 0x2ef   :  { %676 = vrot.lane.b32.xlu2 %v6173_v55, %s5665_s5  ;;  %1766 = vrot.lane.b32.xlu0 %v6221_v37, %s5662_s28 }
 0x2f0   :  { %670 = vrot.lane.b32.xlu1 %v6131_v12, %s5665_s5  ;;  %4980 = vmatmul.msk.f32.gmra.mxu3 %vm411_vm7, %v6249_v44 }
 0x2f1   :  { %v6341_v2 = vpop.permute.xlu2 %640  ;;  %v6343_v3 = vpop.permute.xlu0 %600 }
 0x2f2   :  { %9608 = vst [vmem:[#allocation31_spill] sm:$0xff] %v6341_v2  ;;  %v6350_v33 = vpop.permute.xlu1 %602 }
 0x2f3   :  { %9609 = vst [vmem:[#allocation32_spill] sm:$0xff] %v6343_v3  ;;  %v1021_v20 = vpop.f32.mrf.mxu3 }
 0x2f4   :  { %9610 = vst [vmem:[#allocation33_spill] sm:$0xff] %v6350_v33  ;;  %v1205_v22 = vmul.f32 %v1021_v20, %v6348_v15 }
 0x2f6   :  { %1293 = vmatmul.f32.gmra.mxu1 %v1205_v22 }
 0x2f7   :  { %1559 = vrot.lane.b32.xlu2 %v6223_v24, %s5662_s28  ;;  %1561 = vrot.lane.b32.xlu0 %v6237_v42, %s5662_s28 }
 0x2f8   :  { %674 = vrot.lane.b32.xlu1 %v6157_v16, %s5665_s5  ;;  %4981 = vmatmul.msk.f32.gmra.mxu3 %vm411_vm7, %v6343_v3 }
 0x2f9   :  { %v6363_v52 = vpop.permute.xlu2 %610  ;;  %v1485_v50 = vpop.permute.xlu0 %1484 }
 0x2fa   :  { %9612 = vst [vmem:[#allocation35_spill] sm:$0xff] %v6363_v52  ;;  %v1487_v27 = vpop.permute.xlu1 %1486 }
 0x2fb   :  { %v1024_v56 = vpop.f32.mrf.mxu3 }
 0x2fc   :  { %v1206_v58 = vmul.f32 %v1024_v56, %v6368_v36 }
 0x2fe   :  { %1296 = vmatmul.f32.gmra.mxu1 %v1206_v58  ;;  %v6392_v58 = vpop.f32.mrf.mxu2 }
 0x2ff   :  { %1620 = vrot.lane.b32.xlu2 %v6251_v26, %s5662_s28  ;;  %652 = vrot.lane.b32.xlu0 %v6237_v42, %s5664_s15  ;;  %9615 = vst [vmem:[#allocation38_spill] sm:$0xff] %v6392_v58 }
 0x300   :  { %678 = vrot.lane.b32.xlu1 %v6191_v49, %s5665_s5  ;;  %4982 = vmatmul.msk.f32.gmra.mxu3 %vm411_vm7, %v6350_v33 }
 0x301   :  { %v6381_v31 = vpop.permute.xlu2 %1551  ;;  %v6390_v56 = vpop.permute.xlu0 %636 }
 0x302   :  { %v1489_v38 = vpop.permute.xlu1 %1488  ;;  %9614 = vst [vmem:[#allocation37_spill] sm:$0xff] %v6390_v56 }
 0x303   :  { %v1027_v20 = vpop.f32.mrf.mxu3  ;;  %5024 = vmatpush.xpose.msk.msrb.mxu2 %vm411_vm7, %v1489_v38  ;;  %v6406_v38 = vld [vmem:[%s9454_s2 + $0x48] sm:$0xff] }
 0x304   :  { %v1207_v22 = vmul.f32 %v1027_v20, %v6386_v45 }
 0x306   :  { %1299 = vmatmul.f32.gmra.mxu1 %v1207_v22  ;;  %v6421_v26 = vpop.f32.mrf.mxu2 }
 0x307   :  { %5025 = vmatpush.xpose.msk.msrb.mxu2 %vm411_vm7, %v1487_v27  ;;  %1622 = vrot.lane.b32.xlu0 %v6204_v1, %s5662_s28  ;;  %9619 = vst [vmem:[#allocation42_spill] sm:$0xff] %v6421_v26 }
 0x308   :  { %650 = vrot.lane.b32.xlu1 %v6223_v24, %s5664_s15  ;;  %4983 = vmatmul.msk.f32.gmra.mxu3 %vm411_vm7, %v6323_v0 }
 0x309   :  { %v6401_v14 = vpop.permute.xlu2 %644  ;;  %v6412_v1 = vpop.permute.xlu0 %606 }
 0x30a   :  { %9616 = vst [vmem:[#allocation39_spill] sm:$0xff] %v6401_v14  ;;  %v6408_v20 = vpop.permute.xlu1 %638 }
 0x30b   :  { %9617 = vst [vmem:[#allocation40_spill] sm:$0xff] %v6408_v20  ;;  %v1030_v22 = vpop.f32.mrf.mxu3  ;;  %5026 = vmatpush.xpose.msk.msrb.mxu2 %vm411_vm7, %v1485_v50 }
 0x30c   :  { %v1208_v27 = vmul.f32 %v1030_v22, %v6406_v38  ;;  %9618 = vst [vmem:[#allocation41_spill] sm:$0xff] %v6412_v1 }
 0x30e   :  { %1302 = vmatmul.f32.gmra.mxu1 %v1208_v27  ;;  %v6440_v63 = vpop.f32.mrf.mxu2 }
 0x30f   :  { %5027 = vmatpush.xpose.msk.msrb.mxu2 %vm411_vm7, %v1483_v21  ;;  %1772 = vrot.lane.b32.xlu0 %v6235_v41, %s5662_s28  ;;  %9623 = vst [vmem:[#allocation46_spill] sm:$0xff] %v6440_v63 }
 0x310   :  { %620 = vrot.lane.b32.xlu1 %v6237_v42, %s5663_s14  ;;  %4984 = vmatmul.msk.f32.gmra.mxu3 %vm411_vm7, %v6412_v1 }
 0x311   :  { %v6423_v13 = vpop.permute.xlu2 %1553 }
 0x312   :  { %v6425_v50 = vpop.permute.xlu1 %1547 }
 0x313   :  { %v1033_v22 = vpop.f32.mrf.mxu3  ;;  %5028 = vmatpush.xpose.msk.msrb.mxu2 %vm411_vm7, %v6271_v28 }
 0x314   :  { %v1209_v21 = vmul.f32 %v1033_v22, %v6266_v48  ;;  %v6447_v22 = vpack.i.bf16 %v6421_v26, %v6440_v63 }
 0x316   :  { %1305 = vmatmul.f32.gmra.mxu1 %v1209_v21  ;;  %9624 = vst [vmem:[#allocation47_spill] sm:$0xff] %v6447_v22 }
 0x317   :  { %1628 = vrot.lane.b32.xlu0 %v6249_v44, %s5662_s28 }
 0x318   :  { %680 = vrot.lane.b32.xlu1 %v6211_v59, %s5665_s5 }
 0x319   :  { %v6434_v27 = vpop.permute.xlu2 %616  ;;  %v6436_v34 = vpop.permute.xlu0 %612 }
 0x31a   :  { %9620 = vst [vmem:[#allocation43_spill] sm:$0xff] %v6434_v27  ;;  %v6438_v40 = vpop.permute.xlu1 %608 }
 0x31b   :  { %9621 = vst [vmem:[#allocation44_spill] sm:$0xff] %v6436_v34  ;;  %v1036_v24 = vpop.f32.mrf.mxu3  ;;  %4985 = vmatmul.msk.f32.gmra.mxu3 %vm411_vm7, %v6438_v40 }
 0x31c   :  { %9622 = vst [vmem:[#allocation45_spill] sm:$0xff] %v6438_v40  ;;  %v1210_v28 = vmul.f32 %v1036_v24, %v6288_v29 }
 0x31e   :  { %1308 = vmatmul.f32.gmra.mxu1 %v1210_v28 }
 0x31f   :  { %1774 = vrot.lane.b32.xlu0 %v6303_v19, %s5662_s28 }
 0x320   :  { %5244 = vrot.lane.b32.xlu1 %v6447_v22, %s5663_s14 }
 0x321   :  { %v1479_v21 = vpop.permute.xlu2 %1478  ;;  %v6453_v44 = vpop.permute.xlu0 %1555 }
 0x322   :  { %v6455_v61 = vpop.permute.xlu1 %1549  ;;  %5029 = vmatpush.xpose.msk.msrb.mxu2 %vm411_vm7, %v1479_v21 }
 0x323   :  { %v1039_v58 = vpop.f32.mrf.mxu3  ;;  %4986 = vmatmul.msk.f32.gmra.mxu3 %vm411_vm7, %v6363_v52 }
 0x324   :  { %v1211_v24 = vmul.f32 %v1039_v58, %v6308_v60 }
 0x326   :  { %1311 = vmatmul.f32.gmra.mxu1 %v1211_v24 }
 0x327   :  { %1630 = vrot.lane.b32.xlu0 %v6343_v3, %s5662_s28 }
 0x328   :  { %1770 = vrot.lane.b32.xlu1 %v6277_v53, %s5662_s28 }
 0x329   :  { %v1477_v28 = vpop.permute.xlu0 %1476  ;;  %v1475_v22 = vpop.permute.xlu2 %1474 }
 0x32a   :  { %v6465_v26 = vpop.permute.xlu1 %642  ;;  %5030 = vmatpush.xpose.msk.msrb.mxu2 %vm411_vm7, %v1477_v28 }
 0x32b   :  { %9625 = vst [vmem:[#allocation48_spill] sm:$0xff] %v6465_v26  ;;  %v1042_v63 = vpop.f32.mrf.mxu3  ;;  %4987 = vmatmul.msk.f32.gmra.mxu3 %vm411_vm7, %v6436_v34 }
 0x32c   :  { %v1212_v21 = vmul.f32 %v1042_v63, %v6328_v32 }
 0x32e   :  { %1314 = vmatmul.f32.gmra.mxu1 %v1212_v21  ;;  %5031 = vmatpush.xpose.msk.msrb.mxu2 %vm411_vm7, %v1475_v22 }
 0x32f   :  { %1776 = vrot.lane.b32.xlu0 %v6330_v18, %s5662_s28 }
 0x331   :  { %5032 = vmatmul.msk.f32.vlgmr.msrb.gmra.mxu2 %vm411_vm7, %v6057_v25  ;;  %v6476_v58 = vpop.permute.xlu0 %664  ;;  %v6499_v9 = vpop.permute.xlu2 %656 }
 0x332   :  { %v6478_v24 = vpop.permute.xlu1 %614 }
 0x333   :  { %9626 = vst [vmem:[#allocation49_spill] sm:$0xff] %v6478_v24  ;;  %v1045_v28 = vpop.f32.mrf.mxu3  ;;  %4988 = vmatmul.msk.f32.gmra.mxu3 %vm411_vm7, %v6478_v24 }
 0x334   :  { %v1213_v63 = vmul.f32 %v1045_v28, %v6348_v15 }
 0x336   :  { %1317 = vmatmul.f32.gmra.mxu1 %v1213_v63 }
 0x339   :  { %5033 = vmatmul.msk.f32.gmra.mxu2 %vm411_vm7, %v6063_v4  ;;  %v6485_v22 = vpop.permute.xlu0 %668 }
 0x33a   :  { %9627 = vst [vmem:[#allocation50_spill] sm:$0xff] %v6485_v22  ;;  %v6487_v21 = vpop.permute.xlu1 %646 }
 0x33b   :  { %9628 = vst [vmem:[#allocation51_spill] sm:$0xff] %v6487_v21  ;;  %v1048_v3 = vpop.f32.mrf.mxu3  ;;  %4989 = vmatmul.msk.f32.gmra.mxu3 %vm411_vm7, %v6434_v27 }
 0x33c   :  { %v1214_v25 = vmul.f32 %v1048_v3, %v6368_v36 }
 0x33e   :  { %1320 = vmatmul.f32.gmra.mxu1 %v1214_v25 }
 0x341   :  { %5034 = vmatmul.msk.f32.gmra.mxu2 %vm411_vm7, %v6071_v47  ;;  %v1558_v18 = vpop.permute.xlu0 %1557 }
 0x342   :  { %v6494_v28 = vpop.permute.xlu1 %654 }
 0x343   :  { %9629 = vst [vmem:[#allocation52_spill] sm:$0xff] %v6494_v28  ;;  %1912 = vrot.lane.b32.xlu2 %v6494_v28, %s5662_s28  ;;  %v1051_v4 = vpop.f32.mrf.mxu3 }
 0x344   :  { %v1215_v63 = vmul.f32 %v1051_v4, %v6386_v45  ;;  %v6512_v4 = vpop.permute.xlu2 %660 }
 0x345   :  { %9632 = vst [vmem:[#allocation55_spill] sm:$0xff] %v6512_v4 }
 0x346   :  { %1323 = vmatmul.f32.gmra.mxu1 %v1215_v63 }
 0x349   :  { %5035 = vmatmul.msk.f32.gmra.mxu2 %vm411_vm7, %v6081_v6  ;;  %v6503_v3 = vpop.permute.xlu0 %648 }
 0x34a   :  { %9630 = vst [vmem:[#allocation53_spill] sm:$0xff] %v6503_v3  ;;  %v6505_v25 = vpop.permute.xlu1 %658 }
 0x34b   :  { %9631 = vst [vmem:[#allocation54_spill] sm:$0xff] %v6505_v25  ;;  %684 = vrot.lane.b32.xlu2 %v6237_v42, %s5665_s5  ;;  %1916 = vrot.lane.b32.xlu1 %v6505_v25, %s5662_s28  ;;  %v1054_v47 = vpop.f32.mrf.mxu3 }
 0x34c   :  { %v1216_v28 = vmul.f32 %v1054_v47, %v6406_v38  ;;  %v6527_v47 = vpop.permute.xlu2 %672 }
 0x34d   :  { %9635 = vst [vmem:[#allocation58_spill] sm:$0xff] %v6527_v47 }
 0x34e   :  { %1326 = vmatmul.f32.gmra.mxu1 %v1216_v28 }
 0x351   :  { %5036 = vmatmul.msk.f32.gmra.mxu2 %vm411_vm7, %v6089_v7  ;;  %v6516_v6 = vpop.permute.xlu0 %618 }
 0x352   :  { %9633 = vst [vmem:[#allocation56_spill] sm:$0xff] %v6516_v6  ;;  %v6518_v63 = vpop.permute.xlu1 %662  ;;  %4990 = vmatmul.msk.f32.gmra.mxu3 %vm411_vm7, %v6516_v6  ;;  %v6535_v11 = vpop.f32.mrf.mxu1 }
 0x353   :  { %9634 = vst [vmem:[#allocation57_spill] sm:$0xff] %v6518_v63  ;;  %1918 = vrot.lane.b32.xlu1 %v6512_v4, %s5662_s28  ;;  %v1057_v25 = vpop.f32.mrf.mxu3  ;;  %1768 = vrot.lane.b32.xlu2 %v6253_v46, %s5662_s28 }
 0x354   :  { %v1217_v28 = vmul.f32 %v1057_v25, %v6266_v48  ;;  %9638 = vst [vmem:[#allocation61_spill] sm:$0xff] %v6535_v11  ;;  %v6550_v11 = vpop.permute.xlu2 %676 }
 0x355   :  { %9640 = vst [vmem:[#allocation63_spill] sm:$0xff] %v6550_v11 }
 0x356   :  { %1329 = vmatmul.f32.gmra.mxu1 %v1217_v28 }
 0x359   :  { %5037 = vmatmul.msk.f32.gmra.mxu2 %vm411_vm7, %v6097_v8  ;;  %v6531_v7 = vpop.permute.xlu0 %682 }
 0x35a   :  { %9636 = vst [vmem:[#allocation59_spill] sm:$0xff] %v6531_v7  ;;  %v6533_v42 = vpop.permute.xlu1 %666 }
 0x35b   :  { %9637 = vst [vmem:[#allocation60_spill] sm:$0xff] %v6533_v42  ;;  %1920 = vrot.lane.b32.xlu1 %v6518_v63, %s5662_s28  ;;  %v1060_v4 = vpop.f32.mrf.mxu3  ;;  %1914 = vrot.lane.b32.xlu2 %v6499_v9, %s5662_s28 }
 0x35c   :  { %v1218_v25 = vmul.f32 %v1060_v4, %v6288_v29  ;;  %1924 = vrot.lane.b32.xlu0 %v6533_v42, %s5662_s28 }
 0x35e   :  { %1332 = vmatmul.f32.gmra.mxu1 %v1218_v25  ;;  %v6559_v25 = vpop.f32.mrf.mxu1 }
 0x361   :  { %5038 = vmatmul.msk.f32.gmra.mxu2 %vm411_vm7, %v6107_v57  ;;  %v6546_v8 = vpop.permute.xlu0 %1766 }
 0x362   :  { %v6548_v28 = vpop.permute.xlu1 %670 }
 0x363   :  { %9639 = vst [vmem:[#allocation62_spill] sm:$0xff] %v6548_v28  ;;  %1632 = vrot.lane.b32.xlu1 %v6350_v33, %s5662_s28  ;;  %v1063_v63 = vpop.f32.mrf.mxu3  ;;  %1624 = vrot.lane.b32.xlu2 %v6283_v54, %s5662_s28 }
 0x364   :  { %v1219_v4 = vmul.f32 %v1063_v63, %v6308_v60  ;;  %1985 = vrot.lane.b32.xlu0 %v6548_v28, %s5662_s28 }
 0x366   :  { %1335 = vmatmul.f32.gmra.mxu1 %v1219_v4  ;;  %v1560_v4 = vpop.permute.xlu2 %1559 }
 0x369   :  { %5039 = vmatmul.msk.f32.gmra.mxu2 %vm411_vm7, %v6119_v10  ;;  %v1562_v57 = vpop.permute.xlu0 %1561  ;;  %v6574_v10 = vpop.f32.mrf.mxu1 }
 0x36a   :  { %v6563_v42 = vpop.permute.xlu1 %674  ;;  %5040 = vmatpush.xpose.msk.msrb.mxu0 %vm411_vm7, %v1562_v57 }
 0x36b   :  { %9641 = vst [vmem:[#allocation64_spill] sm:$0xff] %v6563_v42  ;;  %1778 = vrot.lane.b32.xlu1 %v6293_v30, %s5662_s28  ;;  %v1066_v33 = vpop.f32.mrf.mxu3  ;;  %1626 = vrot.lane.b32.xlu2 %v6310_v17, %s5662_s28 }
 0x36c   :  { %v1220_v63 = vmul.f32 %v1066_v33, %v6328_v32  ;;  %1987 = vrot.lane.b32.xlu0 %v6527_v47, %s5662_s28  ;;  %v9659_v47 = vld [vmem:[#allocation16_spill] sm:$0xff] }
 0x36e   :  { %1338 = vmatmul.f32.gmra.mxu1 %v1220_v63  ;;  %5041 = vmatpush.xpose.msk.msrb.mxu0 %vm411_vm7, %v1560_v4 }
 0x371   :  { %v6588_v63 = vpop.f32.mrf.mxu1 }
 0x372   :  { %v6576_v28 = vpop.permute.xlu1 %678  ;;  %5042 = vmatpush.xpose.msk.msrb.mxu0 %vm411_vm7, %v1558_v18 }
 0x373   :  { %9642 = vst [vmem:[#allocation65_spill] sm:$0xff] %v6576_v28  ;;  %1634 = vrot.lane.b32.xlu1 %v6323_v0, %s5662_s28  ;;  %v1069_v57 = vpop.f32.mrf.mxu3  ;;  %1922 = vrot.lane.b32.xlu2 %v6476_v58, %s5662_s28 }
 0x374   :  { %v1221_v33 = vmul.f32 %v1069_v57, %v6348_v15  ;;  %1989 = vrot.lane.b32.xlu0 %v6563_v42, %s5662_s28 }
 0x376   :  { %1341 = vmatmul.f32.gmra.mxu1 %v1221_v33  ;;  %5043 = vmatpush.xpose.msk.msrb.mxu0 %vm411_vm7, %v6453_v44 }
 0x37a   :  { %v6590_v4 = vpop.permute.xlu1 %650  ;;  %5044 = vmatpush.xpose.msk.msrb.mxu0 %vm411_vm7, %v6423_v13  ;;  %v6607_v13 = vpop.f32.mrf.mxu1 }
 0x37b   :  { %9643 = vst [vmem:[#allocation66_spill] sm:$0xff] %v6590_v4  ;;  %v1072_v18 = vpop.f32.mrf.mxu3  ;;  %1780 = vrot.lane.b32.xlu1 %v6390_v56, %s5662_s28  ;;  %1839 = vrot.lane.b32.xlu2 %v6408_v20, %s5662_s28 }
 0x37c   :  { %v1222_v57 = vmul.f32 %v1072_v18, %v6368_v36  ;;  %1701 = vrot.lane.b32.xlu0 %v6478_v24, %s5662_s28 }
 0x37e   :  { %1344 = vmatmul.f32.gmra.mxu1 %v1222_v57  ;;  %5045 = vmatpush.xpose.msk.msrb.mxu0 %vm411_vm7, %v6381_v31 }
 0x382   :  { %v6603_v44 = vpop.permute.xlu1 %620  ;;  %5046 = vmatpush.xpose.msk.msrb.mxu0 %vm411_vm7, %v6455_v61  ;;  %v6622_v61 = vpop.permute.xlu0 %652 }
 0x383   :  { %9644 = vst [vmem:[#allocation67_spill] sm:$0xff] %v6603_v44  ;;  %v1075_v33 = vpop.f32.mrf.mxu3  ;;  %1697 = vrot.lane.b32.xlu2 %v6363_v52, %s5662_s28  ;;  %1926 = vrot.lane.b32.xlu1 %v6485_v22, %s5662_s28  ;;  %v9662_v22 = vld [vmem:[#allocation9_spill] sm:$0xff] }
 0x384   :  { %v1223_v18 = vmul.f32 %v1075_v33, %v6386_v45  ;;  %1847 = vrot.lane.b32.xlu0 %v6487_v21, %s5662_s28  ;;  %4991 = vmatmul.msk.f32.gmra.mxu3 %vm411_vm7, %v6603_v44  ;;  %9645 = vst [vmem:[#allocation68_spill] sm:$0xff] %v6622_v61 }
 0x386   :  { %1347 = vmatmul.f32.gmra.mxu1 %v1223_v18  ;;  %5047 = vmatpush.xpose.msk.msrb.mxu0 %vm411_vm7, %v6425_v50  ;;  %v6633_v50 = vpop.f32.mrf.mxu1 }
 0x389   :  { %5048 = vmatmul.msk.f32.vlgmr.msrb.gmra.mxu0 %vm411_vm7, %v6131_v12 }
 0x38a   :  { %v6641_v33 = vpop.permute.xlu0 %1622 }
 0x38b   :  { %v1078_v31 = vpop.f32.mrf.mxu3  ;;  %1843 = vrot.lane.b32.xlu2 %v6465_v26, %s5662_s28  ;;  %1693 = vrot.lane.b32.xlu1 %v6412_v1, %s5662_s28  ;;  %v9652_v1 = vld [vmem:[#allocation38_spill] sm:$0xff] }
 0x38c   :  { %v1224_v57 = vmul.f32 %v1078_v31, %v6406_v38  ;;  %1703 = vrot.lane.b32.xlu0 %v6434_v27, %s5662_s28  ;;  %4992 = vmatmul.msk.f32.gmra.mxu3 %vm411_vm7, %v6221_v37  ;;  %v6648_v31 = vpop.permute.xlu2 %1620  ;;  %v9660_v37 = vld [vmem:[#allocation18_spill] sm:$0xff] }
 0x38e   :  { %1350 = vmatmul.f32.gmra.mxu1 %v1224_v57  ;;  %v6654_v57 = vpop.permute.xlu1 %680 }
 0x38f   :  { %9646 = vst [vmem:[#allocation69_spill] sm:$0xff] %v6654_v57 }
 0x391   :  { %5049 = vmatmul.msk.f32.gmra.mxu0 %vm411_vm7, %v6139_v5  ;;  %v6650_v5 = vpop.f32.mrf.mxu1 }
 0x393   :  { %v1081_v12 = vpop.f32.mrf.mxu3  ;;  %1699 = vrot.lane.b32.xlu2 %v6436_v34, %s5662_s28  ;;  %1695 = vrot.lane.b32.xlu1 %v6438_v40, %s5662_s28  ;;  %v5263_v34 = vpack.i.bf16 %v6209_v62, %v6291_v35  ;;  %v5253_v35 = vpack.i.bf16 %v6247_v43, %v6352_v39  ;;  %v5268_v40 = vpack.i.bf16 %v6189_v23, %v6269_v51  ;;  %v9651_v51 = vld [vmem:[#allocation7_spill] sm:$0xff] }
 0x394   :  { %v1225_v18 = vmul.f32 %v1081_v12, %v6266_v48  ;;  %1849 = vrot.lane.b32.xlu0 %v6503_v3, %s5662_s28  ;;  %4993 = vmatmul.msk.f32.gmra.mxu3 %vm411_vm7, %v6253_v46 }
 0x396   :  { %1353 = vmatmul.f32.gmra.mxu1 %v1225_v18  ;;  %v6666_v18 = vpop.permute.xlu0 %1772 }
 0x399   :  { %5050 = vmatmul.msk.f32.gmra.mxu0 %vm411_vm7, %v6157_v16  ;;  %v6669_v24 = vpop.f32.mrf.mxu1 }
 0x39b   :  { %1845 = vrot.lane.b32.xlu2 %v6401_v14, %s5662_s28  ;;  %1841 = vrot.lane.b32.xlu1 %v6341_v2, %s5662_s28 }
 0x39c   :  { %1995 = vrot.lane.b32.xlu0 %v6654_v57, %s5662_s28  ;;  %4994 = vmatmul.msk.f32.gmra.mxu3 %vm411_vm7, %v6277_v53  ;;  %v6691_v57 = vpop.permute.xlu1 %5244  ;;  %v9657_v53 = vld [vmem:[#allocation15_spill] sm:$0xff] }
 0x39d   :  { %v6664_v12 = vpop.permute.xlu2 %1912  ;;  %9649 = vst [vmem:[#allocation72_spill] sm:$0xff] %v6691_v57  ;;  %v9650_v57 = vld [vmem:[#allocation8_spill] sm:$0xff] }
 0x39e   :  { %9647 = vst [vmem:[#allocation70_spill] sm:$0xff] %v6664_v12  ;;  %v1084_v27 = vpop.f32.mrf.mxu3  ;;  %v5278_v39 = vpack.i.bf16 %v9651_v51, %v9650_v57  ;;  %v9658_v51 = vld [vmem:[#allocation28_spill] sm:$0xff] }
 0x39f   :  { %v1226_v16 = vmul.f32 %v1084_v27, %v6288_v29  ;;  %v5258_v46 = vpack.i.bf16 %v9659_v47, %v9658_v51 }
 0x3a1   :  { %1356 = vmatmul.f32.gmra.mxu1 %v1226_v16  ;;  %5051 = vmatmul.msk.f32.gmra.mxu0 %vm411_vm7, %v6173_v55  ;;  %v6685_v55 = vpop.permute.xlu0 %1628 }
 0x3a3   :  { %1993 = vrot.lane.b32.xlu2 %v6576_v28, %s5662_s28  ;;  %1991 = vrot.lane.b32.xlu1 %v6550_v11, %s5662_s28  ;;  %v6695_v28 = vpop.f32.mrf.mxu1  ;;  %v9653_v11 = vld [vmem:[#allocation36_spill] sm:$0xff] }
 0x3a4   :  { %5264 = vrot.lane.b32.xlu0 %v5263_v34, %s5663_s14  ;;  %4995 = vmatmul.msk.f32.gmra.mxu3 %vm411_vm7, %v6235_v41 }
 0x3a5   :  { %v6682_v27 = vpop.permute.xlu2 %684 }
 0x3a6   :  { %9648 = vst [vmem:[#allocation71_spill] sm:$0xff] %v6682_v27  ;;  %v1087_v16 = vpop.f32.mrf.mxu3 }
 0x3a7   :  { %v1227_v52 = vmul.f32 %v1087_v16, %v6308_v60 }
 0x3a9   :  { %1359 = vmatmul.f32.gmra.mxu1 %v1227_v52  ;;  %5052 = vmatmul.msk.f32.gmra.mxu0 %vm411_vm7, %v6191_v49  ;;  %v6714_v41 = vpop.permute.xlu0 %1774 }
 0x3ab   :  { %5254 = vrot.lane.b32.xlu1 %v5253_v35, %s5663_s14  ;;  %1705 = vrot.lane.b32.xlu2 %v6516_v6, %s5662_s28  ;;  %v6712_v6 = vpack.i.bf16 %v9653_v11, %v9652_v1 }
 0x3ac   :  { %5269 = vrot.lane.b32.xlu0 %v5268_v40, %s5663_s14  ;;  %4996 = vmatmul.msk.f32.gmra.mxu3 %vm411_vm7, %v6303_v19  ;;  %v6719_v19 = vpop.permute.xlu1 %1770 }
 0x3ad   :  { %v6703_v49 = vpop.permute.xlu2 %1768  ;;  %9654 = vst [vmem:[#allocation8_spill] sm:$0xff] %v6712_v6 }
 0x3ae   :  { %v1090_v52 = vpop.f32.mrf.mxu3 }
 0x3af   :  { %v1228_v16 = vmul.f32 %v1090_v52, %v6328_v32  ;;  %v9655_v52 = vld [vmem:[#allocation47_spill] sm:$0xff] }
 0x3b1   :  { %1362 = vmatmul.f32.gmra.mxu1 %v1228_v16  ;;  %5053 = vmatmul.msk.f32.gmra.mxu0 %vm411_vm7, %v6211_v59  ;;  %v9656_v59 = vld [vmem:[#allocation30_spill] sm:$0xff]  ;;  %v6725_v16 = vpop.f32.mrf.mxu1 }
 0x3b3   :  { %5279 = vrot.lane.b32.xlu1 %v5278_v39, %s5663_s14  ;;  %5249 = vrot.lane.b32.xlu2 %v6712_v6, %s5663_s14 }
 0x3b4   :  { %5284 = vrot.lane.b32.xlu0 %v9655_v52, %s5664_s15  ;;  %4997 = vmatmul.msk.f32.gmra.mxu3 %vm411_vm7, %v9656_v59  ;;  %v1631_v52 = vpop.permute.xlu0 %1630  ;;  %v1523_v12 = vpop.f32.mrf.mxu2 }
 0x3b5   :  { %v6727_v42 = vpop.permute.xlu2 %1914 }
 0x3b6   :  { %v1093_v11 = vpop.f32.mrf.mxu3 }
 0x3b7   :  { %v1229_v1 = vmul.f32 %v1093_v11, %v6348_v15 }
 0x3b9   :  { %1365 = vmatmul.f32.gmra.mxu1 %v1229_v1  ;;  %5054 = vmatmul.msk.f32.gmra.mxu0 %vm411_vm7, %v9657_v53  ;;  %v6744_v53 = vpop.f32.mrf.mxu1 }
 0x3bb   :  { %5289 = vrot.lane.b32.xlu1 %v6712_v6, %s5664_s15  ;;  %5259 = vrot.lane.b32.xlu2 %v5258_v46, %s5663_s14  ;;  %v9661_v6 = vld [vmem:[#allocation10_spill] sm:$0xff] }
 0x3bc   :  { %5304 = vrot.lane.b32.xlu0 %v5263_v34, %s5664_s15  ;;  %4998 = vmatmul.msk.f32.gmra.mxu3 %vm411_vm7, %v6293_v30  ;;  %v5313_v0 = vpack.i.bf16 %v9662_v22, %v9661_v6  ;;  %v5323_v22 = vpack.i.bf16 %v9659_v47, %v6247_v43 }
 0x3bd   :  { %v6740_v59 = vpop.permute.xlu1 %1916  ;;  %v6742_v11 = vpop.permute.xlu2 %1624 }
 0x3be   :  { %v1096_v1 = vpop.f32.mrf.mxu3 }
 0x3bf   :  { %v1230_v51 = vmul.f32 %v1096_v1, %v6368_v36  ;;  %v6758_v1 = vpop.permute.xlu0 %1776 }
 0x3c1   :  { %1368 = vmatmul.f32.gmra.mxu1 %v1230_v51  ;;  %5055 = vmatmul.msk.f32.gmra.mxu0 %vm411_vm7, %v9660_v37  ;;  %v6760_v51 = vpop.f32.mrf.mxu1  ;;  %v5328_v37 = vpack.i.bf16 %v6189_v23, %v6209_v62  ;;  %v9663_v23 = vld [vmem:[#allocation46_spill] sm:$0xff] }
 0x3c2   :  { %v5338_v62 = vpack.i.bf16 %v9650_v57, %v9663_v23  ;;  %v1526_v23 = vpop.f32.mrf.mxu2 }
 0x3c3   :  { %5314 = vrot.lane.b32.xlu1 %v5313_v0, %s5664_s15  ;;  %5274 = vrot.lane.b32.xlu2 %v5313_v0, %s5663_s14 }
 0x3c4   :  { %5309 = vrot.lane.b32.xlu0 %v5268_v40, %s5664_s15  ;;  %4999 = vmatmul.msk.f32.gmra.mxu3 %vm411_vm7, %v6390_v56 }
 0x3c5   :  { %v6756_v34 = vpop.permute.xlu1 %1918  ;;  %v1627_v30 = vpop.permute.xlu2 %1626 }
 0x3c9   :  { %v6779_v47 = vpop.f32.mrf.mxu1 }
 0x3cb   :  { %5329 = vrot.lane.b32.xlu1 %v5328_v37, %s5665_s5  ;;  %5294 = vrot.lane.b32.xlu2 %v5253_v35, %s5664_s15 }
 0x3cc   :  { %5324 = vrot.lane.b32.xlu0 %v5323_v22, %s5665_s5  ;;  %5000 = vmatmul.msk.f32.gmra.mxu3 %vm411_vm7, %v6408_v20 }
 0x3cd   :  { %v6771_v40 = vpop.permute.xlu1 %1920  ;;  %v6775_v6 = vpop.permute.xlu2 %1922 }
 0x3ce   :  { %v6773_v56 = vpop.permute.xlu0 %1924 }
 0x3d3   :  { %5339 = vrot.lane.b32.xlu1 %v5338_v62, %s5665_s5  ;;  %5299 = vrot.lane.b32.xlu2 %v5258_v46, %s5664_s15  ;;  %v6799_v62 = vpop.f32.mrf.mxu1 }
 0x3d4   :  { %1707 = vrot.lane.b32.xlu0 %v6603_v44, %s5662_s28  ;;  %5001 = vmatmul.msk.f32.gmra.mxu3 %vm411_vm7, %v6341_v2 }
 0x3d5   :  { %v1633_v35 = vpop.permute.xlu1 %1632  ;;  %v1099_v37 = vpop.f32.mrf.mxu3 }
 0x3d6   :  { %v6787_v22 = vpop.permute.xlu0 %1985  ;;  %v1231_v20 = vmul.f32 %v1099_v37, %v6386_v45  ;;  %v6790_v43 = vpop.permute.xlu2 %1839 }
 0x3d7   :  { %9664 = vst [vmem:[#allocation47_spill] sm:$0xff] %v6787_v22 }
 0x3d8   :  { %9665 = vst [vmem:[#allocation15_spill] sm:$0xff] %v6790_v43  ;;  %1371 = vmatmul.f32.gmra.mxu1 %v1231_v20  ;;  %v1529_v20 = vpop.f32.mrf.mxu2 }
 0x3db   :  { %1999 = vrot.lane.b32.xlu1 %v6682_v27, %s5662_s28  ;;  %5319 = vrot.lane.b32.xlu2 %v5278_v39, %s5664_s15 }
 0x3dc   :  { %5002 = vmatmul.msk.f32.gmra.mxu3 %vm411_vm7, %v6465_v26  ;;  %1853 = vrot.lane.b32.xlu0 %v6622_v61, %s5662_s28  ;;  %v6811_v26 = vpop.f32.mrf.mxu1 }
 0x3dd   :  { %v1779_v46 = vpop.permute.xlu1 %1778 }
 0x3de   :  { %v6801_v2 = vpop.permute.xlu0 %1987  ;;  %v6803_v37 = vpop.permute.xlu2 %1697 }
 0x3df   :  { %9666 = vst [vmem:[#allocation18_spill] sm:$0xff] %v6801_v2 }
 0x3e3   :  { %5334 = vrot.lane.b32.xlu2 %v5313_v0, %s5665_s5 }
 0x3e4   :  { %5003 = vmatmul.msk.f32.gmra.mxu3 %vm411_vm7, %v6401_v14  ;;  %v1532_v14 = vpop.f32.mrf.mxu2  ;;  %v6823_v2 = vpop.f32.mrf.mxu1 }
 0x3e5   :  { %v1635_v39 = vpop.permute.xlu1 %1634 }
 0x3e6   :  { %v6808_v44 = vpop.permute.xlu0 %1989  ;;  %5056 = vmatpush.xpose.msk.msra.mxu2 %vm411_vm7, %v1635_v39  ;;  %v6818_v0 = vpop.permute.xlu2 %1843 }
 0x3e7   :  { %9667 = vst [vmem:[#allocation73_spill] sm:$0xff] %v6808_v44 }
 0x3ea   :  { %5057 = vmatpush.xpose.msk.msra.mxu2 %vm411_vm7, %v1633_v35 }
 0x3eb   :  { %1851 = vrot.lane.b32.xlu2 %v6590_v4, %s5662_s28 }
 0x3ec   :  { %5004 = vmatmul.msk.f32.gmra.mxu3 %vm411_vm7, %v6487_v21  ;;  %v1535_v21 = vpop.f32.mrf.mxu2 }
 0x3ed   :  { %v1781_v44 = vpop.permute.xlu1 %1780 }
 0x3ee   :  { %v6820_v22 = vpop.permute.xlu0 %1701  ;;  %5058 = vmatpush.xpose.msk.msra.mxu2 %vm411_vm7, %v1631_v52  ;;  %v6834_v39 = vpop.permute.xlu2 %1699 }
 0x3ef   :  { %v6838_v52 = vpop.f32.mrf.mxu1 }
 0x3f2   :  { %5059 = vmatpush.xpose.msk.msra.mxu2 %vm411_vm7, %v6685_v55 }
 0x3f3   :  { %1997 = vrot.lane.b32.xlu2 %v6531_v7, %s5662_s28 }
 0x3f4   :  { %5005 = vmatmul.msk.f32.gmra.mxu3 %vm411_vm7, %v6503_v3  ;;  %v9668_v3 = vld [vmem:[#allocation61_spill] sm:$0xff] }
 0x3f5   :  { %v6847_v27 = vadd.f32 %v1523_v12, %v9668_v3  ;;  %v6863_v3 = vpop.permute.xlu1 %1926  ;;  %v9671_v12 = vld [vmem:[#allocation21_spill] sm:$0xff] }
 0x3f6   :  { %v6831_v35 = vpop.permute.xlu0 %1847  ;;  %5060 = vmatpush.xpose.msk.msra.mxu2 %vm411_vm7, %v1627_v30  ;;  %v6850_v30 = vadd.f32 %v1529_v20, %v6574_v10  ;;  %v6852_v43 = vpop.permute.xlu2 %1845 }
 0x3f8   :  { %9669 = vst [vmem:[#allocation61_spill] sm:$0xff] %v6850_v30  ;;  %v2064_v10 = vsel %vm342_vm6, %v6850_v30, -inf }
 0x3fa   :  { %5061 = vmatpush.xpose.msk.msra.mxu2 %vm411_vm7, %v6742_v11  ;;  %v1538_v11 = vpop.f32.mrf.mxu2 }
 0x3fc   :  { %5006 = vmatmul.msk.f32.gmra.mxu3 %vm411_vm7, %v6590_v4  ;;  %v6861_v4 = vpop.f32.mrf.mxu1 }
 0x3fd   :  { %9670 = vst [vmem:[#allocation74_spill] sm:$0xff] %v6861_v4 }
 0x3fe   :  { %v6842_v55 = vpop.permute.xlu0 %1703  ;;  %5062 = vmatpush.xpose.msk.msra.mxu2 %vm411_vm7, %v6641_v33  ;;  %v2058_v33 = vsel %vm342_vm6, %v6847_v27, -inf  ;;  %v6879_v30 = vpop.permute.xlu2 %1993 }
 0x3ff   :  { %9673 = vst [vmem:[#allocation75_spill] sm:$0xff] %v6879_v30  ;;  %v6904_v30 = vadd.f32 %v1535_v21, %v6607_v13 }
 0x402   :  { %5063 = vmatpush.xpose.msk.msra.mxu2 %vm411_vm7, %v6648_v31 }
 0x404   :  { %5007 = vmatmul.msk.f32.gmra.mxu3 %vm411_vm7, %v6622_v61  ;;  %v6873_v61 = vadd.f32 %v1526_v23, %v6559_v25  ;;  %v9675_v25 = vld [vmem:[#allocation12_spill] sm:$0xff] }
 0x405   :  { %2059 = vmax.xlane.f32.xlu1 %v2058_v33  ;;  %5064 = vmatmul.msk.f32.vlgmr.msra.gmra.mxu2 %vm411_vm7, %v9671_v12  ;;  %v6877_v33 = vadd.f32 %v1532_v14, %v6588_v63  ;;  %v1541_v12 = vpop.f32.mrf.mxu2 }
 0x406   :  { %5088 = vmatpush.xpose.msk.msrb.mxu2 %vm411_vm7, %v1781_v44  ;;  %2065 = vmax.xlane.f32.xlu0 %v2064_v10  ;;  %v6869_v31 = vpop.permute.xlu0 %1849  ;;  %v1596_v44 = vpop.f32.mrf.mxu0  ;;  %v9674_v10 = vld [vmem:[#allocation52_spill] sm:$0xff] }
 0x407   :  { %v1102_v20 = vpop.f32.mrf.mxu3  ;;  %9672 = vst [vmem:[#allocation21_spill] sm:$0xff] %v6877_v33  ;;  %v2067_v23 = vsel %vm342_vm6, %v6877_v33, -inf  ;;  %v6921_v13 = vadd.f32 %v1596_v44, %v6695_v28  ;;  %v9676_v28 = vld [vmem:[#allocation54_spill] sm:$0xff] }
 0x408   :  { %v1232_v4 = vmul.f32 %v1102_v20, %v6406_v38  ;;  %v6898_v20 = vadd.f32 %v1541_v12, %v6650_v5  ;;  %v2070_v5 = vsel %vm342_vm6, %v6904_v30, -inf  ;;  %v6927_v12 = vadd.f32 %v1538_v11, %v6633_v50 }
 0x40a   :  { %5089 = vmatpush.xpose.msk.msrb.mxu2 %vm411_vm7, %v1779_v46  ;;  %1374 = vmatmul.f32.gmra.mxu1 %v1232_v4  ;;  %v2061_v46 = vsel %vm342_vm6, %v6873_v61, -inf  ;;  %v6893_v4 = vpop.f32.mrf.mxu1 }
 0x40c   :  { %5008 = vmatmul.msk.f32.gmra.mxu3 %vm411_vm7, %v9674_v10 }
 0x40d   :  { %2062 = vmax.xlane.f32.xlu1 %v2061_v46  ;;  %5065 = vmatmul.msk.f32.gmra.mxu2 %vm411_vm7, %v9675_v25  ;;  %v6900_v46 = vpop.permute.xlu1 %1693 }
 0x40e   :  { %5090 = vmatpush.xpose.msk.msrb.mxu2 %vm411_vm7, %v6758_v1  ;;  %2068 = vmax.xlane.f32.xlu0 %v2067_v23  ;;  %v6891_v14 = vpop.permute.xlu0 %1995  ;;  %v1599_v63 = vpop.f32.mrf.mxu0 }
 0x40f   :  { %v1105_v1 = vpop.f32.mrf.mxu3  ;;  %v6912_v23 = vpop.permute.xlu2 %1705 }
 0x410   :  { %v1233_v33 = vmul.f32 %v1105_v1, %v6266_v48 }
 0x412   :  { %5091 = vmatpush.xpose.msk.msrb.mxu2 %vm411_vm7, %v6714_v41  ;;  %1377 = vmatmul.f32.gmra.mxu1 %v1233_v33  ;;  %v2076_v41 = vsel %vm342_vm6, %v6898_v20, -inf  ;;  %v6929_v25 = vpop.f32.mrf.mxu1 }
 0x414   :  { %5009 = vmatmul.msk.f32.gmra.mxu3 %vm411_vm7, %v6499_v9 }
 0x415   :  { %2077 = vmax.xlane.f32.xlu1 %v2076_v41  ;;  %5066 = vmatmul.msk.f32.gmra.mxu2 %vm411_vm7, %v6283_v54  ;;  %v6931_v1 = vpop.permute.xlu1 %1695  ;;  %v2082_v54 = vsel %vm342_vm6, %v6921_v13, -inf }
 0x416   :  { %5092 = vmatpush.xpose.msk.msrb.mxu2 %vm411_vm7, %v6666_v18  ;;  %2071 = vmax.xlane.f32.xlu0 %v2070_v5  ;;  %v6918_v48 = vpop.permute.xlu0 %5264  ;;  %v1602_v21 = vpop.f32.mrf.mxu0 }
 0x417   :  { %v1108_v18 = vpop.f32.mrf.mxu3 }
 0x418   :  { %v1234_v33 = vmul.f32 %v1108_v18, %v6288_v29  ;;  %v2073_v29 = vsel %vm342_vm6, %v6927_v12, -inf }
 0x41a   :  { %5093 = vmatpush.xpose.msk.msrb.mxu2 %vm411_vm7, %v6719_v19  ;;  %1380 = vmatmul.f32.gmra.mxu1 %v1234_v33  ;;  %v1544_v19 = vpop.f32.mrf.mxu2  ;;  %v6960_v33 = vpop.f32.mrf.mxu1 }
 0x41c   :  { %5010 = vmatmul.msk.f32.gmra.mxu3 %vm411_vm7, %v9676_v28  ;;  %2083 = vmax.xlane.f32.xlu2 %v2082_v54  ;;  %v9677_v54 = vld [vmem:[#allocation55_spill] sm:$0xff] }
 0x41d   :  { %5067 = vmatmul.msk.f32.gmra.mxu2 %vm411_vm7, %v6310_v17  ;;  %v6956_v17 = vadd.f32 %v1544_v19, %v6669_v24  ;;  %v9678_v24 = vld [vmem:[#allocation20_spill] sm:$0xff] }
 0x41e   :  { %5094 = vmatpush.xpose.msk.msrb.mxu2 %vm411_vm7, %v6703_v49  ;;  %2074 = vmax.xlane.f32.xlu0 %v2073_v29  ;;  %v6943_v50 = vpop.permute.xlu0 %5269  ;;  %v1605_v44 = vpop.f32.mrf.mxu0 }
 0x41f   :  { %v1111_v11 = vpop.f32.mrf.mxu3  ;;  %v6947_v49 = vpop.permute.xlu2 %5249  ;;  %v6951_v5 = vadd.f32 %v1605_v44, %v6760_v51  ;;  %v6979_v44 = vadd.f32 %v1599_v63, %v6725_v16 }
 0x420   :  { %v1235_v41 = vmul.f32 %v1111_v11, %v6308_v60  ;;  %v2079_v60 = vsel %vm342_vm6, %v6956_v17, -inf }
 0x421   :  { %v2091_v18 = vsel %vm342_vm6, %v6951_v5, -inf }
 0x422   :  { %5095 = vmatpush.xpose.msk.msrb.mxu2 %vm411_vm7, %v6546_v8  ;;  %1383 = vmatmul.f32.gmra.mxu1 %v1235_v41  ;;  %v6962_v8 = vpop.permute.xlu1 %1841 }
 0x424   :  { %5011 = vmatmul.msk.f32.gmra.mxu3 %vm411_vm7, %v9677_v54  ;;  %2092 = vmax.xlane.f32.xlu2 %v2091_v18  ;;  %v9680_v18 = vld [vmem:[#allocation57_spill] sm:$0xff] }
 0x425   :  { %5068 = vmatmul.msk.f32.gmra.mxu2 %vm411_vm7, %v9678_v24 }
 0x426   :  { %5120 = vmatpush.xpose.msk.msra.mxu2 %vm411_vm7, %v6863_v3  ;;  %2080 = vmax.xlane.f32.xlu0 %v2079_v60  ;;  %v6972_v51 = vpop.permute.xlu0 %5284  ;;  %v1608_v29 = vpop.f32.mrf.mxu0 }
 0x427   :  { %9679 = vst [vmem:[#allocation52_spill] sm:$0xff] %v6972_v51  ;;  %v1114_v3 = vpop.f32.mrf.mxu3  ;;  %v6976_v11 = vadd.f32 %v1608_v29, %v6779_v47  ;;  %v2085_v47 = vsel %vm342_vm6, %v6979_v44, -inf  ;;  %v9693_v51 = vld [vmem:[#allocation50_spill] sm:$0xff] }
 0x428   :  { %v1236_v19 = vmul.f32 %v1114_v3, %v6328_v32  ;;  %v6989_v32 = vpop.f32.mrf.mxu1 }
 0x429   :  { %v2094_v41 = vsel %vm342_vm6, %v6976_v11, -inf }
 0x42a   :  { %5121 = vmatpush.xpose.msk.msra.mxu2 %vm411_vm7, %v6773_v56  ;;  %v6983_v56 = vpop.permute.xlu2 %5259  ;;  %1386 = vmatmul.f32.gmra.mxu1 %v1236_v19  ;;  %v6995_v16 = vpop.permute.xlu1 %1991 }
 0x42b   :  { %2095 = vmax.xlane.f32.xlu1 %v2094_v41 }
 0x42c   :  { %5012 = vmatmul.msk.f32.gmra.mxu3 %vm411_vm7, %v9680_v18 }
 0x42e   :  { %5122 = vmatpush.xpose.msk.msra.mxu2 %vm411_vm7, %v6775_v6  ;;  %2086 = vmax.xlane.f32.xlu0 %v2085_v47  ;;  %v9681_v6 = vld [vmem:[#allocation32_spill] sm:$0xff]  ;;  %v6999_v63 = vpop.permute.xlu0 %5304  ;;  %v1611_v24 = vpop.f32.mrf.mxu0 }
 0x42f   :  { %5069 = vmatmul.msk.f32.gmra.mxu2 %vm411_vm7, %v9681_v6  ;;  %9682 = vst [vmem:[#allocation12_spill] sm:$0xff] %v6999_v63  ;;  %v1117_v60 = vpop.f32.mrf.mxu3  ;;  %v7003_v29 = vadd.f32 %v1611_v24, %v6799_v62 }
 0x430   :  { %v1237_v3 = vmul.f32 %v1117_v60, %v6348_v15  ;;  %v7024_v47 = vpop.f32.mrf.mxu1 }
 0x431   :  { %9683 = vst [vmem:[#allocation54_spill] sm:$0xff] %v7003_v29  ;;  %v2097_v19 = vsel %vm342_vm6, %v7003_v29, -inf }
 0x432   :  { %5123 = vmatpush.xpose.msk.msra.mxu2 %vm411_vm7, %v6771_v40  ;;  %v7006_v40 = vadd.f32 %v1602_v21, %v6744_v53  ;;  %1389 = vmatmul.f32.gmra.mxu1 %v1237_v3  ;;  %v7012_v41 = vpop.permute.xlu2 %5274  ;;  %v9684_v53 = vld [vmem:[#allocation33_spill] sm:$0xff]  ;;  %v7030_v24 = vpop.permute.xlu1 %5254  ;;  %v9687_v3 = vld [vmem:[#allocation60_spill] sm:$0xff] }
 0x433   :  { %2098 = vmax.xlane.f32.xlu1 %v2097_v19  ;;  %v9688_v19 = vld [vmem:[#allocation70_spill] sm:$0xff] }
 0x434   :  { %5013 = vmatmul.msk.f32.gmra.mxu3 %vm411_vm7, %v6476_v58  ;;  %v2088_v15 = vsel %vm342_vm6, %v7006_v40, -inf }
 0x436   :  { %5124 = vmatpush.xpose.msk.msra.mxu2 %vm411_vm7, %v6756_v34  ;;  %2089 = vmax.xlane.f32.xlu0 %v2088_v15  ;;  %v7022_v34 = vpop.permute.xlu0 %5309  ;;  %v1614_v21 = vpop.f32.mrf.mxu0 }
 0x437   :  { %5070 = vmatmul.msk.f32.gmra.mxu2 %vm411_vm7, %v9684_v53  ;;  %9685 = vst [vmem:[#allocation55_spill] sm:$0xff] %v7022_v34  ;;  %v1120_v62 = vpop.f32.mrf.mxu3  ;;  %v7028_v60 = vadd.f32 %v1614_v21, %v6811_v26  ;;  %v9690_v26 = vld [vmem:[#allocation29_spill] sm:$0xff] }
 0x438   :  { %v1238_v6 = vmul.f32 %v1120_v62, %v6368_v36 }
 0x439   :  { %9686 = vst [vmem:[#allocation20_spill] sm:$0xff] %v7028_v60 }
 0x43a   :  { %5125 = vmatpush.xpose.msk.msra.mxu2 %vm411_vm7, %v6740_v59  ;;  %1392 = vmatmul.f32.gmra.mxu1 %v1238_v6  ;;  %v2100_v59 = vsel %vm342_vm6, %v7028_v60, -inf  ;;  %v7040_v36 = vpop.permute.xlu2 %5294  ;;  %v7050_v6 = vpop.f32.mrf.mxu1  ;;  %v9726_v60 = vld [vmem:[#allocation15_spill] sm:$0xff] }
 0x43b   :  { %2101 = vmax.xlane.f32.xlu1 %v2100_v59  ;;  %9689 = vst [vmem:[#allocation57_spill] sm:$0xff] %v7040_v36 }
 0x43c   :  { %5014 = vmatmul.msk.f32.gmra.mxu3 %vm411_vm7, %v9687_v3 }
 0x43e   :  { %5126 = vmatpush.xpose.msk.msra.mxu2 %vm411_vm7, %v6727_v42  ;;  %v7044_v15 = vpop.permute.xlu0 %5324  ;;  %v1617_v42 = vpop.f32.mrf.mxu0 }
 0x43f   :  { %5071 = vmatmul.msk.f32.gmra.mxu2 %vm411_vm7, %v9690_v26  ;;  %9691 = vst [vmem:[#allocation32_spill] sm:$0xff] %v7044_v15  ;;  %v1123_v53 = vpop.f32.mrf.mxu3  ;;  %v7048_v21 = vadd.f32 %v1617_v42, %v6823_v2  ;;  %v9694_v26 = vld [vmem:[#allocation14_spill] sm:$0xff] }
 0x440   :  { %v1239_v62 = vmul.f32 %v1123_v53, %v6386_v45  ;;  %v9695_v45 = vld [vmem:[#allocation19_spill] sm:$0xff] }
 0x441   :  { %9692 = vst [vmem:[#allocation33_spill] sm:$0xff] %v7048_v21  ;;  %v2103_v59 = vsel %vm342_vm6, %v7048_v21, -inf  ;;  %v9725_v21 = vld [vmem:[#allocation37_spill] sm:$0xff] }
 0x442   :  { %5127 = vmatpush.xpose.msk.msra.mxu2 %vm411_vm7, %v9688_v19  ;;  %1395 = vmatmul.f32.gmra.mxu1 %v1239_v62  ;;  %v7054_v19 = vpop.permute.xlu1 %5279  ;;  %v7063_v42 = vpop.permute.xlu2 %5299  ;;  %v9697_v62 = vld [vmem:[#allocation16_spill] sm:$0xff] }
 0x443   :  { %2104 = vmax.xlane.f32.xlu0 %v2103_v59  ;;  %9696 = vst [vmem:[#allocation60_spill] sm:$0xff] %v7063_v42  ;;  %v9698_v59 = vld [vmem:[#allocation13_spill] sm:$0xff]  ;;  %v7069_v34 = vpop.f32.mrf.mxu1 }
 0x444   :  { %5015 = vmatmul.msk.f32.gmra.mxu3 %vm411_vm7, %v9693_v51 }
 0x446   :  { %v1708_v15 = vpop.permute.xlu0 %1707 }
 0x447   :  { %5096 = vmatmul.msk.f32.vlgmr.msrb.gmra.mxu2 %vm411_vm7, %v9694_v26  ;;  %v1126_v2 = vpop.f32.mrf.mxu3  ;;  %5072 = vmatpush.xpose.msk.msra.mxu0 %vm411_vm7, %v1708_v15  ;;  %v9699_v26 = vld [vmem:[#allocation62_spill] sm:$0xff]  ;;  %v9701_v15 = vld [vmem:[#allocation11_spill] sm:$0xff] }
 0x448   :  { %3626 = vmatpush.msrb.mxu2 %v9695_v45  ;;  %v1240_v53 = vmul.f32 %v1126_v2, %v6406_v38  ;;  %v9702_v38 = vld [vmem:[#allocation22_spill] sm:$0xff] }
 0x449   :  { %v9703_v2 = vld [vmem:[#allocation10_spill] sm:$0xff] }
 0x44a   :  { %3627 = vmatpush.msrb.mxu2 %v9697_v62  ;;  %1398 = vmatmul.f32.gmra.mxu1 %v1240_v53  ;;  %v7073_v45 = vpop.permute.xlu1 %5289 }
 0x44b   :  { %5073 = vmatpush.xpose.msk.msra.mxu0 %vm411_vm7, %v6912_v23  ;;  %9700 = vst [vmem:[#allocation70_spill] sm:$0xff] %v7073_v45  ;;  %v7084_v23 = vld [vmem:[%s9454_s2 + $0x10] sm:$0xff] }
 0x44c   :  { %3628 = vmatpush.msrb.mxu2 %v9698_v59  ;;  %5016 = vmatmul.msk.f32.gmra.mxu3 %vm411_vm7, %v9699_v26  ;;  %v9704_v59 = vld [vmem:[#allocation9_spill] sm:$0xff]  ;;  %v9708_v45 = vld [vmem:[#allocation24_spill] sm:$0xff] }
 0x44e   :  { %3629 = vmatpush.msrb.mxu2 %v9701_v15  ;;  %v7088_v15 = vpop.permute.xlu2 %5319 }
 0x44f   :  { %5097 = vmatmul.msk.f32.gmra.mxu2 %vm411_vm7, %v9702_v38  ;;  %v1129_v53 = vpop.f32.mrf.mxu3  ;;  %5074 = vmatpush.xpose.msk.msra.mxu0 %vm411_vm7, %v6842_v55  ;;  %9705 = vst [vmem:[#allocation29_spill] sm:$0xff] %v7088_v15  ;;  %v7093_v38 = vpop.f32.mrf.mxu1  ;;  %v9706_v55 = vld [vmem:[#allocation58_spill] sm:$0xff]  ;;  %v9712_v15 = vld [vmem:[#allocation17_spill] sm:$0xff] }
 0x450   :  { %3630 = vmatpush.msrb.mxu2 %v9703_v2  ;;  %v1241_v62 = vmul.f32 %v7084_v23, %v1129_v53  ;;  %v9707_v2 = vld [vmem:[#allocation7_spill] sm:$0xff] }
 0x452   :  { %3631 = vmatpush.msrb.mxu2 %v9704_v59  ;;  %1401 = vmatmul.f32.gmra.mxu1 %v1241_v62  ;;  %v7100_v53 = vpop.permute.xlu1 %5314  ;;  %v9710_v59 = vld [vmem:[#allocation64_spill] sm:$0xff] }
 0x453   :  { %5075 = vmatpush.xpose.msk.msra.mxu0 %vm411_vm7, %v6820_v22  ;;  %9709 = vst [vmem:[#allocation50_spill] sm:$0xff] %v7100_v53  ;;  %v9714_v53 = vld [vmem:[#allocation63_spill] sm:$0xff] }
 0x454   :  { %3632 = vmatpush.msrb.mxu2 %v9650_v57  ;;  %5017 = vmatmul.msk.f32.gmra.mxu3 %vm411_vm7, %v9706_v55  ;;  %v7107_v57 = vld [vmem:[%s9454_s2 + $0x18] sm:$0xff] }
 0x456   :  { %3633 = vmatpush.msrb.mxu2 %v9707_v2 }
 0x457   :  { %5098 = vmatmul.msk.f32.gmra.mxu2 %vm411_vm7, %v9708_v45  ;;  %v1132_v62 = vpop.f32.mrf.mxu3  ;;  %5076 = vmatpush.xpose.msk.msra.mxu0 %vm411_vm7, %v6834_v39  ;;  %v7114_v45 = vpop.permute.xlu2 %5334 }
 0x458   :  { %v1242_v22 = vmul.f32 %v7107_v57, %v1132_v62  ;;  %9711 = vst [vmem:[#allocation14_spill] sm:$0xff] %v7114_v45  ;;  %v7116_v2 = vpop.f32.mrf.mxu1  ;;  %v7125_v62 = vld [vmem:[%s9454_s2 + $0x20] sm:$0xff]  ;;  %v1854_v45 = vpop.permute.xlu0 %1853 }
 0x45a   :  { %1404 = vmatmul.f32.gmra.mxu1 %v1242_v22  ;;  %v7128_v22 = vpop.permute.xlu1 %5329 }
 0x45b   :  { %5077 = vmatpush.xpose.msk.msra.mxu0 %vm411_vm7, %v6803_v37  ;;  %9713 = vst [vmem:[#allocation19_spill] sm:$0xff] %v7128_v22  ;;  %v9720_v22 = vld [vmem:[#allocation30_spill] sm:$0xff] }
 0x45c   :  { %5018 = vmatmul.msk.f32.gmra.mxu3 %vm411_vm7, %v9710_v59 }
 0x45f   :  { %5099 = vmatmul.msk.f32.gmra.mxu2 %vm411_vm7, %v9712_v15  ;;  %v1135_v39 = vpop.f32.mrf.mxu3  ;;  %5078 = vmatpush.xpose.msk.msra.mxu0 %vm411_vm7, %v6931_v1  ;;  %v9715_v1 = vld [vmem:[#allocation41_spill] sm:$0xff]  ;;  %v9716_v15 = vld [vmem:[#allocation27_spill] sm:$0xff]  ;;  %v1852_v63 = vpop.permute.xlu2 %1851 }
 0x460   :  { %v1243_v37 = vmul.f32 %v7125_v62, %v1135_v39  ;;  %v7139_v42 = vpop.f32.mrf.mxu1 }
 0x462   :  { %1407 = vmatmul.f32.gmra.mxu1 %v1243_v37  ;;  %v7144_v37 = vld [vmem:[%s9454_s2 + $0x28] sm:$0xff] }
 0x463   :  { %5079 = vmatpush.xpose.msk.msra.mxu0 %vm411_vm7, %v6900_v46 }
 0x464   :  { %5019 = vmatmul.msk.f32.gmra.mxu3 %vm411_vm7, %v9714_v53 }
 0x466   :  { %5080 = vmatmul.msk.f32.vlgmr.msra.gmra.mxu0 %vm411_vm7, %v9715_v1  ;;  %v9718_v1 = vld [vmem:[#allocation65_spill] sm:$0xff] }
 0x467   :  { %5104 = vmatpush.xpose.msk.msrb.mxu0 %vm411_vm7, %v1854_v45  ;;  %5100 = vmatmul.msk.f32.gmra.mxu2 %vm411_vm7, %v9716_v15  ;;  %v1138_v39 = vpop.f32.mrf.mxu3  ;;  %v7148_v45 = vpop.permute.xlu1 %5339  ;;  %v9719_v15 = vld [vmem:[#allocation45_spill] sm:$0xff] }
 0x468   :  { %v1244_v46 = vmul.f32 %v7144_v37, %v1138_v39  ;;  %9717 = vst [vmem:[#allocation16_spill] sm:$0xff] %v7148_v45  ;;  %v9723_v45 = vld [vmem:[#allocation26_spill] sm:$0xff] }
 0x46a   :  { %1410 = vmatmul.f32.gmra.mxu1 %v1244_v46  ;;  %v7166_v46 = vpop.f32.mrf.mxu1 }
 0x46b   :  { %5105 = vmatpush.xpose.msk.msrb.mxu0 %vm411_vm7, %v1852_v63  ;;  %v7161_v63 = vld [vmem:[%s9454_s2 + $0x30] sm:$0xff] }
 0x46c   :  { %5020 = vmatmul.msk.f32.gmra.mxu3 %vm411_vm7, %v9718_v1 }
 0x46e   :  { %5081 = vmatmul.msk.f32.gmra.mxu0 %vm411_vm7, %v9719_v15  ;;  %v9722_v15 = vld [vmem:[#allocation35_spill] sm:$0xff] }
 0x46f   :  { %5106 = vmatpush.xpose.msk.msrb.mxu0 %vm411_vm7, %v6869_v31  ;;  %5101 = vmatmul.msk.f32.gmra.mxu2 %vm411_vm7, %v9720_v22  ;;  %v1141_v36 = vpop.f32.mrf.mxu3  ;;  %v9721_v31 = vld [vmem:[#allocation69_spill] sm:$0xff]  ;;  %v2000_v22 = vpop.permute.xlu1 %1999 }
 0x470   :  { %v1245_v39 = vmul.f32 %v7161_v63, %v1141_v36 }
 0x472   :  { %1413 = vmatmul.f32.gmra.mxu1 %v1245_v39 }
 0x473   :  { %5107 = vmatpush.xpose.msk.msrb.mxu0 %vm411_vm7, %v6831_v35  ;;  %v7179_v35 = vld [vmem:[%s9454_s2 + $0x38] sm:$0xff] }
 0x474   :  { %5021 = vmatmul.msk.f32.gmra.mxu3 %vm411_vm7, %v9721_v31  ;;  %v5257_v31 = vunpack.i.h.bf16 %v7030_v24 }
 0x476   :  { %5082 = vmatmul.msk.f32.gmra.mxu0 %vm411_vm7, %v9722_v15  ;;  %v9724_v15 = vld [vmem:[#allocation44_spill] sm:$0xff] }
 0x477   :  { %5108 = vmatpush.xpose.msk.msrb.mxu0 %vm411_vm7, %v6852_v43  ;;  %5102 = vmatmul.msk.f32.gmra.mxu2 %vm411_vm7, %v9723_v45  ;;  %v1144_v36 = vpop.f32.mrf.mxu3  ;;  %v7184_v43 = vpop.f32.mrf.mxu1 }
 0x478   :  { %v1246_v39 = vmul.f32 %v7179_v35, %v1144_v36  ;;  %v2060_v45 = vpop.xlane.xlu1 %2059 }
 0x47a   :  { %1416 = vmatmul.f32.gmra.mxu1 %v1246_v39 }
 0x47b   :  { %5109 = vmatpush.xpose.msk.msrb.mxu0 %vm411_vm7, %v6818_v0  ;;  %v7197_v0 = vld [vmem:[%s9454_s2 + $0x40] sm:$0xff] }
 0x47c   :  { %5022 = vmatmul.msk.f32.gmra.mxu3 %vm411_vm7, %v6531_v7 }
 0x47e   :  { %5083 = vmatmul.msk.f32.gmra.mxu0 %vm411_vm7, %v9724_v15  ;;  %v1998_v15 = vpop.permute.xlu2 %1997 }
 0x47f   :  { %5110 = vmatpush.xpose.msk.msrb.mxu0 %vm411_vm7, %v6962_v8  ;;  %5103 = vmatmul.msk.f32.gmra.mxu2 %vm411_vm7, %v9725_v21  ;;  %v1147_v36 = vpop.f32.mrf.mxu3  ;;  %v2250_v8 = vsub.f32 %v6847_v27, %v2060_v45  ;;  %v7204_v7 = vpop.f32.mrf.mxu1  ;;  %v9728_v21 = vld [vmem:[#allocation71_spill] sm:$0xff]  ;;  %v5262_v27 = vunpack.i.h.bf16 %v6983_v56 }
 0x480   :  { %v1247_v39 = vmul.f32 %v7197_v0, %v1147_v36  ;;  %9727 = vst [vmem:[#allocation13_spill] sm:$0xff] %v7204_v7  ;;  %v9729_v36 = vld [vmem:[#allocation49_spill] sm:$0xff]  ;;  %v7218_v45 = vld [vmem:[%s9454_s2 + $0x48] sm:$0xff] }
 0x481   :  { %v2314_v29 = vmul.f32 1.442695, %v2250_v8  ;;  %v5267_v8 = vunpack.i.h.bf16 %v6918_v48 }
 0x482   :  { %1419 = vmatmul.f32.gmra.mxu1 %v1247_v39 }
 0x483   :  { %5111 = vmatpush.xpose.msk.msrb.mxu0 %vm411_vm7, %v9726_v60  ;;  %v2063_v60 = vpop.xlane.xlu1 %2062  ;;  %5367 = vpow2.f32 %v2314_v29  ;;  %v9731_v29 = vld [vmem:[#allocation43_spill] sm:$0xff] }
 0x484   :  { %5023 = vmatmul.msk.f32.gmra.mxu3 %vm411_vm7, %v9728_v21  ;;  %v5272_v21 = vunpack.i.h.bf16 %v6943_v50 }
 0x486   :  { %5084 = vmatmul.msk.f32.gmra.mxu0 %vm411_vm7, %v9729_v36 }
 0x487   :  { %5136 = vmatpush.xpose.msk.msra.mxu0 %vm411_vm7, %v2000_v22  ;;  %5128 = vmatmul.msk.f32.vlgmr.msra.gmra.mxu2 %vm411_vm7, %v9674_v10  ;;  %v1150_v22 = vpop.f32.mrf.mxu3  ;;  %v2066_v10 = vpop.xlane.xlu0 %2065 }
 0x488   :  { %3756 = vmatpush.msra.mxu2 %v5257_v31  ;;  %v1248_v39 = vmul.f32 %v7218_v45, %v1150_v22  ;;  %v2251_v31 = vsub.f32 %v6873_v61, %v2063_v60  ;;  %v7231_v7 = vpop.f32.mrf.mxu1  ;;  %v5277_v61 = vunpack.i.h.bf16 %v7012_v41 }
 0x48a   :  { %3757 = vmatpush.msra.mxu2 %v5262_v27  ;;  %1422 = vmatmul.f32.gmra.mxu1 %v1248_v39  ;;  %v9730_v27 = vld [vmem:[#allocation75_spill] sm:$0xff]  ;;  %v7241_v39 = vpop.eup %5367 }
 0x48b   :  { %5137 = vmatpush.xpose.msk.msra.mxu0 %vm411_vm7, %v1998_v15  ;;  %v1669_v15 = vpop.f32.mrf.mxu2 }
 0x48c   :  { %v7223_v36 = vadd.f32 %v1669_v15, %v6838_v52  ;;  %3758 = vmatpush.msra.mxu2 %v5267_v8  ;;  %v5276_v52 = vunpack.i.l.bf16 %v7012_v41  ;;  %v5282_v41 = vunpack.i.h.bf16 %v7054_v19 }
 0x48e   :  { %v2106_v22 = vsel %vm342_vm6, %v7223_v36, -inf  ;;  %3759 = vmatpush.msra.mxu2 %v5272_v21  ;;  %5085 = vmatmul.msk.f32.gmra.mxu0 %vm411_vm7, %v9731_v29  ;;  %v5281_v21 = vunpack.i.l.bf16 %v7054_v19  ;;  %v2442_v29 = vsel %vm342_vm6, %v7241_v39, 0.0 }
 0x48f   :  { %5138 = vmatpush.xpose.msk.msra.mxu0 %vm411_vm7, %v6891_v14  ;;  %2107 = vmax.xlane.f32.xlu1 %v2106_v22  ;;  %v2316_v14 = vmul.f32 1.442695, %v2251_v31  ;;  %v1153_v60 = vpop.f32.mrf.mxu3  ;;  %v9732_v22 = vld [vmem:[#allocation74_spill] sm:$0xff] }
 0x490   :  { %5129 = vmatmul.msk.f32.gmra.mxu2 %vm411_vm7, %v6499_v9  ;;  %v1249_v15 = vmul.f32 %v7084_v23, %v1153_v60  ;;  %v9734_v60 = vld [vmem:[#allocation73_spill] sm:$0xff] }
 0x491   :  { %3760 = vmatpush.msra.mxu2 %v5276_v52  ;;  %5369 = vpow2.f32 %v2316_v14  ;;  %v9735_v14 = vld [vmem:[#allocation56_spill] sm:$0xff] }
 0x492   :  { %1425 = vmatmul.f32.gmra.mxu1 %v1249_v15 }
 0x493   :  { %5139 = vmatpush.xpose.msk.msra.mxu0 %vm411_vm7, %v9730_v27  ;;  %v1672_v8 = vpop.f32.mrf.mxu2  ;;  %3761 = vmatpush.msra.mxu2 %v5277_v61  ;;  %v9733_v27 = vld [vmem:[#allocation61_spill] sm:$0xff]  ;;  %v2069_v61 = vpop.xlane.xlu0 %2068 }
 0x494   :  { %v7246_v31 = vadd.f32 %v1672_v8, %v9732_v22  ;;  %v2252_v9 = vsub.f32 %v9733_v27, %v2066_v10  ;;  %v7258_v10 = vpop.f32.mrf.mxu1  ;;  %v9736_v27 = vld [vmem:[#allocation18_spill] sm:$0xff] }
 0x495   :  { %3762 = vmatpush.msra.mxu2 %v5281_v21 }
 0x496   :  { %v2109_v52 = vsel %vm342_vm6, %v7246_v31, -inf  ;;  %5086 = vmatmul.msk.f32.gmra.mxu0 %vm411_vm7, %v9735_v14  ;;  %v9739_v14 = vld [vmem:[#allocation67_spill] sm:$0xff] }
 0x497   :  { %5140 = vmatpush.xpose.msk.msra.mxu0 %vm411_vm7, %v6995_v16  ;;  %2110 = vmax.xlane.f32.xlu2 %v2109_v52  ;;  %v2318_v16 = vmul.f32 1.442695, %v2252_v9  ;;  %v1156_v19 = vpop.f32.mrf.mxu3  ;;  %v7264_v15 = vpop.eup %5369  ;;  %v9737_v9 = vld [vmem:[#allocation21_spill] sm:$0xff] }
 0x498   :  { %2443 = vadd.xlane.f32.xlu1 %v2442_v29  ;;  %3763 = vmatpush.msra.mxu2 %v5282_v41  ;;  %v1250_v8 = vmul.f32 %v7107_v57, %v1156_v19  ;;  %v2253_v41 = vsub.f32 %v9737_v9, %v2069_v61  ;;  %v9738_v29 = vld [vmem:[#allocation47_spill] sm:$0xff]  ;;  %v2078_v61 = vpop.xlane.xlu1 %2077 }
 0x499   :  { %5130 = vmatmul.msk.f32.gmra.mxu2 %vm411_vm7, %v9676_v28  ;;  %5371 = vpow2.f32 %v2318_v16  ;;  %v2445_v28 = vsel %vm342_vm6, %v7264_v15, 0.0 }
 0x49a   :  { %1428 = vmatmul.f32.gmra.mxu1 %v1250_v8 }
 0x49b   :  { %5141 = vmatpush.xpose.msk.msra.mxu0 %vm411_vm7, %v9734_v60  ;;  %v1675_v21 = vpop.f32.mrf.mxu2  ;;  %v2072_v60 = vpop.xlane.xlu0 %2071 }
 0x49c   :  { %v7268_v22 = vadd.f32 %v1675_v21, %v6893_v4  ;;  %v2320_v4 = vmul.f32 1.442695, %v2253_v41  ;;  %v7285_v8 = vpop.f32.mrf.mxu1  ;;  %v2256_v41 = vsub.f32 %v6898_v20, %v2078_v61 }
 0x49e   :  { %v2112_v52 = vsel %vm342_vm6, %v7268_v22, -inf  ;;  %5087 = vmatmul.msk.f32.gmra.mxu0 %vm411_vm7, %v9739_v14  ;;  %5373 = vpow2.f32 %v2320_v4  ;;  %v9740_v14 = vld [vmem:[#allocation40_spill] sm:$0xff] }
 0x49f   :  { %5142 = vmatpush.xpose.msk.msra.mxu0 %vm411_vm7, %v9736_v27  ;;  %2113 = vmax.xlane.f32.xlu0 %v2112_v52  ;;  %v1159_v16 = vpop.f32.mrf.mxu3  ;;  %v7283_v19 = vpop.eup %5371 }
 0x4a0   :  { %2446 = vadd.xlane.f32.xlu2 %v2445_v28  ;;  %v1251_v21 = vmul.f32 %v7125_v62, %v1159_v16  ;;  %v2254_v28 = vsub.f32 %v6904_v30, %v2072_v60 }
 0x4a1   :  { %5131 = vmatmul.msk.f32.gmra.mxu2 %vm411_vm7, %v9677_v54  ;;  %v2448_v54 = vsel %vm342_vm6, %v7283_v19, 0.0 }
 0x4a2   :  { %1431 = vmatmul.f32.gmra.mxu1 %v1251_v21  ;;  %v2322_v61 = vmul.f32 1.442695, %v2254_v28 }
 0x4a3   :  { %5143 = vmatpush.xpose.msk.msra.mxu0 %vm411_vm7, %v9738_v29  ;;  %v1678_v27 = vpop.f32.mrf.mxu2  ;;  %v2326_v29 = vmul.f32 1.442695, %v2256_v41  ;;  %v2075_v16 = vpop.xlane.xlu0 %2074 }
 0x4a4   :  { %v7289_v9 = vadd.f32 %v1678_v27, %v6929_v25  ;;  %v9741_v25 = vld [vmem:[#allocation46_spill] sm:$0xff]  ;;  %v7302_v4 = vpop.eup %5373  ;;  %v7306_v60 = vpop.f32.mrf.mxu1 }
 0x4a5   :  { %v9742_v27 = vld [vmem:[#allocation42_spill] sm:$0xff]  ;;  %5375 = vpow2.f32 %v2326_v29  ;;  %v9745_v29 = vld [vmem:[#allocation31_spill] sm:$0xff] }
 0x4a6   :  { %v2115_v52 = vsel %vm342_vm6, %v7289_v9, -inf  ;;  %5112 = vmatmul.msk.f32.vlgmr.msrb.gmra.mxu0 %vm411_vm7, %v9740_v14  ;;  %5377 = vpow2.f32 %v2322_v61  ;;  %v9744_v14 = vld [vmem:[#allocation36_spill] sm:$0xff] }
 0x4a7   :  { %2116 = vmax.xlane.f32.xlu1 %v2115_v52  ;;  %2449 = vadd.xlane.f32.xlu0 %v2448_v54  ;;  %v1162_v20 = vpop.f32.mrf.mxu3  ;;  %v9743_v52 = vld [vmem:[#allocation38_spill] sm:$0xff]  ;;  %v2451_v54 = vsel %vm342_vm6, %v7302_v4, 0.0 }
 0x4a8   :  { %3691 = vmatpush.msrb.mxu0 %v9741_v25  ;;  %v1252_v21 = vmul.f32 %v7144_v37, %v1162_v20 }
 0x4a9   :  { %5132 = vmatmul.msk.f32.gmra.mxu2 %vm411_vm7, %v9680_v18  ;;  %v2255_v18 = vsub.f32 %v6927_v12, %v2075_v16  ;;  %v9747_v16 = vld [vmem:[#allocation28_spill] sm:$0xff] }
 0x4aa   :  { %3692 = vmatpush.msrb.mxu0 %v9742_v27  ;;  %1434 = vmatmul.f32.gmra.mxu1 %v1252_v21 }
 0x4ab   :  { %v1681_v30 = vpop.f32.mrf.mxu2  ;;  %v2324_v12 = vmul.f32 1.442695, %v2255_v18  ;;  %v7323_v20 = vpop.eup %5375 }
 0x4ac   :  { %v7309_v41 = vadd.f32 %v1681_v30, %v6960_v33  ;;  %3693 = vmatpush.msrb.mxu0 %v9743_v52  ;;  %v9746_v33 = vld [vmem:[#allocation34_spill] sm:$0xff]  ;;  %v7327_v30 = vpop.eup %5377  ;;  %v7335_v18 = vpop.f32.mrf.mxu1 }
 0x4ad   :  { %5379 = vpow2.f32 %v2324_v12 }
 0x4ae   :  { %v2118_v28 = vsel %vm342_vm6, %v7309_v41, -inf  ;;  %3694 = vmatpush.msrb.mxu0 %v9744_v14  ;;  %v9749_v14 = vld [vmem:[#allocation23_spill] sm:$0xff] }
 0x4af   :  { %2452 = vadd.xlane.f32.xlu1 %v2451_v54  ;;  %2119 = vmax.xlane.f32.xlu2 %v2118_v28  ;;  %v1165_v25 = vpop.f32.mrf.mxu3  ;;  %v9748_v54 = vld [vmem:[#allocation25_spill] sm:$0xff] }
 0x4b0   :  { %5113 = vmatmul.msk.f32.gmra.mxu0 %vm411_vm7, %v9745_v29  ;;  %v1253_v61 = vmul.f32 %v7161_v63, %v1165_v25  ;;  %v9750_v29 = vld [vmem:[#allocation48_spill] sm:$0xff] }
 0x4b1   :  { %5133 = vmatmul.msk.f32.gmra.mxu2 %vm411_vm7, %v6476_v58  ;;  %3695 = vmatpush.msrb.mxu0 %v9746_v33  ;;  %v2460_v58 = vsel %vm342_vm6, %v7323_v20, 0.0 }
 0x4b2   :  { %1437 = vmatmul.f32.gmra.mxu1 %v1253_v61 }
 0x4b3   :  { %3696 = vmatpush.msrb.mxu0 %v9747_v16  ;;  %v1684_v21 = vpop.f32.mrf.mxu2  ;;  %v7347_v61 = vpop.eup %5379 }
 0x4b4   :  { %v7330_v52 = vadd.f32 %v1684_v21, %v6989_v32  ;;  %v2454_v32 = vsel %vm342_vm6, %v7327_v30, 0.0 }
 0x4b5   :  { %3697 = vmatpush.msrb.mxu0 %v9748_v54  ;;  %v9752_v54 = vld [vmem:[#allocation51_spill] sm:$0xff] }
 0x4b6   :  { %v2121_v28 = vsel %vm342_vm6, %v7330_v52, -inf }
 0x4b7   :  { %2461 = vadd.xlane.f32.xlu1 %v2460_v58  ;;  %3698 = vmatpush.msrb.mxu0 %v9749_v14  ;;  %v1168_v12 = vpop.f32.mrf.mxu3 }
 0x4b8   :  { %2122 = vmax.xlane.f32.xlu0 %v2121_v28  ;;  %2455 = vadd.xlane.f32.xlu2 %v2454_v32  ;;  %v1254_v25 = vmul.f32 %v7179_v35, %v1168_v12  ;;  %v2457_v32 = vsel %vm342_vm6, %v7347_v61, 0.0 }
 0x4b9   :  { %5114 = vmatmul.msk.f32.gmra.mxu0 %vm411_vm7, %v9750_v29  ;;  %5134 = vmatmul.msk.f32.gmra.mxu2 %vm411_vm7, %v9687_v3  ;;  %v7356_v29 = vpop.f32.mrf.mxu1  ;;  %v9751_v3 = vld [vmem:[#allocation39_spill] sm:$0xff] }
 0x4ba   :  { %1440 = vmatmul.f32.gmra.mxu1 %v1254_v25 }
 0x4bb   :  { %v1687_v21 = vpop.f32.mrf.mxu2 }
 0x4bc   :  { %v7350_v58 = vadd.f32 %v1687_v21, %v7024_v47  ;;  %v2084_v47 = vpop.xlane.xlu2 %2083 }
 0x4be   :  { %v2124_v28 = vsel %vm342_vm6, %v7350_v58, -inf }
 0x4bf   :  { %v1171_v12 = vpop.f32.mrf.mxu3 }
 0x4c0   :  { %2458 = vadd.xlane.f32.xlu0 %v2457_v32  ;;  %2125 = vmax.xlane.f32.xlu2 %v2124_v28  ;;  %v1255_v25 = vmul.f32 %v7197_v0, %v1171_v12  ;;  %v2258_v32 = vsub.f32 %v6921_v13, %v2084_v47  ;;  %v9753_v47 = vld [vmem:[#allocation53_spill] sm:$0xff] }
 0x4c1   :  { %5115 = vmatmul.msk.f32.gmra.mxu0 %vm411_vm7, %v9751_v3  ;;  %5135 = vmatmul.msk.f32.gmra.mxu2 %vm411_vm7, %v9693_v51  ;;  %v7371_v16 = vpop.f32.mrf.mxu1 }
 0x4c2   :  { %1443 = vmatmul.f32.gmra.mxu1 %v1255_v25  ;;  %v2330_v3 = vmul.f32 1.442695, %v2258_v32 }
 0x4c3   :  { %v1690_v21 = vpop.f32.mrf.mxu2 }
 0x4c4   :  { %v7364_v14 = vadd.f32 %v1690_v21, %v7050_v6  ;;  %5381 = vpow2.f32 %v2330_v3 }
 0x4c6   :  { %v2127_v28 = vsel %vm342_vm6, %v7364_v14, -inf }
 0x4c7   :  { %v1174_v51 = vpop.f32.mrf.mxu3 }
 0x4c8   :  { %2128 = vmax.xlane.f32.xlu0 %v2127_v28  ;;  %v1256_v12 = vmul.f32 %v7218_v45, %v1174_v51  ;;  %v2081_v28 = vpop.xlane.xlu0 %2080 }
 0x4c9   :  { %5116 = vmatmul.msk.f32.gmra.mxu0 %vm411_vm7, %v9752_v54  ;;  %v7384_v32 = vpop.f32.mrf.mxu1 }
 0x4ca   :  { %1446 = vmatmul.f32.gmra.mxu1 %v1256_v12  ;;  %v7382_v21 = vpop.eup %5381 }
 0x4cb   :  { %v1815_v33 = vpop.f32.mrf.mxu2  ;;  %9754 = vst [vmem:[#allocation62_spill] sm:$0xff] %v7382_v21 }
 0x4cc   :  { %v7375_v6 = vadd.f32 %v1815_v33, %v7258_v10  ;;  %v2466_v10 = vsel %vm342_vm6, %v7382_v21, 0.0  ;;  %v9755_v33 = vld [vmem:[#allocation66_spill] sm:$0xff] }
 0x4ce   :  { %v2154_v13 = vsel %vm342_vm6, %v7375_v6, -inf }
 0x4cf   :  { %2155 = vmax.xlane.f32.xlu1 %v2154_v13  ;;  %v1177_v54 = vpop.f32.mrf.mxu3  ;;  %v9756_v13 = vld [vmem:[#allocation68_spill] sm:$0xff] }
 0x4d0   :  { %v1257_v25 = vmul.f32 %v7084_v23, %v1177_v54  ;;  %v2257_v23 = vsub.f32 %v6956_v17, %v2081_v28 }
 0x4d1   :  { %5117 = vmatmul.msk.f32.gmra.mxu0 %vm411_vm7, %v9753_v47  ;;  %v7391_v12 = vpop.f32.mrf.mxu1 }
 0x4d2   :  { %1449 = vmatmul.f32.gmra.mxu1 %v1257_v25  ;;  %v2087_v25 = vpop.xlane.xlu0 %2086 }
 0x4d7   :  { %2467 = vadd.xlane.f32.xlu1 %v2466_v10  ;;  %v1180_v3 = vpop.f32.mrf.mxu3  ;;  %v2328_v10 = vmul.f32 1.442695, %v2257_v23 }
 0x4d8   :  { %v1258_v51 = vmul.f32 %v7107_v57, %v1180_v3  ;;  %v9757_v57 = vld [vmem:[#allocation72_spill] sm:$0xff] }
 0x4d9   :  { %5118 = vmatmul.msk.f32.gmra.mxu0 %vm411_vm7, %v9755_v33  ;;  %v7397_v33 = vpop.xlane.xlu1 %2095  ;;  %v5246_v3 = vunpack.i.l.bf16 %v9757_v57  ;;  %5383 = vpow2.f32 %v2328_v10 }
 0x4da   :  { %1452 = vmatmul.f32.gmra.mxu1 %v1258_v51  ;;  %v7403_v51 = vpop.f32.mrf.mxu1 }
 0x4df   :  { %v1183_v47 = vpop.f32.mrf.mxu3 }
 0x4e0   :  { %v1259_v54 = vmul.f32 %v7125_v62, %v1183_v47  ;;  %v5247_v62 = vunpack.i.h.bf16 %v9757_v57  ;;  %v2090_v47 = vpop.xlane.xlu0 %2089  ;;  %v5256_v57 = vunpack.i.l.bf16 %v7030_v24 }
 0x4e1   :  { %5119 = vmatmul.msk.f32.gmra.mxu0 %vm411_vm7, %v9756_v13  ;;  %v5252_v13 = vunpack.i.h.bf16 %v6947_v49 }
 0x4e2   :  { %1455 = vmatmul.f32.gmra.mxu1 %v1259_v54  ;;  %v7413_v54 = vpop.eup %5383 }
 0x4e3   :  { %v1742_v27 = vpop.f32.mrf.mxu0  ;;  %v2463_v24 = vsel %vm342_vm6, %v7413_v54, 0.0 }
 0x4e4   :  { %v7400_v21 = vadd.f32 %v1742_v27, %v7069_v34  ;;  %v5251_v34 = vunpack.i.l.bf16 %v6947_v49  ;;  %v1818_v27 = vpop.f32.mrf.mxu2 }
 0x4e6   :  { %v2130_v17 = vsel %vm342_vm6, %v7400_v21, -inf }
 0x4e7   :  { %v1186_v28 = vpop.f32.mrf.mxu3  ;;  %2131 = vmax.xlane.f32.xlu2 %v2130_v17  ;;  %v2260_v17 = vsub.f32 %v7006_v40, %v2090_v47  ;;  %v5266_v40 = vunpack.i.l.bf16 %v6918_v48 }
 0x4e8   :  { %v1260_v23 = vmul.f32 %v7144_v37, %v1186_v28  ;;  %v7420_v37 = vpop.xlane.xlu1 %2098 }
 0x4e9   :  { %5144 = vmatmul.msk.f32.vlgmr.msra.gmra.mxu0 %vm411_vm7, %v9699_v26 }
 0x4ea   :  { %3821 = vmatpush.msra.mxu0 %v5246_v3  ;;  %1458 = vmatmul.f32.gmra.mxu1 %v1260_v23  ;;  %v2259_v3 = vsub.f32 %v6979_v44, %v2087_v25  ;;  %v7430_v44 = vpop.f32.mrf.mxu1  ;;  %v7435_v23 = vadd.f32 %v1818_v27, %v7285_v8  ;;  %v2093_v27 = vpop.xlane.xlu2 %2092 }
 0x4eb   :  { %v1745_v26 = vpop.f32.mrf.mxu0 }
 0x4ec   :  { %3822 = vmatpush.msra.mxu0 %v5247_v62  ;;  %v7416_v10 = vadd.f32 %v1745_v26, %v7093_v38  ;;  %v5261_v62 = vunpack.i.l.bf16 %v6983_v56  ;;  %v2332_v28 = vmul.f32 1.442695, %v2259_v3  ;;  %v5271_v56 = vunpack.i.l.bf16 %v6943_v50 }
 0x4ee   :  { %3823 = vmatpush.msra.mxu0 %v5251_v34  ;;  %v2133_v49 = vsel %vm342_vm6, %v7416_v10, -inf  ;;  %v1821_v34 = vpop.f32.mrf.mxu2  ;;  %5385 = vpow2.f32 %v2332_v28 }
 0x4ef   :  { %v1189_v38 = vpop.f32.mrf.mxu3  ;;  %2134 = vmax.xlane.f32.xlu0 %v2133_v49  ;;  %2464 = vadd.xlane.f32.xlu2 %v2463_v24  ;;  %v2261_v49 = vsub.f32 %v6951_v5, %v2093_v27 }
 0x4f0   :  { %3824 = vmatpush.msra.mxu0 %v5252_v13  ;;  %v1261_v25 = vmul.f32 %v7161_v63, %v1189_v38  ;;  %v2157_v63 = vsel %vm342_vm6, %v7435_v23, -inf  ;;  %v7447_v50 = vpop.xlane.xlu1 %2101 }
 0x4f1   :  { %5145 = vmatmul.msk.f32.gmra.mxu0 %vm411_vm7, %v9706_v55  ;;  %v2334_v55 = vmul.f32 1.442695, %v2260_v17 }
 0x4f2   :  { %3825 = vmatpush.msra.mxu0 %v5256_v57  ;;  %1461 = vmatmul.f32.gmra.mxu1 %v1261_v25  ;;  %v7450_v26 = vpop.f32.mrf.mxu1 }
 0x4f3   :  { %v1748_v13 = vpop.f32.mrf.mxu0  ;;  %5387 = vpow2.f32 %v2334_v55 }
 0x4f4   :  { %3826 = vmatpush.msra.mxu0 %v5261_v62  ;;  %v7439_v47 = vadd.f32 %v1748_v13, %v7116_v2  ;;  %v7452_v57 = vpop.eup %5385 }
 0x4f5   :  { %v2469_v38 = vsel %vm342_vm6, %v7452_v57, 0.0 }
 0x4f6   :  { %3827 = vmatpush.msra.mxu0 %v5266_v40  ;;  %v2136_v48 = vsel %vm342_vm6, %v7439_v47, -inf  ;;  %v1824_v62 = vpop.f32.mrf.mxu2  ;;  %v2336_v40 = vmul.f32 1.442695, %v2261_v49  ;;  %v9759_v49 = vld [vmem:[#allocation54_spill] sm:$0xff] }
 0x4f7   :  { %v1192_v8 = vpop.f32.mrf.mxu3  ;;  %2137 = vmax.xlane.f32.xlu1 %v2136_v48  ;;  %2158 = vmax.xlane.f32.xlu0 %v2157_v63  ;;  %v7475_v28 = vadd.f32 %v1824_v62, %v7335_v18  ;;  %v7481_v48 = vpop.xlane.xlu0 %2104  ;;  %v2263_v62 = vsub.f32 %v9759_v49, %v7420_v37  ;;  %v9763_v49 = vld [vmem:[#allocation13_spill] sm:$0xff] }
 0x4f8   :  { %3828 = vmatpush.msra.mxu0 %v5271_v56  ;;  %v1262_v2 = vmul.f32 %v7179_v35, %v1192_v8  ;;  %v2262_v56 = vsub.f32 %v6976_v11, %v7397_v33  ;;  %5389 = vpow2.f32 %v2336_v40 }
 0x4f9   :  { %5146 = vmatmul.msk.f32.gmra.mxu0 %vm411_vm7, %v9710_v59  ;;  %v7454_v3 = vpop.eup %5387 }
 0x4fa   :  { %1464 = vmatmul.f32.gmra.mxu1 %v1262_v2  ;;  %v2472_v25 = vsel %vm342_vm6, %v7454_v3, 0.0  ;;  %v7479_v13 = vpop.f32.mrf.mxu1  ;;  %v2338_v63 = vmul.f32 1.442695, %v2262_v56 }
 0x4fb   :  { %v1751_v59 = vpop.f32.mrf.mxu0 }
 0x4fc   :  { %v7457_v17 = vadd.f32 %v1751_v59, %v7139_v42 }
 0x4fe   :  { %v2139_v35 = vsel %vm342_vm6, %v7457_v17, -inf  ;;  %v1827_v18 = vpop.f32.mrf.mxu2 }
 0x4ff   :  { %v1195_v24 = vpop.f32.mrf.mxu3  ;;  %2140 = vmax.xlane.f32.xlu2 %v2139_v35  ;;  %2470 = vadd.xlane.f32.xlu0 %v2469_v38 }
 0x500   :  { %v1263_v42 = vmul.f32 %v7197_v0, %v1195_v24  ;;  %2473 = vadd.xlane.f32.xlu1 %v2472_v25  ;;  %v2163_v0 = vsel %vm342_vm6, %v7475_v28, -inf }
 0x501   :  { %5147 = vmatmul.msk.f32.gmra.mxu0 %vm411_vm7, %v9714_v53  ;;  %v7472_v53 = vadd.f32 %v1821_v34, %v7306_v60 }
 0x502   :  { %v7469_v5 = vpop.xlane.xlu1 %2107  ;;  %1467 = vmatmul.f32.gmra.mxu1 %v1263_v42  ;;  %v7502_v35 = vpop.f32.mrf.mxu1 }
 0x503   :  { %v1754_v55 = vpop.f32.mrf.mxu0  ;;  %v2160_v60 = vsel %vm342_vm6, %v7472_v53, -inf }
 0x504   :  { %v7493_v2 = vadd.f32 %v1754_v55, %v7166_v46  ;;  %v2340_v55 = vmul.f32 1.442695, %v2263_v62 }
 0x506   :  { %v2142_v38 = vsel %vm342_vm6, %v7493_v2, -inf  ;;  %v1830_v56 = vpop.f32.mrf.mxu2 }
 0x507   :  { %v1198_v34 = vpop.f32.mrf.mxu3  ;;  %2164 = vmax.xlane.f32.xlu2 %v2163_v0  ;;  %2161 = vmax.xlane.f32.xlu0 %v2160_v60  ;;  %v7520_v60 = vadd.f32 %v1827_v18, %v7356_v29 }
 0x508   :  { %v1264_v11 = vmul.f32 %v7218_v45, %v1198_v34  ;;  %v9760_v45 = vld [vmem:[#allocation69_spill] sm:$0xff] }
 0x509   :  { %5148 = vmatmul.msk.f32.gmra.mxu0 %vm411_vm7, %v9718_v1  ;;  %v7495_v1 = vpop.eup %5389  ;;  %9762 = vst [vmem:[#allocation10_spill] sm:$0xff] %v7520_v60 }
 0x50a   :  { %v7490_v33 = vpop.xlane.xlu2 %2110  ;;  %1470 = vmatmul.f32.gmra.mxu1 %v1264_v11  ;;  %v2475_v46 = vsel %vm342_vm6, %v7495_v1, 0.0 }
 0x50b   :  { %v2444_v8 = vpop.xlane.xlu1 %2443  ;;  %v1757_v27 = vpop.f32.mrf.mxu0 }
 0x50c   :  { %5391 = vrcp.f32 %v2444_v8  ;;  %v7498_v59 = vadd.f32 %v1757_v27, %v7184_v43  ;;  %v2645_v34 = vand.u32 2147483648, %v2444_v8  ;;  %v2643_v27 = vand.u32 2147483647, %v2444_v8 }
 0x50d   :  { %5393 = vpow2.f32 %v2338_v63  ;;  %vm2639_vm9 = vweird.f32 %v2444_v8 }
 0x50e   :  { %9758 = vst [vmem:[#allocation11_spill] sm:$0xff] %v7498_v59  ;;  %v2145_v24 = vsel %vm342_vm6, %v7498_v59, -inf  ;;  %vm2644_vm11 = vcmp.eq.f32.partialorder %v2643_v27, 8.507059e+37  ;;  %v1833_v59 = vpop.f32.mrf.mxu2 }
 0x50f   :  { %2476 = vadd.xlane.f32.xlu2 %v2475_v46  ;;  %2143 = vmax.xlane.f32.xlu0 %v2142_v38  ;;  %v9765_v46 = vld [vmem:[#allocation20_spill] sm:$0xff] }
 0x510   :  { %2146 = vmax.xlane.f32.xlu1 %v2145_v24  ;;  %v2264_v38 = vsub.f32 %v9765_v46, %v7447_v50  ;;  %v2166_v50 = vsel %vm342_vm6, %v7520_v60, -inf  ;;  %v9770_v60 = vld [vmem:[#allocation60_spill] sm:$0xff] }
 0x511   :  { %5149 = vmatmul.msk.f32.gmra.mxu0 %vm411_vm7, %v9760_v45 }
 0x512   :  { %v5392_v25 = vpop.eup %5391  ;;  %v7512_v43 = vpop.xlane.xlu0 %2113 }
 0x513   :  { %v2635_v37 = vmul.f32 %v5392_v25, %v2444_v8  ;;  %v7514_v42 = vpop.xlane.xlu2 %2446  ;;  %v7517_v40 = vpop.eup %5393  ;;  %vm2640_vm8 = vweird.f32 %v5392_v25 }
 0x514   :  { %5395 = vrcp.f32 %v7514_v42  ;;  %9761 = vst [vmem:[#allocation22_spill] sm:$0xff] %v7517_v40  ;;  %v1760_v63 = vpop.f32.mrf.mxu0  ;;  %v2478_v24 = vsel %vm342_vm6, %v7517_v40, 0.0  ;;  %vm2641_vm10 = vmor %vm2639_vm9, %vm2640_vm8  ;;  %v7541_v8 = vpop.f32.mrf.mxu1  ;;  %vm2654_vm13 = vweird.f32 %v7514_v42 }
 0x515   :  { %v2636_v0 = vsub.f32 1.0, %v2635_v37  ;;  %v7523_v45 = vadd.f32 %v1760_v63, %v9763_v49  ;;  %5397 = vpow2.f32 %v2340_v55  ;;  %v9766_v37 = vld [vmem:[#allocation59_spill] sm:$0xff]  ;;  %v2646_v49 = vor.u32 1.1754944e-38, %v2645_v34 }
 0x516   :  { %v7549_v34 = vadd.f32 %v1830_v56, %v7371_v16  ;;  %v2658_v16 = vand.u32 2147483647, %v7514_v42  ;;  %v9772_v56 = vld [vmem:[#allocation12_spill] sm:$0xff] }
 0x517   :  { %v2637_v11 = vmul.f32 %v5392_v25, %v2636_v0  ;;  %9764 = vst [vmem:[#allocation9_spill] sm:$0xff] %v7523_v45  ;;  %v2148_v29 = vsel %vm342_vm6, %v7523_v45, -inf  ;;  %v9767_v0 = vld [vmem:[#allocation33_spill] sm:$0xff]  ;;  %2479 = vadd.xlane.f32.xlu0 %v2478_v24 }
 0x518   :  { %v2265_v63 = vsub.f32 %v9767_v0, %v7481_v48  ;;  %2149 = vmax.xlane.f32.xlu2 %v2148_v29  ;;  %2167 = vmax.xlane.f32.xlu1 %v2166_v50  ;;  %v2342_v48 = vmul.f32 1.442695, %v2264_v38  ;;  %v9768_v45 = vld [vmem:[#allocation57_spill] sm:$0xff]  ;;  %v5302_v50 = vunpack.i.h.bf16 %v9770_v60  ;;  %vm2659_vm15 = vcmp.eq.f32.partialorder %v2658_v16, 8.507059e+37 }
 0x519   :  { %v2638_v62 = vadd.f32 %v5392_v25, %v2637_v11  ;;  %5150 = vmatmul.msk.f32.gmra.mxu0 %vm411_vm7, %v9766_v37  ;;  %v5297_v40 = vunpack.i.h.bf16 %v9768_v45 }
 0x51a   :  { %v7533_v18 = vpop.eup %5395  ;;  %v7539_v55 = vpop.xlane.xlu1 %2116 }
 0x51b   :  { %v2642_v11 = vsel %vm2641_vm10, %v5392_v25, %v2638_v62  ;;  %v2650_v46 = vmul.f32 %v7533_v18, %v7514_v42  ;;  %v7545_v37 = vpop.xlane.xlu0 %2449  ;;  %v2344_v25 = vmul.f32 1.442695, %v2265_v63  ;;  %v7553_v62 = vpop.eup %5397  ;;  %vm2655_vm12 = vweird.f32 %v7533_v18 }
 0x51c   :  { %v2647_v0 = vsel %vm2644_vm11, %v2646_v49, %v2642_v11  ;;  %5399 = vrcp.f32 %v7545_v37  ;;  %v1763_v27 = vpop.f32.mrf.mxu0  ;;  %9769 = vst [vmem:[#allocation58_spill] sm:$0xff] %v7553_v62  ;;  %v2660_v49 = vand.u32 2147483648, %v7514_v42  ;;  %v5307_v63 = vunpack.i.h.bf16 %v9772_v56  ;;  %vm2656_vm14 = vmor %vm2654_vm13, %vm2655_vm12 }
 0x51d   :  { %v2648_v24 = vmul.f32 %v7241_v39, %v2647_v0  ;;  %v2651_v29 = vsub.f32 1.0, %v2650_v46  ;;  %v7559_v11 = vadd.f32 %v1763_v27, %v7231_v7  ;;  %5401 = vpow2.f32 %v2342_v48  ;;  %v9773_v0 = vld [vmem:[#allocation71_spill] sm:$0xff] }
 0x51e   :  { %v2267_v39 = vsub.f32 %v7246_v31, %v7490_v33  ;;  %v2169_v7 = vsel %vm342_vm6, %v7549_v34, -inf  ;;  %5403 = vpow2.f32 %v2344_v25  ;;  %v2266_v31 = vsub.f32 %v7223_v36, %v7469_v5  ;;  %v9774_v36 = vld [vmem:[#allocation55_spill] sm:$0xff] }
 0x51f   :  { %v2652_v38 = vmul.f32 %v7533_v18, %v2651_v29  ;;  %9771 = vst [vmem:[#allocation24_spill] sm:$0xff] %v7559_v11  ;;  %5152 = vmatmul.msk.f32.vlgmr.msrb.gmra.mxu2 %vm342_vm6, %v2648_v24  ;;  %v2151_v48 = vsel %vm342_vm6, %v7559_v11, -inf  ;;  %v2481_v33 = vsel %vm342_vm6, %v7553_v62, 0.0  ;;  %v2661_v29 = vor.u32 1.1754944e-38, %v2660_v49 }
 0x520   :  { %3886 = vmatpush.msrb.mxu2 %v5297_v40  ;;  %2170 = vmax.xlane.f32.xlu2 %v2169_v7  ;;  %v5312_v5 = vunpack.i.h.bf16 %v9774_v36  ;;  %v2348_v42 = vmul.f32 1.442695, %v2267_v39  ;;  %v9775_v39 = vld [vmem:[#allocation50_spill] sm:$0xff]  ;;  %vm2669_vm2 = vweird.f32 %v7545_v37 }
 0x521   :  { %v2653_v46 = vadd.f32 %v7533_v18, %v2652_v38  ;;  %5151 = vmatmul.msk.f32.gmra.mxu0 %vm411_vm7, %v9773_v0  ;;  %2152 = vmax.xlane.f32.xlu0 %v2151_v48  ;;  %v7592_v38 = vpop.f32.mrf.mxu1  ;;  %v7597_v48 = vadd.f32 %v1833_v59, %v7384_v32  ;;  %v5316_v16 = vunpack.i.l.bf16 %v9775_v39  ;;  %v2675_v32 = vand.u32 2147483648, %v7545_v37 }
 0x522   :  { %v7574_v24 = vpop.eup %5399  ;;  %3887 = vmatpush.msrb.mxu2 %v5302_v50  ;;  %v7581_v40 = vpop.xlane.xlu1 %2452  ;;  %2482 = vadd.xlane.f32.xlu1 %v2481_v33  ;;  %v2346_v33 = vmul.f32 1.442695, %v2266_v31 }
 0x523   :  { %v2665_v27 = vmul.f32 %v7574_v24, %v7545_v37  ;;  %v7587_v25 = vpop.xlane.xlu2 %2119  ;;  %5405 = vrcp.f32 %v7581_v40  ;;  %v2657_v50 = vsel %vm2656_vm14, %v7533_v18, %v2653_v46  ;;  %v7594_v7 = vpop.eup %5401  ;;  %v5317_v46 = vunpack.i.h.bf16 %v9775_v39 }
 0x524   :  { %3888 = vmatpush.msrb.mxu2 %v5307_v63  ;;  %v2662_v49 = vsel %vm2659_vm15, %v2661_v29, %v2657_v50  ;;  %v7599_v62 = vpop.f32.mrf.mxu0  ;;  %v7604_v18 = vpop.eup %5403  ;;  %5407 = vpow2.f32 %v2348_v42  ;;  %vm2670_vm1 = vweird.f32 %v7574_v24  ;;  %v2484_v29 = vsel %vm342_vm6, %v7594_v7, 0.0  ;;  %v9776_v50 = vld [vmem:[#allocation29_spill] sm:$0xff] }
 0x525   :  { %v2666_v0 = vsub.f32 1.0, %v2665_v27  ;;  %v2663_v11 = vmul.f32 %v7264_v15, %v2662_v49  ;;  %v1836_v31 = vpop.f32.mrf.mxu2  ;;  %v2268_v15 = vsub.f32 %v7268_v22, %v7512_v43  ;;  %5409 = vpow2.f32 %v2346_v33  ;;  %vm7624_vm3 = vmor %vm2669_vm2, %vm2670_vm1 }
 0x526   :  { %3889 = vmatpush.msrb.mxu2 %v5312_v5  ;;  %v2673_v5 = vand.u32 2147483647, %v7545_v37  ;;  %v5321_v22 = vunpack.i.l.bf16 %v9776_v50  ;;  %v2487_v37 = vsel %vm342_vm6, %v7604_v18, 0.0  ;;  %v7633_v33 = vadd.f32 %v1836_v31, %v7391_v12 }
 0x527   :  { %v2667_v63 = vmul.f32 %v7574_v24, %v2666_v0  ;;  %5153 = vmatmul.msk.f32.gmra.mxu2 %vm342_vm6, %v2663_v11  ;;  %v2172_v11 = vsel %vm342_vm6, %v7597_v48, -inf  ;;  %v5322_v0 = vunpack.i.h.bf16 %v9776_v50  ;;  %v2676_v39 = vor.u32 1.1754944e-38, %v2675_v32 }
 0x528   :  { %3890 = vmatpush.msrb.mxu2 %v5316_v16  ;;  %2485 = vadd.xlane.f32.xlu2 %v2484_v29  ;;  %v2350_v50 = vmul.f32 1.442695, %v2268_v15  ;;  %vm2674_vm4 = vcmp.eq.f32.partialorder %v2673_v5, 8.507059e+37  ;;  %vm2684_vm8 = vweird.f32 %v7581_v40 }
 0x529   :  { %v5406_v59 = vpop.eup %5405  ;;  %v2668_v27 = vadd.f32 %v7574_v24, %v2667_v63  ;;  %2488 = vadd.xlane.f32.xlu0 %v2487_v37  ;;  %v2688_v37 = vand.u32 2147483647, %v7581_v40  ;;  %v7649_v43 = vpop.f32.mrf.mxu1 }
 0x52a   :  { %v2680_v42 = vmul.f32 %v5406_v59, %v7581_v40  ;;  %3891 = vmatpush.msrb.mxu2 %v5317_v46  ;;  %2173 = vmax.xlane.f32.xlu1 %v2172_v11  ;;  %v2690_v46 = vand.u32 2147483648, %v7581_v40  ;;  %v7641_v11 = vpop.xlane.xlu1 %2461  ;;  %v7644_v12 = vpop.eup %5407  ;;  %vm2685_vm5 = vweird.f32 %v5406_v59 }
 0x52b   :  { %v7630_v49 = vpop.xlane.xlu0 %2122  ;;  %v7635_v63 = vpop.xlane.xlu2 %2455  ;;  %v2672_v29 = vsel %vm7624_vm3, %v7574_v24, %v2668_v27  ;;  %v2270_v24 = vsub.f32 %v7309_v41, %v7587_v25  ;;  %vm2686_vm9 = vmor %vm2684_vm8, %vm2685_vm5  ;;  %v2493_v41 = vsel %vm342_vm6, %v7644_v12, 0.0  ;;  %vm2689_vm10 = vcmp.eq.f32.partialorder %v2688_v37, 8.507059e+37 }
 0x52c   :  { %v2681_v16 = vsub.f32 1.0, %v2680_v42  ;;  %5411 = vrcp.f32 %v7635_v63  ;;  %3892 = vmatpush.msrb.mxu2 %v5321_v22  ;;  %v2677_v42 = vsel %vm2674_vm4, %v2676_v39, %v2672_v29  ;;  %v7654_v27 = vpop.eup %5409  ;;  %v2269_v22 = vsub.f32 %v7289_v9, %v7539_v55 }
 0x52d   :  { %v7646_v31 = vpop.f32.mrf.mxu0  ;;  %v2678_v15 = vmul.f32 %v7283_v19, %v2677_v42  ;;  %5413 = vrcp.f32 %v7641_v11  ;;  %v2691_v39 = vor.u32 1.1754944e-38, %v2690_v46  ;;  %v2175_v19 = vsel %vm342_vm6, %v7633_v33, -inf }
 0x52e   :  { %v2682_v32 = vmul.f32 %v5406_v59, %v2681_v16  ;;  %3893 = vmatpush.msrb.mxu2 %v5322_v0  ;;  %5415 = vpow2.f32 %v2350_v50  ;;  %v2354_v0 = vmul.f32 1.442695, %v2270_v24  ;;  %v2490_v16 = vsel %vm342_vm6, %v7654_v27, 0.0 }
 0x52f   :  { %5154 = vmatmul.msk.f32.gmra.mxu2 %vm342_vm6, %v2678_v15  ;;  %v2352_v50 = vmul.f32 1.442695, %v2269_v22  ;;  %v7678_v24 = vadd.f32 %v7599_v62, %v7403_v51  ;;  %v2705_v15 = vand.u32 2147483648, %v7635_v63  ;;  %v2271_v22 = vsub.f32 %v7330_v52, %v7630_v49 }
 0x530   :  { %v2683_v5 = vadd.f32 %v5406_v59, %v2682_v32  ;;  %2494 = vadd.xlane.f32.xlu2 %v2493_v41  ;;  %vm2699_vm12 = vweird.f32 %v7635_v63  ;;  %vm2729_vm5 = vweird.f32 %v7641_v11 }
 0x531   :  { %2491 = vadd.xlane.f32.xlu0 %v2490_v16  ;;  %v7687_v41 = vpop.f32.mrf.mxu1  ;;  %v2706_v52 = vor.u32 1.1754944e-38, %v2705_v15  ;;  %v2356_v16 = vmul.f32 1.442695, %v2271_v22 }
 0x532   :  { %v2687_v25 = vsel %vm2686_vm9, %v5406_v59, %v2683_v5  ;;  %v5412_v40 = vpop.eup %5411  ;;  %2176 = vmax.xlane.f32.xlu1 %v2175_v19 }
 0x533   :  { %v7667_v9 = vpop.xlane.xlu0 %2458  ;;  %v2692_v55 = vsel %vm2689_vm10, %v2691_v39, %v2687_v25  ;;  %v2695_v29 = vmul.f32 %v5412_v40, %v7635_v63  ;;  %v7672_v32 = vpop.eup %5413  ;;  %vm2700_vm11 = vweird.f32 %v5412_v40 }
 0x534   :  { %5417 = vrcp.f32 %v7667_v9  ;;  %v2693_v46 = vmul.f32 %v7302_v4, %v2692_v55  ;;  %v7674_v37 = vpop.eup %5415  ;;  %v2703_v4 = vand.u32 2147483647, %v7635_v63  ;;  %v2725_v19 = vmul.f32 %v7672_v32, %v7641_v11  ;;  %vm2701_vm13 = vmor %vm2699_vm12, %vm2700_vm11 }
 0x535   :  { %v2696_v59 = vsub.f32 1.0, %v2695_v29  ;;  %5419 = vpow2.f32 %v2354_v0  ;;  %v2496_v25 = vsel %vm342_vm6, %v7674_v37, 0.0  ;;  %v2178_v0 = vsel %vm342_vm6, %v7678_v24, -inf }
 0x536   :  { %v1894_v42 = vpop.f32.mrf.mxu0  ;;  %5421 = vpow2.f32 %v2352_v50  ;;  %vm2704_vm14 = vcmp.eq.f32.partialorder %v2703_v4, 8.507059e+37  ;;  %v2726_v50 = vsub.f32 1.0, %v2725_v19  ;;  %vm2714_vm1 = vweird.f32 %v7667_v9 }
 0x537   :  { %v7682_v5 = vadd.f32 %v1894_v42, %v7450_v26  ;;  %v2697_v39 = vmul.f32 %v5412_v40, %v2696_v59  ;;  %5155 = vmatmul.msk.f32.gmra.mxu2 %vm342_vm6, %v2693_v46  ;;  %v2720_v59 = vand.u32 2147483648, %v7667_v9  ;;  %5423 = vpow2.f32 %v2356_v16 }
 0x538   :  { %v2727_v22 = vmul.f32 %v7672_v32, %v2726_v50  ;;  %vm2730_vm4 = vweird.f32 %v7672_v32  ;;  %v2735_v50 = vand.u32 2147483648, %v7641_v11 }
 0x539   :  { %v2184_v51 = vsel %vm342_vm6, %v7682_v5, -inf  ;;  %v2698_v62 = vadd.f32 %v5412_v40, %v2697_v39  ;;  %2179 = vmax.xlane.f32.xlu0 %v2178_v0  ;;  %vm2731_vm8 = vmor %vm2729_vm5, %vm2730_vm4 }
 0x53a   :  { %v5418_v26 = vpop.eup %5417  ;;  %2185 = vmax.xlane.f32.xlu2 %v2184_v51  ;;  %2497 = vadd.xlane.f32.xlu1 %v2496_v25  ;;  %v7708_v51 = vadd.f32 %v7646_v31, %v7430_v44  ;;  %v7718_v31 = vpop.f32.mrf.mxu1  ;;  %v2728_v16 = vadd.f32 %v7672_v32, %v2727_v22 }
 0x53b   :  { %v2710_v49 = vmul.f32 %v5418_v26, %v7667_v9  ;;  %v2702_v55 = vsel %vm2701_vm13, %v5412_v40, %v2698_v62  ;;  %v7700_v29 = vpop.eup %5419  ;;  %vm2715_vm15 = vweird.f32 %v5418_v26  ;;  %v2718_v40 = vand.u32 2147483647, %v7667_v9 }
 0x53c   :  { %v2707_v46 = vsel %vm2704_vm14, %v2706_v52, %v2702_v55  ;;  %v7704_v39 = vpop.eup %5421  ;;  %vm2716_vm2 = vmor %vm2714_vm1, %vm2715_vm15  ;;  %v2721_v62 = vor.u32 1.1754944e-38, %v2720_v59  ;;  %v2181_v25 = vsel %vm342_vm6, %v7708_v51, -inf  ;;  %v2732_v59 = vsel %vm2731_vm8, %v7672_v32, %v2728_v16 }
 0x53d   :  { %v2711_v63 = vsub.f32 1.0, %v2710_v49  ;;  %v2708_v15 = vmul.f32 %v7327_v30, %v2707_v46  ;;  %v2502_v30 = vsel %vm342_vm6, %v7700_v29, 0.0  ;;  %v2499_v44 = vsel %vm342_vm6, %v7704_v39, 0.0  ;;  %v7725_v55 = vpop.eup %5423 }
 0x53e   :  { %v1897_v42 = vpop.f32.mrf.mxu0  ;;  %vm2719_vm3 = vcmp.eq.f32.partialorder %v2718_v40, 8.507059e+37 }
 0x53f   :  { %v2712_v4 = vmul.f32 %v5418_v26, %v2711_v63  ;;  %5156 = vmatmul.msk.f32.gmra.mxu2 %vm342_vm6, %v2708_v15  ;;  %v7730_v46 = vadd.f32 %v1897_v42, %v7479_v13  ;;  %v2736_v15 = vor.u32 1.1754944e-38, %v2735_v50 }
 0x541   :  { %v2713_v19 = vadd.f32 %v5418_v26, %v2712_v4  ;;  %2182 = vmax.xlane.f32.xlu0 %v2181_v25  ;;  %v2187_v4 = vsel %vm342_vm6, %v7730_v46, -inf }
 0x542   :  { %2503 = vadd.xlane.f32.xlu2 %v2502_v30  ;;  %2500 = vadd.xlane.f32.xlu1 %v2499_v44  ;;  %v2156_v52 = vpop.xlane.xlu1 %2155  ;;  %v7739_v42 = vpop.f32.mrf.mxu1 }
 0x543   :  { %v2717_v9 = vsel %vm2716_vm2, %v5418_v26, %v2713_v19  ;;  %v2733_v26 = vand.u32 2147483647, %v7641_v11  ;;  %v2129_v11 = vpop.xlane.xlu0 %2128  ;;  %v2126_v30 = vpop.xlane.xlu2 %2125 }
 0x544   :  { %v2722_v49 = vsel %vm2719_vm3, %v2721_v62, %v2717_v9  ;;  %v2273_v62 = vsub.f32 %v7364_v14, %v2129_v11  ;;  %v2272_v25 = vsub.f32 %v7350_v58, %v2126_v30  ;;  %v9779_v30 = vld [vmem:[#allocation62_spill] sm:$0xff] }
 0x545   :  { %v2723_v0 = vmul.f32 %v7347_v61, %v2722_v49  ;;  %v2505_v61 = vsel %vm342_vm6, %v7725_v55, 0.0  ;;  %vm2734_vm9 = vcmp.eq.f32.partialorder %v2733_v26, 8.507059e+37 }
 0x546   :  { %v1900_v63 = vpop.f32.mrf.mxu0  ;;  %v2737_v13 = vsel %vm2734_vm9, %v2736_v15, %v2732_v59  ;;  %v2358_v50 = vmul.f32 1.442695, %v2272_v25  ;;  %v2282_v59 = vsub.f32 %v7375_v6, %v2156_v52 }
 0x547   :  { %5157 = vmatmul.msk.f32.gmra.mxu2 %vm342_vm6, %v2723_v0  ;;  %v7742_v19 = vadd.f32 %v1900_v63, %v7502_v35  ;;  %v2738_v32 = vmul.f32 %v7323_v20, %v2737_v13  ;;  %v2360_v0 = vmul.f32 1.442695, %v2273_v62 }
 0x549   :  { %2188 = vmax.xlane.f32.xlu0 %v2187_v4  ;;  %v2190_v49 = vsel %vm342_vm6, %v7742_v19, -inf }
 0x54a   :  { %2506 = vadd.xlane.f32.xlu2 %v2505_v61  ;;  %v2468_v40 = vpop.xlane.xlu1 %2467  ;;  %v7756_v58 = vpop.f32.mrf.mxu1 }
 0x54b   :  { %5425 = vrcp.f32 %v2468_v40  ;;  %v2763_v26 = vand.u32 2147483647, %v2468_v40  ;;  %v2765_v35 = vand.u32 2147483648, %v2468_v40  ;;  %vm2759_vm11 = vweird.f32 %v2468_v40 }
 0x54c   :  { %5427 = vpow2.f32 %v2360_v0 }
 0x54d   :  { %5429 = vpow2.f32 %v2358_v50  ;;  %v2766_v13 = vor.u32 1.1754944e-38, %v2765_v35  ;;  %vm2764_vm13 = vcmp.eq.f32.partialorder %v2763_v26, 8.507059e+37 }
 0x54e   :  { %v1903_v22 = vpop.f32.mrf.mxu0 }
 0x54f   :  { %5158 = vmatmul.msk.f32.gmra.mxu2 %vm342_vm6, %v2738_v32  ;;  %v7751_v20 = vadd.f32 %v1903_v22, %v7541_v8  ;;  %v9780_v32 = vld [vmem:[#allocation52_spill] sm:$0xff] }
 0x550   :  { %v5287_v0 = vunpack.i.h.bf16 %v9780_v32 }
 0x551   :  { %v5426_v44 = vpop.eup %5425  ;;  %2191 = vmax.xlane.f32.xlu0 %v2190_v49  ;;  %v2193_v8 = vsel %vm342_vm6, %v7751_v20, -inf }
 0x552   :  { %v2755_v9 = vmul.f32 %v5426_v44, %v2468_v40  ;;  %vm2760_vm10 = vweird.f32 %v5426_v44  ;;  %v5286_v40 = vunpack.i.l.bf16 %v9780_v32  ;;  %v5306_v32 = vunpack.i.l.bf16 %v9772_v56 }
 0x553   :  { %vm2761_vm12 = vmor %vm2759_vm11, %vm2760_vm10 }
 0x554   :  { %v2756_v16 = vsub.f32 1.0, %v2755_v9  ;;  %v7766_v9 = vpop.eup %5427 }
 0x556   :  { %v1906_v63 = vpop.f32.mrf.mxu0  ;;  %v2757_v61 = vmul.f32 %v5426_v44, %v2756_v16  ;;  %v1961_v16 = vpop.f32.mrf.mxu2 }
 0x557   :  { %v7754_v14 = vadd.f32 %v1906_v63, %v7592_v38  ;;  %v2378_v38 = vmul.f32 1.442695, %v2282_v59  ;;  %v7778_v63 = vpop.f32.mrf.mxu1 }
 0x558   :  { %v2758_v15 = vadd.f32 %v5426_v44, %v2757_v61 }
 0x559   :  { %v2196_v4 = vsel %vm342_vm6, %v7754_v14, -inf  ;;  %2194 = vmax.xlane.f32.xlu0 %v2193_v8  ;;  %5431 = vpow2.f32 %v2378_v38 }
 0x55a   :  { %2197 = vmax.xlane.f32.xlu1 %v2196_v4  ;;  %v2762_v11 = vsel %vm2761_vm12, %v5426_v44, %v2758_v15  ;;  %v2132_v52 = vpop.xlane.xlu2 %2131  ;;  %v7772_v44 = vpop.eup %5429 }
 0x55b   :  { %v2767_v22 = vsel %vm2764_vm13, %v2766_v13, %v2762_v11  ;;  %v2274_v62 = vsub.f32 %v7400_v21, %v2132_v52  ;;  %v9781_v21 = vld [vmem:[#allocation70_spill] sm:$0xff]  ;;  %v2508_v61 = vsel %vm342_vm6, %v7772_v44, 0.0  ;;  %v5296_v13 = vunpack.i.l.bf16 %v9768_v45 }
 0x55c   :  { %v2768_v6 = vmul.f32 %v9779_v30, %v2767_v22  ;;  %v5291_v35 = vunpack.i.l.bf16 %v9781_v21  ;;  %v5292_v59 = vunpack.i.h.bf16 %v9781_v21  ;;  %v5301_v22 = vunpack.i.l.bf16 %v9770_v60 }
 0x55d   :  { %v2362_v50 = vmul.f32 1.442695, %v2274_v62 }
 0x55e   :  { %v1909_v25 = vpop.f32.mrf.mxu0  ;;  %5160 = vmatmul.msk.f32.vlgmr.msrb.gmra.mxu0 %vm342_vm6, %v2768_v6  ;;  %v7797_v45 = vpop.f32.mrf.mxu2 }
 0x55f   :  { %v7769_v49 = vadd.f32 %v1909_v25, %v7649_v43  ;;  %3951 = vmatpush.msrb.mxu0 %v5286_v40  ;;  %5433 = vpow2.f32 %v2362_v50  ;;  %v2511_v43 = vsel %vm342_vm6, %v7766_v9, 0.0  ;;  %v7785_v4 = vpop.eup %5431  ;;  %v7800_v40 = vpop.f32.mrf.mxu1 }
 0x560   :  { %v2538_v6 = vsel %vm342_vm6, %v7785_v4, 0.0 }
 0x561   :  { %v2199_v26 = vsel %vm342_vm6, %v7769_v49, -inf  ;;  %3952 = vmatpush.msrb.mxu0 %v5287_v0  ;;  %2509 = vadd.xlane.f32.xlu0 %v2508_v61 }
 0x562   :  { %2200 = vmax.xlane.f32.xlu2 %v2199_v26  ;;  %2512 = vadd.xlane.f32.xlu1 %v2511_v43  ;;  %v2135_v15 = vpop.xlane.xlu0 %2134  ;;  %v2465_v11 = vpop.xlane.xlu2 %2464 }
 0x563   :  { %3953 = vmatpush.msrb.mxu0 %v5291_v35  ;;  %v2275_v8 = vsub.f32 %v7416_v10, %v2135_v15  ;;  %5435 = vrcp.f32 %v2465_v11  ;;  %v5311_v10 = vunpack.i.l.bf16 %v9774_v36  ;;  %v2750_v61 = vand.u32 2147483648, %v2465_v11 }
 0x564   :  { %vm2744_vm15 = vweird.f32 %v2465_v11 }
 0x565   :  { %3954 = vmatpush.msrb.mxu0 %v5292_v59  ;;  %v7789_v38 = vpop.eup %5433  ;;  %v2364_v30 = vmul.f32 1.442695, %v2275_v8  ;;  %v7811_v8 = vadd.f32 %v1961_v16, %v7687_v41 }
 0x566   :  { %v2514_v52 = vsel %vm342_vm6, %v7789_v38, 0.0  ;;  %v7808_v59 = vpop.f32.mrf.mxu2 }
 0x567   :  { %3955 = vmatpush.msrb.mxu0 %v5296_v13  ;;  %5437 = vpow2.f32 %v2364_v30  ;;  %v2748_v13 = vand.u32 2147483647, %v2465_v11  ;;  %9782 = vst [vmem:[#allocation64_spill] sm:$0xff] %v7811_v8  ;;  %v2202_v16 = vsel %vm342_vm6, %v7811_v8, -inf }
 0x569   :  { %3956 = vmatpush.msrb.mxu0 %v5301_v22  ;;  %v5436_v60 = vpop.eup %5435  ;;  %vm2749_vm2 = vcmp.eq.f32.partialorder %v2748_v13, 8.507059e+37 }
 0x56a   :  { %2539 = vadd.xlane.f32.xlu2 %v2538_v6  ;;  %2515 = vadd.xlane.f32.xlu1 %v2514_v52  ;;  %v2138_v62 = vpop.xlane.xlu1 %2137  ;;  %v2159_v25 = vpop.xlane.xlu0 %2158  ;;  %v2740_v0 = vmul.f32 %v5436_v60, %v2465_v11  ;;  %vm2745_vm14 = vweird.f32 %v5436_v60  ;;  %v2751_v52 = vor.u32 1.1754944e-38, %v2750_v61 }
 0x56b   :  { %3957 = vmatpush.msrb.mxu0 %v5306_v32  ;;  %v2276_v50 = vsub.f32 %v7439_v47, %v2138_v62  ;;  %v2283_v35 = vsub.f32 %v7435_v23, %v2159_v25  ;;  %v7815_v6 = vpop.f32.mrf.mxu1  ;;  %vm2746_vm1 = vmor %vm2744_vm15, %vm2745_vm14 }
 0x56c   :  { %v2741_v56 = vsub.f32 1.0, %v2740_v0 }
 0x56d   :  { %3958 = vmatpush.msrb.mxu0 %v5311_v10  ;;  %v7803_v26 = vpop.eup %5437  ;;  %v2366_v21 = vmul.f32 1.442695, %v2276_v50  ;;  %v2380_v47 = vmul.f32 1.442695, %v2283_v35 }
 0x56e   :  { %v2517_v43 = vsel %vm342_vm6, %v7803_v26, 0.0  ;;  %v2742_v36 = vmul.f32 %v5436_v60, %v2741_v56 }
 0x56f   :  { %5439 = vpow2.f32 %v2366_v21  ;;  %2518 = vadd.xlane.f32.xlu0 %v2517_v43 }
 0x570   :  { %v2743_v15 = vadd.f32 %v5436_v60, %v2742_v36  ;;  %v7833_v36 = vpop.f32.mrf.mxu2 }
 0x572   :  { %v2141_v22 = vpop.xlane.xlu2 %2140  ;;  %v2471_v30 = vpop.xlane.xlu0 %2470  ;;  %v2747_v10 = vsel %vm2746_vm1, %v5436_v60, %v2743_v15 }
 0x573   :  { %v7813_v23 = vpop.xlane.xlu1 %2473  ;;  %5441 = vrcp.f32 %v2471_v30  ;;  %v2752_v62 = vsel %vm2749_vm2, %v2751_v52, %v2747_v10  ;;  %v2277_v61 = vsub.f32 %v7457_v17, %v2141_v22  ;;  %v2780_v10 = vand.u32 2147483648, %v2471_v30 }
 0x574   :  { %5443 = vrcp.f32 %v7813_v23  ;;  %v2753_v11 = vmul.f32 %v7413_v54, %v2752_v62  ;;  %vm2774_vm4 = vweird.f32 %v2471_v30  ;;  %v7843_v17 = vadd.f32 %v7797_v45, %v7718_v31 }
 0x575   :  { %v7818_v32 = vpop.eup %5439  ;;  %5445 = vpow2.f32 %v2380_v47  ;;  %v7836_v47 = vpop.f32.mrf.mxu1  ;;  %v2781_v22 = vor.u32 1.1754944e-38, %v2780_v10  ;;  %vm2789_vm10 = vweird.f32 %v7813_v23  ;;  %v2793_v31 = vand.u32 2147483647, %v7813_v23 }
 0x576   :  { %v2520_v41 = vsel %vm342_vm6, %v7818_v32, 0.0  ;;  %5159 = vmatmul.msk.f32.gmra.mxu2 %vm342_vm6, %v2753_v11  ;;  %v2368_v11 = vmul.f32 1.442695, %v2277_v61 }
 0x577   :  { %2521 = vadd.xlane.f32.xlu1 %v2520_v41  ;;  %2203 = vmax.xlane.f32.xlu0 %v2202_v16  ;;  %v2778_v16 = vand.u32 2147483647, %v2471_v30  ;;  %vm2794_vm12 = vcmp.eq.f32.partialorder %v2793_v31, 8.507059e+37 }
 0x579   :  { %v5442_v25 = vpop.eup %5441  ;;  %vm2779_vm9 = vcmp.eq.f32.partialorder %v2778_v16, 8.507059e+37 }
 0x57a   :  { %v7826_v0 = vpop.eup %5443  ;;  %v2770_v50 = vmul.f32 %v5442_v25, %v2471_v30  ;;  %v2165_v56 = vpop.xlane.xlu2 %2164  ;;  %vm2775_vm3 = vweird.f32 %v5442_v25  ;;  %v2795_v30 = vand.u32 2147483648, %v7813_v23 }
 0x57b   :  { %v2162_v21 = vpop.xlane.xlu0 %2161  ;;  %v7828_v60 = vpop.eup %5445  ;;  %v2785_v35 = vmul.f32 %v7826_v0, %v7813_v23  ;;  %vm2776_vm5 = vmor %vm2774_vm4, %vm2775_vm3  ;;  %vm2790_vm8 = vweird.f32 %v7826_v0 }
 0x57c   :  { %9783 = vst [vmem:[#allocation17_spill] sm:$0xff] %v7828_v60  ;;  %v2284_v43 = vsub.f32 %v7472_v53, %v2162_v21  ;;  %v2771_v54 = vsub.f32 1.0, %v2770_v50  ;;  %v2541_v62 = vsel %vm342_vm6, %v7828_v60, 0.0  ;;  %vm7858_vm11 = vmor %vm2789_vm10, %vm2790_vm8 }
 0x57d   :  { %v2786_v15 = vsub.f32 1.0, %v2785_v35  ;;  %v7873_v16 = vpop.f32.mrf.mxu1 }
 0x57e   :  { %v2382_v13 = vmul.f32 1.442695, %v2284_v43  ;;  %v2772_v52 = vmul.f32 %v5442_v25, %v2771_v54 }
 0x57f   :  { %v2787_v41 = vmul.f32 %v7826_v0, %v2786_v15  ;;  %2542 = vadd.xlane.f32.xlu1 %v2541_v62  ;;  %v7864_v62 = vpop.f32.mrf.mxu0 }
 0x580   :  { %5447 = vpow2.f32 %v2382_v13  ;;  %v2773_v53 = vadd.f32 %v5442_v25, %v2772_v52  ;;  %v7856_v13 = vpop.f32.mrf.mxu2 }
 0x581   :  { %v2788_v43 = vadd.f32 %v7826_v0, %v2787_v41  ;;  %v2285_v41 = vsub.f32 %v7475_v28, %v2165_v56 }
 0x582   :  { %v2477_v50 = vpop.xlane.xlu2 %2476  ;;  %v2777_v35 = vsel %vm2776_vm5, %v5442_v25, %v2773_v53  ;;  %v2796_v53 = vor.u32 1.1754944e-38, %v2795_v30 }
 0x583   :  { %v2144_v21 = vpop.xlane.xlu0 %2143  ;;  %5449 = vrcp.f32 %v2477_v50  ;;  %v7847_v54 = vpop.xlane.xlu1 %2146  ;;  %v2782_v15 = vsel %vm2779_vm9, %v2781_v22, %v2777_v35  ;;  %v2792_v23 = vsel %vm7858_vm11, %v7826_v0, %v2788_v43  ;;  %v2810_v43 = vand.u32 2147483648, %v2477_v50 }
 0x584   :  { %v2278_v61 = vsub.f32 %v7493_v2, %v2144_v21  ;;  %5451 = vpow2.f32 %v2368_v11  ;;  %v2783_v45 = vmul.f32 %v7452_v57, %v2782_v15  ;;  %v2205_v2 = vsel %vm342_vm6, %v7843_v17, -inf }
 0x585   :  { %v2797_v56 = vsel %vm2794_vm12, %v2796_v53, %v2792_v23  ;;  %v2808_v31 = vand.u32 2147483647, %v2477_v50  ;;  %vm2804_vm14 = vweird.f32 %v2477_v50  ;;  %v7896_v23 = vadd.f32 %v7808_v59, %v7739_v42 }
 0x586   :  { %v7854_v25 = vpop.eup %5447  ;;  %v2370_v10 = vmul.f32 1.442695, %v2278_v61  ;;  %5161 = vmatmul.msk.f32.gmra.mxu0 %vm342_vm6, %v2783_v45  ;;  %v2384_v61 = vmul.f32 1.442695, %v2285_v41  ;;  %v2798_v30 = vmul.f32 %v7454_v3, %v2797_v56  ;;  %v7900_v56 = vpop.f32.mrf.mxu1 }
 0x587   :  { %9784 = vst [vmem:[#allocation63_spill] sm:$0xff] %v7854_v25  ;;  %2206 = vmax.xlane.f32.xlu1 %v2205_v2  ;;  %v2544_v57 = vsel %vm342_vm6, %v7854_v25, 0.0  ;;  %v7898_v53 = vpop.f32.mrf.mxu0  ;;  %vm2809_vm1 = vcmp.eq.f32.partialorder %v2808_v31, 8.507059e+37 }
 0x588   :  { %2545 = vadd.xlane.f32.xlu2 %v2544_v57  ;;  %5453 = vpow2.f32 %v2370_v10  ;;  %v7890_v2 = vpop.f32.mrf.mxu2  ;;  %9789 = vst [vmem:[#allocation65_spill] sm:$0xff] %v7896_v23 }
 0x589   :  { %v5450_v11 = vpop.eup %5449 }
 0x58a   :  { %v2800_v22 = vmul.f32 %v5450_v11, %v2477_v50  ;;  %v7879_v35 = vpop.eup %5451  ;;  %vm2805_vm13 = vweird.f32 %v5450_v11 }
 0x58b   :  { %v7875_v21 = vpop.xlane.xlu2 %2149  ;;  %v7877_v28 = vpop.xlane.xlu0 %2479  ;;  %9787 = vst [vmem:[#allocation41_spill] sm:$0xff] %v7879_v35  ;;  %v2523_v52 = vsel %vm342_vm6, %v7879_v35, 0.0  ;;  %vm2806_vm15 = vmor %vm2804_vm14, %vm2805_vm13 }
 0x58c   :  { %v7881_v15 = vpop.xlane.xlu1 %2167  ;;  %5455 = vrcp.f32 %v7877_v28  ;;  %v2801_v0 = vsub.f32 1.0, %v2800_v22  ;;  %v2811_v22 = vor.u32 1.1754944e-38, %v2810_v43  ;;  %vm2819_vm3 = vweird.f32 %v7877_v28 }
 0x58d   :  { %5457 = vpow2.f32 %v2384_v61 }
 0x58e   :  { %v2802_v45 = vmul.f32 %v5450_v11, %v2801_v0  ;;  %v7887_v10 = vpop.eup %5453  ;;  %5162 = vmatmul.msk.f32.gmra.mxu0 %vm342_vm6, %v2798_v30 }
 0x58f   :  { %9788 = vst [vmem:[#allocation27_spill] sm:$0xff] %v7887_v10  ;;  %2524 = vadd.xlane.f32.xlu1 %v2523_v52  ;;  %v2526_v57 = vsel %vm342_vm6, %v7887_v10, 0.0  ;;  %v2825_v10 = vand.u32 2147483648, %v7877_v28 }
 0x590   :  { %v2803_v41 = vadd.f32 %v5450_v11, %v2802_v45  ;;  %2527 = vadd.xlane.f32.xlu0 %v2526_v57  ;;  %v2208_v57 = vsel %vm342_vm6, %v7896_v23, -inf }
 0x592   :  { %v5456_v3 = vpop.eup %5455  ;;  %v2807_v50 = vsel %vm2806_vm15, %v5450_v11, %v2803_v41  ;;  %v9791_v41 = vld [vmem:[#allocation24_spill] sm:$0xff] }
 0x593   :  { %v2815_v61 = vmul.f32 %v5456_v3, %v7877_v28  ;;  %v2171_v0 = vpop.xlane.xlu2 %2170  ;;  %v2812_v8 = vsel %vm2809_vm1, %v2811_v22, %v2807_v50  ;;  %v7907_v59 = vpop.eup %5457  ;;  %vm2820_vm2 = vweird.f32 %v5456_v3 }
 0x594   :  { %v2287_v30 = vsub.f32 %v7549_v34, %v2171_v0  ;;  %v2153_v52 = vpop.xlane.xlu0 %2152  ;;  %9790 = vst [vmem:[#allocation45_spill] sm:$0xff] %v7907_v59  ;;  %v2813_v11 = vmul.f32 %v7495_v1, %v2812_v8  ;;  %v2823_v34 = vand.u32 2147483647, %v7877_v28  ;;  %vm7921_vm4 = vmor %vm2819_vm3, %vm2820_vm2  ;;  %v7929_v8 = vadd.f32 %v7856_v13, %v7778_v63 }
 0x595   :  { %v7904_v45 = vpop.xlane.xlu1 %2482  ;;  %v2816_v42 = vsub.f32 1.0, %v2815_v61  ;;  %v2281_v22 = vsub.f32 %v9791_v41, %v2153_v52  ;;  %v9792_v61 = vld [vmem:[#allocation11_spill] sm:$0xff]  ;;  %v2826_v52 = vor.u32 1.1754944e-38, %v2825_v10 }
 0x596   :  { %5459 = vrcp.f32 %v7904_v45  ;;  %v2388_v43 = vmul.f32 1.442695, %v2287_v30  ;;  %v2279_v0 = vsub.f32 %v9792_v61, %v7847_v54  ;;  %5163 = vmatmul.msk.f32.gmra.mxu0 %vm342_vm6, %v2813_v11  ;;  %v2547_v30 = vsel %vm342_vm6, %v7907_v59, 0.0  ;;  %9795 = vst [vmem:[#allocation30_spill] sm:$0xff] %v7929_v8  ;;  %v1979_v54 = vpop.f32.mrf.mxu2 }
 0x597   :  { %v2817_v31 = vmul.f32 %v5456_v3, %v2816_v42  ;;  %2209 = vmax.xlane.f32.xlu1 %v2208_v57  ;;  %v7935_v57 = vpop.f32.mrf.mxu0  ;;  %vm2824_vm5 = vcmp.eq.f32.partialorder %v2823_v34, 8.507059e+37  ;;  %v2376_v11 = vmul.f32 1.442695, %v2281_v22  ;;  %v9798_v22 = vld [vmem:[#allocation10_spill] sm:$0xff]  ;;  %vm2834_vm9 = vweird.f32 %v7904_v45 }
 0x598   :  { %5461 = vpow2.f32 %v2388_v43  ;;  %2548 = vadd.xlane.f32.xlu0 %v2547_v30  ;;  %v2372_v63 = vmul.f32 1.442695, %v2279_v0  ;;  %v2286_v30 = vsub.f32 %v9798_v22, %v7881_v15  ;;  %v2214_v0 = vsel %vm342_vm6, %v7929_v8, -inf }
 0x599   :  { %v2818_v50 = vadd.f32 %v5456_v3, %v2817_v31  ;;  %v2840_v22 = vand.u32 2147483648, %v7904_v45 }
 0x59b   :  { %v7931_v43 = vpop.xlane.xlu2 %2485  ;;  %v2822_v28 = vsel %vm7921_vm4, %v5456_v3, %v2818_v50  ;;  %v7948_v3 = vadd.f32 %v7833_v36, %v7756_v58  ;;  %v7950_v50 = vpop.f32.mrf.mxu1  ;;  %v7960_v58 = vadd.f32 %v1979_v54, %v7815_v6 }
 0x59c   :  { %v7925_v1 = vpop.eup %5459  ;;  %5463 = vrcp.f32 %v7931_v43  ;;  %v7942_v13 = vpop.xlane.xlu0 %2488  ;;  %v2827_v10 = vsel %vm2824_vm5, %v2826_v52, %v2822_v28  ;;  %v9799_v52 = vld [vmem:[#allocation22_spill] sm:$0xff]  ;;  %vm2849_vm13 = vweird.f32 %v7931_v43 }
 0x59d   :  { %v2830_v31 = vmul.f32 %v7925_v1, %v7904_v45  ;;  %v7940_v41 = vpop.xlane.xlu1 %2173  ;;  %9797 = vst [vmem:[#allocation26_spill] sm:$0xff] %v7948_v3  ;;  %5465 = vrcp.f32 %v7942_v13  ;;  %v2828_v28 = vmul.f32 %v9799_v52, %v2827_v10  ;;  %v2211_v15 = vsel %vm342_vm6, %v7948_v3, -inf  ;;  %v9803_v3 = vld [vmem:[#allocation9_spill] sm:$0xff] }
 0x59e   :  { %v7944_v61 = vpop.eup %5461  ;;  %5467 = vpow2.f32 %v2376_v11  ;;  %9800 = vst [vmem:[#allocation44_spill] sm:$0xff] %v7960_v58  ;;  %v2838_v11 = vand.u32 2147483647, %v7904_v45  ;;  %vm2835_vm8 = vweird.f32 %v7925_v1  ;;  %v2220_v8 = vsel %vm342_vm6, %v7960_v58, -inf }
 0x59f   :  { %9796 = vst [vmem:[#allocation35_spill] sm:$0xff] %v7944_v61  ;;  %v2831_v34 = vsub.f32 1.0, %v2830_v31  ;;  %2215 = vmax.xlane.f32.xlu1 %v2214_v0  ;;  %5469 = vpow2.f32 %v2372_v63  ;;  %v2553_v36 = vsel %vm342_vm6, %v7944_v61, 0.0  ;;  %5164 = vmatmul.msk.f32.gmra.mxu0 %vm342_vm6, %v2828_v28  ;;  %v7992_v59 = vpop.f32.mrf.mxu0  ;;  %vm8002_vm10 = vmor %vm2834_vm9, %vm2835_vm8  ;;  %v2841_v45 = vor.u32 1.1754944e-38, %v2840_v22 }
 0x5a0   :  { %2554 = vadd.xlane.f32.xlu2 %v2553_v36  ;;  %2212 = vmax.xlane.f32.xlu0 %v2211_v15  ;;  %vm8006_vm11 = vcmp.eq.f32.partialorder %v2838_v11, 8.507059e+37  ;;  %v2855_v11 = vand.u32 2147483648, %v7931_v43  ;;  %v2853_v22 = vand.u32 2147483647, %v7931_v43  ;;  %vm2864_vm3 = vweird.f32 %v7942_v13 }
 0x5a1   :  { %v2832_v42 = vmul.f32 %v7925_v1, %v2831_v34  ;;  %v2386_v34 = vmul.f32 1.442695, %v2286_v30  ;;  %v1982_v30 = vpop.f32.mrf.mxu2 }
 0x5a2   :  { %v7964_v31 = vpop.eup %5463  ;;  %v7990_v61 = vadd.f32 %v1982_v30, %v7836_v47  ;;  %vm2854_vm15 = vcmp.eq.f32.partialorder %v2853_v22, 8.507059e+37 }
 0x5a3   :  { %v2845_v10 = vmul.f32 %v7964_v31, %v7931_v43  ;;  %v7972_v6 = vpop.xlane.xlu2 %2494  ;;  %v7974_v54 = vpop.eup %5465  ;;  %v2833_v63 = vadd.f32 %v7925_v1, %v2832_v42  ;;  %vm2850_vm12 = vweird.f32 %v7964_v31 }
 0x5a4   :  { %5471 = vrcp.f32 %v7972_v6  ;;  %v2860_v28 = vmul.f32 %v7974_v54, %v7942_v13  ;;  %v7983_v15 = vpop.xlane.xlu0 %2491  ;;  %v7987_v42 = vpop.eup %5467  ;;  %9802 = vst [vmem:[#allocation15_spill] sm:$0xff] %v7990_v61  ;;  %vm8031_vm14 = vmor %vm2849_vm13, %vm2850_vm12  ;;  %vm2865_vm1 = vweird.f32 %v7974_v54  ;;  %vm2894_vm12 = vweird.f32 %v7972_v6 }
 0x5a5   :  { %v2177_v0 = vpop.xlane.xlu1 %2176  ;;  %v2846_v52 = vsub.f32 1.0, %v2845_v10  ;;  %9801 = vst [vmem:[#allocation37_spill] sm:$0xff] %v7987_v42  ;;  %v2280_v10 = vsub.f32 %v9803_v3, %v7875_v21  ;;  %5473 = vrcp.f32 %v7983_v15  ;;  %v8011_v3 = vpop.f32.mrf.mxu1  ;;  %vm8075_vm4 = vmor %vm2864_vm3, %vm2865_vm1  ;;  %vm2879_vm5 = vweird.f32 %v7983_v15 }
 0x5a6   :  { %v2289_v36 = vsub.f32 %v7633_v33, %v2177_v0  ;;  %v7998_v33 = vpop.eup %5469  ;;  %5475 = vpow2.f32 %v2386_v34  ;;  %v2861_v58 = vsub.f32 1.0, %v2860_v28  ;;  %v2837_v34 = vsel %vm8002_vm10, %v7925_v1, %v2833_v63 }
 0x5a7   :  { %9804 = vst [vmem:[#allocation49_spill] sm:$0xff] %v7998_v33  ;;  %v2847_v30 = vmul.f32 %v7964_v31, %v2846_v52  ;;  %2221 = vmax.xlane.f32.xlu1 %v2220_v8  ;;  %v2535_v52 = vsel %vm342_vm6, %v7987_v42, 0.0  ;;  %v2842_v28 = vsel %vm8006_vm11, %v2841_v45, %v2837_v34  ;;  %v2529_v1 = vsel %vm342_vm6, %v7998_v33, 0.0 }
 0x5a8   :  { %v2392_v21 = vmul.f32 1.442695, %v2289_v36  ;;  %2536 = vadd.xlane.f32.xlu2 %v2535_v52  ;;  %v2374_v8 = vmul.f32 1.442695, %v2280_v10  ;;  %2530 = vadd.xlane.f32.xlu0 %v2529_v1  ;;  %v2862_v45 = vmul.f32 %v7974_v54, %v2861_v58  ;;  %v2856_v42 = vor.u32 1.1754944e-38, %v2855_v11  ;;  %v2046_v11 = vpop.f32.mrf.mxu0 }
 0x5a9   :  { %v2848_v35 = vadd.f32 %v7964_v31, %v2847_v30  ;;  %v9811_v30 = vld [vmem:[#allocation58_spill] sm:$0xff]  ;;  %v2223_v58 = vsel %vm342_vm6, %v7990_v61, -inf }
 0x5aa   :  { %5477 = vpow2.f32 %v2392_v21  ;;  %v8021_v36 = vpop.eup %5471  ;;  %v2843_v21 = vmul.f32 %v9811_v30, %v2842_v28  ;;  %v2863_v63 = vadd.f32 %v7974_v54, %v2862_v45  ;;  %v2885_v30 = vand.u32 2147483648, %v7983_v15 }
 0x5ab   :  { %v2890_v0 = vmul.f32 %v8021_v36, %v7972_v6  ;;  %v5474_v47 = vpop.eup %5473  ;;  %v2852_v10 = vsel %vm8031_vm14, %v7964_v31, %v2848_v35  ;;  %vm2895_vm8 = vweird.f32 %v8021_v36 }
 0x5ac   :  { %v8046_v52 = vpop.eup %5475  ;;  %v2875_v25 = vmul.f32 %v5474_v47, %v7983_v15  ;;  %5165 = vmatmul.msk.f32.gmra.mxu0 %vm342_vm6, %v2843_v21  ;;  %v8051_v28 = vpop.xlane.xlu0 %2179  ;;  %v2857_v31 = vsel %vm2854_vm15, %v2856_v42, %v2852_v10  ;;  %vm2880_vm2 = vweird.f32 %v5474_v47  ;;  %vm8104_vm13 = vmor %vm2894_vm12, %vm2895_vm8 }
 0x5ad   :  { %v8038_v43 = vpop.xlane.xlu2 %2185  ;;  %v8041_v34 = vpop.xlane.xlu1 %2497  ;;  %9812 = vst [vmem:[#allocation75_spill] sm:$0xff] %v8046_v52  ;;  %v2891_v33 = vsub.f32 1.0, %v2890_v0  ;;  %v2883_v0 = vand.u32 2147483647, %v7983_v15  ;;  %v2858_v61 = vmul.f32 %v7594_v7, %v2857_v31  ;;  %v2550_v42 = vsel %vm342_vm6, %v8046_v52, 0.0  ;;  %vm2881_vm9 = vmor %vm2879_vm5, %vm2880_vm2 }
 0x5ae   :  { %5479 = vrcp.f32 %v8041_v34  ;;  %v2876_v35 = vsub.f32 1.0, %v2875_v25  ;;  %v1462_v23 = vpop.f32.mrf.mxu1  ;;  %v2870_v25 = vand.u32 2147483648, %v7942_v13  ;;  %vm2909_vm1 = vweird.f32 %v8041_v34 }
 0x5af   :  { %5481 = vpow2.f32 %v2374_v8  ;;  %v2892_v22 = vmul.f32 %v8021_v36, %v2891_v33  ;;  %v8071_v10 = vadd.f32 %v2046_v11, %v1462_v23  ;;  %v2868_v33 = vand.u32 2147483647, %v7942_v13 }
 0x5b0   :  { %v8055_v1 = vpop.eup %5477  ;;  %v2877_v21 = vmul.f32 %v5474_v47, %v2876_v35  ;;  %2224 = vmax.xlane.f32.xlu2 %v2223_v58  ;;  %2551 = vadd.xlane.f32.xlu0 %v2550_v42  ;;  %vm2884_vm10 = vcmp.eq.f32.partialorder %v2883_v0, 8.507059e+37  ;;  %v2886_v23 = vor.u32 1.1754944e-38, %v2885_v30  ;;  %v2867_v0 = vsel %vm8075_vm4, %v7974_v54, %v2863_v63 }
 0x5b1   :  { %9813 = vst [vmem:[#allocation43_spill] sm:$0xff] %v8055_v1  ;;  %v2559_v8 = vsel %vm342_vm6, %v8055_v1, 0.0  ;;  %v2893_v13 = vadd.f32 %v8021_v36, %v2892_v22  ;;  %v2871_v30 = vor.u32 1.1754944e-38, %v2870_v25  ;;  %v2900_v42 = vand.u32 2147483648, %v7972_v6 }
 0x5b2   :  { %2560 = vadd.xlane.f32.xlu1 %v2559_v8  ;;  %v2878_v35 = vadd.f32 %v5474_v47, %v2877_v21  ;;  %vm2869_vm11 = vcmp.eq.f32.partialorder %v2868_v33, 8.507059e+37  ;;  %v2898_v22 = vand.u32 2147483647, %v7972_v6  ;;  %v2288_v25 = vsub.f32 %v7597_v48, %v7940_v41 }
 0x5b3   :  { %v2872_v63 = vsel %vm2869_vm11, %v2871_v30, %v2867_v0  ;;  %v2901_v7 = vor.u32 1.1754944e-38, %v2900_v42  ;;  %v2292_v33 = vsub.f32 %v7682_v5, %v8038_v43  ;;  %v2913_v30 = vand.u32 2147483647, %v8041_v34 }
 0x5b4   :  { %v8069_v45 = vpop.eup %5479  ;;  %v2882_v21 = vsel %vm2881_vm9, %v5474_v47, %v2878_v35  ;;  %5166 = vmatmul.msk.f32.gmra.mxu0 %vm342_vm6, %v2858_v61  ;;  %v2183_v15 = vpop.xlane.xlu0 %2182  ;;  %v9816_v61 = vld [vmem:[#allocation16_spill] sm:$0xff]  ;;  %vm2899_vm14 = vcmp.eq.f32.partialorder %v2898_v22, 8.507059e+37 }
 0x5b5   :  { %v8081_v31 = vpop.xlane.xlu2 %2503  ;;  %v2905_v58 = vmul.f32 %v8069_v45, %v8041_v34  ;;  %v8087_v11 = vpop.xlane.xlu1 %2500  ;;  %v2887_v1 = vsel %vm2884_vm10, %v2886_v23, %v2882_v21  ;;  %v5341_v35 = vunpack.i.l.bf16 %v9816_v61  ;;  %v2291_v54 = vsub.f32 %v7708_v51, %v2183_v15 }
 0x5b6   :  { %v8089_v8 = vpop.eup %5481  ;;  %5483 = vrcp.f32 %v8087_v11  ;;  %v2888_v47 = vmul.f32 %v7654_v27, %v2887_v1  ;;  %v2238_v27 = vsel %vm342_vm6, %v8071_v10, -inf  ;;  %v2897_v1 = vsel %vm8104_vm13, %v8021_v36, %v2893_v13 }
 0x5b7   :  { %v2906_v52 = vsub.f32 1.0, %v2905_v58  ;;  %5485 = vrcp.f32 %v8081_v31  ;;  %v2396_v51 = vmul.f32 1.442695, %v2291_v54  ;;  %v2532_v48 = vsel %vm342_vm6, %v8089_v8, 0.0 }
 0x5b8   :  { %5168 = vmatmul.msk.f32.vlgmr.msra.gmra.mxu2 %vm342_vm6, %v2888_v47  ;;  %2533 = vadd.xlane.f32.xlu0 %v2532_v48  ;;  %v2902_v36 = vsel %vm2899_vm14, %v2901_v7, %v2897_v1  ;;  %v2390_v23 = vmul.f32 1.442695, %v2288_v25  ;;  %vm2910_vm15 = vweird.f32 %v8069_v45  ;;  %v2398_v21 = vmul.f32 1.442695, %v2292_v33 }
 0x5b9   :  { %v2907_v6 = vmul.f32 %v8069_v45, %v2906_v52  ;;  %4081 = vmatpush.msra.mxu2 %v5341_v35  ;;  %v2873_v52 = vmul.f32 %v7604_v18, %v2872_v63  ;;  %5487 = vpow2.f32 %v2396_v51  ;;  %v8137_v18 = vadd.f32 %v7890_v2, %v7800_v40  ;;  %vm8143_vm2 = vmor %vm2909_vm1, %vm2910_vm15 }
 0x5ba   :  { %2239 = vmax.xlane.f32.xlu1 %v2238_v27  ;;  %v2915_v15 = vand.u32 2147483648, %v8041_v34  ;;  %v2903_v42 = vmul.f32 %v7644_v12, %v2902_v36  ;;  %v2290_v47 = vsub.f32 %v7678_v24, %v8051_v28  ;;  %vm2914_vm3 = vcmp.eq.f32.partialorder %v2913_v30, 8.507059e+37 }
 0x5bb   :  { %v2908_v5 = vadd.f32 %v8069_v45, %v2907_v6  ;;  %v2217_v28 = vsel %vm342_vm6, %v8137_v18, -inf  ;;  %vm2924_vm5 = vweird.f32 %v8087_v11  ;;  %v2928_v51 = vand.u32 2147483647, %v8087_v11 }
 0x5bc   :  { %v8123_v41 = vpop.eup %5483  ;;  %5167 = vmatmul.msk.f32.gmra.mxu0 %vm342_vm6, %v2873_v52  ;;  %v2189_v58 = vpop.xlane.xlu0 %2188  ;;  %v2916_v35 = vor.u32 1.1754944e-38, %v2915_v15  ;;  %v2394_v63 = vmul.f32 1.442695, %v2290_v47  ;;  %v2945_v22 = vand.u32 2147483648, %v8081_v31  ;;  %vm2939_vm11 = vweird.f32 %v8081_v31 }
 0x5bd   :  { %v2920_v60 = vmul.f32 %v8123_v41, %v8087_v11  ;;  %v8131_v43 = vpop.xlane.xlu2 %2506  ;;  %v8133_v13 = vpop.eup %5485  ;;  %v2912_v12 = vsel %vm8143_vm2, %v8069_v45, %v2908_v5  ;;  %v2293_v24 = vsub.f32 %v7730_v46, %v2189_v58  ;;  %vm2925_vm4 = vweird.f32 %v8123_v41 }
 0x5be   :  { %5489 = vrcp.f32 %v8131_v43  ;;  %v2935_v40 = vmul.f32 %v8133_v13, %v8081_v31  ;;  %v2917_v25 = vsel %vm2914_vm3, %v2916_v35, %v2912_v12  ;;  %v2930_v46 = vand.u32 2147483648, %v8087_v11  ;;  %vm2926_vm8 = vmor %vm2924_vm5, %vm2925_vm4 }
 0x5bf   :  { %v2921_v0 = vsub.f32 1.0, %v2920_v60  ;;  %5491 = vpow2.f32 %v2390_v23  ;;  %v8157_v34 = vpop.eup %5487  ;;  %v2400_v7 = vmul.f32 1.442695, %v2293_v24  ;;  %v2918_v48 = vmul.f32 %v7674_v37, %v2917_v25 }
 0x5c0   :  { %5169 = vmatmul.msk.f32.gmra.mxu2 %vm342_vm6, %v2903_v42  ;;  %5493 = vpow2.f32 %v2398_v21  ;;  %2218 = vmax.xlane.f32.xlu0 %v2217_v28  ;;  %v2565_v54 = vsel %vm342_vm6, %v8157_v34, 0.0  ;;  %v2936_v6 = vsub.f32 1.0, %v2935_v40  ;;  %v2931_v58 = vor.u32 1.1754944e-38, %v2930_v46 }
 0x5c1   :  { %v2922_v2 = vmul.f32 %v8123_v41, %v2921_v0  ;;  %2566 = vadd.xlane.f32.xlu2 %v2565_v54  ;;  %5495 = vpow2.f32 %v2394_v63  ;;  %vm2929_vm9 = vcmp.eq.f32.partialorder %v2928_v51, 8.507059e+37  ;;  %vm2940_vm10 = vweird.f32 %v8133_v13 }
 0x5c2   :  { %v2937_v60 = vmul.f32 %v8133_v13, %v2936_v6  ;;  %5497 = vpow2.f32 %v2400_v7  ;;  %v2943_v40 = vand.u32 2147483647, %v8081_v31  ;;  %vm8197_vm12 = vmor %vm2939_vm11, %vm2940_vm10  ;;  %v2946_v31 = vor.u32 1.1754944e-38, %v2945_v22  ;;  %v1465_v22 = vpop.f32.mrf.mxu1 }
 0x5c3   :  { %v2923_v45 = vadd.f32 %v8123_v41, %v2922_v2  ;;  %v8218_v46 = vadd.f32 %v7864_v62, %v7873_v16  ;;  %v2960_v7 = vand.u32 2147483648, %v8131_v43  ;;  %vm2954_vm15 = vweird.f32 %v8131_v43 }
 0x5c4   :  { %v2192_v27 = vpop.xlane.xlu0 %2191  ;;  %v8166_v1 = vpop.eup %5489  ;;  %v2938_v0 = vadd.f32 %v8133_v13, %v2937_v60  ;;  %vm2944_vm13 = vcmp.eq.f32.partialorder %v2943_v40, 8.507059e+37 }
 0x5c5   :  { %v8169_v33 = vpop.eup %5491  ;;  %v2950_v36 = vmul.f32 %v8166_v1, %v8131_v43  ;;  %v2294_v23 = vsub.f32 %v7742_v19, %v2192_v27  ;;  %v2927_v5 = vsel %vm2926_vm8, %v8123_v41, %v2923_v45  ;;  %vm2955_vm14 = vweird.f32 %v8166_v1 }
 0x5c6   :  { %v8174_v52 = vpop.eup %5493  ;;  %v2556_v37 = vsel %vm342_vm6, %v8169_v33, 0.0  ;;  %v2932_v15 = vsel %vm2929_vm9, %v2931_v58, %v2927_v5  ;;  %vm8228_vm1 = vmor %vm2954_vm15, %vm2955_vm14  ;;  %v2961_v5 = vor.u32 1.1754944e-38, %v2960_v7 }
 0x5c7   :  { %v2568_v11 = vsel %vm342_vm6, %v8174_v52, 0.0  ;;  %v2951_v19 = vsub.f32 1.0, %v2950_v36  ;;  %v2402_v30 = vmul.f32 1.442695, %v2294_v23  ;;  %v8188_v42 = vpop.eup %5495  ;;  %v2933_v2 = vmul.f32 %v7704_v39, %v2932_v15  ;;  %v2049_v15 = vpop.f32.mrf.mxu0 }
 0x5c8   :  { %5170 = vmatmul.msk.f32.gmra.mxu2 %vm342_vm6, %v2918_v48  ;;  %2557 = vadd.xlane.f32.xlu0 %v2556_v37  ;;  %v8195_v12 = vpop.eup %5497  ;;  %v2562_v39 = vsel %vm342_vm6, %v8188_v42, 0.0  ;;  %v2958_v48 = vand.u32 2147483647, %v8131_v43 }
 0x5c9   :  { %2569 = vadd.xlane.f32.xlu2 %v2568_v11  ;;  %v2952_v54 = vmul.f32 %v8166_v1, %v2951_v19  ;;  %5499 = vpow2.f32 %v2402_v30 }
 0x5ca   :  { %vm2959_vm2 = vcmp.eq.f32.partialorder %v2958_v48, 8.507059e+37 }
 0x5cb   :  { %v2953_v27 = vadd.f32 %v8166_v1, %v2952_v54 }
 0x5cc   :  { %v2195_v41 = vpop.xlane.xlu0 %2194 }
 0x5cd   :  { %v2198_v21 = vpop.xlane.xlu1 %2197  ;;  %v2295_v47 = vsub.f32 %v7751_v20, %v2195_v41  ;;  %v2942_v20 = vsel %vm8197_vm12, %v8133_v13, %v2938_v0  ;;  %v2957_v16 = vsel %vm8228_vm1, %v8166_v1, %v2953_v27  ;;  %v8256_v41 = vadd.f32 %v7898_v53, %v7900_v56 }
 0x5ce   :  { %v2296_v24 = vsub.f32 %v7754_v14, %v2198_v21  ;;  %v2571_v14 = vsel %vm342_vm6, %v8195_v12, 0.0  ;;  %v2947_v45 = vsel %vm2944_vm13, %v2946_v31, %v2942_v20  ;;  %v2962_v0 = vsel %vm2959_vm2, %v2961_v5, %v2957_v16 }
 0x5cf   :  { %v2404_v28 = vmul.f32 1.442695, %v2295_v47  ;;  %v8221_v51 = vpop.eup %5499  ;;  %v2948_v60 = vmul.f32 %v7700_v29, %v2947_v45  ;;  %v2226_v29 = vsel %vm342_vm6, %v8218_v46, -inf }
 0x5d0   :  { %5171 = vmatmul.msk.f32.gmra.mxu2 %vm342_vm6, %v2933_v2  ;;  %2563 = vadd.xlane.f32.xlu0 %v2562_v39  ;;  %v2406_v25 = vmul.f32 1.442695, %v2296_v24  ;;  %v2574_v37 = vsel %vm342_vm6, %v8221_v51, 0.0  ;;  %v8259_v2 = vadd.f32 %v2049_v15, %v1465_v22  ;;  %v2963_v24 = vmul.f32 %v7725_v55, %v2962_v0 }
 0x5d1   :  { %5501 = vpow2.f32 %v2404_v28  ;;  %2572 = vadd.xlane.f32.xlu2 %v2571_v14  ;;  %v8270_v39 = vadd.f32 %v7935_v57, %v7950_v50  ;;  %v2229_v55 = vsel %vm342_vm6, %v8256_v41, -inf }
 0x5d3   :  { %v2232_v15 = vsel %vm342_vm6, %v8270_v39, -inf }
 0x5d4   :  { %v2510_v13 = vpop.xlane.xlu0 %2509 }
 0x5d5   :  { %v2201_v63 = vpop.xlane.xlu2 %2200  ;;  %v8211_v6 = vpop.xlane.xlu1 %2512  ;;  %v2973_v28 = vand.u32 2147483647, %v2510_v13  ;;  %v2975_v54 = vand.u32 2147483648, %v2510_v13  ;;  %vm2969_vm4 = vweird.f32 %v2510_v13 }
 0x5d6   :  { %5503 = vrcp.f32 %v8211_v6  ;;  %v2297_v43 = vsub.f32 %v7769_v49, %v2201_v63  ;;  %v2990_v23 = vand.u32 2147483648, %v8211_v6  ;;  %vm2984_vm10 = vweird.f32 %v8211_v6 }
 0x5d7   :  { %5505 = vrcp.f32 %v2510_v13  ;;  %v8226_v36 = vpop.eup %5501  ;;  %vm2974_vm9 = vcmp.eq.f32.partialorder %v2973_v28, 8.507059e+37  ;;  %v2976_v57 = vor.u32 1.1754944e-38, %v2975_v54 }
 0x5d8   :  { %5507 = vpow2.f32 %v2406_v25  ;;  %5172 = vmatmul.msk.f32.gmra.mxu2 %vm342_vm6, %v2948_v60  ;;  %v2577_v62 = vsel %vm342_vm6, %v8226_v36, 0.0  ;;  %2227 = vmax.xlane.f32.xlu0 %v2226_v29  ;;  %v2408_v47 = vmul.f32 1.442695, %v2297_v43  ;;  %v2241_v25 = vsel %vm342_vm6, %v8259_v2, -inf }
 0x5d9   :  { %2578 = vadd.xlane.f32.xlu1 %v2577_v62  ;;  %2575 = vadd.xlane.f32.xlu2 %v2574_v37  ;;  %v2988_v60 = vand.u32 2147483647, %v8211_v6  ;;  %v2991_v22 = vor.u32 1.1754944e-38, %v2990_v23 }
 0x5db   :  { %vm2989_vm13 = vcmp.eq.f32.partialorder %v2988_v60, 8.507059e+37 }
 0x5dc   :  { %v8241_v58 = vpop.eup %5503 }
 0x5dd   :  { %v8245_v11 = vpop.xlane.xlu2 %2539  ;;  %v5506_v21 = vpop.eup %5505  ;;  %v2980_v1 = vmul.f32 %v8241_v58, %v8211_v6  ;;  %vm2985_vm5 = vweird.f32 %v8241_v58 }
 0x5de   :  { %5509 = vrcp.f32 %v8245_v11  ;;  %v8250_v49 = vpop.xlane.xlu1 %2515  ;;  %v2965_v19 = vmul.f32 %v5506_v21, %v2510_v13  ;;  %v8252_v30 = vpop.eup %5507  ;;  %vm2970_vm3 = vweird.f32 %v5506_v21  ;;  %vm8293_vm11 = vmor %vm2984_vm10, %vm2985_vm5  ;;  %vm3119_vm14 = vweird.f32 %v8245_v11 }
 0x5df   :  { %v2981_v40 = vsub.f32 1.0, %v2980_v1  ;;  %5511 = vrcp.f32 %v8250_v49  ;;  %v2580_v53 = vsel %vm342_vm6, %v8252_v30, 0.0  ;;  %vm2971_vm8 = vmor %vm2969_vm4, %vm2970_vm3  ;;  %v3003_v37 = vand.u32 2147483647, %v8250_v49 }
 0x5e0   :  { %v2966_v35 = vsub.f32 1.0, %v2965_v19  ;;  %5173 = vmatmul.msk.f32.gmra.mxu2 %vm342_vm6, %v2963_v24  ;;  %5513 = vpow2.f32 %v2408_v47  ;;  %2230 = vmax.xlane.f32.xlu0 %v2229_v55  ;;  %v8308_v19 = vadd.f32 %v7992_v59, %v8011_v3  ;;  %vm2999_vm15 = vweird.f32 %v8250_v49 }
 0x5e1   :  { %v2982_v20 = vmul.f32 %v8241_v58, %v2981_v40  ;;  %2581 = vadd.xlane.f32.xlu1 %v2580_v53  ;;  %2242 = vmax.xlane.f32.xlu2 %v2241_v25  ;;  %vm3004_vm2 = vcmp.eq.f32.partialorder %v3003_v37, 8.507059e+37  ;;  %v3123_v54 = vand.u32 2147483647, %v8245_v11  ;;  %v9827_v25 = vld [vmem:[#allocation32_spill] sm:$0xff] }
 0x5e2   :  { %v2967_v31 = vmul.f32 %v5506_v21, %v2966_v35  ;;  %v8278_v45 = vpop.xlane.xlu0 %2518  ;;  %v2235_v60 = vsel %vm342_vm6, %v8308_v19, -inf }
 0x5e3   :  { %5515 = vrcp.f32 %v8278_v45  ;;  %v2983_v50 = vadd.f32 %v8241_v58, %v2982_v20  ;;  %v3125_v20 = vand.u32 2147483648, %v8245_v11  ;;  %v3020_v53 = vand.u32 2147483648, %v8278_v45 }
 0x5e4   :  { %v8266_v56 = vpop.eup %5509  ;;  %v2968_v14 = vadd.f32 %v5506_v21, %v2967_v31  ;;  %vm3124_vm10 = vcmp.eq.f32.partialorder %v3123_v54, 8.507059e+37 }
 0x5e5   :  { %v3115_v63 = vmul.f32 %v8266_v56, %v8245_v11  ;;  %v5512_v27 = vpop.eup %5511  ;;  %vm3120_vm3 = vweird.f32 %v8266_v56  ;;  %v3126_v11 = vor.u32 1.1754944e-38, %v3125_v20 }
 0x5e6   :  { %v2995_v7 = vmul.f32 %v5512_v27, %v8250_v49  ;;  %v2972_v48 = vsel %vm2971_vm8, %v5506_v21, %v2968_v14  ;;  %v8289_v43 = vpop.eup %5513  ;;  %v3005_v21 = vand.u32 2147483648, %v8250_v49  ;;  %vm3000_vm12 = vweird.f32 %v5512_v27  ;;  %vm8328_vm5 = vmor %vm3119_vm14, %vm3120_vm3 }
 0x5e7   :  { %v3116_v13 = vsub.f32 1.0, %v3115_v63  ;;  %v2977_v62 = vsel %vm2974_vm9, %v2976_v57, %v2972_v48  ;;  %v2583_v35 = vsel %vm342_vm6, %v8289_v43, 0.0  ;;  %vm3001_vm1 = vmor %vm2999_vm15, %vm3000_vm12  ;;  %v5326_v57 = vunpack.i.l.bf16 %v9827_v25 }
 0x5e8   :  { %v2996_v16 = vsub.f32 1.0, %v2995_v7  ;;  %v2978_v5 = vmul.f32 %v7772_v44, %v2977_v62  ;;  %v2987_v44 = vsel %vm8293_vm11, %v8241_v58, %v2983_v50  ;;  %2233 = vmax.xlane.f32.xlu0 %v2232_v15  ;;  %v3006_v58 = vor.u32 1.1754944e-38, %v3005_v21 }
 0x5e9   :  { %v3117_v6 = vmul.f32 %v8266_v56, %v3116_v13  ;;  %v5516_v0 = vpop.eup %5515  ;;  %2584 = vadd.xlane.f32.xlu2 %v2583_v35  ;;  %v2992_v59 = vsel %vm2989_vm13, %v2991_v22, %v2987_v44  ;;  %v3018_v50 = vand.u32 2147483647, %v8278_v45  ;;  %vm3014_vm8 = vweird.f32 %v8278_v45 }
 0x5ea   :  { %v2997_v1 = vmul.f32 %v5512_v27, %v2996_v16  ;;  %5174 = vmatmul.msk.f32.gmra.mxu2 %vm342_vm6, %v2978_v5  ;;  %v3010_v40 = vmul.f32 %v5516_v0, %v8278_v45  ;;  %v8315_v24 = vpop.xlane.xlu1 %2521  ;;  %vm3015_vm4 = vweird.f32 %v5516_v0  ;;  %v2993_v63 = vmul.f32 %v7766_v9, %v2992_v59  ;;  %v9832_v16 = vld [vmem:[#allocation19_spill] sm:$0xff] }
 0x5eb   :  { %5517 = vrcp.f32 %v8315_v24  ;;  %v3118_v3 = vadd.f32 %v8266_v56, %v3117_v6  ;;  %vm8340_vm9 = vmor %vm3014_vm8, %vm3015_vm4  ;;  %v5331_v5 = vunpack.i.l.bf16 %v9832_v16  ;;  %vm3019_vm11 = vcmp.eq.f32.partialorder %v3018_v50, 8.507059e+37  ;;  %v9835_v59 = vld [vmem:[#allocation7_spill] sm:$0xff] }
 0x5ec   :  { %v2998_v47 = vadd.f32 %v5512_v27, %v2997_v1  ;;  %v3011_v28 = vsub.f32 1.0, %v3010_v40  ;;  %v5332_v15 = vunpack.i.h.bf16 %v9832_v16  ;;  %v3035_v6 = vand.u32 2147483648, %v8315_v24 }
 0x5ed   :  { %v3122_v13 = vsel %vm8328_vm5, %v8266_v56, %v3118_v3  ;;  %v3021_v56 = vor.u32 1.1754944e-38, %v3020_v53  ;;  %vm3029_vm13 = vweird.f32 %v8315_v24 }
 0x5ee   :  { %v3002_v49 = vsel %vm3001_vm1, %v5512_v27, %v2998_v47  ;;  %v3012_v14 = vmul.f32 %v5516_v0, %v3011_v28  ;;  %v3127_v29 = vsel %vm3124_vm10, %v3126_v11, %v3122_v13  ;;  %v9833_v47 = vld [vmem:[#allocation14_spill] sm:$0xff] }
 0x5ef   :  { %v3007_v31 = vsel %vm3004_vm2, %v3006_v58, %v3002_v49  ;;  %v3128_v44 = vmul.f32 %v7785_v4, %v3127_v29  ;;  %v5336_v40 = vunpack.i.l.bf16 %v9833_v47  ;;  %v9834_v58 = vld [vmem:[#allocation42_spill] sm:$0xff]  ;;  %v5337_v4 = vunpack.i.h.bf16 %v9833_v47  ;;  %v9838_v47 = vld [vmem:[#allocation65_spill] sm:$0xff] }
 0x5f0   :  { %v3008_v55 = vmul.f32 %v7789_v38, %v3007_v31  ;;  %v3013_v7 = vadd.f32 %v5516_v0, %v3012_v14  ;;  %v5327_v38 = vunpack.i.h.bf16 %v9827_v25  ;;  %2236 = vmax.xlane.f32.xlu0 %v2235_v60  ;;  %v5343_v3 = vpack.i.bf16 %v9835_v59, %v9834_v58  ;;  %v8365_v14 = vpop.xlane.xlu0 %2203 }
 0x5f1   :  { %v5518_v9 = vpop.eup %5517  ;;  %v3036_v49 = vor.u32 1.1754944e-38, %v3035_v6 }
 0x5f2   :  { %5175 = vmatmul.msk.f32.gmra.mxu2 %vm342_vm6, %v2993_v63  ;;  %5176 = vmatmul.msk.f32.vlgmr.msra.gmra.mxu0 %vm342_vm6, %v3008_v55  ;;  %v3025_v45 = vmul.f32 %v5518_v9, %v8315_v24  ;;  %v2543_v23 = vpop.xlane.xlu1 %2542  ;;  %v3017_v62 = vsel %vm8340_vm9, %v5516_v0, %v3013_v7  ;;  %vm3030_vm12 = vweird.f32 %v5518_v9  ;;  %v3033_v0 = vand.u32 2147483647, %v8315_v24 }
 0x5f3   :  { %4016 = vmatpush.msra.mxu0 %v5326_v57  ;;  %5519 = vrcp.f32 %v2543_v23  ;;  %v3022_v21 = vsel %vm3019_vm11, %v3021_v56, %v3017_v62  ;;  %vm3031_vm14 = vmor %vm3029_vm13, %vm3030_vm12  ;;  %v5342_v24 = vunpack.i.h.bf16 %v9816_v61  ;;  %v3140_v50 = vand.u32 2147483648, %v2543_v23  ;;  %v9837_v62 = vld [vmem:[#allocation17_spill] sm:$0xff] }
 0x5f4   :  { %v3026_v37 = vsub.f32 1.0, %v3025_v45  ;;  %v3023_v1 = vmul.f32 %v7803_v26, %v3022_v21  ;;  %vm3034_vm15 = vcmp.eq.f32.partialorder %v3033_v0, 8.507059e+37  ;;  %v3138_v13 = vand.u32 2147483647, %v2543_v23  ;;  %v8380_v0 = vpop.f32.mrf.mxu2 }
 0x5f5   :  { %4017 = vmatpush.msra.mxu0 %v5327_v38  ;;  %vm3134_vm2 = vweird.f32 %v2543_v23  ;;  %v3141_v61 = vor.u32 1.1754944e-38, %v3140_v50 }
 0x5f6   :  { %v3027_v22 = vmul.f32 %v5518_v9, %v3026_v37  ;;  %vm3139_vm4 = vcmp.eq.f32.partialorder %v3138_v13, 8.507059e+37 }
 0x5f7   :  { %4018 = vmatpush.msra.mxu0 %v5331_v5 }
 0x5f8   :  { %v3028_v35 = vadd.f32 %v5518_v9, %v3027_v22 }
 0x5f9   :  { %4019 = vmatpush.msra.mxu0 %v5332_v15  ;;  %v5520_v26 = vpop.eup %5519 }
 0x5fa   :  { %5177 = vmatmul.msk.f32.gmra.mxu0 %vm342_vm6, %v3023_v1  ;;  %5184 = vmatmul.msk.f32.vlgmr.msrb.gmra.mxu2 %vm342_vm6, %v3128_v44  ;;  %v3130_v28 = vmul.f32 %v5520_v26, %v2543_v23  ;;  %v2207_v54 = vpop.xlane.xlu1 %2206  ;;  %v3032_v20 = vsel %vm3031_vm14, %v5518_v9, %v3028_v35  ;;  %vm3135_vm1 = vweird.f32 %v5520_v26  ;;  %v9836_v23 = vld [vmem:[#allocation8_spill] sm:$0xff] }
 0x5fb   :  { %4020 = vmatpush.msra.mxu0 %v5336_v40  ;;  %5344 = vrot.lane.b32.xlu1 %v5343_v3, %s5665_s5  ;;  %v2299_v31 = vsub.f32 %v7843_v17, %v2207_v54  ;;  %v2546_v53 = vpop.xlane.xlu2 %2545  ;;  %v3037_v55 = vsel %vm3034_vm15, %v3036_v49, %v3032_v20  ;;  %vm3136_vm3 = vmor %vm3134_vm2, %vm3135_vm1 }
 0x5fc   :  { %v3131_v63 = vsub.f32 1.0, %v3130_v28  ;;  %5521 = vrcp.f32 %v2546_v53  ;;  %v3038_v57 = vmul.f32 %v7818_v32, %v3037_v55  ;;  %v3155_v45 = vand.u32 2147483648, %v2546_v53 }
 0x5fd   :  { %4021 = vmatpush.msra.mxu0 %v5337_v4  ;;  %v2412_v25 = vmul.f32 1.442695, %v2299_v31  ;;  %v3153_v29 = vand.u32 2147483647, %v2546_v53  ;;  %vm3149_vm8 = vweird.f32 %v2546_v53 }
 0x5fe   :  { %v3132_v27 = vmul.f32 %v5520_v26, %v3131_v63  ;;  %v3156_v6 = vor.u32 1.1754944e-38, %v3155_v45  ;;  %v9841_v45 = vld [vmem:[#allocation26_spill] sm:$0xff] }
 0x5ff   :  { %4022 = vmatpush.msra.mxu0 %v5342_v24  ;;  %5523 = vpow2.f32 %v2412_v25  ;;  %vm3154_vm10 = vcmp.eq.f32.partialorder %v3153_v29, 8.507059e+37  ;;  %v9839_v24 = vld [vmem:[#allocation63_spill] sm:$0xff] }
 0x600   :  { %v3133_v7 = vadd.f32 %v5520_v26, %v3132_v27 }
 0x602   :  { %5178 = vmatmul.msk.f32.gmra.mxu0 %vm342_vm6, %v3038_v57  ;;  %v5522_v17 = vpop.eup %5521  ;;  %v2525_v9 = vpop.xlane.xlu1 %2524  ;;  %v3137_v38 = vsel %vm3136_vm3, %v5520_v26, %v3133_v7 }
 0x603   :  { %v3145_v11 = vmul.f32 %v5522_v17, %v2546_v53  ;;  %5525 = vrcp.f32 %v2525_v9  ;;  %v8369_v48 = vpop.xlane.xlu0 %2527  ;;  %v3142_v32 = vsel %vm3139_vm4, %v3141_v61, %v3137_v38  ;;  %vm3150_vm5 = vweird.f32 %v5522_v17  ;;  %v9840_v61 = vld [vmem:[#allocation41_spill] sm:$0xff] }
 0x604   :  { %5527 = vrcp.f32 %v8369_v48  ;;  %5349 = vrot.lane.b32.xlu0 %v9836_v23, %s5665_s5  ;;  %v3143_v16 = vmul.f32 %v9837_v62, %v3142_v32  ;;  %vm3151_vm9 = vmor %vm3149_vm8, %vm3150_vm5  ;;  %v3048_v4 = vand.u32 2147483647, %v2525_v9  ;;  %v3050_v49 = vand.u32 2147483648, %v2525_v9 }
 0x605   :  { %v8371_v60 = vpop.eup %5523  ;;  %v3146_v56 = vsub.f32 1.0, %v3145_v11  ;;  %vm3044_vm12 = vweird.f32 %v2525_v9  ;;  %v3065_v50 = vand.u32 2147483648, %v8369_v48  ;;  %vm3059_vm1 = vweird.f32 %v8369_v48  ;;  %v8392_v11 = vpop.f32.mrf.mxu2 }
 0x606   :  { %v2589_v37 = vsel %vm342_vm6, %v8371_v60, 0.0  ;;  %5185 = vmatmul.msk.f32.gmra.mxu2 %vm342_vm6, %v3143_v16  ;;  %v3051_v63 = vor.u32 1.1754944e-38, %v3050_v49  ;;  %vm3049_vm14 = vcmp.eq.f32.partialorder %v3048_v4, 8.507059e+37  ;;  %v3063_v7 = vand.u32 2147483647, %v8369_v48 }
 0x607   :  { %v3147_v5 = vmul.f32 %v5522_v17, %v3146_v56  ;;  %2590 = vadd.xlane.f32.xlu2 %v2589_v37 }
 0x608   :  { %vm3064_vm3 = vcmp.eq.f32.partialorder %v3063_v7, 8.507059e+37 }
 0x609   :  { %v5526_v21 = vpop.eup %5525  ;;  %v3148_v15 = vadd.f32 %v5522_v17, %v3147_v5  ;;  %v3066_v5 = vor.u32 1.1754944e-38, %v3065_v50 }
 0x60a   :  { %v3040_v1 = vmul.f32 %v5526_v21, %v2525_v9  ;;  %v2210_v44 = vpop.xlane.xlu1 %2209  ;;  %v5528_v22 = vpop.eup %5527  ;;  %vm3045_vm11 = vweird.f32 %v5526_v21 }
 0x60b   :  { %v2300_v40 = vsub.f32 %v9838_v47, %v2210_v44  ;;  %v3152_v35 = vsel %vm3151_vm9, %v5522_v17, %v3148_v15  ;;  %v3055_v59 = vmul.f32 %v5528_v22, %v8369_v48  ;;  %v2549_v3 = vpop.xlane.xlu0 %2548  ;;  %vm3046_vm13 = vmor %vm3044_vm12, %vm3045_vm11  ;;  %vm3060_vm15 = vweird.f32 %v5528_v22  ;;  %v2052_v44 = vpop.f32.mrf.mxu0  ;;  %v9842_v47 = vld [vmem:[#allocation27_spill] sm:$0xff] }
 0x60c   :  { %v3041_v58 = vsub.f32 1.0, %v3040_v1  ;;  %v3157_v26 = vsel %vm3154_vm10, %v3156_v6, %v3152_v35  ;;  %5529 = vrcp.f32 %v2549_v3  ;;  %vm3061_vm2 = vmor %vm3059_vm1, %vm3060_vm15  ;;  %v3170_v15 = vand.u32 2147483648, %v2549_v3 }
 0x60d   :  { %v2414_v28 = vmul.f32 1.442695, %v2300_v40  ;;  %v3056_v20 = vsub.f32 1.0, %v3055_v59  ;;  %v3158_v31 = vmul.f32 %v9839_v24, %v3157_v26  ;;  %vm3164_vm5 = vweird.f32 %v2549_v3  ;;  %v8404_v4 = vpop.f32.mrf.mxu2 }
 0x60e   :  { %v3042_v54 = vmul.f32 %v5526_v21, %v3041_v58  ;;  %v3168_v6 = vand.u32 2147483647, %v2549_v3  ;;  %v1468_v58 = vpop.f32.mrf.mxu1  ;;  %v3171_v59 = vor.u32 1.1754944e-38, %v3170_v15 }
 0x60f   :  { %5531 = vpow2.f32 %v2414_v28  ;;  %v3057_v55 = vmul.f32 %v5528_v22, %v3056_v20  ;;  %5186 = vmatmul.msk.f32.gmra.mxu2 %vm342_vm6, %v3158_v31  ;;  %v8402_v26 = vadd.f32 %v2052_v44, %v1468_v58  ;;  %v9843_v28 = vld [vmem:[#allocation45_spill] sm:$0xff] }
 0x610   :  { %v3043_v53 = vadd.f32 %v5526_v21, %v3042_v54  ;;  %vm3169_vm9 = vcmp.eq.f32.partialorder %v3168_v6, 8.507059e+37  ;;  %v9847_v58 = vld [vmem:[#allocation49_spill] sm:$0xff] }
 0x611   :  { %v3058_v25 = vadd.f32 %v5528_v22, %v3057_v55  ;;  %v2244_v31 = vsel %vm342_vm6, %v8402_v26, -inf  ;;  %v9844_v55 = vld [vmem:[#allocation64_spill] sm:$0xff] }
 0x612   :  { %v3047_v57 = vsel %vm3046_vm13, %v5526_v21, %v3043_v53  ;;  %v5530_v27 = vpop.eup %5529  ;;  %v8412_v24 = vpop.xlane.xlu1 %2215 }
 0x613   :  { %v3052_v13 = vsel %vm3049_vm14, %v3051_v63, %v3047_v57  ;;  %v3160_v17 = vmul.f32 %v5530_v27, %v2549_v3  ;;  %v2213_v32 = vpop.xlane.xlu0 %2212  ;;  %v3062_v16 = vsel %vm3061_vm2, %v5528_v22, %v3058_v25  ;;  %vm3165_vm4 = vweird.f32 %v5530_v27  ;;  %v8398_v1 = vpop.xlane.xlu2 %2554 }
 0x614   :  { %v3053_v9 = vmul.f32 %v9840_v61, %v3052_v13  ;;  %v2301_v23 = vsub.f32 %v9841_v45, %v2213_v32  ;;  %v3067_v37 = vsel %vm3064_vm3, %v3066_v5, %v3062_v16  ;;  %vm3166_vm8 = vmor %vm3164_vm5, %vm3165_vm4  ;;  %v2298_v63 = vsub.f32 %v9844_v55, %v8365_v14  ;;  %v2055_v7 = vpop.f32.mrf.mxu0 }
 0x615   :  { %v8390_v38 = vpop.eup %5531  ;;  %v3161_v56 = vsub.f32 1.0, %v3160_v17  ;;  %v3068_v40 = vmul.f32 %v9842_v47, %v3067_v37  ;;  %v8423_v17 = vpop.f32.mrf.mxu2  ;;  %vm3194_vm4 = vweird.f32 %v8398_v1 }
 0x616   :  { %5179 = vmatmul.msk.f32.gmra.mxu0 %vm342_vm6, %v3053_v9  ;;  %v2592_v62 = vsel %vm342_vm6, %v8390_v38, 0.0  ;;  %v2416_v29 = vmul.f32 1.442695, %v2301_v23  ;;  %v2410_v61 = vmul.f32 1.442695, %v2298_v63  ;;  %v1471_v32 = vpop.f32.mrf.mxu1 }
 0x617   :  { %2593 = vadd.xlane.f32.xlu2 %v2592_v62  ;;  %v3162_v48 = vmul.f32 %v5530_v27, %v3161_v56  ;;  %v8428_v45 = vadd.f32 %v2055_v7, %v1471_v32 }
 0x618   :  { %5533 = vpow2.f32 %v2416_v29 }
 0x619   :  { %v3163_v21 = vadd.f32 %v5530_v27, %v3162_v48  ;;  %v2247_v47 = vsel %vm342_vm6, %v8428_v45, -inf }
 0x61a   :  { %v8430_v16 = vpop.xlane.xlu1 %2221 }
 0x61b   :  { %v2531_v35 = vpop.xlane.xlu0 %2530  ;;  %v3167_v22 = vsel %vm3166_vm8, %v5530_v27, %v3163_v21  ;;  %v8419_v25 = vpop.xlane.xlu2 %2536 }
 0x61c   :  { %5535 = vrcp.f32 %v2531_v35  ;;  %v3172_v3 = vsel %vm3169_vm9, %v3171_v59, %v3167_v22  ;;  %v3080_v14 = vand.u32 2147483648, %v2531_v35  ;;  %vm3074_vm11 = vweird.f32 %v2531_v35 }
 0x61d   :  { %5537 = vrcp.f32 %v8398_v1  ;;  %v3173_v54 = vmul.f32 %v9843_v28, %v3172_v3  ;;  %v3078_v62 = vand.u32 2147483647, %v2531_v35 }
 0x61e   :  { %5180 = vmatmul.msk.f32.gmra.mxu0 %vm342_vm6, %v3068_v40  ;;  %v8406_v49 = vpop.eup %5533  ;;  %v3081_v15 = vor.u32 1.1754944e-38, %v3080_v14 }
 0x61f   :  { %v2595_v20 = vsel %vm342_vm6, %v8406_v49, 0.0  ;;  %5187 = vmatmul.msk.f32.gmra.mxu2 %vm342_vm6, %v3173_v54  ;;  %vm3079_vm13 = vcmp.eq.f32.partialorder %v3078_v62, 8.507059e+37 }
 0x620   :  { %2596 = vadd.xlane.f32.xlu2 %v2595_v20 }
 0x622   :  { %v5536_v53 = vpop.eup %5535 }
 0x623   :  { %v3070_v57 = vmul.f32 %v5536_v53, %v2531_v35  ;;  %v2552_v27 = vpop.xlane.xlu0 %2551  ;;  %v8421_v50 = vpop.eup %5537  ;;  %vm3075_vm10 = vweird.f32 %v5536_v53 }
 0x624   :  { %5539 = vrcp.f32 %v2552_v27  ;;  %v3190_v56 = vmul.f32 %v8421_v50, %v8398_v1  ;;  %vm8432_vm12 = vmor %vm3074_vm11, %vm3075_vm10  ;;  %v8441_v44 = vpop.xlane.xlu2 %2224  ;;  %v3185_v54 = vand.u32 2147483648, %v2552_v27  ;;  %v3183_v55 = vand.u32 2147483647, %v2552_v27 }
 0x625   :  { %2245 = vmax.xlane.f32.xlu1 %v2244_v31  ;;  %v3071_v13 = vsub.f32 1.0, %v3070_v57  ;;  %5541 = vrcp.f32 %v8419_v25  ;;  %v8451_v31 = vpop.f32.mrf.mxu2  ;;  %vm3179_vm15 = vweird.f32 %v2552_v27  ;;  %vm3195_vm2 = vweird.f32 %v8421_v50  ;;  %v8465_v32 = vpop.xlane.xlu1 %2560 }
 0x626   :  { %5543 = vpow2.f32 %v2410_v61  ;;  %v3191_v21 = vsub.f32 1.0, %v3190_v56  ;;  %v3186_v56 = vor.u32 1.1754944e-38, %v3185_v54  ;;  %vm3184_vm3 = vcmp.eq.f32.partialorder %v3183_v55, 8.507059e+37  ;;  %vm8476_vm5 = vmor %vm3194_vm4, %vm3195_vm2 }
 0x627   :  { %v3072_v9 = vmul.f32 %v5536_v53, %v3071_v13 }
 0x628   :  { %v3192_v3 = vmul.f32 %v8421_v50, %v3191_v21  ;;  %v3200_v21 = vand.u32 2147483648, %v8398_v1 }
 0x629   :  { %v3073_v23 = vadd.f32 %v5536_v53, %v3072_v9 }
 0x62a   :  { %v5540_v48 = vpop.eup %5539  ;;  %v3193_v9 = vadd.f32 %v8421_v50, %v3192_v3 }
 0x62b   :  { %v8436_v29 = vpop.xlane.xlu0 %2533  ;;  %v3077_v37 = vsel %vm8432_vm12, %v5536_v53, %v3073_v23  ;;  %v3175_v6 = vmul.f32 %v5540_v48, %v2552_v27  ;;  %v8445_v40 = vpop.eup %5541  ;;  %vm3180_vm14 = vweird.f32 %v5540_v48 }
 0x62c   :  { %5545 = vrcp.f32 %v8436_v29  ;;  %v3082_v22 = vsel %vm3079_vm13, %v3081_v15, %v3077_v37  ;;  %v8449_v20 = vpop.eup %5543  ;;  %v3100_v53 = vmul.f32 %v8445_v40, %v8419_v25  ;;  %vm8456_vm1 = vmor %vm3179_vm15, %vm3180_vm14  ;;  %v3198_v37 = vand.u32 2147483647, %v8398_v1 }
 0x62d   :  { %v3176_v35 = vsub.f32 1.0, %v3175_v6  ;;  %v3083_v59 = vmul.f32 %v9847_v58, %v3082_v22  ;;  %v2586_v5 = vsel %vm342_vm6, %v8449_v20, 0.0  ;;  %5547 = vrcp.f32 %v8465_v32  ;;  %v8490_v54 = vpop.f32.mrf.mxu2 }
 0x62e   :  { %2248 = vmax.xlane.f32.xlu0 %v2247_v47  ;;  %v3101_v23 = vsub.f32 1.0, %v3100_v53  ;;  %v9852_v47 = vld [vmem:[#allocation75_spill] sm:$0xff]  ;;  %v3095_v22 = vand.u32 2147483648, %v8436_v29  ;;  %v3197_v58 = vsel %vm8476_vm5, %v8421_v50, %v3193_v9  ;;  %vm3089_vm9 = vweird.f32 %v8436_v29 }
 0x62f   :  { %v3177_v28 = vmul.f32 %v5540_v48, %v3176_v35  ;;  %5181 = vmatmul.msk.f32.gmra.mxu0 %vm342_vm6, %v3083_v59  ;;  %v3093_v3 = vand.u32 2147483647, %v8436_v29  ;;  %vm3199_vm11 = vcmp.eq.f32.partialorder %v3198_v37, 8.507059e+37  ;;  %vm3105_vm12 = vweird.f32 %v8445_v40 }
 0x630   :  { %v3102_v1 = vmul.f32 %v8445_v40, %v3101_v23  ;;  %vm3104_vm14 = vweird.f32 %v8419_v25  ;;  %v9853_v23 = vld [vmem:[#allocation35_spill] sm:$0xff] }
 0x631   :  { %v3178_v57 = vadd.f32 %v5540_v48, %v3177_v28  ;;  %v3201_v28 = vor.u32 1.1754944e-38, %v3200_v21  ;;  %vm3094_vm13 = vcmp.eq.f32.partialorder %v3093_v3, 8.507059e+37  ;;  %vm3106_vm15 = vmor %vm3104_vm14, %vm3105_vm12 }
 0x632   :  { %v5546_v63 = vpop.eup %5545 }
 0x633   :  { %v3085_v7 = vmul.f32 %v5546_v63, %v8436_v29  ;;  %v8461_v61 = vpop.xlane.xlu0 %2218  ;;  %v3182_v14 = vsel %vm8456_vm1, %v5540_v48, %v3178_v57  ;;  %vm3090_vm8 = vweird.f32 %v5546_v63  ;;  %v3096_v57 = vor.u32 1.1754944e-38, %v3095_v22  ;;  %v8493_v13 = vpop.eup %5547 }
 0x634   :  { %v8469_v62 = vpop.xlane.xlu2 %2566  ;;  %v3187_v15 = vsel %vm3184_vm3, %v3186_v56, %v3182_v14  ;;  %vm3091_vm10 = vmor %vm3089_vm9, %vm3090_vm8  ;;  %v3202_v50 = vsel %vm3199_vm11, %v3201_v28, %v3197_v58  ;;  %v3110_v29 = vand.u32 2147483648, %v8419_v25  ;;  %v3108_v56 = vand.u32 2147483647, %v8419_v25  ;;  %v9855_v28 = vld [vmem:[#allocation34_spill] sm:$0xff] }
 0x635   :  { %v3086_v27 = vsub.f32 1.0, %v3085_v7  ;;  %v3188_v35 = vmul.f32 %v9852_v47, %v3187_v15  ;;  %5549 = vrcp.f32 %v8469_v62  ;;  %v3103_v7 = vadd.f32 %v8445_v40, %v3102_v1 }
 0x636   :  { %2587 = vadd.xlane.f32.xlu0 %v2586_v5  ;;  %v3220_v5 = vmul.f32 %v8493_v13, %v8465_v32  ;;  %v3111_v25 = vor.u32 1.1754944e-38, %v3110_v29  ;;  %vm3109_vm1 = vcmp.eq.f32.partialorder %v3108_v56, 8.507059e+37  ;;  %vm3225_vm3 = vweird.f32 %v8493_v13 }
 0x637   :  { %v3087_v48 = vmul.f32 %v5546_v63, %v3086_v27  ;;  %5188 = vmatmul.msk.f32.gmra.mxu2 %vm342_vm6, %v3188_v35  ;;  %v3203_v27 = vmul.f32 %v9853_v23, %v3202_v50  ;;  %v3107_v21 = vsel %vm3106_vm15, %v8445_v40, %v3103_v7  ;;  %v8511_v35 = vpop.f32.mrf.mxu2  ;;  %v8520_v50 = vpop.f32.mrf.mxu0 }
 0x638   :  { %v3112_v47 = vsel %vm3109_vm1, %v3111_v25, %v3107_v21 }
 0x639   :  { %v3088_v59 = vadd.f32 %v5546_v63, %v3087_v48 }
 0x63b   :  { %v2558_v53 = vpop.xlane.xlu0 %2557  ;;  %v3092_v55 = vsel %vm3091_vm10, %v5546_v63, %v3088_v59  ;;  %v8506_v37 = vpop.eup %5549  ;;  %v9854_v59 = vld [vmem:[#allocation37_spill] sm:$0xff]  ;;  %vm3224_vm10 = vweird.f32 %v8465_v32 }
 0x63c   :  { %5551 = vrcp.f32 %v2558_v53  ;;  %v3097_v9 = vsel %vm3094_vm13, %v3096_v57, %v3092_v55  ;;  %v8500_v14 = vpop.xlane.xlu2 %2569  ;;  %v3250_v22 = vmul.f32 %v8506_v37, %v8469_v62  ;;  %v3113_v3 = vmul.f32 %v9854_v59, %v3112_v47  ;;  %v9856_v55 = vld [vmem:[#allocation28_spill] sm:$0xff]  ;;  %vm8552_vm11 = vmor %vm3224_vm10, %vm3225_vm3 }
 0x63d   :  { %v3098_v63 = vmul.f32 %v8089_v8, %v3097_v9  ;;  %v3221_v8 = vsub.f32 1.0, %v3220_v5  ;;  %v5353_v57 = vpack.i.bf16 %v9856_v55, %v9855_v28  ;;  %v3213_v29 = vand.u32 2147483647, %v2558_v53 }
 0x63e   :  { %v3251_v7 = vsub.f32 1.0, %v3250_v22  ;;  %v3215_v9 = vand.u32 2147483648, %v2558_v53  ;;  %vm3209_vm4 = vweird.f32 %v2558_v53  ;;  %v3228_v55 = vand.u32 2147483647, %v8465_v32 }
 0x63f   :  { %5182 = vmatmul.msk.f32.gmra.mxu0 %vm342_vm6, %v3098_v63  ;;  %5189 = vmatmul.msk.f32.gmra.mxu2 %vm342_vm6, %v3203_v27  ;;  %v3222_v40 = vmul.f32 %v8493_v13, %v3221_v8  ;;  %vm8533_vm5 = vcmp.eq.f32.partialorder %v3213_v29, 8.507059e+37  ;;  %vm3255_vm13 = vweird.f32 %v8506_v37 }
 0x640   :  { %v3252_v8 = vmul.f32 %v8506_v37, %v3251_v7  ;;  %v3216_v22 = vor.u32 1.1754944e-38, %v3215_v9  ;;  %v8544_v7 = vpop.xlane.xlu1 %2239  ;;  %v8548_v9 = vpop.f32.mrf.mxu0  ;;  %vm3229_vm1 = vcmp.eq.f32.partialorder %v3228_v55, 8.507059e+37 }
 0x641   :  { %v3223_v25 = vadd.f32 %v8493_v13, %v3222_v40 }
 0x642   :  { %v5552_v15 = vpop.eup %5551 }
 0x643   :  { %v3205_v6 = vmul.f32 %v5552_v15, %v2558_v53  ;;  %v2564_v48 = vpop.xlane.xlu0 %2563  ;;  %vm3210_vm2 = vweird.f32 %v5552_v15  ;;  %v3227_v47 = vsel %vm8552_vm11, %v8493_v13, %v3223_v25  ;;  %v3258_v13 = vand.u32 2147483647, %v8469_v62 }
 0x644   :  { %5553 = vrcp.f32 %v2564_v48  ;;  %v8522_v56 = vpop.xlane.xlu2 %2572  ;;  %vm3211_vm8 = vmor %vm3209_vm4, %vm3210_vm2  ;;  %v3243_v59 = vand.u32 2147483647, %v2564_v48  ;;  %vm3239_vm12 = vweird.f32 %v2564_v48  ;;  %vm3254_vm2 = vweird.f32 %v8469_v62 }
 0x645   :  { %5555 = vrcp.f32 %v8500_v14  ;;  %v3206_v58 = vsub.f32 1.0, %v3205_v6  ;;  %v8530_v6 = vpop.f32.mrf.mxu2  ;;  %vm8576_vm3 = vmor %vm3254_vm2, %vm3255_vm13  ;;  %vm3259_vm4 = vcmp.eq.f32.partialorder %v3258_v13, 8.507059e+37 }
 0x646   :  { %5557 = vrcp.f32 %v8522_v56  ;;  %vm3244_vm15 = vcmp.eq.f32.partialorder %v3243_v59, 8.507059e+37 }
 0x647   :  { %v3207_v1 = vmul.f32 %v5552_v15, %v3206_v58  ;;  %5183 = vmatmul.msk.f32.gmra.mxu0 %vm342_vm6, %v3113_v3  ;;  %v3245_v3 = vand.u32 2147483648, %v2564_v48 }
 0x649   :  { %v3208_v27 = vadd.f32 %v5552_v15, %v3207_v1 }
 0x64a   :  { %v5554_v63 = vpop.eup %5553  ;;  %5354 = vrot.lane.b32.xlu0 %v5353_v57, %s5665_s5  ;;  %v3230_v57 = vand.u32 2147483648, %v8465_v32  ;;  %v3253_v32 = vadd.f32 %v8506_v37, %v3252_v8 }
 0x64b   :  { %v8526_v23 = vpop.eup %5555  ;;  %v3235_v5 = vmul.f32 %v5554_v63, %v2564_v48  ;;  %v2228_v21 = vpop.xlane.xlu0 %2227  ;;  %vm3240_vm9 = vweird.f32 %v5554_v63  ;;  %v3212_v28 = vsel %vm3211_vm8, %v5552_v15, %v3208_v27  ;;  %vm3269_vm8 = vweird.f32 %v8500_v14 }
 0x64c   :  { %v3265_v1 = vmul.f32 %v8526_v23, %v8500_v14  ;;  %v2306_v53 = vsub.f32 %v8218_v46, %v2228_v21  ;;  %v3217_v29 = vsel %vm8533_vm5, %v3216_v22, %v3212_v28  ;;  %vm3241_vm14 = vmor %vm3239_vm12, %vm3240_vm9  ;;  %v3246_v21 = vor.u32 1.1754944e-38, %v3245_v3  ;;  %v8563_v28 = vpop.xlane.xlu2 %2575  ;;  %v8566_v48 = vpop.eup %5557 }
 0x64d   :  { %v3236_v58 = vsub.f32 1.0, %v3235_v5  ;;  %v3218_v27 = vmul.f32 %v8169_v33, %v3217_v29  ;;  %v3231_v8 = vor.u32 1.1754944e-38, %v3230_v57  ;;  %v8571_v25 = vpop.f32.mrf.mxu2  ;;  %v9863_v57 = vld [vmem:[#allocation30_spill] sm:$0xff]  ;;  %vm3270_vm5 = vweird.f32 %v8526_v23 }
 0x64e   :  { %v2426_v15 = vmul.f32 1.442695, %v2306_v53  ;;  %v3266_v22 = vsub.f32 1.0, %v3265_v1  ;;  %v2302_v29 = vsub.f32 %v9863_v57, %v8412_v24  ;;  %vm8609_vm9 = vmor %vm3269_vm8, %vm3270_vm5  ;;  %vm3285_vm11 = vweird.f32 %v8566_v48 }
 0x64f   :  { %v3237_v40 = vmul.f32 %v5554_v63, %v3236_v58  ;;  %5190 = vmatmul.msk.f32.gmra.mxu2 %vm342_vm6, %v3218_v27  ;;  %v3232_v3 = vsel %vm3229_vm1, %v3231_v8, %v3227_v47  ;;  %v9864_v27 = vld [vmem:[#allocation43_spill] sm:$0xff]  ;;  %vm3284_vm12 = vweird.f32 %v8522_v56  ;;  %vm3299_vm1 = vweird.f32 %v8563_v28 }
 0x650   :  { %5559 = vpow2.f32 %v2426_v15  ;;  %v3267_v55 = vmul.f32 %v8526_v23, %v3266_v22  ;;  %v2418_v8 = vmul.f32 1.442695, %v2302_v29  ;;  %vm8646_vm13 = vmor %vm3284_vm12, %vm3285_vm11 }
 0x651   :  { %v3238_v46 = vadd.f32 %v5554_v63, %v3237_v40  ;;  %v3260_v40 = vand.u32 2147483648, %v8469_v62  ;;  %5561 = vrcp.f32 %v8563_v28  ;;  %v3280_v62 = vmul.f32 %v8566_v48, %v8522_v56 }
 0x653   :  { %v3242_v58 = vsel %vm3241_vm14, %v5554_v63, %v3238_v46  ;;  %v2231_v33 = vpop.xlane.xlu0 %2230  ;;  %v3261_v5 = vor.u32 1.1754944e-38, %v3260_v40  ;;  %v8591_v46 = vpop.xlane.xlu1 %2578  ;;  %v3281_v24 = vsub.f32 1.0, %v3280_v62  ;;  %v3275_v40 = vand.u32 2147483648, %v8500_v14 }
 0x654   :  { %v3247_v53 = vsel %vm3244_vm15, %v3246_v21, %v3242_v58  ;;  %v2307_v59 = vsub.f32 %v8256_v41, %v2231_v33  ;;  %v3233_v21 = vmul.f32 %v9864_v27, %v3232_v3  ;;  %v8598_v58 = vpop.f32.mrf.mxu0  ;;  %vm3314_vm5 = vweird.f32 %v8591_v46 }
 0x655   :  { %v3248_v63 = vmul.f32 %v8188_v42, %v3247_v53  ;;  %v3257_v42 = vsel %vm8576_vm3, %v8506_v37, %v3253_v32  ;;  %v3268_v37 = vadd.f32 %v8526_v23, %v3267_v55  ;;  %v3273_v53 = vand.u32 2147483647, %v8500_v14  ;;  %v8614_v1 = vpop.f32.mrf.mxu2 }
 0x656   :  { %v2428_v15 = vmul.f32 1.442695, %v2307_v59  ;;  %v8593_v41 = vpop.eup %5559  ;;  %v3262_v22 = vsel %vm3259_vm4, %v3261_v5, %v3257_v42  ;;  %v3282_v59 = vmul.f32 %v8566_v48, %v3281_v24  ;;  %v2303_v55 = vsub.f32 %v8137_v18, %v8461_v61  ;;  %v8627_v42 = vpop.xlane.xlu2 %2242 }
 0x657   :  { %5192 = vmatmul.msk.f32.vlgmr.msrb.gmra.mxu0 %vm342_vm6, %v3248_v63  ;;  %v2610_v47 = vsel %vm342_vm6, %v8593_v41, 0.0  ;;  %5191 = vmatmul.msk.f32.gmra.mxu2 %vm342_vm6, %v3233_v21  ;;  %v8603_v33 = vpop.eup %5561  ;;  %v3263_v13 = vmul.f32 %v8157_v34, %v3262_v22  ;;  %v3272_v14 = vsel %vm8609_vm9, %v8526_v23, %v3268_v37  ;;  %v3276_v62 = vor.u32 1.1754944e-38, %v3275_v40 }
 0x658   :  { %5563 = vpow2.f32 %v2428_v15  ;;  %2611 = vadd.xlane.f32.xlu2 %v2610_v47  ;;  %v3295_v3 = vmul.f32 %v8603_v33, %v8563_v28  ;;  %vm3274_vm10 = vcmp.eq.f32.partialorder %v3273_v53, 8.507059e+37  ;;  %v3283_v23 = vadd.f32 %v8566_v48, %v3282_v59 }
 0x659   :  { %5565 = vrcp.f32 %v8591_v46  ;;  %v3277_v15 = vsel %vm3274_vm10, %v3276_v62, %v3272_v14  ;;  %v2420_v18 = vmul.f32 1.442695, %v2303_v55  ;;  %v3290_v61 = vand.u32 2147483648, %v8522_v56 }
 0x65a   :  { %5567 = vpow2.f32 %v2418_v8  ;;  %v3296_v27 = vsub.f32 1.0, %v3295_v3  ;;  %v3288_v22 = vand.u32 2147483647, %v8522_v56  ;;  %v9869_v3 = vld [vmem:[#allocation15_spill] sm:$0xff]  ;;  %vm3300_vm15 = vweird.f32 %v8603_v33 }
 0x65b   :  { %v2234_v32 = vpop.xlane.xlu0 %2233  ;;  %v8631_v29 = vpop.xlane.xlu1 %2581  ;;  %v3291_v56 = vor.u32 1.1754944e-38, %v3290_v61  ;;  %v2305_v14 = vsub.f32 %v9869_v3, %v8441_v44  ;;  %v3303_v44 = vand.u32 2147483647, %v8563_v28  ;;  %vm8679_vm2 = vmor %vm3299_vm1, %vm3300_vm15 }
 0x65c   :  { %v2308_v5 = vsub.f32 %v8270_v39, %v2234_v32  ;;  %v8639_v47 = vpop.f32.mrf.mxu0  ;;  %v3278_v39 = vmul.f32 %v8174_v52, %v3277_v15  ;;  %5569 = vrcp.f32 %v8631_v29  ;;  %v3297_v40 = vmul.f32 %v8603_v33, %v3296_v27 }
 0x65d   :  { %v3287_v52 = vsel %vm8646_vm13, %v8566_v48, %v3283_v23  ;;  %5571 = vpow2.f32 %v2420_v18  ;;  %vm3289_vm14 = vcmp.eq.f32.partialorder %v3288_v22, 8.507059e+37  ;;  %v8659_v63 = vpop.f32.mrf.mxu2  ;;  %v3305_v27 = vand.u32 2147483648, %v8563_v28 }
 0x65e   :  { %v8623_v34 = vpop.eup %5563  ;;  %v2430_v8 = vmul.f32 1.442695, %v2308_v5  ;;  %v3292_v62 = vsel %vm3289_vm14, %v3291_v56, %v3287_v52  ;;  %v3298_v48 = vadd.f32 %v8603_v33, %v3297_v40  ;;  %v8667_v5 = vpop.xlane.xlu2 %2584  ;;  %vm3304_vm3 = vcmp.eq.f32.partialorder %v3303_v44, 8.507059e+37 }
 0x65f   :  { %5193 = vmatmul.msk.f32.gmra.mxu0 %vm342_vm6, %v3263_v13  ;;  %v2613_v57 = vsel %vm342_vm6, %v8623_v34, 0.0  ;;  %v8636_v21 = vpop.eup %5565  ;;  %v3293_v61 = vmul.f32 %v8195_v12, %v3292_v62  ;;  %v3306_v56 = vor.u32 1.1754944e-38, %v3305_v27  ;;  %v3318_v27 = vand.u32 2147483647, %v8591_v46 }
 0x660   :  { %2614 = vadd.xlane.f32.xlu1 %v2613_v57  ;;  %v8644_v24 = vpop.eup %5567  ;;  %v3310_v53 = vmul.f32 %v8636_v21, %v8591_v46  ;;  %5573 = vpow2.f32 %v2430_v8  ;;  %v3302_v12 = vsel %vm8679_vm2, %v8603_v33, %v3298_v48  ;;  %vm3315_vm4 = vweird.f32 %v8636_v21 }
 0x661   :  { %v2598_v59 = vsel %vm342_vm6, %v8644_v24, 0.0  ;;  %5575 = vrcp.f32 %v8667_v5  ;;  %vm8716_vm8 = vmor %vm3314_vm5, %vm3315_vm4  ;;  %vm3319_vm9 = vcmp.eq.f32.partialorder %v3318_v27, 8.507059e+37  ;;  %vm3329_vm11 = vweird.f32 %v8631_v29 }
 0x662   :  { %v3311_v57 = vsub.f32 1.0, %v3310_v53  ;;  %v8669_v23 = vpop.eup %5569  ;;  %v9873_v53 = vld [vmem:[#allocation44_spill] sm:$0xff]  ;;  %vm3344_vm15 = vweird.f32 %v8667_v5 }
 0x663   :  { %v2237_v37 = vpop.xlane.xlu0 %2236  ;;  %v8675_v22 = vpop.eup %5571  ;;  %v3325_v28 = vmul.f32 %v8669_v23, %v8631_v29  ;;  %v2304_v52 = vsub.f32 %v9873_v53, %v8430_v16  ;;  %v2311_v53 = vsub.f32 %v8259_v2, %v8627_v42  ;;  %vm3330_vm10 = vweird.f32 %v8669_v23 }
 0x664   :  { %v2309_v13 = vsub.f32 %v8308_v19, %v2237_v37  ;;  %v2424_v37 = vmul.f32 1.442695, %v2305_v14  ;;  %v8684_v32 = vpop.f32.mrf.mxu0  ;;  %v3312_v8 = vmul.f32 %v8636_v21, %v3311_v57  ;;  %v2601_v14 = vsel %vm342_vm6, %v8675_v22, 0.0  ;;  %vm3331_vm12 = vmor %vm3329_vm11, %vm3330_vm10 }
 0x665   :  { %9872 = vst [vmem:[#allocation74_spill] sm:$0xff] %v8684_v32  ;;  %v8703_v33 = vpop.f32.mrf.mxu2  ;;  %v3326_v48 = vsub.f32 1.0, %v3325_v28  ;;  %v2436_v2 = vmul.f32 1.442695, %v2311_v53  ;;  %v3335_v42 = vand.u32 2147483648, %v8631_v29 }
 0x666   :  { %v2432_v18 = vmul.f32 1.442695, %v2309_v13  ;;  %v8693_v40 = vpop.eup %5573  ;;  %v9874_v13 = vld [vmem:[#allocation25_spill] sm:$0xff]  ;;  %v3313_v62 = vadd.f32 %v8636_v21, %v3312_v8 }
 0x667   :  { %5194 = vmatmul.msk.f32.gmra.mxu0 %vm342_vm6, %v3278_v39  ;;  %v2616_v16 = vsel %vm342_vm6, %v8693_v40, 0.0  ;;  %v8708_v57 = vpop.eup %5575  ;;  %v3327_v39 = vmul.f32 %v8669_v23, %v3326_v48  ;;  %v3336_v27 = vor.u32 1.1754944e-38, %v3335_v42  ;;  %v4366_v42 = vld [vmem:[%s9453_s1 + $0xd0] sm:$0xff] }
 0x668   :  { %2599 = vadd.xlane.f32.xlu1 %v2598_v59  ;;  %5577 = vpow2.f32 %v2432_v18  ;;  %v9875_v59 = vld [vmem:[#allocation23_spill] sm:$0xff]  ;;  %v3340_v8 = vmul.f32 %v8708_v57, %v8667_v5  ;;  %vm3345_vm14 = vweird.f32 %v8708_v57  ;;  %4606 = vmatpush.msrb.mxu3 %v4366_v42 }
 0x669   :  { %v5358_v3 = vpack.i.bf16 %v9875_v59, %v9874_v13  ;;  %5579 = vpow2.f32 %v2424_v37  ;;  %vm3346_vm1 = vmor %vm3344_vm15, %vm3345_vm14 }
 0x66d   :  { %v5345_v55 = vpop.permute.xlu1 %5344 }
 0x66e   :  { %v5347_v19 = vunpack.i.h.bf16 %v5345_v55  ;;  %v5346_v15 = vunpack.i.l.bf16 %v5345_v55  ;;  %v3307_v55 = vsel %vm3304_vm3, %v3306_v56, %v3302_v12  ;;  %v8714_v44 = vpop.eup %5577 }
 0x66f   :  { %5195 = vmatmul.msk.f32.gmra.mxu0 %vm342_vm6, %v3293_v61  ;;  %v3308_v18 = vmul.f32 %v8221_v51, %v3307_v55  ;;  %v8727_v51 = vpop.eup %5579  ;;  %v2619_v13 = vsel %vm342_vm6, %v8714_v44, 0.0  ;;  %v3333_v55 = vand.u32 2147483647, %v8631_v29 }
 0x670   :  { %4023 = vmatpush.msra.mxu0 %v5347_v19  ;;  %4082 = vmatpush.msra.mxu2 %v5346_v15  ;;  %v2422_v19 = vmul.f32 1.442695, %v2304_v52  ;;  %v3320_v15 = vand.u32 2147483648, %v8591_v46  ;;  %v3317_v46 = vsel %vm8716_vm8, %v8636_v21, %v3313_v62  ;;  %v8731_v52 = vpop.f32.mrf.mxu0  ;;  %v3341_v21 = vsub.f32 1.0, %v3340_v8  ;;  %v8742_v62 = vpop.f32.mrf.mxu2 }
 0x671   :  { %2602 = vadd.xlane.f32.xlu1 %v2601_v14  ;;  %5359 = vrot.lane.b32.xlu2 %v5358_v3, %s5665_s5  ;;  %9878 = vst [vmem:[#allocation61_spill] sm:$0xff] %v8731_v52  ;;  %v3328_v3 = vadd.f32 %v8669_v23, %v3327_v39  ;;  %v2607_v14 = vsel %vm342_vm6, %v8727_v51, 0.0  ;;  %vm3334_vm13 = vcmp.eq.f32.partialorder %v3333_v55, 8.507059e+37  ;;  %s4900_s5 = sshll.u32 %s9455_s3, 4  ;;  %s4901_s5 = int_to_ptr.hbm [resolvable:$true] %s4900_s5 }
 0x672   :  { %5581 = vpow2.f32 %v2422_v19  ;;  %v3321_v12 = vor.u32 1.1754944e-38, %v3320_v15  ;;  %v3342_v19 = vmul.f32 %v8708_v57, %v3341_v21 }
 0x673   :  { %v3332_v15 = vsel %vm3331_vm12, %v8669_v23, %v3328_v3  ;;  %5583 = vpow2.f32 %v2436_v2  ;;  %v3348_v23 = vand.u32 2147483647, %v8667_v5 }
 0x674   :  { %2617 = vadd.xlane.f32.xlu0 %v2616_v16  ;;  %v3322_v59 = vsel %vm3319_vm9, %v3321_v12, %v3317_v46  ;;  %v3337_v29 = vsel %vm3334_vm13, %v3336_v27, %v3332_v15 }
 0x675   :  { %v3323_v48 = vmul.f32 %v8226_v36, %v3322_v59  ;;  %v3343_v36 = vadd.f32 %v8708_v57, %v3342_v19  ;;  %v3338_v39 = vmul.f32 %v8252_v30, %v3337_v29  ;;  %vm3349_vm2 = vcmp.eq.f32.partialorder %v3348_v23, 8.507059e+37 }
 0x676   :  { %v5350_v37 = vpop.permute.xlu0 %5349 }
 0x677   :  { %v5351_v28 = vunpack.i.l.bf16 %v5350_v37  ;;  %5196 = vmatmul.msk.f32.gmra.mxu0 %vm342_vm6, %v3308_v18  ;;  %v5352_v56 = vunpack.i.h.bf16 %v5350_v37  ;;  %v3350_v37 = vand.u32 2147483648, %v8667_v5  ;;  %v3347_v46 = vsel %vm3346_vm1, %v8708_v57, %v3343_v36 }
 0x678   :  { %v8745_v16 = vpop.eup %5581  ;;  %v8752_v61 = vpop.f32.mrf.mxu0 }
 0x679   :  { %4083 = vmatpush.msra.mxu2 %v5351_v28  ;;  %2620 = vadd.xlane.f32.xlu1 %v2619_v13  ;;  %v2604_v18 = vsel %vm342_vm6, %v8745_v16, 0.0  ;;  %9879 = vst [vmem:[#allocation73_spill] sm:$0xff] %v8752_v61  ;;  %v8760_v8 = vpop.eup %5583  ;;  %v8762_v28 = vpop.f32.mrf.mxu2  ;;  %v3351_v12 = vor.u32 1.1754944e-38, %v3350_v37 }
 0x67a   :  { %v2625_v53 = vsel %vm342_vm6, %v8760_v8, 0.0 }
 0x67b   :  { %4084 = vmatpush.msra.mxu2 %v5352_v56  ;;  %v2310_v56 = vsub.f32 %v8071_v10, %v8544_v7  ;;  %v3352_v5 = vsel %vm3349_vm2, %v3351_v12, %v3347_v46 }
 0x67c   :  { %2608 = vadd.xlane.f32.xlu0 %v2607_v14  ;;  %v3353_v13 = vmul.f32 %v8289_v43, %v3352_v5 }
 0x67d   :  { %v2434_v59 = vmul.f32 1.442695, %v2310_v56 }
 0x67f   :  { %5197 = vmatmul.msk.f32.gmra.mxu0 %vm342_vm6, %v3323_v48  ;;  %5585 = vpow2.f32 %v2434_v59  ;;  %v8790_v48 = vpop.xlane.xlu2 %2590 }
 0x680   :  { %v8770_v30 = vpop.f32.mrf.mxu0  ;;  %v3380_v52 = vand.u32 2147483648, %v8790_v48  ;;  %vm3374_vm10 = vweird.f32 %v8790_v48 }
 0x681   :  { %2605 = vadd.xlane.f32.xlu1 %v2604_v18  ;;  %9880 = vst [vmem:[#allocation56_spill] sm:$0xff] %v8770_v30  ;;  %v8774_v3 = vpop.f32.mrf.mxu2 }
 0x685   :  { %v8779_v2 = vpop.eup %5585 }
 0x686   :  { %v2622_v43 = vsel %vm342_vm6, %v8779_v2, 0.0 }
 0x687   :  { %5198 = vmatmul.msk.f32.gmra.mxu0 %vm342_vm6, %v3338_v39 }
 0x688   :  { %v8776_v57 = vpop.f32.mrf.mxu0 }
 0x689   :  { %2626 = vadd.xlane.f32.xlu1 %v2625_v53  ;;  %v8781_v7 = vpop.f32.mrf.mxu2 }
 0x68a   :  { %v8798_v36 = vpop.xlane.xlu2 %2593 }
 0x68b   :  { %vm3389_vm14 = vweird.f32 %v8798_v36 }
 0x68f   :  { %5199 = vmatmul.msk.f32.gmra.mxu0 %vm342_vm6, %v3353_v13 }
 0x690   :  { %v8788_v55 = vpop.f32.mrf.mxu0 }
 0x691   :  { %v3895_v29 = vpop.f32.mrf.mxu2 }
 0x693   :  { %v8810_v13 = vpop.xlane.xlu2 %2596 }
 0x698   :  { %v2246_v21 = vpop.xlane.xlu1 %2245  ;;  %v8800_v23 = vpop.f32.mrf.mxu0 }
 0x699   :  { %v2312_v14 = vsub.f32 %v8402_v26, %v2246_v21 }
 0x69a   :  { %2623 = vadd.xlane.f32.xlu2 %v2622_v43 }
 0x69b   :  { %v2438_v10 = vmul.f32 1.442695, %v2312_v14 }
 0x69d   :  { %5587 = vpow2.f32 %v2438_v10 }
 0x69e   :  { %5589 = vrcp.f32 %v8790_v48 }
 0x6a0   :  { %v8812_v59 = vpop.f32.mrf.mxu0 }
 0x6a1   :  { %v2249_v19 = vpop.xlane.xlu0 %2248 }
 0x6a2   :  { %v2313_v27 = vsub.f32 %v8428_v45, %v2249_v19  ;;  %v8806_v45 = vpop.f32.mrf.mxu2 }
 0x6a3   :  { %v8792_v26 = vpop.eup %5587 }
 0x6a4   :  { %v2628_v15 = vsel %vm342_vm6, %v8792_v26, 0.0  ;;  %v2440_v18 = vmul.f32 1.442695, %v2313_v27  ;;  %v5590_v37 = vpop.eup %5589 }
 0x6a5   :  { %2629 = vadd.xlane.f32.xlu1 %v2628_v15  ;;  %v3370_v12 = vmul.f32 %v5590_v37, %v8790_v48  ;;  %vm3375_vm5 = vweird.f32 %v5590_v37 }
 0x6a6   :  { %5591 = vpow2.f32 %v2440_v18  ;;  %vm3376_vm11 = vmor %vm3374_vm10, %vm3375_vm5 }
 0x6a7   :  { %v3371_v5 = vsub.f32 1.0, %v3370_v12 }
 0x6a8   :  { %v8823_v32 = vpop.f32.mrf.mxu0 }
 0x6a9   :  { %v2588_v39 = vpop.xlane.xlu0 %2587  ;;  %v3372_v43 = vmul.f32 %v5590_v37, %v3371_v5 }
 0x6aa   :  { %5593 = vrcp.f32 %v2588_v39  ;;  %v3365_v42 = vand.u32 2147483648, %v2588_v39  ;;  %v3363_v27 = vand.u32 2147483647, %v2588_v39  ;;  %v3901_v18 = vpop.f32.mrf.mxu2  ;;  %vm3359_vm4 = vweird.f32 %v2588_v39 }
 0x6ab   :  { %5595 = vrcp.f32 %v8798_v36 }
 0x6ac   :  { %v8802_v46 = vpop.eup %5591  ;;  %5597 = vrcp.f32 %v8810_v13  ;;  %vm3364_vm9 = vcmp.eq.f32.partialorder %v3363_v27, 8.507059e+37 }
 0x6ad   :  { %v2631_v53 = vsel %vm342_vm6, %v8802_v46, 0.0 }
 0x6ae   :  { %2632 = vadd.xlane.f32.xlu0 %v2631_v53  ;;  %v3366_v53 = vor.u32 1.1754944e-38, %v3365_v42  ;;  %v3381_v42 = vor.u32 1.1754944e-38, %v3380_v52  ;;  %v3393_v52 = vand.u32 2147483647, %v8798_v36 }
 0x6b0   :  { %v5594_v56 = vpop.eup %5593  ;;  %vm3394_vm1 = vcmp.eq.f32.partialorder %v3393_v52, 8.507059e+37 }
 0x6b1   :  { %v3355_v21 = vmul.f32 %v5594_v56, %v2588_v39  ;;  %v8814_v14 = vpop.eup %5595  ;;  %vm3360_vm3 = vweird.f32 %v5594_v56 }
 0x6b2   :  { %4194 = vrot.lane.b32.xlu2 %v3895_v29, %s5666_s11  ;;  %v3385_v19 = vmul.f32 %v8814_v14, %v8798_v36  ;;  %vm3361_vm8 = vmor %vm3359_vm4, %vm3360_vm3  ;;  %v5598_v61 = vpop.eup %5597  ;;  %vm3390_vm13 = vweird.f32 %v8814_v14  ;;  %vm3404_vm3 = vweird.f32 %v8810_v13 }
 0x6b3   :  { %v3356_v10 = vsub.f32 1.0, %v3355_v21  ;;  %v3373_v21 = vadd.f32 %v5590_v37, %v3372_v43  ;;  %vm3391_vm15 = vmor %vm3389_vm14, %vm3390_vm13  ;;  %vm3405_vm2 = vweird.f32 %v5598_v61 }
 0x6b4   :  { %v3386_v5 = vsub.f32 1.0, %v3385_v19  ;;  %vm3406_vm4 = vmor %vm3404_vm3, %vm3405_vm2 }
 0x6b5   :  { %v3357_v15 = vmul.f32 %v5594_v56, %v3356_v10  ;;  %v3378_v10 = vand.u32 2147483647, %v8790_v48  ;;  %v3377_v48 = vsel %vm3376_vm11, %v5590_v37, %v3373_v21  ;;  %v8840_v37 = vpop.f32.mrf.mxu0 }
 0x6b7   :  { %v3358_v12 = vadd.f32 %v5594_v56, %v3357_v15  ;;  %vm3379_vm12 = vcmp.eq.f32.partialorder %v3378_v10, 8.507059e+37 }
 0x6b8   :  { %v3382_v27 = vsel %vm3379_vm12, %v3381_v42, %v3377_v48 }
 0x6b9   :  { %v3362_v30 = vsel %vm3361_vm8, %v5594_v56, %v3358_v12  ;;  %v3387_v56 = vmul.f32 %v8814_v14, %v3386_v5  ;;  %v3395_v12 = vand.u32 2147483648, %v8798_v36 }
 0x6ba   :  { %v3367_v29 = vsel %vm3364_vm9, %v3366_v53, %v3362_v30  ;;  %4198 = vrot.lane.b32.xlu2 %v3901_v18, %s5666_s11  ;;  %v3400_v30 = vmul.f32 %v5598_v61, %v8810_v13  ;;  %v3383_v53 = vmul.f32 %v8371_v60, %v3382_v27  ;;  %v3408_v60 = vand.u32 2147483647, %v8810_v13 }
 0x6bb   :  { %v3368_v15 = vmul.f32 %v8449_v20, %v3367_v29  ;;  %v3904_v20 = vpop.f32.mrf.mxu2 }
 0x6bc   :  { %v5355_v39 = vpop.permute.xlu0 %5354  ;;  %v3401_v18 = vsub.f32 1.0, %v3400_v30  ;;  %vm3409_vm5 = vcmp.eq.f32.partialorder %v3408_v60, 8.507059e+37 }
 0x6bd   :  { %v5356_v43 = vunpack.i.l.bf16 %v5355_v39  ;;  %5200 = vmatmul.msk.f32.vlgmr.msra.gmra.mxu0 %vm342_vm6, %v3368_v15  ;;  %v5357_v19 = vunpack.i.h.bf16 %v5355_v39  ;;  %v3410_v15 = vand.u32 2147483648, %v8810_v13 }
 0x6be   :  { %4130 = vrot.lane.b32.xlu1 %v8571_v25, %s5667_s12  ;;  %v3388_v25 = vadd.f32 %v8814_v14, %v3387_v56  ;;  %v3402_v21 = vmul.f32 %v5598_v61, %v3401_v18 }
 0x6bf   :  { %4085 = vmatpush.msra.mxu2 %v5356_v43  ;;  %v3411_v56 = vor.u32 1.1754944e-38, %v3410_v15 }
 0x6c0   :  { %v3392_v5 = vsel %vm3391_vm15, %v8814_v14, %v3388_v25  ;;  %v3403_v36 = vadd.f32 %v5598_v61, %v3402_v21 }
 0x6c1   :  { %4086 = vmatpush.msra.mxu2 %v5357_v19 }
 0x6c2   :  { %4132 = vrot.lane.b32.xlu0 %v8614_v1, %s5667_s12  ;;  %4200 = vrot.lane.b32.xlu2 %v3904_v20, %s5666_s11  ;;  %v3396_v1 = vor.u32 1.1754944e-38, %v3395_v12  ;;  %v3407_v39 = vsel %vm3406_vm4, %v5598_v61, %v3403_v36 }
 0x6c3   :  { %v3907_v29 = vpop.f32.mrf.mxu2 }
 0x6c4   :  { %v3397_v10 = vsel %vm3394_vm1, %v3396_v1, %v3392_v5 }
 0x6c5   :  { %5201 = vmatmul.msk.f32.gmra.mxu0 %vm342_vm6, %v3383_v53  ;;  %v3398_v14 = vmul.f32 %v8390_v38, %v3397_v10 }
 0x6c6   :  { %4136 = vrot.lane.b32.xlu1 %v8703_v33, %s5667_s12  ;;  %v8853_v33 = vpop.f32.mrf.mxu0 }
 0x6ca   :  { %4134 = vrot.lane.b32.xlu0 %v8659_v63, %s5667_s12  ;;  %4202 = vrot.lane.b32.xlu2 %v3907_v29, %s5666_s11  ;;  %v3412_v63 = vsel %vm3409_vm5, %v3411_v56, %v3407_v39 }
 0x6cb   :  { %v2612_v30 = vpop.xlane.xlu2 %2611  ;;  %v3910_v43 = vpop.f32.mrf.mxu2  ;;  %v3413_v13 = vmul.f32 %v8406_v49, %v3412_v63 }
 0x6cc   :  { %5599 = vrcp.f32 %v2612_v30  ;;  %v3485_v27 = vand.u32 2147483648, %v2612_v30  ;;  %v3483_v49 = vand.u32 2147483647, %v2612_v30  ;;  %vm3479_vm9 = vweird.f32 %v2612_v30 }
 0x6cd   :  { %5202 = vmatmul.msk.f32.gmra.mxu0 %vm342_vm6, %v3398_v14 }
 0x6ce   :  { %4138 = vrot.lane.b32.xlu1 %v8742_v62, %s5667_s12  ;;  %v8864_v62 = vpop.f32.mrf.mxu0  ;;  %v3486_v53 = vor.u32 1.1754944e-38, %v3485_v27  ;;  %vm3484_vm11 = vcmp.eq.f32.partialorder %v3483_v49, 8.507059e+37 }
 0x6d2   :  { %4204 = vrot.lane.b32.xlu2 %v3910_v43, %s5666_s11  ;;  %v5600_v38 = vpop.eup %5599 }
 0x6d3   :  { %v2615_v48 = vpop.xlane.xlu1 %2614  ;;  %v3475_v61 = vmul.f32 %v5600_v38, %v2612_v30  ;;  %v5360_v42 = vpop.permute.xlu2 %5359  ;;  %vm3480_vm8 = vweird.f32 %v5600_v38  ;;  %v4365_v30 = vld [vmem:[%s9453_s1 + $0xc0] sm:$0xff] }
 0x6d4   :  { %5601 = vrcp.f32 %v2615_v48  ;;  %v5361_v20 = vunpack.i.l.bf16 %v5360_v42  ;;  %v3913_v25 = vpop.f32.mrf.mxu2  ;;  %v5362_v18 = vunpack.i.h.bf16 %v5360_v42  ;;  %vm3481_vm10 = vmor %vm3479_vm9, %vm3480_vm8  ;;  %v3498_v14 = vand.u32 2147483647, %v2615_v48  ;;  %4607 = vmatpush.msrb.mxu3 %v4365_v30 }
 0x6d5   :  { %5203 = vmatmul.msk.f32.gmra.mxu0 %vm342_vm6, %v3413_v13  ;;  %v3476_v19 = vsub.f32 1.0, %v3475_v61  ;;  %vm3494_vm13 = vweird.f32 %v2615_v48 }
 0x6d6   :  { %4140 = vrot.lane.b32.xlu1 %v8762_v28, %s5667_s12  ;;  %4087 = vmatpush.msra.mxu2 %v5361_v20  ;;  %v3960_v5 = vpop.f32.mrf.mxu0  ;;  %vm3499_vm15 = vcmp.eq.f32.partialorder %v3498_v14, 8.507059e+37 }
 0x6d7   :  { %v3477_v28 = vmul.f32 %v5600_v38, %v3476_v19 }
 0x6d8   :  { %4088 = vmatpush.msra.mxu2 %v5362_v18 }
 0x6d9   :  { %v3478_v52 = vadd.f32 %v5600_v38, %v3477_v28 }
 0x6da   :  { %v5602_v12 = vpop.eup %5601  ;;  %4206 = vrot.lane.b32.xlu2 %v3913_v25, %s5666_s11 }
 0x6db   :  { %v3490_v21 = vmul.f32 %v5602_v12, %v2615_v48  ;;  %v2600_v1 = vpop.xlane.xlu1 %2599  ;;  %v3482_v29 = vsel %vm3481_vm10, %v5600_v38, %v3478_v52  ;;  %vm3495_vm12 = vweird.f32 %v5602_v12 }
 0x6dc   :  { %5603 = vrcp.f32 %v2600_v1  ;;  %v3487_v10 = vsel %vm3484_vm11, %v3486_v53, %v3482_v29  ;;  %v3916_v56 = vpop.f32.mrf.mxu2  ;;  %vm3496_vm14 = vmor %vm3494_vm13, %vm3495_vm12  ;;  %v3425_v19 = vand.u32 2147483648, %v2600_v1  ;;  %v3423_v25 = vand.u32 2147483647, %v2600_v1 }
 0x6dd   :  { %v3491_v36 = vsub.f32 1.0, %v3490_v21  ;;  %v3488_v15 = vmul.f32 %v8593_v41, %v3487_v10  ;;  %vm3419_vm2 = vweird.f32 %v2600_v1 }
 0x6de   :  { %4142 = vrot.lane.b32.xlu1 %v8774_v3, %s5667_s12  ;;  %v3500_v3 = vand.u32 2147483648, %v2615_v48  ;;  %v3963_v61 = vpop.f32.mrf.mxu0  ;;  %v3426_v49 = vor.u32 1.1754944e-38, %v3425_v19  ;;  %vm3424_vm4 = vcmp.eq.f32.partialorder %v3423_v25, 8.507059e+37 }
 0x6df   :  { %v3492_v60 = vmul.f32 %v5602_v12, %v3491_v36  ;;  %5208 = vmatmul.msk.f32.vlgmr.msra.gmra.mxu2 %vm342_vm6, %v3488_v15 }
 0x6e0   :  { %v3501_v41 = vor.u32 1.1754944e-38, %v3500_v3 }
 0x6e1   :  { %v3493_v39 = vadd.f32 %v5602_v12, %v3492_v60 }
 0x6e2   :  { %v5604_v63 = vpop.eup %5603  ;;  %4208 = vrot.lane.b32.xlu2 %v3916_v56, %s5666_s11 }
 0x6e3   :  { %v3415_v43 = vmul.f32 %v5604_v63, %v2600_v1  ;;  %v3497_v38 = vsel %vm3496_vm14, %v5602_v12, %v3493_v39  ;;  %vm3420_vm1 = vweird.f32 %v5604_v63 }
 0x6e4   :  { %v2603_v13 = vpop.xlane.xlu1 %2602  ;;  %v3502_v20 = vsel %vm3499_vm15, %v3501_v41, %v3497_v38  ;;  %vm3421_vm3 = vmor %vm3419_vm2, %vm3420_vm1 }
 0x6e5   :  { %5605 = vrcp.f32 %v2603_v13  ;;  %v3416_v48 = vsub.f32 1.0, %v3415_v43  ;;  %v3503_v27 = vmul.f32 %v8623_v34, %v3502_v20  ;;  %v3440_v36 = vand.u32 2147483648, %v2603_v13 }
 0x6e6   :  { %4146 = vrot.lane.b32.xlu1 %v8776_v57, %s5667_s12  ;;  %v3438_v60 = vand.u32 2147483647, %v2603_v13  ;;  %vm3434_vm8 = vweird.f32 %v2603_v13 }
 0x6e7   :  { %v2618_v42 = vpop.xlane.xlu0 %2617  ;;  %v3417_v57 = vmul.f32 %v5604_v63, %v3416_v48  ;;  %5209 = vmatmul.msk.f32.gmra.mxu2 %vm342_vm6, %v3503_v27  ;;  %v3441_v43 = vor.u32 1.1754944e-38, %v3440_v36 }
 0x6e8   :  { %5607 = vrcp.f32 %v2618_v42  ;;  %v3515_v56 = vand.u32 2147483648, %v2618_v42  ;;  %v3513_v41 = vand.u32 2147483647, %v2618_v42  ;;  %vm3439_vm11 = vcmp.eq.f32.partialorder %v3438_v60, 8.507059e+37 }
 0x6e9   :  { %v3418_v18 = vadd.f32 %v5604_v63, %v3417_v57  ;;  %vm3509_vm12 = vweird.f32 %v2618_v42 }
 0x6ea   :  { %4210 = vrot.lane.b32.xlu2 %v3960_v5, %s5666_s11  ;;  %v3966_v5 = vpop.f32.mrf.mxu0  ;;  %v3516_v20 = vor.u32 1.1754944e-38, %v3515_v56  ;;  %vm3514_vm14 = vcmp.eq.f32.partialorder %v3513_v41, 8.507059e+37 }
 0x6eb   :  { %v5606_v28 = vpop.eup %5605  ;;  %v3422_v53 = vsel %vm3421_vm3, %v5604_v63, %v3418_v18 }
 0x6ec   :  { %v3430_v12 = vmul.f32 %v5606_v28, %v2603_v13  ;;  %v8883_v52 = vpop.xlane.xlu1 %2620  ;;  %v3427_v10 = vsel %vm3424_vm4, %v3426_v49, %v3422_v53  ;;  %vm3435_vm5 = vweird.f32 %v5606_v28 }
 0x6ed   :  { %5609 = vrcp.f32 %v8883_v52  ;;  %v3428_v3 = vmul.f32 %v8644_v24, %v3427_v10  ;;  %vm8892_vm9 = vmor %vm3434_vm8, %vm3435_vm5  ;;  %vm3524_vm1 = vweird.f32 %v8883_v52  ;;  %v3528_v53 = vand.u32 2147483647, %v8883_v52 }
 0x6ee   :  { %4144 = vrot.lane.b32.xlu1 %v8781_v7, %s5667_s12  ;;  %v5608_v21 = vpop.eup %5607  ;;  %v3431_v34 = vsub.f32 1.0, %v3430_v12 }
 0x6ef   :  { %v3505_v1 = vmul.f32 %v5608_v21, %v2618_v42  ;;  %v8886_v29 = vpop.xlane.xlu0 %2608  ;;  %vm3510_vm10 = vweird.f32 %v5608_v21  ;;  %5204 = vmatmul.msk.f32.gmra.mxu0 %vm342_vm6, %v3428_v3  ;;  %vm3529_vm3 = vcmp.eq.f32.partialorder %v3528_v53, 8.507059e+37 }
 0x6f0   :  { %5611 = vrcp.f32 %v8886_v29  ;;  %v3432_v7 = vmul.f32 %v5606_v28, %v3431_v34  ;;  %vm3511_vm13 = vmor %vm3509_vm12, %vm3510_vm10  ;;  %v3470_v63 = vand.u32 2147483648, %v8886_v29 }
 0x6f1   :  { %v3506_v15 = vsub.f32 1.0, %v3505_v1 }
 0x6f2   :  { %v3433_v14 = vadd.f32 %v5606_v28, %v3432_v7  ;;  %4212 = vrot.lane.b32.xlu2 %v3963_v61, %s5666_s11  ;;  %v3969_v34 = vpop.f32.mrf.mxu0 }
 0x6f3   :  { %v3507_v39 = vmul.f32 %v5608_v21, %v3506_v15  ;;  %v5610_v30 = vpop.eup %5609 }
 0x6f4   :  { %v3520_v13 = vmul.f32 %v5610_v30, %v8883_v52  ;;  %v2606_v38 = vpop.xlane.xlu1 %2605  ;;  %v3437_v48 = vsel %vm8892_vm9, %v5606_v28, %v3433_v14  ;;  %vm3525_vm15 = vweird.f32 %v5610_v30  ;;  %v3530_v28 = vand.u32 2147483648, %v8883_v52 }
 0x6f5   :  { %v3508_v24 = vadd.f32 %v5608_v21, %v3507_v39  ;;  %5613 = vrcp.f32 %v2606_v38  ;;  %v3442_v19 = vsel %vm3439_vm11, %v3441_v43, %v3437_v48  ;;  %vm3526_vm2 = vmor %vm3524_vm1, %vm3525_vm15  ;;  %v3455_v36 = vand.u32 2147483648, %v2606_v38 }
 0x6f6   :  { %4148 = vrot.lane.b32.xlu1 %v8788_v55, %s5667_s12  ;;  %v8901_v55 = vpop.eup %5611  ;;  %v3521_v57 = vsub.f32 1.0, %v3520_v13  ;;  %v3443_v61 = vmul.f32 %v8675_v22, %v3442_v19  ;;  %v3531_v10 = vor.u32 1.1754944e-38, %v3530_v28  ;;  %vm3449_vm5 = vweird.f32 %v2606_v38 }
 0x6f7   :  { %v3512_v27 = vsel %vm3511_vm13, %v5608_v21, %v3508_v24  ;;  %v3460_v18 = vmul.f32 %v8901_v55, %v8886_v29  ;;  %vm3465_vm9 = vweird.f32 %v8901_v55  ;;  %vm3464_vm11 = vweird.f32 %v8886_v29 }
 0x6f8   :  { %v3522_v25 = vmul.f32 %v5610_v30, %v3521_v57  ;;  %v3517_v49 = vsel %vm3514_vm14, %v3516_v20, %v3512_v27  ;;  %5205 = vmatmul.msk.f32.gmra.mxu0 %vm342_vm6, %v3443_v61  ;;  %vm3466_vm12 = vmor %vm3464_vm11, %vm3465_vm9  ;;  %v3471_v13 = vor.u32 1.1754944e-38, %v3470_v63 }
 0x6f9   :  { %v3518_v12 = vmul.f32 %v8693_v40, %v3517_v49  ;;  %v3461_v21 = vsub.f32 1.0, %v3460_v18 }
 0x6fa   :  { %v3523_v42 = vadd.f32 %v5610_v30, %v3522_v25  ;;  %4214 = vrot.lane.b32.xlu2 %v3966_v5, %s5666_s11  ;;  %v3456_v5 = vor.u32 1.1754944e-38, %v3455_v36  ;;  %v3972_v56 = vpop.f32.mrf.mxu0 }
 0x6fb   :  { %v5614_v22 = vpop.eup %5613  ;;  %5210 = vmatmul.msk.f32.gmra.mxu2 %vm342_vm6, %v3518_v12  ;;  %v3462_v15 = vmul.f32 %v8901_v55, %v3461_v21  ;;  %v4364_v12 = vld [vmem:[%s9453_s1 + $0xb0] sm:$0xff] }
 0x6fc   :  { %v3445_v1 = vmul.f32 %v5614_v22, %v2606_v38  ;;  %v3527_v40 = vsel %vm3526_vm2, %v5610_v30, %v3523_v42  ;;  %vm3450_vm4 = vweird.f32 %v5614_v22  ;;  %4608 = vmatpush.msrb.mxu3 %v4364_v12 }
 0x6fd   :  { %v3532_v52 = vsel %vm3529_vm3, %v3531_v10, %v3527_v40  ;;  %vm3451_vm8 = vmor %vm3449_vm5, %vm3450_vm4  ;;  %v3463_v39 = vadd.f32 %v8901_v55, %v3462_v15 }
 0x6fe   :  { %4150 = vrot.lane.b32.xlu1 %v8800_v23, %s5667_s12  ;;  %v3446_v7 = vsub.f32 1.0, %v3445_v1  ;;  %v3453_v23 = vand.u32 2147483647, %v2606_v38  ;;  %v3533_v14 = vmul.f32 %v8714_v44, %v3532_v52  ;;  %v3468_v44 = vand.u32 2147483647, %v8886_v29 }
 0x6ff   :  { %v3467_v24 = vsel %vm3466_vm12, %v8901_v55, %v3463_v39 }
 0x700   :  { %v3447_v60 = vmul.f32 %v5614_v22, %v3446_v7  ;;  %vm3454_vm10 = vcmp.eq.f32.partialorder %v3453_v23, 8.507059e+37  ;;  %vm3469_vm13 = vcmp.eq.f32.partialorder %v3468_v44, 8.507059e+37 }
 0x701   :  { %v3472_v38 = vsel %vm3469_vm13, %v3471_v13, %v3467_v24 }
 0x702   :  { %v3448_v3 = vadd.f32 %v5614_v22, %v3447_v60  ;;  %4216 = vrot.lane.b32.xlu2 %v3969_v34, %s5666_s11  ;;  %v3975_v48 = vpop.f32.mrf.mxu0  ;;  %v3473_v29 = vmul.f32 %v8727_v51, %v3472_v38 }
 0x703   :  { %5211 = vmatmul.msk.f32.gmra.mxu2 %vm342_vm6, %v3533_v14 }
 0x704   :  { %v3452_v30 = vsel %vm3451_vm8, %v5614_v22, %v3448_v3 }
 0x705   :  { %v3457_v41 = vsel %vm3454_vm10, %v3456_v5, %v3452_v30 }
 0x706   :  { %4196 = vrot.lane.b32.xlu1 %v8806_v45, %s5666_s11  ;;  %v2627_v45 = vpop.xlane.xlu1 %2626  ;;  %v3458_v43 = vmul.f32 %v8745_v16, %v3457_v41 }
 0x707   :  { %5615 = vrcp.f32 %v2627_v45  ;;  %v3560_v40 = vand.u32 2147483648, %v2627_v45  ;;  %vm3554_vm4 = vweird.f32 %v2627_v45  ;;  %v3558_v36 = vand.u32 2147483647, %v2627_v45 }
 0x708   :  { %5206 = vmatmul.msk.f32.gmra.mxu0 %vm342_vm6, %v3458_v43 }
 0x709   :  { %v3561_v14 = vor.u32 1.1754944e-38, %v3560_v40  ;;  %vm3559_vm8 = vcmp.eq.f32.partialorder %v3558_v36, 8.507059e+37 }
 0x70a   :  { %4218 = vrot.lane.b32.xlu2 %v3972_v56, %s5666_s11  ;;  %v3978_v27 = vpop.f32.mrf.mxu0 }
 0x70d   :  { %v2624_v20 = vpop.xlane.xlu2 %2623  ;;  %v5616_v57 = vpop.eup %5615 }
 0x70e   :  { %4152 = vrot.lane.b32.xlu1 %v8812_v59, %s5667_s12  ;;  %5617 = vrcp.f32 %v2624_v20  ;;  %v3550_v16 = vmul.f32 %v5616_v57, %v2627_v45  ;;  %v3545_v18 = vand.u32 2147483648, %v2624_v20  ;;  %v3543_v28 = vand.u32 2147483647, %v2624_v20 }
 0x70f   :  { %vm3539_vm15 = vweird.f32 %v2624_v20  ;;  %vm3555_vm1 = vweird.f32 %v5616_v57 }
 0x710   :  { %5207 = vmatmul.msk.f32.gmra.mxu0 %vm342_vm6, %v3473_v29  ;;  %v3551_v59 = vsub.f32 1.0, %v3550_v16  ;;  %v3546_v34 = vor.u32 1.1754944e-38, %v3545_v18  ;;  %vm3544_vm3 = vcmp.eq.f32.partialorder %v3543_v28, 8.507059e+37  ;;  %vm3556_vm5 = vmor %vm3554_vm4, %vm3555_vm1 }
 0x712   :  { %4220 = vrot.lane.b32.xlu2 %v3975_v48, %s5666_s11  ;;  %v3552_v49 = vmul.f32 %v5616_v57, %v3551_v59  ;;  %v3981_v60 = vpop.f32.mrf.mxu0 }
 0x714   :  { %v5618_v19 = vpop.eup %5617  ;;  %v3553_v22 = vadd.f32 %v5616_v57, %v3552_v49 }
 0x715   :  { %v3535_v61 = vmul.f32 %v5618_v19, %v2624_v20  ;;  %vm3540_vm14 = vweird.f32 %v5618_v19  ;;  %v4195_v10 = vpop.permute.xlu2 %4194 }
 0x716   :  { %4154 = vrot.lane.b32.xlu1 %v8823_v32, %s5667_s12  ;;  %vm3541_vm2 = vmor %vm3539_vm15, %vm3540_vm14  ;;  %v3557_v3 = vsel %vm3556_vm5, %v5616_v57, %v3553_v22 }
 0x717   :  { %v3536_v25 = vsub.f32 1.0, %v3535_v61  ;;  %v3562_v5 = vsel %vm3559_vm8, %v3561_v14, %v3557_v3 }
 0x718   :  { %v2630_v55 = vpop.xlane.xlu1 %2629  ;;  %v3563_v41 = vmul.f32 %v8760_v8, %v3562_v5 }
 0x719   :  { %5619 = vrcp.f32 %v2630_v55  ;;  %v3537_v51 = vmul.f32 %v5618_v19, %v3536_v25  ;;  %v3575_v30 = vand.u32 2147483648, %v2630_v55  ;;  %vm3569_vm10 = vweird.f32 %v2630_v55 }
 0x71a   :  { %4222 = vrot.lane.b32.xlu2 %v3978_v27, %s5666_s11  ;;  %v3573_v63 = vand.u32 2147483647, %v2630_v55 }
 0x71b   :  { %v3538_v32 = vadd.f32 %v5618_v19, %v3537_v51  ;;  %v3576_v24 = vor.u32 1.1754944e-38, %v3575_v30 }
 0x71c   :  { %vm3574_vm12 = vcmp.eq.f32.partialorder %v3573_v63, 8.507059e+37 }
 0x71d   :  { %v3542_v1 = vsel %vm3541_vm2, %v5618_v19, %v3538_v32  ;;  %v8945_v44 = vpop.permute.xlu2 %4198  ;;  %vm4338_vm2 = vcmask 392192  }
 0x71e   :  { %v3547_v7 = vsel %vm3544_vm3, %v3546_v34, %v3542_v1 }
 0x71f   :  { %v5620_v42 = vpop.eup %5619  ;;  %v3548_v52 = vmul.f32 %v8779_v2, %v3547_v7 }
 0x720   :  { %v3565_v53 = vmul.f32 %v5620_v42, %v2630_v55  ;;  %vm3570_vm9 = vweird.f32 %v5620_v42 }
 0x721   :  { %v2633_v15 = vpop.xlane.xlu0 %2632  ;;  %5212 = vmatmul.msk.f32.gmra.mxu2 %vm342_vm6, %v3548_v52  ;;  %vm3571_vm11 = vmor %vm3569_vm10, %vm3570_vm9 }
 0x722   :  { %v3566_v21 = vsub.f32 1.0, %v3565_v53  ;;  %5621 = vrcp.f32 %v2633_v15  ;;  %4224 = vrot.lane.b32.xlu2 %v3981_v60, %s5666_s11  ;;  %v3590_v8 = vand.u32 2147483648, %v2633_v15  ;;  %vm3584_vm14 = vweird.f32 %v2633_v15  ;;  %v4362_v60 = vld [vmem:[%s9453_s1 + $0x90] sm:$0xff]  ;;  %s5670_s11 = smov 128  }
 0x723   :  { %v3588_v16 = vand.u32 2147483647, %v2633_v15 }
 0x724   :  { %v3567_v23 = vmul.f32 %v5620_v42, %v3566_v21  ;;  %v3591_v59 = vor.u32 1.1754944e-38, %v3590_v8 }
 0x725   :  { %v4201_v61 = vpop.permute.xlu2 %4200  ;;  %vm3589_vm1 = vcmp.eq.f32.partialorder %v3588_v16, 8.507059e+37 }
 0x726   :  { %v3568_v39 = vadd.f32 %v5620_v42, %v3567_v23 }
 0x728   :  { %v5622_v56 = vpop.eup %5621  ;;  %v3572_v43 = vsel %vm3571_vm11, %v5620_v42, %v3568_v39 }
 0x729   :  { %v3580_v2 = vmul.f32 %v5622_v56, %v2633_v15  ;;  %5213 = vmatmul.msk.f32.gmra.mxu2 %vm342_vm6, %v3563_v41  ;;  %v3577_v20 = vsel %vm3574_vm12, %v3576_v24, %v3572_v43  ;;  %vm3585_vm13 = vweird.f32 %v5622_v56 }
 0x72a   :  { %v3578_v55 = vmul.f32 %v8792_v26, %v3577_v20  ;;  %vm3586_vm15 = vmor %vm3584_vm14, %vm3585_vm13 }
 0x72b   :  { %v3581_v45 = vsub.f32 1.0, %v3580_v2 }
 0x72d   :  { %v3582_v13 = vmul.f32 %v5622_v56, %v3581_v45  ;;  %v4203_v28 = vpop.permute.xlu2 %4202 }
 0x72f   :  { %v3583_v29 = vadd.f32 %v5622_v56, %v3582_v13 }
 0x730   :  { %v4131_v38 = vpop.permute.xlu1 %4130 }
 0x731   :  { %v4306_v48 = vsel %vm411_vm7, %v8380_v0, %v4131_v38  ;;  %5214 = vmatmul.msk.f32.gmra.mxu2 %vm342_vm6, %v3578_v55  ;;  %v3587_v19 = vsel %vm3586_vm15, %v5622_v56, %v3583_v29 }
 0x732   :  { %v8951_v57 = vsel %vm37_vm0, %v4306_v48, %v4195_v10  ;;  %v3592_v25 = vsel %vm3589_vm1, %v3591_v59, %v3587_v19 }
 0x733   :  { %v3593_v49 = vmul.f32 %v8802_v46, %v3592_v25 }
 0x734   :  { %v4133_v14 = vpop.permute.xlu0 %4132 }
 0x735   :  { %v4307_v2 = vsel %vm411_vm7, %v8392_v11, %v4133_v14 }
 0x738   :  { %v4137_v27 = vpop.permute.xlu1 %4136 }
 0x739   :  { %v4309_v0 = vsel %vm411_vm7, %v8423_v17, %v4137_v27  ;;  %5215 = vmatmul.msk.f32.gmra.mxu2 %vm342_vm6, %v3593_v49  ;;  %v4205_v27 = vpop.permute.xlu2 %4204 }
 0x73a   :  { %v8958_v18 = vsel %vm37_vm0, %v4309_v0, %v4201_v61  ;;  %v4025_v51 = vpop.f32.mrf.mxu0  ;;  %v4361_v0 = vld [vmem:[%s9453_s1 + $0x80] sm:$0xff] }
 0x73b   :  { %4258 = vrot.lane.b32.xlu1 %v4025_v51, %s5668_s19 }
 0x73c   :  { %v4135_v56 = vpop.permute.xlu0 %4134 }
 0x73d   :  { %v4308_v20 = vsel %vm411_vm7, %v8404_v4, %v4135_v56 }
 0x73e   :  { %v4324_v29 = vsel %vm37_vm0, %v4308_v20, %v8945_v44 }
 0x740   :  { %v4139_v26 = vpop.permute.xlu1 %4138 }
 0x741   :  { %v4310_v12 = vsel %vm411_vm7, %v8451_v31, %v4139_v26  ;;  %v4207_v25 = vpop.permute.xlu2 %4206 }
 0x742   :  { %v8966_v42 = vsel %vm37_vm0, %v4310_v12, %v4203_v28  ;;  %v4028_v17 = vpop.f32.mrf.mxu0 }
 0x743   :  { %4156 = vrot.lane.b32.xlu1 %v8840_v37, %s5667_s12  ;;  %4260 = vrot.lane.b32.xlu0 %v4028_v17, %s5668_s19  ;;  %v4363_v37 = vld [vmem:[%s9453_s1 + $0xa0] sm:$0xff] }
 0x744   :  { %4609 = vmatpush.msrb.mxu3 %v4363_v37 }
 0x746   :  { %4610 = vmatpush.msrb.mxu3 %v4362_v60 }
 0x748   :  { %v8977_v31 = vpop.permute.xlu1 %4140  ;;  %4611 = vmatpush.msrb.mxu3 %v4361_v0 }
 0x749   :  { %v4209_v28 = vpop.permute.xlu2 %4208  ;;  %v4311_v12 = vsel %vm411_vm7, %v8490_v54, %v8977_v31 }
 0x74a   :  { %v4031_v46 = vpop.f32.mrf.mxu0  ;;  %v4327_v17 = vsel %vm37_vm0, %v4311_v12, %v4205_v27 }
 0x74b   :  { %4158 = vrot.lane.b32.xlu1 %v8853_v33, %s5667_s12  ;;  %4262 = vrot.lane.b32.xlu0 %v4031_v46, %s5668_s19 }
 0x750   :  { %v8982_v53 = vpop.permute.xlu1 %4142 }
 0x752   :  { %v4034_v32 = vpop.f32.mrf.mxu0 }
 0x753   :  { %4160 = vrot.lane.b32.xlu1 %v8864_v62, %s5667_s12  ;;  %4264 = vrot.lane.b32.xlu0 %v4034_v32, %s5668_s19  ;;  %s5671_s12 = smov 8  }
 0x758   :  { %v8984_v34 = vpop.permute.xlu1 %4146 }
 0x760   :  { %v8987_v22 = vpop.permute.xlu1 %4144 }
 0x762   :  { %v4090_v1 = vpop.f32.mrf.mxu2 }
 0x768   :  { %v8990_v62 = vpop.permute.xlu1 %4148 }
 0x76a   :  { %v4093_v7 = vpop.f32.mrf.mxu2 }
 0x76c   :  { %v4037_v33 = vpop.f32.mrf.mxu0 }
 0x76d   :  { %4266 = vrot.lane.b32.xlu0 %v4037_v33, %s5668_s19  ;;  %v4211_v33 = vpop.permute.xlu2 %4210 }
 0x770   :  { %v8993_v10 = vpop.permute.xlu1 %4150 }
 0x775   :  { %v4040_v21 = vpop.f32.mrf.mxu0 }
 0x776   :  { %4268 = vrot.lane.b32.xlu0 %v4040_v21, %s5668_s19  ;;  %v4312_v21 = vsel %vm411_vm7, %v8511_v35, %v8982_v53  ;;  %v4314_v53 = vsel %vm411_vm7, %v8520_v50, %v8984_v34 }
 0x778   :  { %v4197_v15 = vpop.permute.xlu1 %4196 }
 0x779   :  { %v4323_v45 = vsel %vm37_vm0, %v4307_v2, %v4197_v15 }
 0x77e   :  { %v4096_v52 = vpop.f32.mrf.mxu2 }
 0x780   :  { %v9000_v3 = vpop.permute.xlu1 %4152 }
 0x785   :  { %v4043_v40 = vpop.f32.mrf.mxu0 }
 0x786   :  { %4270 = vrot.lane.b32.xlu0 %v4043_v40, %s5668_s19  ;;  %v4099_v23 = vpop.f32.mrf.mxu2 }
 0x788   :  { %v9004_v39 = vpop.permute.xlu1 %4154 }
 0x78d   :  { %v4046_v36 = vpop.f32.mrf.mxu0 }
 0x78e   :  { %4272 = vrot.lane.b32.xlu0 %v4046_v36, %s5668_s19 }
 0x796   :  { %4274 = vrot.lane.b32.xlu0 %v4090_v1, %s5668_s19  ;;  %v4328_v1 = vsel %vm37_vm0, %v4312_v21, %v4207_v25 }
 0x79e   :  { %4276 = vrot.lane.b32.xlu0 %v4093_v7, %s5668_s19  ;;  %v4213_v7 = vpop.permute.xlu2 %4212 }
 0x7a4   :  { %v4102_v5 = vpop.f32.mrf.mxu2 }
 0x7a6   :  { %4278 = vrot.lane.b32.xlu0 %v4096_v52, %s5668_s19  ;;  %v4313_v52 = vsel %vm411_vm7, %v8530_v6, %v8987_v22 }
 0x7a7   :  { %v4329_v60 = vsel %vm37_vm0, %v4313_v52, %v4209_v28 }
 0x7ac   :  { %v4105_v30 = vpop.f32.mrf.mxu2 }
 0x7ad   :  { %v4259_v63 = vpop.permute.xlu1 %4258 }
 0x7ae   :  { %4280 = vrot.lane.b32.xlu0 %v4099_v23, %s5668_s19  ;;  %v9011_v41 = vsel %vm4338_vm2, %v8951_v57, %v4259_v63  ;;  %v4215_v23 = vpop.permute.xlu2 %4214 }
 0x7af   :  { %v4367_v38 = vsel %vm342_vm6, %v9011_v41, 0.0 }
 0x7b4   :  { %v4108_v24 = vpop.f32.mrf.mxu2 }
 0x7b5   :  { %v4261_v43 = vpop.permute.xlu0 %4260  ;;  %v4157_v50 = vpop.permute.xlu1 %4156 }
 0x7b6   :  { %v9015_v13 = vsel %vm4338_vm2, %v4323_v45, %v4261_v43  ;;  %4282 = vrot.lane.b32.xlu0 %v4102_v5, %s5668_s19  ;;  %v4330_v5 = vsel %vm37_vm0, %v4314_v53, %v4211_v33  ;;  %v4217_v2 = vpop.permute.xlu2 %4216  ;;  %v9886_v33 = vld [vmem:[#allocation56_spill] sm:$0xff] }
 0x7b7   :  { %v4368_v48 = vsel %vm342_vm6, %v9015_v13, 0.0 }
 0x7b8   :  { %v4369_v11 = vadd.f32 %v4368_v48, %v4367_v38 }
 0x7bc   :  { %v4111_v8 = vpop.f32.mrf.mxu2 }
 0x7bd   :  { %v4263_v57 = vpop.permute.xlu0 %4262  ;;  %4288 = vrot.lane.b32.xlu1 %v4111_v8, %s5668_s19  ;;  %v4159_v48 = vpop.permute.xlu1 %4158  ;;  %v4317_v8 = vsel %vm411_vm7, %v8639_v47, %v9000_v3  ;;  %v9884_v47 = vld [vmem:[#allocation61_spill] sm:$0xff] }
 0x7be   :  { %v9027_v16 = vsel %vm4338_vm2, %v4324_v29, %v4263_v57  ;;  %4284 = vrot.lane.b32.xlu0 %v4105_v30, %s5668_s19  ;;  %v4316_v29 = vsel %vm411_vm7, %v8598_v58, %v8993_v10  ;;  %v4319_v3 = vsel %vm411_vm7, %v9884_v47, %v4157_v50 }
 0x7bf   :  { %v4370_v55 = vsel %vm342_vm6, %v9027_v16, 0.0 }
 0x7c0   :  { %v4371_v19 = vadd.f32 %v4370_v55, %v4369_v11  ;;  %v4315_v11 = vsel %vm411_vm7, %v8548_v9, %v8990_v62 }
 0x7c1   :  { %v4331_v57 = vsel %vm37_vm0, %v4315_v11, %v4213_v7 }
 0x7c5   :  { %v4265_v59 = vpop.permute.xlu0 %4264  ;;  %v4161_v58 = vpop.permute.xlu1 %4160 }
 0x7c6   :  { %v9035_v4 = vsel %vm4338_vm2, %v8958_v18, %v4265_v59  ;;  %4286 = vrot.lane.b32.xlu0 %v4108_v24, %s5668_s19  ;;  %v4219_v24 = vpop.permute.xlu2 %4218  ;;  %v4321_v21 = vsel %vm411_vm7, %v9886_v33, %v4161_v58 }
 0x7c7   :  { %v4372_v44 = vsel %vm342_vm6, %v9035_v4, 0.0 }
 0x7c8   :  { %v4373_v61 = vadd.f32 %v4372_v44, %v4371_v19  ;;  %v4332_v19 = vsel %vm37_vm0, %v4316_v29, %v4215_v23  ;;  %v9883_v44 = vld [vmem:[#allocation74_spill] sm:$0xff] }
 0x7c9   :  { %v4318_v9 = vsel %vm411_vm7, %v9883_v44, %v9004_v39 }
 0x7ca   :  { %v4334_v39 = vsel %vm37_vm0, %v4318_v9, %v4219_v24 }
 0x7ce   :  { %v4221_v38 = vpop.permute.xlu2 %4220 }
 0x7cf   :  { %v4335_v28 = vsel %vm37_vm0, %v4319_v3, %v4221_v38 }
 0x7d6   :  { %v4223_v59 = vpop.permute.xlu2 %4222 }
 0x7de   :  { %v4225_v7 = vpop.permute.xlu2 %4224 }
 0x7df   :  { %v4267_v49 = vpop.permute.xlu0 %4266  ;;  %v4337_v52 = vsel %vm37_vm0, %v4321_v21, %v4225_v7 }
 0x7e0   :  { %v9045_v51 = vsel %vm4338_vm2, %v8966_v42, %v4267_v49 }
 0x7e1   :  { %v4374_v18 = vsel %vm342_vm6, %v9045_v51, 0.0 }
 0x7e2   :  { %v4375_v26 = vadd.f32 %v4374_v18, %v4373_v61  ;;  %v4333_v61 = vsel %vm37_vm0, %v4317_v8, %v4217_v2 }
 0x7e8   :  { %v4269_v46 = vpop.permute.xlu0 %4268 }
 0x7e9   :  { %v9054_v32 = vsel %vm4338_vm2, %v4327_v17, %v4269_v46 }
 0x7ea   :  { %v4376_v37 = vsel %vm342_vm6, %v9054_v32, 0.0 }
 0x7eb   :  { %v4377_v42 = vadd.f32 %v4376_v37, %v4375_v26  ;;  %v9885_v37 = vld [vmem:[#allocation73_spill] sm:$0xff] }
 0x7f8   :  { %v4271_v40 = vpop.permute.xlu0 %4270 }
 0x7f9   :  { %v9063_v54 = vsel %vm4338_vm2, %v4328_v1, %v4271_v40 }
 0x7fa   :  { %v4378_v31 = vsel %vm342_vm6, %v9063_v54, 0.0 }
 0x7fb   :  { %v4379_v36 = vadd.f32 %v4378_v31, %v4377_v42  ;;  %v4320_v42 = vsel %vm411_vm7, %v9885_v37, %v4159_v48 }
 0x800   :  { %v4273_v15 = vpop.permute.xlu0 %4272 }
 0x801   :  { %v9072_v35 = vsel %vm4338_vm2, %v4329_v60, %v4273_v15  ;;  %v4336_v15 = vsel %vm37_vm0, %v4320_v42, %v4223_v59 }
 0x802   :  { %v4380_v14 = vsel %vm342_vm6, %v9072_v35, 0.0 }
 0x803   :  { %v4381_v30 = vadd.f32 %v4380_v14, %v4379_v36 }
 0x808   :  { %v4275_v56 = vpop.permute.xlu0 %4274 }
 0x809   :  { %v9081_v6 = vsel %vm4338_vm2, %v4330_v5, %v4275_v56 }
 0x80a   :  { %v4382_v22 = vsel %vm342_vm6, %v9081_v6, 0.0 }
 0x80b   :  { %v4383_v63 = vadd.f32 %v4382_v22, %v4381_v30 }
 0x810   :  { %v4277_v45 = vpop.permute.xlu0 %4276 }
 0x811   :  { %v9096_v55 = vsel %vm4338_vm2, %v4331_v57, %v4277_v45 }
 0x812   :  { %v4384_v10 = vsel %vm342_vm6, %v9096_v55, 0.0 }
 0x813   :  { %v4385_v49 = vadd.f32 %v4384_v10, %v4383_v63 }
 0x818   :  { %v4279_v43 = vpop.permute.xlu0 %4278 }
 0x819   :  { %v9103_v62 = vsel %vm4338_vm2, %v4332_v19, %v4279_v43 }
 0x81a   :  { %v4386_v0 = vsel %vm342_vm6, %v9103_v62, 0.0 }
 0x81b   :  { %v4387_v12 = vadd.f32 %v4386_v0, %v4385_v49 }
 0x820   :  { %v4281_v34 = vpop.permute.xlu0 %4280 }
 0x821   :  { %v9111_v27 = vsel %vm4338_vm2, %v4333_v61, %v4281_v34  ;;  %v9887_v34 = vld [vmem:[#allocation6_spill] sm:$0xff] }
 0x822   :  { %v4388_v26 = vsel %vm342_vm6, %v9111_v27, 0.0 }
 0x823   :  { %v4389_v1 = vadd.f32 %v4388_v26, %v4387_v12 }
 0x828   :  { %v4283_v20 = vpop.permute.xlu0 %4282 }
 0x829   :  { %v9117_v18 = vsel %vm4338_vm2, %v4334_v39, %v4283_v20 }
 0x82a   :  { %v4390_v46 = vsel %vm342_vm6, %v9117_v18, 0.0 }
 0x82b   :  { %v4391_v36 = vadd.f32 %v4390_v46, %v4389_v1 }
 0x82f   :  { %v4289_v40 = vpop.permute.xlu1 %4288 }
 0x830   :  { %v4285_v25 = vpop.permute.xlu0 %4284  ;;  %v9136_v53 = vsel %vm4338_vm2, %v4337_v52, %v4289_v40 }
 0x831   :  { %v9123_v17 = vsel %vm4338_vm2, %v4335_v28, %v4285_v25  ;;  %v4396_v30 = vsel %vm342_vm6, %v9136_v53, 0.0 }
 0x832   :  { %v4392_v31 = vsel %vm342_vm6, %v9123_v17, 0.0 }
 0x833   :  { %v4393_v23 = vadd.f32 %v4392_v31, %v4391_v36 }
 0x838   :  { %v4287_v60 = vpop.permute.xlu0 %4286 }
 0x839   :  { %v4353_v14 = vsel %vm4338_vm2, %v4336_v15, %v4287_v60 }
 0x83a   :  { %v4394_v5 = vsel %vm342_vm6, %v4353_v14, 0.0 }
 0x83b   :  { %v4395_v56 = vadd.f32 %v4394_v5, %v4393_v23 }
 0x83d   :  { %v4397_v22 = vadd.f32 %v4396_v30, %v4395_v56 }
 0x83f   :  { %v4398_v63 = vrot.slane %v4397_v22, 4 }
 0x841   :  { %v4399_v2 = vadd.f32 %v4398_v63, %v4397_v22 }
 0x843   :  { %v4400_v45 = vrot.slane %v4399_v2, 2 }
 0x845   :  { %v4401_v43 = vadd.f32 %v4400_v45, %v4399_v2 }
 0x847   :  { %v4402_v24 = vrot.slane %v4401_v43, 1 }
 0x849   :  { %v4403_v50 = vadd.f32 %v4402_v24, %v4401_v43 }
 0x84b   :  { %v4404_v38 = vmul.f32 %v4403_v50, %v9887_v34 }
 0x84d   :  { %v9144_v48 = vsub.f32 %v9011_v41, %v4404_v38  ;;  %v9147_v11 = vsub.f32 %v9015_v13, %v4404_v38  ;;  %v9150_v20 = vsub.f32 %v9027_v16, %v4404_v38  ;;  %v9153_v29 = vsub.f32 %v9035_v4, %v4404_v38 }
 0x84e   :  { %v9156_v57 = vsub.f32 %v9045_v51, %v4404_v38  ;;  %v9159_v8 = vsub.f32 %v9054_v32, %v4404_v38  ;;  %v9162_v19 = vsub.f32 %v9063_v54, %v4404_v38  ;;  %v9165_v41 = vsub.f32 %v9081_v6, %v4404_v38 }
 0x84f   :  { %v4421_v13 = vmul.f32 %v9144_v48, %v9144_v48  ;;  %v4422_v16 = vmul.f32 %v9147_v11, %v9147_v11  ;;  %v4423_v4 = vmul.f32 %v9150_v20, %v9150_v20  ;;  %v4424_v51 = vmul.f32 %v9153_v29, %v9153_v29 }
 0x850   :  { %v4425_v6 = vmul.f32 %v9156_v57, %v9156_v57  ;;  %v9181_v58 = vsub.f32 %v9072_v35, %v4404_v38  ;;  %v4426_v10 = vmul.f32 %v9159_v8, %v9159_v8  ;;  %v4427_v3 = vmul.f32 %v9162_v19, %v9162_v19 }
 0x851   :  { %v4437_v32 = vsel %vm342_vm6, %v4421_v13, 0.0  ;;  %v4438_v54 = vsel %vm342_vm6, %v4422_v16, 0.0  ;;  %v4440_v44 = vsel %vm342_vm6, %v4423_v4, 0.0  ;;  %v4442_v61 = vsel %vm342_vm6, %v4424_v51, 0.0  ;;  %v4360_v51 = vld [vmem:[%s9453_s1 + $0x70] sm:$0xff] }
 0x852   :  { %v4439_v59 = vadd.f32 %v4438_v54, %v4437_v32  ;;  %v4444_v0 = vsel %vm342_vm6, %v4425_v6, 0.0  ;;  %v9190_v25 = vsub.f32 %v9096_v55, %v4404_v38  ;;  %v4428_v49 = vmul.f32 %v9181_v58, %v9181_v58  ;;  %v4359_v32 = vld [vmem:[%s9453_s1 + $0x60] sm:$0xff]  ;;  %4612 = vmatpush.msrb.mxu3 %v4360_v51 }
 0x853   :  { %v4446_v35 = vsel %vm342_vm6, %v4426_v10, 0.0  ;;  %v9196_v28 = vsub.f32 %v9103_v62, %v4404_v38  ;;  %v4429_v12 = vmul.f32 %v9165_v41, %v9165_v41  ;;  %v4448_v46 = vsel %vm342_vm6, %v4427_v3, 0.0 }
 0x854   :  { %v4441_v9 = vadd.f32 %v4440_v44, %v4439_v59  ;;  %v9202_v42 = vsub.f32 %v9111_v27, %v4404_v38  ;;  %v4430_v55 = vmul.f32 %v9190_v25, %v9190_v25  ;;  %v4450_v33 = vsel %vm342_vm6, %v4428_v49, 0.0  ;;  %4613 = vmatpush.msrb.mxu3 %v4359_v32  ;;  %v4355_v49 = vld [vmem:[%s9453_s1 + $0xe2] ss:$0 sm:$0xff] }
 0x855   :  { %v9208_v1 = vsub.f32 %v9117_v18, %v4404_v38  ;;  %v4431_v62 = vmul.f32 %v9196_v28, %v9196_v28  ;;  %v4452_v40 = vsel %vm342_vm6, %v4429_v12, 0.0  ;;  %v4418_v7 = vsub.f32 %v9123_v17, %v4404_v38 }
 0x856   :  { %v4443_v47 = vadd.f32 %v4442_v61, %v4441_v9  ;;  %v4432_v27 = vmul.f32 %v9202_v42, %v9202_v42  ;;  %v4454_v36 = vsel %vm342_vm6, %v4430_v55, 0.0  ;;  %v4419_v15 = vsub.f32 %v4353_v14, %v4404_v38 }
 0x857   :  { %v4433_v60 = vmul.f32 %v9208_v1, %v9208_v1  ;;  %v4456_v18 = vsel %vm342_vm6, %v4431_v62, 0.0  ;;  %v9221_v5 = vsub.f32 %v9136_v53, %v4404_v38  ;;  %v4434_v56 = vmul.f32 %v4418_v7, %v4418_v7 }
 0x858   :  { %v4445_v39 = vadd.f32 %v4444_v0, %v4443_v47  ;;  %v4458_v30 = vsel %vm342_vm6, %v4432_v27, 0.0  ;;  %v4435_v22 = vmul.f32 %v4419_v15, %v4419_v15 }
 0x859   :  { %v4460_v63 = vsel %vm342_vm6, %v4433_v60, 0.0  ;;  %v4436_v14 = vmul.f32 %v9221_v5, %v9221_v5  ;;  %v4462_v45 = vsel %vm342_vm6, %v4434_v56, 0.0 }
 0x85a   :  { %v4447_v26 = vadd.f32 %v4446_v35, %v4445_v39  ;;  %v4464_v24 = vsel %vm342_vm6, %v4435_v22, 0.0 }
 0x85b   :  { %v4466_v53 = vsel %vm342_vm6, %v4436_v14, 0.0 }
 0x85c   :  { %v4449_v37 = vadd.f32 %v4448_v46, %v4447_v26  ;;  %v4356_v46 = vld [vmem:[%s9453_s1 + $0xe3] ss:$0 sm:$0xff] }
 0x85e   :  { %v4451_v21 = vadd.f32 %v4450_v33, %v4449_v37 }
 0x860   :  { %v4453_v31 = vadd.f32 %v4452_v40, %v4451_v21 }
 0x862   :  { %v4455_v52 = vadd.f32 %v4454_v36, %v4453_v31 }
 0x864   :  { %v4457_v23 = vadd.f32 %v4456_v18, %v4455_v52 }
 0x866   :  { %v4459_v17 = vadd.f32 %v4458_v30, %v4457_v23 }
 0x868   :  { %v4461_v2 = vadd.f32 %v4460_v63, %v4459_v17 }
 0x86a   :  { %v4463_v43 = vadd.f32 %v4462_v45, %v4461_v2 }
 0x86c   :  { %v4465_v50 = vadd.f32 %v4464_v24, %v4463_v43 }
 0x86e   :  { %v4467_v38 = vadd.f32 %v4466_v53, %v4465_v50 }
 0x870   :  { %v4468_v13 = vrot.slane %v4467_v38, 4 }
 0x872   :  { %v4469_v16 = vadd.f32 %v4468_v13, %v4467_v38 }
 0x874   :  { %v4470_v4 = vrot.slane %v4469_v16, 2 }
 0x876   :  { %v4471_v54 = vadd.f32 %v4470_v4, %v4469_v16 }
 0x878   :  { %v4472_v59 = vrot.slane %v4471_v54, 1 }
 0x87a   :  { %v4473_v6 = vadd.f32 %v4472_v59, %v4471_v54 }
 0x87c   :  { %v4474_v44 = vmul.f32 %v4473_v6, %v9887_v34 }
 0x87e   :  { %v4475_v9 = vadd.f32 1e-05, %v4474_v44 }
 0x880   :  { %5623 = vrsqrt.f32 %v4475_v9  ;;  %vm4482_vm7 = vweird.f32 %v4475_v9 }
 0x886   :  { %v5624_v10 = vpop.eup %5623 }
 0x887   :  { %v4477_v61 = vmul.f32 %v5624_v10, %v4475_v9  ;;  %vm4483_vm0 = vweird.f32 %v5624_v10 }
 0x888   :  { %vm4484_vm3 = vmor %vm4482_vm7, %vm4483_vm0 }
 0x889   :  { %v4478_v47 = vmul.f32 %v5624_v10, %v4477_v61 }
 0x88b   :  { %v4479_v3 = vmul.f32 0.5, %v4478_v47 }
 0x88d   :  { %v4480_v0 = vsub.f32 1.5, %v4479_v3 }
 0x88f   :  { %v4481_v39 = vmul.f32 %v5624_v10, %v4480_v0 }
 0x891   :  { %v4485_v35 = vsel %vm4484_vm3, %v5624_v10, %v4481_v39 }
 0x892   :  { %v4500_v26 = vmul.f32 %v4485_v35, %v4419_v15  ;;  %v4486_v12 = vmul.f32 %v4485_v35, %v9144_v48  ;;  %v4487_v33 = vmul.f32 %v4485_v35, %v9147_v11  ;;  %v4488_v31 = vmul.f32 %v4485_v35, %v9150_v20 }
 0x893   :  { %v4494_v27 = vmul.f32 %v4485_v35, %v9165_v41  ;;  %v4495_v36 = vmul.f32 %v4485_v35, %v9190_v25  ;;  %v4496_v48 = vmul.f32 %v4485_v35, %v9196_v28  ;;  %v4497_v52 = vmul.f32 %v4485_v35, %v9202_v42 }
 0x894   :  { %v4516_v37 = vmul.f32 %v4500_v26, %v4355_v49  ;;  %v4502_v55 = vmul.f32 %v4486_v12, %v4355_v49  ;;  %v4503_v40 = vmul.f32 %v4487_v33, %v4355_v49  ;;  %v4498_v15 = vmul.f32 %v4485_v35, %v9208_v1 }
 0x895   :  { %v4499_v60 = vmul.f32 %v4485_v35, %v4418_v7  ;;  %v4510_v23 = vmul.f32 %v4494_v27, %v4355_v49  ;;  %v4511_v56 = vmul.f32 %v4495_v36, %v4355_v49  ;;  %v4512_v30 = vmul.f32 %v4496_v48, %v4355_v49 }
 0x896   :  { %v4518_v21 = vadd.f32 %v4502_v55, %v4356_v46  ;;  %v4532_v18 = vadd.f32 %v4516_v37, %v4356_v46  ;;  %v4519_v11 = vadd.f32 %v4503_v40, %v4356_v46  ;;  %v4513_v17 = vmul.f32 %v4497_v52, %v4355_v49 }
 0x897   :  { %v4514_v22 = vmul.f32 %v4498_v15, %v4355_v49  ;;  %v4515_v63 = vmul.f32 %v4499_v60, %v4355_v49  ;;  %v4526_v20 = vadd.f32 %v4510_v23, %v4356_v46  ;;  %v4527_v2 = vadd.f32 %v4511_v56, %v4356_v46 }
 0x898   :  { %v4534_v62 = vmax.f32 %v4518_v21, 0.0  ;;  %v4528_v41 = vadd.f32 %v4512_v30, %v4356_v46  ;;  %v4501_v25 = vmul.f32 %v4485_v35, %v9221_v5  ;;  %v4529_v14 = vadd.f32 %v4513_v17, %v4356_v46 }
 0x899   :  { %v4530_v28 = vadd.f32 %v4514_v22, %v4356_v46  ;;  %v4531_v45 = vadd.f32 %v4515_v63, %v4356_v46  ;;  %v4535_v42 = vmax.f32 %v4519_v11, 0.0  ;;  %v4504_v43 = vmul.f32 %v4488_v31, %v4355_v49 }
 0x89a   :  { %5216 = vmatmul.msk.f32.vlgmr.msrb.gmra.mxu3 %vm342_vm6, %v4534_v62  ;;  %v4517_v1 = vmul.f32 %v4501_v25, %v4355_v49  ;;  %v4489_v50 = vmul.f32 %v4485_v35, %v9153_v29  ;;  %v4490_v16 = vmul.f32 %v4485_v35, %v9156_v57  ;;  %v4491_v32 = vmul.f32 %v4485_v35, %v9159_v8 }
 0x89b   :  { %v4520_v24 = vadd.f32 %v4504_v43, %v4356_v46  ;;  %v4492_v29 = vmul.f32 %v4485_v35, %v9162_v19  ;;  %v4493_v57 = vmul.f32 %v4485_v35, %v9181_v58  ;;  %v4542_v0 = vmax.f32 %v4526_v20, 0.0 }
 0x89c   :  { %v4533_v7 = vadd.f32 %v4517_v1, %v4356_v46  ;;  %v4505_v38 = vmul.f32 %v4489_v50, %v4355_v49  ;;  %v4506_v4 = vmul.f32 %v4490_v16, %v4355_v49  ;;  %v4507_v59 = vmul.f32 %v4491_v32, %v4355_v49 }
 0x89d   :  { %v4536_v53 = vmax.f32 %v4520_v24, 0.0  ;;  %v4508_v9 = vmul.f32 %v4492_v29, %v4355_v49  ;;  %v4509_v47 = vmul.f32 %v4493_v57, %v4355_v49  ;;  %v4543_v39 = vmax.f32 %v4527_v2, 0.0 }
 0x89e   :  { %v4521_v13 = vadd.f32 %v4505_v38, %v4356_v46  ;;  %v4522_v51 = vadd.f32 %v4506_v4, %v4356_v46  ;;  %v4523_v6 = vadd.f32 %v4507_v59, %v4356_v46  ;;  %v4544_v19 = vmax.f32 %v4528_v41, 0.0 }
 0x89f   :  { %v4524_v10 = vadd.f32 %v4508_v9, %v4356_v46  ;;  %v4525_v3 = vadd.f32 %v4509_v47, %v4356_v46  ;;  %v4545_v26 = vmax.f32 %v4529_v14, 0.0  ;;  %v4546_v58 = vmax.f32 %v4530_v28, 0.0 }
 0x8a0   :  { %v4537_v5 = vmax.f32 %v4521_v13, 0.0  ;;  %v4538_v54 = vmax.f32 %v4522_v51, 0.0  ;;  %v4539_v44 = vmax.f32 %v4523_v6, 0.0  ;;  %v4547_v49 = vmax.f32 %v4531_v45, 0.0 }
 0x8a1   :  { %v4540_v61 = vmax.f32 %v4524_v10, 0.0  ;;  %v4541_v8 = vmax.f32 %v4525_v3, 0.0  ;;  %v4548_v35 = vmax.f32 %v4532_v18, 0.0  ;;  %v4549_v12 = vmax.f32 %v4533_v7, 0.0 }
 0x8a2   :  { %5217 = vmatmul.msk.f32.gmra.mxu3 %vm342_vm6, %v4535_v42 }
 0x8aa   :  { %5218 = vmatmul.msk.f32.gmra.mxu3 %vm342_vm6, %v4536_v53 }
 0x8b2   :  { %5219 = vmatmul.msk.f32.gmra.mxu3 %vm342_vm6, %v4537_v5 }
 0x8ba   :  { %5220 = vmatmul.msk.f32.gmra.mxu3 %vm342_vm6, %v4538_v54 }
 0x8c2   :  { %5221 = vmatmul.msk.f32.gmra.mxu3 %vm342_vm6, %v4539_v44 }
 0x8ca   :  { %5222 = vmatmul.msk.f32.gmra.mxu3 %vm342_vm6, %v4540_v61 }
 0x8d2   :  { %5223 = vmatmul.msk.f32.gmra.mxu3 %vm342_vm6, %v4541_v8 }
 0x8da   :  { %5224 = vmatmul.msk.f32.gmra.mxu3 %vm342_vm6, %v4542_v0 }
 0x8e2   :  { %5225 = vmatmul.msk.f32.gmra.mxu3 %vm342_vm6, %v4543_v39 }
 0x8ea   :  { %5226 = vmatmul.msk.f32.gmra.mxu3 %vm342_vm6, %v4544_v19 }
 0x8f2   :  { %5227 = vmatmul.msk.f32.gmra.mxu3 %vm342_vm6, %v4545_v26 }
 0x8fa   :  { %5228 = vmatmul.msk.f32.gmra.mxu3 %vm342_vm6, %v4546_v58 }
 0x902   :  { %5229 = vmatmul.msk.f32.gmra.mxu3 %vm342_vm6, %v4547_v49 }
 0x90a   :  { %5230 = vmatmul.msk.f32.gmra.mxu3 %vm342_vm6, %v4548_v35 }
 0x912   :  { %5231 = vmatmul.msk.f32.gmra.mxu3 %vm342_vm6, %v4549_v12 }
 0x91d   :  { %v4615_v46 = vpop.f32.mrf.mxu3 }
 0x91e   :  { %v4663_v60 = vsel %vm342_vm6, %v4615_v46, 0.0 }
 0x925   :  { %v4618_v37 = vpop.f32.mrf.mxu3 }
 0x926   :  { %v4664_v15 = vsel %vm342_vm6, %v4618_v37, 0.0 }
 0x927   :  { %v4665_v11 = vadd.f32 %v4664_v15, %v4663_v60 }
 0x92d   :  { %v4621_v55 = vpop.f32.mrf.mxu3 }
 0x92e   :  { %v4666_v18 = vsel %vm342_vm6, %v4621_v55, 0.0 }
 0x92f   :  { %v4667_v56 = vadd.f32 %v4666_v18, %v4665_v11 }
 0x935   :  { %v4624_v33 = vpop.f32.mrf.mxu3 }
 0x936   :  { %v4668_v23 = vsel %vm342_vm6, %v4624_v33, 0.0 }
 0x937   :  { %v4669_v22 = vadd.f32 %v4668_v23, %v4667_v56 }
 0x93d   :  { %v4627_v21 = vpop.f32.mrf.mxu3 }
 0x93e   :  { %v4670_v17 = vsel %vm342_vm6, %v4627_v21, 0.0 }
 0x93f   :  { %v4671_v20 = vadd.f32 %v4670_v17, %v4669_v22 }
 0x945   :  { %v4630_v62 = vpop.f32.mrf.mxu3 }
 0x946   :  { %v4672_v63 = vsel %vm342_vm6, %v4630_v62, 0.0 }
 0x947   :  { %v4673_v41 = vadd.f32 %v4672_v63, %v4671_v20 }
 0x94d   :  { %v4633_v40 = vpop.f32.mrf.mxu3 }
 0x94e   :  { %v4674_v2 = vsel %vm342_vm6, %v4633_v40, 0.0 }
 0x94f   :  { %v4675_v14 = vadd.f32 %v4674_v2, %v4673_v41 }
 0x955   :  { %v9273_v31 = vpop.f32.mrf.mxu3 }
 0x956   :  { %v4676_v25 = vsel %vm342_vm6, %v9273_v31, 0.0 }
 0x957   :  { %v4677_v42 = vadd.f32 %v4676_v25, %v4675_v14 }
 0x95d   :  { %v9275_v27 = vpop.f32.mrf.mxu3 }
 0x95e   :  { %v4678_v45 = vsel %vm342_vm6, %v9275_v27, 0.0 }
 0x95f   :  { %v4679_v1 = vadd.f32 %v4678_v45, %v4677_v42 }
 0x965   :  { %v9277_v36 = vpop.f32.mrf.mxu3 }
 0x966   :  { %v4680_v43 = vsel %vm342_vm6, %v9277_v36, 0.0 }
 0x967   :  { %v4681_v24 = vadd.f32 %v4680_v43, %v4679_v1 }
 0x96d   :  { %v9279_v48 = vpop.f32.mrf.mxu3 }
 0x96e   :  { %v4682_v7 = vsel %vm342_vm6, %v9279_v48, 0.0 }
 0x96f   :  { %v4683_v53 = vadd.f32 %v4682_v7, %v4681_v24 }
 0x975   :  { %v9281_v52 = vpop.f32.mrf.mxu3 }
 0x976   :  { %v4684_v50 = vsel %vm342_vm6, %v9281_v52, 0.0 }
 0x977   :  { %v4685_v16 = vadd.f32 %v4684_v50, %v4683_v53 }
 0x97d   :  { %v9287_v30 = vpop.f32.mrf.mxu3 }
 0x97e   :  { %v4686_v13 = vsel %vm342_vm6, %v9287_v30, 0.0 }
 0x97f   :  { %v4687_v4 = vadd.f32 %v4686_v13, %v4685_v16 }
 0x985   :  { %v9294_v28 = vpop.f32.mrf.mxu3 }
 0x986   :  { %v4688_v5 = vsel %vm342_vm6, %v9294_v28, 0.0 }
 0x987   :  { %v4689_v32 = vadd.f32 %v4688_v5, %v4687_v4 }
 0x98d   :  { %v9304_v38 = vpop.f32.mrf.mxu3 }
 0x98e   :  { %v4690_v51 = vsel %vm342_vm6, %v9304_v38, 0.0 }
 0x98f   :  { %v4691_v54 = vadd.f32 %v4690_v51, %v4689_v32 }
 0x995   :  { %v4660_v59 = vpop.f32.mrf.mxu3 }
 0x996   :  { %v4692_v6 = vsel %vm342_vm6, %v4660_v59, 0.0 }
 0x997   :  { %v4693_v29 = vadd.f32 %v4692_v6, %v4691_v54 }
 0x999   :  { %v4694_v44 = vrot.slane %v4693_v29, 4 }
 0x99b   :  { %v4695_v9 = vadd.f32 %v4694_v44, %v4693_v29 }
 0x99d   :  { %v4696_v10 = vrot.slane %v4695_v9, 2 }
 0x99f   :  { %v4697_v57 = vadd.f32 %v4696_v10, %v4695_v9 }
 0x9a1   :  { %v4698_v61 = vrot.slane %v4697_v57, 1 }
 0x9a3   :  { %v4699_v47 = vadd.f32 %v4698_v61, %v4697_v57 }
 0x9a5   :  { %v4700_v3 = vmul.f32 %v4699_v47, %v9887_v34 }
 0x9a7   :  { %v9314_v8 = vsub.f32 %v4615_v46, %v4700_v3  ;;  %v9316_v0 = vsub.f32 %v4618_v37, %v4700_v3  ;;  %v9318_v39 = vsub.f32 %v4621_v55, %v4700_v3  ;;  %v9320_v19 = vsub.f32 %v4624_v33, %v4700_v3 }
 0x9a8   :  { %v9326_v49 = vsub.f32 %v4627_v21, %v4700_v3  ;;  %v9330_v12 = vsub.f32 %v4630_v62, %v4700_v3  ;;  %v9336_v15 = vsub.f32 %v4633_v40, %v4700_v3  ;;  %v9342_v11 = vsub.f32 %v9273_v31, %v4700_v3 }
 0x9a9   :  { %v4717_v26 = vmul.f32 %v9314_v8, %v9314_v8  ;;  %v4718_v58 = vmul.f32 %v9316_v0, %v9316_v0  ;;  %v4719_v35 = vmul.f32 %v9318_v39, %v9318_v39  ;;  %v4720_v46 = vmul.f32 %v9320_v19, %v9320_v19 }
 0x9aa   :  { %v4721_v60 = vmul.f32 %v9326_v49, %v9326_v49  ;;  %v4722_v62 = vmul.f32 %v9330_v12, %v9330_v12  ;;  %v9348_v17 = vsub.f32 %v9275_v27, %v4700_v3  ;;  %v4723_v40 = vmul.f32 %v9336_v15, %v9336_v15 }
 0x9ab   :  { %v4733_v37 = vsel %vm342_vm6, %v4717_v26, 0.0  ;;  %v4734_v55 = vsel %vm342_vm6, %v4718_v58, 0.0  ;;  %v4736_v21 = vsel %vm342_vm6, %v4719_v35, 0.0  ;;  %v4738_v23 = vsel %vm342_vm6, %v4720_v46, 0.0 }
 0x9ac   :  { %v4735_v33 = vadd.f32 %v4734_v55, %v4733_v37  ;;  %v4740_v22 = vsel %vm342_vm6, %v4721_v60, 0.0  ;;  %v9354_v20 = vsub.f32 %v9277_v36, %v4700_v3  ;;  %v4724_v31 = vmul.f32 %v9342_v11, %v9342_v11 }
 0x9ad   :  { %v4742_v2 = vsel %vm342_vm6, %v4722_v62, 0.0  ;;  %v4711_v25 = vsub.f32 %v9279_v48, %v4700_v3  ;;  %v4725_v27 = vmul.f32 %v9348_v17, %v9348_v17  ;;  %v4744_v14 = vsel %vm342_vm6, %v4723_v40, 0.0 }
 0x9ae   :  { %v4737_v18 = vadd.f32 %v4736_v21, %v4735_v33  ;;  %v4712_v42 = vsub.f32 %v9281_v52, %v4700_v3  ;;  %v4726_v36 = vmul.f32 %v9354_v20, %v9354_v20  ;;  %v4746_v43 = vsel %vm342_vm6, %v4724_v31, 0.0 }
 0x9af   :  { %v9368_v7 = vsub.f32 %v9287_v30, %v4700_v3  ;;  %v4727_v24 = vmul.f32 %v4711_v25, %v4711_v25  ;;  %v4748_v48 = vsel %vm342_vm6, %v4725_v27, 0.0  ;;  %v9372_v53 = vsub.f32 %v9294_v28, %v4700_v3 }
 0x9b0   :  { %v4739_v56 = vadd.f32 %v4738_v23, %v4737_v18  ;;  %v4728_v13 = vmul.f32 %v4712_v42, %v4712_v42  ;;  %v4750_v16 = vsel %vm342_vm6, %v4726_v36, 0.0  ;;  %v9376_v5 = vsub.f32 %v9304_v38, %v4700_v3 }
 0x9b1   :  { %v4729_v4 = vmul.f32 %v9368_v7, %v9368_v7  ;;  %v4752_v30 = vsel %vm342_vm6, %v4727_v24, 0.0  ;;  %v9381_v32 = vsub.f32 %v4660_v59, %v4700_v3  ;;  %v4730_v54 = vmul.f32 %v9372_v53, %v9372_v53 }
 0x9b2   :  { %v4741_v63 = vadd.f32 %v4740_v22, %v4739_v56  ;;  %v4754_v28 = vsel %vm342_vm6, %v4728_v13, 0.0  ;;  %v4731_v29 = vmul.f32 %v9376_v5, %v9376_v5 }
 0x9b3   :  { %v4756_v38 = vsel %vm342_vm6, %v4729_v4, 0.0  ;;  %v4732_v9 = vmul.f32 %v9381_v32, %v9381_v32  ;;  %v4758_v10 = vsel %vm342_vm6, %v4730_v54, 0.0  ;;  %v4831_v54 = vld [vmem:[#allocation2 + $0x8] sm:$0xff] }
 0x9b4   :  { %v4743_v41 = vadd.f32 %v4742_v2, %v4741_v63  ;;  %v4760_v59 = vsel %vm342_vm6, %v4731_v29, 0.0 }
 0x9b5   :  { %v4762_v47 = vsel %vm342_vm6, %v4732_v9, 0.0 }
 0x9b6   :  { %v4745_v45 = vadd.f32 %v4744_v14, %v4743_v41 }
 0x9b8   :  { %v4747_v1 = vadd.f32 %v4746_v43, %v4745_v45 }
 0x9ba   :  { %v4749_v50 = vadd.f32 %v4748_v48, %v4747_v1 }
 0x9bc   :  { %v4751_v52 = vadd.f32 %v4750_v16, %v4749_v50 }
 0x9be   :  { %v4753_v51 = vadd.f32 %v4752_v30, %v4751_v52 }
 0x9c0   :  { %v4755_v6 = vadd.f32 %v4754_v28, %v4753_v51  ;;  %v4832_v51 = vld [vmem:[#allocation2 + $0x10] sm:$0xff] }
 0x9c2   :  { %v4757_v44 = vadd.f32 %v4756_v38, %v4755_v6 }
 0x9c4   :  { %v4759_v57 = vadd.f32 %v4758_v10, %v4757_v44  ;;  %v4833_v44 = vld [vmem:[#allocation2 + $0x18] sm:$0xff] }
 0x9c6   :  { %v4761_v61 = vadd.f32 %v4760_v59, %v4759_v57  ;;  %v4834_v59 = vld [vmem:[#allocation2 + $0x20] sm:$0xff] }
 0x9c8   :  { %v4763_v3 = vadd.f32 %v4762_v47, %v4761_v61 }
 0x9ca   :  { %v4764_v26 = vrot.slane %v4763_v3, 4 }
 0x9cc   :  { %v4765_v58 = vadd.f32 %v4764_v26, %v4763_v3  ;;  %v4835_v26 = vld [vmem:[#allocation2 + $0x28] sm:$0xff] }
 0x9ce   :  { %v4766_v35 = vrot.slane %v4765_v58, 2 }
 0x9d0   :  { %v4767_v46 = vadd.f32 %v4766_v35, %v4765_v58 }
 0x9d2   :  { %v4768_v37 = vrot.slane %v4767_v46, 1 }
 0x9d4   :  { %v4769_v55 = vadd.f32 %v4768_v37, %v4767_v46 }
 0x9d6   :  { %v4770_v33 = vmul.f32 %v4769_v55, %v9887_v34  ;;  %v4357_v34 = vld [vmem:[%s9453_s1 + $0xe4] ss:$0 sm:$0xff] }
 0x9d8   :  { %v4771_v60 = vadd.f32 1e-05, %v4770_v33 }
 0x9da   :  { %5625 = vrsqrt.f32 %v4771_v60  ;;  %vm4778_vm5 = vweird.f32 %v4771_v60 }
 0x9e0   :  { %v5626_v21 = vpop.eup %5625 }
 0x9e1   :  { %v4773_v18 = vmul.f32 %v5626_v21, %v4771_v60  ;;  %vm4779_vm4 = vweird.f32 %v5626_v21  ;;  %v4836_v60 = vld [vmem:[#allocation2 + $0x30] sm:$0xff] }
 0x9e2   :  { %vm4780_vm8 = vmor %vm4778_vm5, %vm4779_vm4 }
 0x9e3   :  { %v4774_v62 = vmul.f32 %v5626_v21, %v4773_v18  ;;  %v4837_v18 = vld [vmem:[#allocation2 + $0x38] sm:$0xff] }
 0x9e5   :  { %v4775_v23 = vmul.f32 0.5, %v4774_v62 }
 0x9e7   :  { %v4776_v56 = vsub.f32 1.5, %v4775_v23 }
 0x9e9   :  { %v4777_v40 = vmul.f32 %v5626_v21, %v4776_v56 }
 0x9eb   :  { %v4781_v22 = vsel %vm4780_vm8, %v5626_v21, %v4777_v40 }
 0x9ec   :  { %v4782_v63 = vmul.f32 %v4781_v22, %v9314_v8  ;;  %v4783_v31 = vmul.f32 %v4781_v22, %v9316_v0  ;;  %v4784_v2 = vmul.f32 %v4781_v22, %v9318_v39  ;;  %v4785_v41 = vmul.f32 %v4781_v22, %v9320_v19  ;;  %v9408_v0 = vld [vmem:[%s9453_s1 + $0xe5] ss:$0 sm:$0xff]  ;;  %s5669_s1 = smov [#allocation3]  }
 0x9ed   :  { %v4787_v27 = vmul.f32 %v4781_v22, %v9330_v12  ;;  %v4788_v14 = vmul.f32 %v4781_v22, %v9336_v15  ;;  %v4786_v45 = vmul.f32 %v4781_v22, %v9326_v49  ;;  %v4792_v36 = vmul.f32 %v4781_v22, %v4711_v25  ;;  %s4898_s9 = sshll.u32 %s5669_s1, 4  ;;  %s4899_s9 = int_to_ptr.vmem [resolvable:$true] %s4898_s9 }
 0x9ee   :  { %v4793_v43 = vmul.f32 %v4781_v22, %v4712_v42  ;;  %v4798_v1 = vmul.f32 %v4782_v63, %v4357_v34  ;;  %v4799_v8 = vmul.f32 %v4783_v31, %v4357_v34  ;;  %v4800_v24 = vmul.f32 %v4784_v2, %v4357_v34  ;;  %v4838_v63 = vld [vmem:[#allocation2 + $0x40] sm:$0xff] }
 0x9ef   :  { %v4789_v39 = vmul.f32 %v4781_v22, %v9342_v11  ;;  %v4801_v48 = vmul.f32 %v4785_v41, %v4357_v34  ;;  %v4790_v19 = vmul.f32 %v4781_v22, %v9348_v17  ;;  %v4802_v12 = vmul.f32 %v4786_v45, %v4357_v34 }
 0x9f0   :  { %v4791_v15 = vmul.f32 %v4781_v22, %v9354_v20  ;;  %v4803_v50 = vmul.f32 %v4787_v27, %v4357_v34  ;;  %v4804_v49 = vmul.f32 %v4788_v14, %v4357_v34  ;;  %v4814_v25 = vadd.f32 %v4798_v1, %v9408_v0  ;;  %v4830_v20 = vld [vmem:[#allocation2] sm:$0xff]  ;;  %v4839_v27 = vld [vmem:[#allocation2 + $0x48] sm:$0xff] }
 0x9f1   :  { %v4815_v42 = vadd.f32 %v4799_v8, %v9408_v0  ;;  %v4816_v13 = vadd.f32 %v4800_v24, %v9408_v0  ;;  %v4805_v16 = vmul.f32 %v4789_v39, %v4357_v34  ;;  %v4817_v52 = vadd.f32 %v4801_v48, %v9408_v0  ;;  %v4841_v24 = vld [vmem:[#allocation2 + $0x58] sm:$0xff] }
 0x9f2   :  { %v4794_v4 = vmul.f32 %v4781_v22, %v9368_v7  ;;  %v4795_v11 = vmul.f32 %v4781_v22, %v9372_v53  ;;  %v4806_v30 = vmul.f32 %v4790_v19, %v4357_v34  ;;  %v4818_v17 = vadd.f32 %v4802_v12, %v9408_v0  ;;  %v4842_v12 = vld [vmem:[#allocation2 + $0x60] sm:$0xff] }
 0x9f3   :  { %v4796_v28 = vmul.f32 %v4781_v22, %v9376_v5  ;;  %v4807_v6 = vmul.f32 %v4791_v15, %v4357_v34  ;;  %v4808_v29 = vmul.f32 %v4792_v36, %v4357_v34  ;;  %v4819_v38 = vadd.f32 %v4803_v50, %v9408_v0 }
 0x9f4   :  { %v4820_v9 = vadd.f32 %v4804_v49, %v9408_v0  ;;  %v4846_v10 = vadd.f32 %v4830_v20, %v4814_v25  ;;  %v4847_v57 = vadd.f32 %v4831_v54, %v4815_v42  ;;  %v4848_v7 = vadd.f32 %v4832_v51, %v4816_v13  ;;  %v4843_v49 = vld [vmem:[#allocation2 + $0x68] sm:$0xff]  ;;  %v4844_v13 = vld [vmem:[#allocation2 + $0x70] sm:$0xff] }
 0x9f5   :  { %v4797_v53 = vmul.f32 %v4781_v22, %v9381_v32  ;;  %v4809_v61 = vmul.f32 %v4793_v43, %v4357_v34  ;;  %v4821_v47 = vadd.f32 %v4805_v16, %v9408_v0  ;;  %v4849_v3 = vadd.f32 %v4833_v44, %v4817_v52  ;;  %v4840_v43 = vld [vmem:[#allocation2 + $0x50] sm:$0xff] }
 0x9f6   :  { %v4810_v58 = vmul.f32 %v4794_v4, %v4357_v34  ;;  %v4811_v5 = vmul.f32 %v4795_v11, %v4357_v34  ;;  %v4822_v35 = vadd.f32 %v4806_v30, %v9408_v0  ;;  %v4850_v46 = vadd.f32 %v4834_v59, %v4818_v17  ;;  %v4845_v4 = vld [vmem:[#allocation2 + $0x78] sm:$0xff] }
 0x9f7   :  { %v4812_v37 = vmul.f32 %v4796_v28, %v4357_v34  ;;  %v4823_v55 = vadd.f32 %v4807_v6, %v9408_v0  ;;  %v4824_v33 = vadd.f32 %v4808_v29, %v9408_v0  ;;  %v4851_v21 = vadd.f32 %v4835_v26, %v4819_v38 }
 0x9f8   :  { %v4852_v62 = vadd.f32 %v4836_v60, %v4820_v9  ;;  %v4862_v32 = vmax.f32 %v4846_v10, 0.0  ;;  %v4863_v23 = vmax.f32 %v4847_v57, 0.0  ;;  %v4864_v56 = vmax.f32 %v4848_v7, 0.0 }
 0x9f9   :  { %v4813_v40 = vmul.f32 %v4797_v53, %v4357_v34  ;;  %v4825_v22 = vadd.f32 %v4809_v61, %v9408_v0  ;;  %v4853_v31 = vadd.f32 %v4837_v18, %v4821_v47  ;;  %v4865_v2 = vmax.f32 %v4849_v3, 0.0 }
 0x9fa   :  { %v4826_v41 = vadd.f32 %v4810_v58, %v9408_v0  ;;  %v4854_v14 = vadd.f32 %v4838_v63, %v4822_v35  ;;  %v4866_v45 = vmax.f32 %v4850_v46, 0.0  ;;  %4878 = vst.msk [vmem:[#allocation3] sm:$0xff] %vm342_vm6, %v4862_v32  ;;  %v4827_v36 = vadd.f32 %v4811_v5, %v9408_v0 }
 0x9fb   :  { %v4855_v1 = vadd.f32 %v4839_v27, %v4823_v55  ;;  %v4867_v8 = vmax.f32 %v4851_v21, 0.0  ;;  %4879 = vst.msk [vmem:[#allocation3 + $0x8] sm:$0xff] %vm342_vm6, %v4863_v23  ;;  %v4828_v34 = vadd.f32 %v4812_v37, %v9408_v0  ;;  %v4856_v39 = vadd.f32 %v4840_v43, %v4824_v33 }
 0x9fc   :  { %v4868_v48 = vmax.f32 %v4852_v62, 0.0  ;;  %4880 = vst.msk [vmem:[#allocation3 + $0x10] sm:$0xff] %vm342_vm6, %v4864_v56  ;;  %v4829_v19 = vadd.f32 %v4813_v40, %v9408_v0  ;;  %v4857_v15 = vadd.f32 %v4841_v24, %v4825_v22  ;;  %v4869_v50 = vmax.f32 %v4853_v31, 0.0 }
 0x9fd   :  { %4881 = vst.msk [vmem:[#allocation3 + $0x18] sm:$0xff] %vm342_vm6, %v4865_v2  ;;  %v4858_v25 = vadd.f32 %v4842_v12, %v4826_v41  ;;  %v4870_v42 = vmax.f32 %v4854_v14, 0.0  ;;  %v4859_v16 = vadd.f32 %v4843_v49, %v4827_v36  ;;  %v4871_v52 = vmax.f32 %v4855_v1, 0.0 }
 0x9fe   :  { %4882 = vst.msk [vmem:[#allocation3 + $0x20] sm:$0xff] %vm342_vm6, %v4866_v45  ;;  %v4860_v11 = vadd.f32 %v4844_v13, %v4828_v34  ;;  %v4872_v30 = vmax.f32 %v4856_v39, 0.0  ;;  %v4861_v0 = vadd.f32 %v4845_v4, %v4829_v19  ;;  %v4873_v17 = vmax.f32 %v4857_v15, 0.0 }
 0x9ff   :  { %4883 = vst.msk [vmem:[#allocation3 + $0x28] sm:$0xff] %vm342_vm6, %v4867_v8  ;;  %v4874_v51 = vmax.f32 %v4858_v25, 0.0  ;;  %v4875_v20 = vmax.f32 %v4859_v16, 0.0 }
 0xa00   :  { %4884 = vst.msk [vmem:[#allocation3 + $0x30] sm:$0xff] %vm342_vm6, %v4868_v48  ;;  %v4876_v54 = vmax.f32 %v4860_v11, 0.0  ;;  %v4877_v28 = vmax.f32 %v4861_v0, 0.0 }
 0xa01   :  { %4885 = vst.msk [vmem:[#allocation3 + $0x38] sm:$0xff] %vm342_vm6, %v4869_v50 }
 0xa02   :  { %4886 = vst.msk [vmem:[#allocation3 + $0x40] sm:$0xff] %vm342_vm6, %v4870_v42 }
 0xa03   :  { %4887 = vst.msk [vmem:[#allocation3 + $0x48] sm:$0xff] %vm342_vm6, %v4871_v52 }
 0xa04   :  { %4888 = vst.msk [vmem:[#allocation3 + $0x50] sm:$0xff] %vm342_vm6, %v4872_v30 }
 0xa05   :  { %4889 = vst.msk [vmem:[#allocation3 + $0x58] sm:$0xff] %vm342_vm6, %v4873_v17 }
 0xa06   :  { %4890 = vst.msk [vmem:[#allocation3 + $0x60] sm:$0xff] %vm342_vm6, %v4874_v51 }
 0xa07   :  { %4891 = vst.msk [vmem:[#allocation3 + $0x68] sm:$0xff] %vm342_vm6, %v4875_v20 }
 0xa08   :  { %4892 = vst.msk [vmem:[#allocation3 + $0x70] sm:$0xff] %vm342_vm6, %v4876_v54 }
 0xa09   :  { %4893 = vst.msk [vmem:[#allocation3 + $0x78] sm:$0xff] %vm342_vm6, %v4877_v28 }
 0xa0a   :  { %4906 = dma.vmem_to_hbm [thread:$0]  %s4899_s9, 2048, %s4901_s5, [#allocation4], %s5670_s11, %s5670_s11, %s5671_s12  }
 0xa0b   :  { %5659 = dma.done.wait [#allocation4], 2048  }
 0xa0c   :  { %5660 = vsyncadd [#allocation4], 4294965248 }
 0xa0d   :  { %4911 = vsyncpa [#allocation4], 1 }

</bundles_post_ra>
